<compile_context>
chip_gen: v7x
topology: tpu7x:2x2x1
jax: 0.10.0
libtpu: 0.0.40
codegen_flags: <defaults>
</compile_context>

<pallas_src>
import math

import jax
import jax.numpy as jnp
from jax.experimental import pallas as pl
from jax.experimental.pallas import tpu as pltpu

# ----------------------------- configuration (small, module-consistent) -----------------
B = 2
N_MELS = 16          # n_mels
T_IN = 32            # input frames
NUM_BLOCKS = 2       # num_blocks (small)
D_MODEL = 64         # output_size
N_HEAD = 4           # ConformerEncoder default attention_heads
D_K = D_MODEL // N_HEAD
LINEAR_UNITS = 2048  # ConformerEncoder default linear_units
CNN_KERNEL = 15      # ConformerEncoder default cnn_module_kernel
PAD = (CNN_KERNEL - 1) // 2
EMB_DIM = 32         # embedding_dim
ATT_CHANNELS = 128   # AttentiveStatisticsPooling default attention_channels
LN_EPS = 1e-5
BN_EPS = 1e-5
STAT_EPS = 1e-12
NEG_INF = -1e30

F1 = (N_MELS - 3) // 2 + 1   # freq dim after Conv2dSubsampling2 (= 7)
T1 = (T_IN - 3) // 2 + 1     # real frames after Conv2dSubsampling2 (= 15)
T1P = 16                     # time padded to an 8-sublane-aligned length
M0P = B * T1P                # token rows inside the kernel (= 32)
CONV_ROWS = 2 * T1P          # zero-padded depthwise-conv staging rows per batch
CONV_OFF = PAD + 1           # data rows live at [CONV_OFF, CONV_OFF + T1P)

assert ATT_CHANNELS == 2 * D_MODEL   # lets tdnn-BN and final-BN vectors share one packed table

USE_BF16 = True
MM_DTYPE = jnp.bfloat16 if USE_BF16 else jnp.float32

# indices into the per-layer packed (N_VEC, D) vector table
(V_LN_FFM_G, V_LN_FFM_B, V_FFM_B2,
 V_LN_MHA_G, V_LN_MHA_B,
 V_BQ, V_BK, V_BV, V_BO, V_POS_U, V_POS_V,
 V_LN_CONV_G, V_LN_CONV_B, V_BN_SCALE, V_BN_SHIFT, V_PW2_B,
 V_LN_FF_G, V_LN_FF_B, V_FF_B2,
 V_LN_FINAL_G, V_LN_FINAL_B) = range(21)
N_VEC = 21


def _mxu(a, w):
    """MXU matmul with bf16 operands (if enabled) and f32 accumulation."""
    return jnp.dot(a.astype(w.dtype), w, preferred_element_type=jnp.float32)


def _bmm(eq, a, b):
    """(Batched) einsum matmul, bf16 operands, f32 accumulation."""
    return jnp.einsum(eq, a.astype(MM_DTYPE), b.astype(MM_DTYPE),
                      preferred_element_type=jnp.float32)


# ============================ the single fused kernel ====================================
def conformer_kernel(patches_ref, pe_ref,
                     vecs_ref, pw1b_ref, blu_ref, wffi_ref, wffo_ref,
                     wqkv_ref, wpos_ref, wo_ref, wpw1_ref, wpw2_ref, dww_ref,
                     sw1_ref, sb1_ref, sw2_ref, sb2_ref,
                     h64_ref, h128_ref, tdnnw_ref, attw_ref, fcw_ref, fcb_ref,
                     out_ref, xs_scr, conv_scr):
    l = pl.program_id(0)
    D = D_MODEL

    # validity masks for the padded time step (t == T1 .. T1P-1 within each batch)
    ridx = jax.lax.broadcasted_iota(jnp.int32, (M0P, 1), 0)
    row_valid = ((ridx & (T1P - 1)) < T1).astype(jnp.float32)          # (M0P, 1)
    kvalid = jax.lax.broadcasted_iota(jnp.int32, (1, T1P), 1) < T1
    key_neg = jnp.where(kvalid, 0.0, NEG_INF).reshape(1, 1, T1P)       # (1, 1, T1P)

    # ---- prologue (grid step 0): Conv2dSubsampling2 as two dense matmuls ----------------
    @pl.when(l == 0)
    def _prologue():
        conv_scr[...] = jnp.zeros_like(conv_scr)
        h = jnp.maximum(_mxu(patches_ref[...], sw1_ref[...]) + sb1_ref[...], 0.0)
        xs_scr[...] = (_mxu(h, sw2_ref[...]) + sb2_ref[...]) * math.sqrt(D_MODEL)

    vecs = vecs_ref[...]                                   # (N_VEC, D) f32

    def row(i):
        return vecs[i:i + 1, :]

    def ln(x, g, b):
        mean = jnp.mean(x, axis=-1, keepdims=True)
        var = jnp.mean(jnp.square(x - mean), axis=-1, keepdims=True)
        return (x - mean) * jax.lax.rsqrt(var + LN_EPS) * g + b

    xs = xs_scr[...]                                       # (M0P, D) residual carrier

    # ---- (a) macaron feed-forward (ff_scale = 0.5) ----
    xn = ln(xs, row(V_LN_FFM_G), row(V_LN_FFM_B))
    h = _mxu(xn, wffi_ref[0]) + blu_ref[0:1, :]            # (M0P, LINEAR_UNITS)
    h = h * jax.nn.sigmoid(h)                              # swish (EUP)
    xs = xs + 0.5 * (_mxu(h, wffo_ref[0]) + row(V_FFM_B2))

    # ---- (b) relative-position multi-head self-attention (wenet: no rel_shift) ----
    xn = ln(xs, row(V_LN_MHA_G), row(V_LN_MHA_B))
    qkv = _mxu(xn, wqkv_ref[...])                          # (M0P, 3D), one wide matmul
    p = _mxu(pe_ref[...], wpos_ref[...])                   # (T1P, D)  linear_pos (no bias)
    q = qkv[:, 0:D] + row(V_BQ)                            # (M0P, D) flat
    k = (qkv[:, D:2 * D] + row(V_BK)).reshape(B, T1P, D)
    v = (qkv[:, 2 * D:3 * D] + row(V_BV)).reshape(B, T1P, D)
    pos_u = row(V_POS_U)
    pos_v = row(V_POS_V)
    scale = 1.0 / math.sqrt(D_K)
    heads = []
    for hh in range(N_HEAD):                               # static, unrolled (4 heads)
        c0 = hh * D_K
        qh = q[:, c0:c0 + D_K]                             # (M0P, D_K)
        kh = k[:, :, c0:c0 + D_K]                          # (B, T1P, D_K)
        vh = v[:, :, c0:c0 + D_K]
        ph = p[:, c0:c0 + D_K]                             # (T1P, D_K)
        ac = _bmm('bqd,bkd->bqk',
                  (qh + pos_u[:, c0:c0 + D_K]).reshape(B, T1P, D_K), kh)
        bd = _bmm('qd,kd->qk', qh + pos_v[:, c0:c0 + D_K], ph)      # batch-independent
        s = (ac + bd.reshape(B, T1P, T1P)) * scale + key_neg        # mask padded key
        s = s - jnp.max(s, axis=-1, keepdims=True)
        e = jnp.exp(s)
        attn = e * pl.reciprocal(jnp.sum(e, axis=-1, keepdims=True), approx=True)
        heads.append(_bmm('bqk,bkd->bqd', attn, vh))
    att = jnp.concatenate(heads, axis=-1).reshape(M0P, D)
    xs = xs + _mxu(att, wo_ref[...]) + row(V_BO)

    # ---- (c) convolution module: pw1 + GLU -> depthwise conv -> BN(folded) -> swish -> pw2 ----
    xn = ln(xs, row(V_LN_CONV_G), row(V_LN_CONV_B))
    y2 = _mxu(xn, wpw1_ref[...]) + pw1b_ref[...]           # (M0P, 2D)
    y = y2[:, 0:D] * jax.nn.sigmoid(y2[:, D:2 * D])        # GLU
    y = y * row_valid                                      # padded frame -> true zero padding
    conv_scr[:, CONV_OFF:CONV_OFF + T1P, :] = y.reshape(B, T1P, D)   # 8-aligned store
    acc = jnp.zeros((B, T1P, D), jnp.float32)
    for kk in range(CNN_KERNEL):                           # static, unrolled; both batches at once
        acc = acc + conv_scr[:, kk + 1:kk + 1 + T1P, :] * dww_ref[kk:kk + 1, :]
    z = acc.reshape(M0P, D) * row(V_BN_SCALE) + row(V_BN_SHIFT)   # BN(eval), dw bias folded in
    z = z * jax.nn.sigmoid(z)                              # swish
    xs = xs + _mxu(z, wpw2_ref[...]) + row(V_PW2_B)

    # ---- (d) feed-forward (ff_scale = 0.5) ----
    xn = ln(xs, row(V_LN_FF_G), row(V_LN_FF_B))
    h = _mxu(xn, wffi_ref[1]) + blu_ref[1:2, :]
    h = h * jax.nn.sigmoid(h)
    xs = xs + 0.5 * (_mxu(h, wffo_ref[1]) + row(V_FF_B2))

    # ---- (e) final block LayerNorm ----
    xs = ln(xs, row(V_LN_FINAL_G), row(V_LN_FINAL_B))
    xs_scr[...] = xs

    # ---- epilogue (last grid step): after_norm + ASP + BatchNorm1d + fc ------------------
    @pl.when(l == NUM_BLOCKS - 1)
    def _epilogue():
        xa = ln(xs, h64_ref[0:1, :], h64_ref[1:2, :])      # encoder after_norm
        x3 = xa.reshape(B, T1P, D)
        tmask = row_valid.reshape(B, T1P, 1)
        inv_len = 1.0 / T1
        # global-context stats (uniform full-length mask of the reference => mean / pop-std)
        gmean = jnp.sum(x3 * tmask, axis=1, keepdims=True) * inv_len
        gvar = jnp.sum(jnp.square(x3 - gmean) * tmask, axis=1, keepdims=True) * inv_len
        gstd = jnp.sqrt(jnp.maximum(gvar, STAT_EPS))
        attn_in = jnp.concatenate(
            [x3,
             jnp.broadcast_to(gmean, (B, T1P, D)),
             jnp.broadcast_to(gstd, (B, T1P, D))], axis=-1).reshape(M0P, 3 * D)
        a = _mxu(attn_in, tdnnw_ref[...]) + h128_ref[0:1, :]        # TDNN conv1d(k=1)
        a = jnp.maximum(a, 0.0) * h128_ref[1:2, :] + h128_ref[2:3, :]   # ReLU + BN(eval)
        a = jnp.tanh(a)
        sc = _mxu(a, attw_ref[...]) + h64_ref[2:3, :]               # (M0P, D) attention scores
        sc3 = sc.reshape(B, T1P, D) + (1.0 - tmask) * NEG_INF       # mask padded frame
        sc3 = sc3 - jnp.max(sc3, axis=1, keepdims=True)
        e = jnp.exp(sc3) * tmask
        w = e * pl.reciprocal(jnp.sum(e, axis=1, keepdims=True), approx=True)
        pmean = jnp.sum(w * x3, axis=1, keepdims=True)
        pvar = jnp.sum(w * jnp.square(x3 - pmean), axis=1, keepdims=True)
        pstd = jnp.sqrt(jnp.maximum(pvar, STAT_EPS))
        pooled = jnp.concatenate([pmean, pstd], axis=-1).reshape(B, 2 * D)
        pooled = pooled * h128_ref[3:4, :] + h128_ref[4:5, :]       # BatchNorm1d (eval, folded)
        out_ref[...] = _mxu(pooled, fcw_ref[...]) + fcb_ref[...]    # Linear(2D, emb)


def pallas_conformer(patches, pe, ep, sp, hp):
    c2 = lambda l: (0, 0)
    in_specs = [
        pl.BlockSpec((M0P, F1 * 9), c2),                                          # patches
        pl.BlockSpec((T1P, D_MODEL), c2),                                         # pe
        pl.BlockSpec((None, N_VEC, D_MODEL), lambda l: (l, 0, 0)),                # vecs
        pl.BlockSpec((None, 1, 2 * D_MODEL), lambda l: (l, 0, 0)),                # pw1_b
        pl.BlockSpec((None, 2, LINEAR_UNITS), lambda l: (l, 0, 0)),               # b_lu
        pl.BlockSpec((None, 2, D_MODEL, LINEAR_UNITS), lambda l: (l, 0, 0, 0)),   # w_ff_in
        pl.BlockSpec((None, 2, LINEAR_UNITS, D_MODEL), lambda l: (l, 0, 0, 0)),   # w_ff_out
        pl.BlockSpec((None, D_MODEL, 3 * D_MODEL), lambda l: (l, 0, 0)),          # w_qkv
        pl.BlockSpec((None, D_MODEL, D_MODEL), lambda l: (l, 0, 0)),              # w_pos
        pl.BlockSpec((None, D_MODEL, D_MODEL), lambda l: (l, 0, 0)),              # w_o
        pl.BlockSpec((None, D_MODEL, 2 * D_MODEL), lambda l: (l, 0, 0)),          # w_pw1
        pl.BlockSpec((None, D_MODEL, D_MODEL), lambda l: (l, 0, 0)),              # w_pw2
        pl.BlockSpec((None, CNN_KERNEL, D_MODEL), lambda l: (l, 0, 0)),           # dw_w
        pl.BlockSpec((F1 * 9, F1 * D_MODEL), c2),                                 # sub w1
        pl.BlockSpec((1, F1 * D_MODEL), c2),                                      # sub b1
        pl.BlockSpec((F1 * D_MODEL, D_MODEL), c2),                                # sub w2
        pl.BlockSpec((1, D_MODEL), c2),                                           # sub b2
        pl.BlockSpec((3, D_MODEL), c2),                                           # head v64
        pl.BlockSpec((5, ATT_CHANNELS), c2),                                      # head v128
        pl.BlockSpec((3 * D_MODEL, ATT_CHANNELS), c2),                            # tdnn_w
        pl.BlockSpec((ATT_CHANNELS, D_MODEL), c2),                                # att_w
        pl.BlockSpec((2 * D_MODEL, EMB_DIM), c2),                                 # fc_w
        pl.BlockSpec((1, EMB_DIM), c2),                                           # fc_b
    ]
    return pl.pallas_call(
        conformer_kernel,
        grid=(NUM_BLOCKS,),
        in_specs=in_specs,
        out_specs=pl.BlockSpec((B, EMB_DIM), c2),
        out_shape=jax.ShapeDtypeStruct((B, EMB_DIM), jnp.float32),
        scratch_shapes=[pltpu.VMEM((M0P, D_MODEL), jnp.float32),           # xs carrier
                        pltpu.VMEM((B, CONV_ROWS, D_MODEL), jnp.float32)], # conv time padding
        compiler_params=pltpu.CompilerParams(dimension_semantics=("arbitrary",)),
    )(patches, pe,
      ep["vecs"], ep["pw1_b"], ep["b_lu"], ep["w_ff_in"], ep["w_ff_out"],
      ep["w_qkv"], ep["w_pos"], ep["w_o"], ep["w_pw1"], ep["w_pw2"], ep["dw_w"],
      sp["w1"], sp["b1"], sp["w2"], sp["b2"],
      hp["v64"], hp["v128"], hp["tdnn_w"], hp["att_w"], hp["fc_w"], hp["fc_b"])


# ----------------------------- parameters ------------------------------------------------
def bn_affine(gamma, beta, mean, var, eps=BN_EPS):
    scale = gamma / jnp.sqrt(var + eps)
    return scale, beta - mean * scale


def make_params(key):
    ks = iter(jax.random.split(key, 1024))

    def uni(shape, bound):
        return jax.random.uniform(next(ks), shape, jnp.float32, -bound, bound)

    def lin(fan_in, fan_out, bias=True):
        bound = 1.0 / math.sqrt(fan_in)
        w = uni((fan_in, fan_out), bound)
        bvec = uni((fan_out,), bound) if bias else jnp.zeros((fan_out,), jnp.float32)
        return w, bvec

    params = {}
    # Conv2dSubsampling2: Conv2d(1, D, 3, stride=2) (as im2col matmul) + Linear(D*F1, D)
    cw, cb = lin(9, D_MODEL)
    ow, ob = lin(D_MODEL * F1, D_MODEL)
    params["sub"] = dict(conv_w=cw, conv_b=cb, out_w=ow, out_b=ob)

    layers = []
    for _ in range(NUM_BLOCKS):
        lp = {}
        ones, zeros = jnp.ones((D_MODEL,), jnp.float32), jnp.zeros((D_MODEL,), jnp.float32)
        lp["ln_ffm_g"], lp["ln_ffm_b"] = ones, zeros
        lp["ffm_w1"], lp["ffm_b1"] = lin(D_MODEL, LINEAR_UNITS)
        lp["ffm_w2"], lp["ffm_b2"] = lin(LINEAR_UNITS, D_MODEL)
        lp["ln_mha_g"], lp["ln_mha_b"] = ones, zeros
        lp["wq"], lp["bq"] = lin(D_MODEL, D_MODEL)
        lp["wk"], lp["bk"] = lin(D_MODEL, D_MODEL)
        lp["wv"], lp["bv"] = lin(D_MODEL, D_MODEL)
        lp["wo"], lp["bo"] = lin(D_MODEL, D_MODEL)
        lp["w_pos"], _ = lin(D_MODEL, D_MODEL, bias=False)
        xav = math.sqrt(6.0 / (N_HEAD + D_K))
        lp["pos_u"] = uni((N_HEAD, 1, D_K), xav)
        lp["pos_v"] = uni((N_HEAD, 1, D_K), xav)
        lp["ln_conv_g"], lp["ln_conv_b"] = ones, zeros
        lp["pw1_w"], lp["pw1_b"] = lin(D_MODEL, 2 * D_MODEL)
        lp["dw_w"] = uni((CNN_KERNEL, D_MODEL), 1.0 / math.sqrt(CNN_KERNEL))
        lp["dw_b"] = uni((D_MODEL,), 1.0 / math.sqrt(CNN_KERNEL))
        lp["bn_g"], lp["bn_b"] = ones, zeros
        lp["bn_m"], lp["bn_v"] = zeros, jnp.ones((D_MODEL,), jnp.float32)
        lp["pw2_w"], lp["pw2_b"] = lin(D_MODEL, D_MODEL)
        lp["ln_ff_g"], lp["ln_ff_b"] = ones, zeros
        lp["ff_w1"], lp["ff_b1"] = lin(D_MODEL, LINEAR_UNITS)
        lp["ff_w2"], lp["ff_b2"] = lin(LINEAR_UNITS, D_MODEL)
        lp["ln_final_g"], lp["ln_final_b"] = ones, zeros
        layers.append(lp)
    params["layers"] = layers
    params["after_norm_g"] = jnp.ones((D_MODEL,), jnp.float32)
    params["after_norm_b"] = jnp.zeros((D_MODEL,), jnp.float32)

    # AttentiveStatisticsPooling (global_context=True): TDNN(3D->128)+ReLU+BN, tanh, Conv1d(128->D)
    tw, tb = lin(3 * D_MODEL, ATT_CHANNELS)
    aw, ab = lin(ATT_CHANNELS, D_MODEL)
    params["asp"] = dict(
        tdnn_w=tw, tdnn_b=tb,
        tdnn_bn_g=jnp.ones((ATT_CHANNELS,), jnp.float32),
        tdnn_bn_b=jnp.zeros((ATT_CHANNELS,), jnp.float32),
        tdnn_bn_m=jnp.zeros((ATT_CHANNELS,), jnp.float32),
        tdnn_bn_v=jnp.ones((ATT_CHANNELS,), jnp.float32),
        conv_w=aw, conv_b=ab)

    # final BatchNorm1d(2D) + Linear(2D, emb)
    params["bn_g"] = jnp.ones((2 * D_MODEL,), jnp.float32)
    params["bn_b"] = jnp.zeros((2 * D_MODEL,), jnp.float32)
    params["bn_m"] = jnp.zeros((2 * D_MODEL,), jnp.float32)
    params["bn_v"] = jnp.ones((2 * D_MODEL,), jnp.float32)
    params["fc_w"], params["fc_b"] = lin(2 * D_MODEL, EMB_DIM)
    return params


def pack_params(params):
    """Reorganize per-module parameters into stacked, kernel-friendly (layer-streamable) arrays."""
    mm = MM_DTYPE
    sub = params["sub"]
    # subsample as two matmuls: block-diagonal conv weight, then the (c,f)->(f,c) regrouped linear
    w1 = jnp.kron(jnp.eye(F1, dtype=jnp.float32), sub["conv_w"])      # (F1*9, F1*D) block-diag
    b1 = jnp.tile(sub["conv_b"], (F1,)).reshape(1, F1 * D_MODEL)
    # out_w rows are indexed by c*F1 + f (channel-major flatten); hidden cols are f*D + c.
    w2 = jnp.transpose(sub["out_w"].reshape(D_MODEL, F1, D_MODEL),
                       (1, 0, 2)).reshape(F1 * D_MODEL, D_MODEL)
    packed_sub = dict(w1=w1.astype(mm), b1=b1, w2=w2.astype(mm),
                      b2=sub["out_b"].reshape(1, D_MODEL))

    def per_layer(fn):
        return jnp.stack([fn(lp) for lp in params["layers"]])

    def layer_vecs(lp):
        s, t = bn_affine(lp["bn_g"], lp["bn_b"], lp["bn_m"], lp["bn_v"])
        return jnp.stack([
            lp["ln_ffm_g"], lp["ln_ffm_b"], lp["ffm_b2"],
            lp["ln_mha_g"], lp["ln_mha_b"],
            lp["bq"], lp["bk"], lp["bv"], lp["bo"],
            lp["pos_u"].reshape(-1), lp["pos_v"].reshape(-1),
            lp["ln_conv_g"], lp["ln_conv_b"],
            s, lp["dw_b"] * s + t, lp["pw2_b"],      # BN(eval) scale / shift (dw bias folded in)
            lp["ln_ff_g"], lp["ln_ff_b"], lp["ff_b2"],
            lp["ln_final_g"], lp["ln_final_b"]])

    packed_enc = dict(
        vecs=per_layer(layer_vecs),
        pw1_b=per_layer(lambda lp: lp["pw1_b"].reshape(1, 2 * D_MODEL)),
        b_lu=per_layer(lambda lp: jnp.stack([lp["ffm_b1"], lp["ff_b1"]])),
        w_ff_in=per_layer(lambda lp: jnp.stack([lp["ffm_w1"], lp["ff_w1"]])).astype(mm),
        w_ff_out=per_layer(lambda lp: jnp.stack([lp["ffm_w2"], lp["ff_w2"]])).astype(mm),
        w_qkv=per_layer(lambda lp: jnp.concatenate([lp["wq"], lp["wk"], lp["wv"]], axis=1)).astype(mm),
        w_pos=per_layer(lambda lp: lp["w_pos"]).astype(mm),
        w_o=per_layer(lambda lp: lp["wo"]).astype(mm),
        w_pw1=per_layer(lambda lp: lp["pw1_w"]).astype(mm),
        w_pw2=per_layer(lambda lp: lp["pw2_w"]).astype(mm),
        dw_w=per_layer(lambda lp: lp["dw_w"]))

    asp = params["asp"]
    ts, tt = bn_affine(asp["tdnn_bn_g"], asp["tdnn_bn_b"], asp["tdnn_bn_m"], asp["tdnn_bn_v"])
    bs, bt = bn_affine(params["bn_g"], params["bn_b"], params["bn_m"], params["bn_v"])
    packed_head = dict(
        v64=jnp.stack([params["after_norm_g"], params["after_norm_b"], asp["conv_b"]]),
        v128=jnp.stack([asp["tdnn_b"], ts, tt, bs, bt]),
        tdnn_w=asp["tdnn_w"].astype(mm),
        att_w=asp["conv_w"].astype(mm),
        fc_w=params["fc_w"].astype(mm),
        fc_b=params["fc_b"].reshape(1, EMB_DIM))
    return dict(sub=packed_sub, enc=packed_enc, head=packed_head)


# ----------------------------- forward ---------------------------------------------------
def _rel_pos_table():
    pos = jnp.arange(T1P, dtype=jnp.float32)[:, None]
    div = jnp.exp(jnp.arange(0, D_MODEL, 2, dtype=jnp.float32)
                  * (-math.log(10000.0) / D_MODEL))
    pe = jnp.zeros((T1P, D_MODEL), jnp.float32)
    pe = pe.at[:, 0::2].set(jnp.sin(pos * div))
    pe = pe.at[:, 1::2].set(jnp.cos(pos * div))
    return pe


def conformer_forward(feat, pp):
    # feat: (B, 1, n_mels, T)  ->  (B, T, n_mels)
    x = jnp.transpose(jnp.squeeze(feat, axis=1), (0, 2, 1)).astype(jnp.float32)

    # im2col for Conv2d(1, D, 3, stride 2): (M0P, F1*9); row layout = per token, freq-major
    # groups of 9 (kt, kf)-row-major taps; padded time rows (t >= T1) are zero.
    idx_t = 2 * jnp.arange(T1)[:, None] + jnp.arange(3)[None, :]
    idx_f = 2 * jnp.arange(F1)[:, None] + jnp.arange(3)[None, :]
    p = x[:, idx_t, :]                      # (B, T1, 3, F)
    p = p[:, :, :, idx_f]                   # (B, T1, 3, F1, 3)
    p = jnp.transpose(p, (0, 1, 3, 2, 4)).reshape(B, T1, F1 * 9)
    p = jnp.pad(p, ((0, 0), (0, T1P - T1), (0, 0)))
    patches = p.reshape(M0P, F1 * 9)

    pe = _rel_pos_table()                   # RelPositionalEncoding table (eval dropout = id)
    return pallas_conformer(patches, pe, pp["enc"], pp["sub"], pp["head"])   # (B, EMB_DIM)


# ----------------------------- main -------------------------------------------------------
if __name__ == "__main__":
    key = jax.random.PRNGKey(0)
    pkey, xkey = jax.random.split(key)
    params = make_params(pkey)
    packed = pack_params(params)
    feat = jax.random.normal(xkey, (B, 1, N_MELS, T_IN), dtype=jnp.float32)

    fwd = jax.jit(conformer_forward)
    out = jax.block_until_ready(fwd(feat, packed))

    assert out.shape == (B, EMB_DIM), out.shape
    assert bool(jnp.all(jnp.isfinite(out)))
    print("KERNEL_OK")
</pallas_src>

<mosaic_0001>
module attributes {stable_mosaic.version = 11 : i64} {
  func.func @conformer_kernel(%arg0: i32, %arg1: memref<32x63xf32, #tpu.memory_space<vmem>>, %arg2: memref<16x64xf32, #tpu.memory_space<vmem>>, %arg3: memref<1x21x64xf32, #tpu.memory_space<vmem>>, %arg4: memref<1x1x128xf32, #tpu.memory_space<vmem>>, %arg5: memref<1x2x2048xf32, #tpu.memory_space<vmem>>, %arg6: memref<1x2x64x2048xbf16, #tpu.memory_space<vmem>>, %arg7: memref<1x2x2048x64xbf16, #tpu.memory_space<vmem>>, %arg8: memref<1x64x192xbf16, #tpu.memory_space<vmem>>, %arg9: memref<1x64x64xbf16, #tpu.memory_space<vmem>>, %arg10: memref<1x64x64xbf16, #tpu.memory_space<vmem>>, %arg11: memref<1x64x128xbf16, #tpu.memory_space<vmem>>, %arg12: memref<1x64x64xbf16, #tpu.memory_space<vmem>>, %arg13: memref<1x15x64xf32, #tpu.memory_space<vmem>>, %arg14: memref<63x448xbf16, #tpu.memory_space<vmem>>, %arg15: memref<1x448xf32, #tpu.memory_space<vmem>>, %arg16: memref<448x64xbf16, #tpu.memory_space<vmem>>, %arg17: memref<1x64xf32, #tpu.memory_space<vmem>>, %arg18: memref<3x64xf32, #tpu.memory_space<vmem>>, %arg19: memref<5x128xf32, #tpu.memory_space<vmem>>, %arg20: memref<192x128xbf16, #tpu.memory_space<vmem>>, %arg21: memref<128x64xbf16, #tpu.memory_space<vmem>>, %arg22: memref<128x32xbf16, #tpu.memory_space<vmem>>, %arg23: memref<1x32xf32, #tpu.memory_space<vmem>>, %arg24: memref<2x32xf32, #tpu.memory_space<vmem>>, %arg25: memref<32x64xf32, #tpu.memory_space<vmem>>, %arg26: memref<2x32x64xf32, #tpu.memory_space<vmem>>) attributes {dimension_semantics = [#tpu.dimension_semantics<arbitrary>], iteration_bounds = array<i64: 2>, scalar_prefetch = 0 : i64, scratch_operands = 2 : i64, tpu.core_type = #tpu.core_type<tc>, window_params = [{pipeline_mode = #tpu.pipeline_mode<synchronous>, transform_indices = @transform_0, window_bounds = array<i64: 32, 63>}, {pipeline_mode = #tpu.pipeline_mode<synchronous>, transform_indices = @transform_1, window_bounds = array<i64: 16, 64>}, {transform_indices = @transform_2, window_bounds = array<i64: 1, 21, 64>}, {transform_indices = @transform_3, window_bounds = array<i64: 1, 1, 128>}, {transform_indices = @transform_4, window_bounds = array<i64: 1, 2, 2048>}, {transform_indices = @transform_5, window_bounds = array<i64: 1, 2, 64, 2048>}, {transform_indices = @transform_6, window_bounds = array<i64: 1, 2, 2048, 64>}, {transform_indices = @transform_7, window_bounds = array<i64: 1, 64, 192>}, {transform_indices = @transform_8, window_bounds = array<i64: 1, 64, 64>}, {transform_indices = @transform_9, window_bounds = array<i64: 1, 64, 64>}, {transform_indices = @transform_10, window_bounds = array<i64: 1, 64, 128>}, {transform_indices = @transform_11, window_bounds = array<i64: 1, 64, 64>}, {transform_indices = @transform_12, window_bounds = array<i64: 1, 15, 64>}, {pipeline_mode = #tpu.pipeline_mode<synchronous>, transform_indices = @transform_13, window_bounds = array<i64: 63, 448>}, {pipeline_mode = #tpu.pipeline_mode<synchronous>, transform_indices = @transform_14, window_bounds = array<i64: 1, 448>}, {pipeline_mode = #tpu.pipeline_mode<synchronous>, transform_indices = @transform_15, window_bounds = array<i64: 448, 64>}, {pipeline_mode = #tpu.pipeline_mode<synchronous>, transform_indices = @transform_16, window_bounds = array<i64: 1, 64>}, {pipeline_mode = #tpu.pipeline_mode<synchronous>, transform_indices = @transform_17, window_bounds = array<i64: 3, 64>}, {pipeline_mode = #tpu.pipeline_mode<synchronous>, transform_indices = @transform_18, window_bounds = array<i64: 5, 128>}, {pipeline_mode = #tpu.pipeline_mode<synchronous>, transform_indices = @transform_19, window_bounds = array<i64: 192, 128>}, {pipeline_mode = #tpu.pipeline_mode<synchronous>, transform_indices = @transform_20, window_bounds = array<i64: 128, 64>}, {pipeline_mode = #tpu.pipeline_mode<synchronous>, transform_indices = @transform_21, window_bounds = array<i64: 128, 32>}, {pipeline_mode = #tpu.pipeline_mode<synchronous>, transform_indices = @transform_22, window_bounds = array<i64: 1, 32>}, {pipeline_mode = #tpu.pipeline_mode<synchronous>, transform_indices = @transform_23, window_bounds = array<i64: 2, 32>}]} {
    %0 = tpu.iota {dimensions = array<i32: 0>} : vector<32x1xi32>
    %c15_i32 = arith.constant 15 : i32
    %1 = vector.broadcast %c15_i32 : i32 to vector<32x1xi32>
    %2 = arith.andi %0, %1 : vector<32x1xi32>
    %c15_i32_0 = arith.constant 15 : i32
    %3 = vector.broadcast %c15_i32_0 : i32 to vector<32x1xi32>
    %4 = arith.cmpi slt, %2, %3 : vector<32x1xi32>
    %5 = arith.extui %4 : vector<32x1xi1> to vector<32x1xi32>
    %6 = arith.sitofp %5 : vector<32x1xi32> to vector<32x1xf32>
    %7 = tpu.iota {dimensions = array<i32: 1>} : vector<1x16xi32>
    %c15_i32_1 = arith.constant 15 : i32
    %8 = vector.broadcast %c15_i32_1 : i32 to vector<1x16xi32>
    %9 = arith.cmpi slt, %7, %8 : vector<1x16xi32>
    %cst = arith.constant 0.000000e+00 : f32
    %cst_2 = arith.constant -1.000000e+30 : f32
    %10 = vector.broadcast %cst : f32 to vector<1x16xf32>
    %11 = vector.broadcast %cst_2 : f32 to vector<1x16xf32>
    %12 = arith.select %9, %10, %11 : vector<1x16xi1>, vector<1x16xf32>
    %13 = vector.shape_cast %12 : vector<1x16xf32> to vector<1x1x16xf32>
    %c0_i32 = arith.constant 0 : i32
    %14 = arith.cmpi eq, %arg0, %c0_i32 : i32
    %15 = arith.extui %14 : i1 to i32
    %c0_i32_3 = arith.constant 0 : i32
    %16 = arith.cmpi ne, %15, %c0_i32_3 : i32
    scf.if %16 {
      %cst_196 = arith.constant 0.000000e+00 : f32
      %518 = vector.broadcast %cst_196 : f32 to vector<2x32x64xf32>
      %c0_197 = arith.constant 0 : index
      %c0_198 = arith.constant 0 : index
      %c0_199 = arith.constant 0 : index
      %519 = vector.load %arg26[%c0_197, %c0_198, %c0_199] : memref<2x32x64xf32, #tpu.memory_space<vmem>>, vector<2x32x64xf32>
      tpu.vector_store %arg26[%c0_197, %c0_198, %c0_199], %518 {strides = array<i32>} : memref<2x32x64xf32, #tpu.memory_space<vmem>>, vector<2x32x64xf32>,
      %c0_200 = arith.constant 0 : index
      %c0_201 = arith.constant 0 : index
      %520 = vector.load %arg1[%c0_200, %c0_201] : memref<32x63xf32, #tpu.memory_space<vmem>>, vector<32x63xf32>
      %c0_202 = arith.constant 0 : index
      %c0_203 = arith.constant 0 : index
      %521 = vector.load %arg14[%c0_202, %c0_203] : memref<63x448xbf16, #tpu.memory_space<vmem>>, vector<63x448xbf16>
      %522 = arith.truncf %520 : vector<32x63xf32> to vector<32x63xbf16>
      %cst_204 = arith.constant dense<0.000000e+00> : vector<32x448xf32>
      %523 = tpu.matmul %522, %521, %cst_204 {dimension_numbers = #tpu.dot_dimension_numbers<[1], [0], [0], [1], [0, 0, 1, 1], [], []>} : vector<32x63xbf16>, vector<63x448xbf16>, vector<32x448xf32> -> vector<32x448xf32>
      %c0_205 = arith.constant 0 : index
      %c0_206 = arith.constant 0 : index
      %524 = vector.load %arg15[%c0_205, %c0_206] : memref<1x448xf32, #tpu.memory_space<vmem>>, vector<1x448xf32>
      %525 = vector.broadcast %524 : vector<1x448xf32> to vector<32x448xf32>
      %526 = arith.addf %523, %525 : vector<32x448xf32>
      %cst_207 = arith.constant 0.000000e+00 : f32
      %527 = vector.broadcast %cst_207 : f32 to vector<32x448xf32>
      %528 = arith.maximumf %526, %527 : vector<32x448xf32>
      %c0_208 = arith.constant 0 : index
      %c0_209 = arith.constant 0 : index
      %529 = vector.load %arg16[%c0_208, %c0_209] : memref<448x64xbf16, #tpu.memory_space<vmem>>, vector<448x64xbf16>
      %530 = arith.truncf %528 : vector<32x448xf32> to vector<32x448xbf16>
      %cst_210 = arith.constant dense<0.000000e+00> : vector<32x64xf32>
      %531 = tpu.matmul %530, %529, %cst_210 {dimension_numbers = #tpu.dot_dimension_numbers<[1], [0], [0], [1], [0, 0, 1, 1], [], []>} : vector<32x448xbf16>, vector<448x64xbf16>, vector<32x64xf32> -> vector<32x64xf32>
      %c0_211 = arith.constant 0 : index
      %c0_212 = arith.constant 0 : index
      %532 = vector.load %arg17[%c0_211, %c0_212] : memref<1x64xf32, #tpu.memory_space<vmem>>, vector<1x64xf32>
      %533 = vector.broadcast %532 : vector<1x64xf32> to vector<32x64xf32>
      %534 = arith.addf %531, %533 : vector<32x64xf32>
      %cst_213 = arith.constant 8.000000e+00 : f32
      %535 = vector.broadcast %cst_213 : f32 to vector<32x64xf32>
      %536 = arith.mulf %534, %535 : vector<32x64xf32>
      %c0_214 = arith.constant 0 : index
      %c0_215 = arith.constant 0 : index
      %537 = vector.load %arg25[%c0_214, %c0_215] : memref<32x64xf32, #tpu.memory_space<vmem>>, vector<32x64xf32>
      tpu.vector_store %arg25[%c0_214, %c0_215], %536 {strides = array<i32>} : memref<32x64xf32, #tpu.memory_space<vmem>>, vector<32x64xf32>,
    } else {
    }
    %c0 = arith.constant 0 : index
    %c0_4 = arith.constant 0 : index
    %c0_5 = arith.constant 0 : index
    %17 = vector.load %arg3[%c0, %c0_4, %c0_5] : memref<1x21x64xf32, #tpu.memory_space<vmem>>, vector<1x21x64xf32>
    %18 = vector.shape_cast %17 : vector<1x21x64xf32> to vector<21x64xf32>
    %c0_6 = arith.constant 0 : index
    %c0_7 = arith.constant 0 : index
    %19 = vector.load %arg25[%c0_6, %c0_7] : memref<32x64xf32, #tpu.memory_space<vmem>>, vector<32x64xf32>
    %20 = vector.extract_strided_slice %18 {offsets = [0, 0], sizes = [1, 64], strides = [1, 1]} : vector<21x64xf32> to vector<1x64xf32>
    %21 = vector.extract_strided_slice %18 {offsets = [1, 0], sizes = [1, 64], strides = [1, 1]} : vector<21x64xf32> to vector<1x64xf32>
    %cst_8 = arith.constant dense<0.000000e+00> : vector<32xf32>
    %22 = vector.multi_reduction <add>, %19, %cst_8 [1] : vector<32x64xf32> to vector<32xf32>
    %23 = vector.shape_cast %22 : vector<32xf32> to vector<32x1xf32>
    %cst_9 = arith.constant 6.400000e+01 : f32
    %24 = vector.broadcast %cst_9 : f32 to vector<32x1xf32>
    %25 = arith.divf %23, %24 : vector<32x1xf32>
    %26 = vector.broadcast %25 : vector<32x1xf32> to vector<32x64xf32>
    %27 = arith.subf %19, %26 : vector<32x64xf32>
    %28 = arith.mulf %27, %27 : vector<32x64xf32>
    %cst_10 = arith.constant dense<0.000000e+00> : vector<32xf32>
    %29 = vector.multi_reduction <add>, %28, %cst_10 [1] : vector<32x64xf32> to vector<32xf32>
    %30 = vector.shape_cast %29 : vector<32xf32> to vector<32x1xf32>
    %cst_11 = arith.constant 6.400000e+01 : f32
    %31 = vector.broadcast %cst_11 : f32 to vector<32x1xf32>
    %32 = arith.divf %30, %31 : vector<32x1xf32>
    %33 = vector.broadcast %25 : vector<32x1xf32> to vector<32x64xf32>
    %34 = arith.subf %19, %33 : vector<32x64xf32>
    %cst_12 = arith.constant 9.99999974E-6 : f32
    %35 = vector.broadcast %cst_12 : f32 to vector<32x1xf32>
    %36 = arith.addf %32, %35 : vector<32x1xf32>
    %37 = math.rsqrt %36 : vector<32x1xf32>
    %38 = vector.broadcast %37 : vector<32x1xf32> to vector<32x64xf32>
    %39 = arith.mulf %34, %38 : vector<32x64xf32>
    %40 = vector.broadcast %20 : vector<1x64xf32> to vector<32x64xf32>
    %41 = arith.mulf %39, %40 : vector<32x64xf32>
    %42 = vector.broadcast %21 : vector<1x64xf32> to vector<32x64xf32>
    %43 = arith.addf %41, %42 : vector<32x64xf32>
    %c0_13 = arith.constant 0 : index
    %c0_14 = arith.constant 0 : index
    %c0_15 = arith.constant 0 : index
    %c0_16 = arith.constant 0 : index
    %44 = vector.load %arg6[%c0_13, %c0_14, %c0_15, %c0_16] : memref<1x2x64x2048xbf16, #tpu.memory_space<vmem>>, vector<1x1x64x2048xbf16>
    %45 = vector.shape_cast %44 : vector<1x1x64x2048xbf16> to vector<64x2048xbf16>
    %46 = arith.truncf %43 : vector<32x64xf32> to vector<32x64xbf16>
    %cst_17 = arith.constant dense<0.000000e+00> : vector<32x2048xf32>
    %47 = tpu.matmul %46, %45, %cst_17 {dimension_numbers = #tpu.dot_dimension_numbers<[1], [0], [0], [1], [0, 0, 1, 1], [], []>} : vector<32x64xbf16>, vector<64x2048xbf16>, vector<32x2048xf32> -> vector<32x2048xf32>
    %c0_18 = arith.constant 0 : index
    %c0_19 = arith.constant 0 : index
    %c0_20 = arith.constant 0 : index
    %48 = vector.load %arg5[%c0_18, %c0_19, %c0_20] : memref<1x2x2048xf32, #tpu.memory_space<vmem>>, vector<1x1x2048xf32>
    %49 = vector.shape_cast %48 : vector<1x1x2048xf32> to vector<1x2048xf32>
    %50 = vector.broadcast %49 : vector<1x2048xf32> to vector<32x2048xf32>
    %51 = arith.addf %47, %50 : vector<32x2048xf32>
    %52 = arith.negf %51 : vector<32x2048xf32>
    %53 = math.exp %52 : vector<32x2048xf32>
    %cst_21 = arith.constant 1.000000e+00 : f32
    %54 = vector.broadcast %cst_21 : f32 to vector<32x2048xf32>
    %55 = arith.addf %54, %53 : vector<32x2048xf32>
    %56 = arith.divf %54, %55 : vector<32x2048xf32>
    %57 = arith.mulf %51, %56 : vector<32x2048xf32>
    %c0_22 = arith.constant 0 : index
    %c0_23 = arith.constant 0 : index
    %c0_24 = arith.constant 0 : index
    %c0_25 = arith.constant 0 : index
    %58 = vector.load %arg7[%c0_22, %c0_23, %c0_24, %c0_25] : memref<1x2x2048x64xbf16, #tpu.memory_space<vmem>>, vector<1x1x2048x64xbf16>
    %59 = vector.shape_cast %58 : vector<1x1x2048x64xbf16> to vector<2048x64xbf16>
    %60 = arith.truncf %57 : vector<32x2048xf32> to vector<32x2048xbf16>
    %cst_26 = arith.constant dense<0.000000e+00> : vector<32x64xf32>
    %61 = tpu.matmul %60, %59, %cst_26 {dimension_numbers = #tpu.dot_dimension_numbers<[1], [0], [0], [1], [0, 0, 1, 1], [], []>} : vector<32x2048xbf16>, vector<2048x64xbf16>, vector<32x64xf32> -> vector<32x64xf32>
    %62 = vector.extract_strided_slice %18 {offsets = [2, 0], sizes = [1, 64], strides = [1, 1]} : vector<21x64xf32> to vector<1x64xf32>
    %63 = vector.broadcast %62 : vector<1x64xf32> to vector<32x64xf32>
    %64 = arith.addf %61, %63 : vector<32x64xf32>
    %cst_27 = arith.constant 5.000000e-01 : f32
    %65 = vector.broadcast %cst_27 : f32 to vector<32x64xf32>
    %66 = arith.mulf %65, %64 : vector<32x64xf32>
    %67 = arith.addf %19, %66 : vector<32x64xf32>
    %68 = vector.extract_strided_slice %18 {offsets = [3, 0], sizes = [1, 64], strides = [1, 1]} : vector<21x64xf32> to vector<1x64xf32>
    %69 = vector.extract_strided_slice %18 {offsets = [4, 0], sizes = [1, 64], strides = [1, 1]} : vector<21x64xf32> to vector<1x64xf32>
    %cst_28 = arith.constant dense<0.000000e+00> : vector<32xf32>
    %70 = vector.multi_reduction <add>, %67, %cst_28 [1] : vector<32x64xf32> to vector<32xf32>
    %71 = vector.shape_cast %70 : vector<32xf32> to vector<32x1xf32>
    %cst_29 = arith.constant 6.400000e+01 : f32
    %72 = vector.broadcast %cst_29 : f32 to vector<32x1xf32>
    %73 = arith.divf %71, %72 : vector<32x1xf32>
    %74 = vector.broadcast %73 : vector<32x1xf32> to vector<32x64xf32>
    %75 = arith.subf %67, %74 : vector<32x64xf32>
    %76 = arith.mulf %75, %75 : vector<32x64xf32>
    %cst_30 = arith.constant dense<0.000000e+00> : vector<32xf32>
    %77 = vector.multi_reduction <add>, %76, %cst_30 [1] : vector<32x64xf32> to vector<32xf32>
    %78 = vector.shape_cast %77 : vector<32xf32> to vector<32x1xf32>
    %cst_31 = arith.constant 6.400000e+01 : f32
    %79 = vector.broadcast %cst_31 : f32 to vector<32x1xf32>
    %80 = arith.divf %78, %79 : vector<32x1xf32>
    %81 = vector.broadcast %73 : vector<32x1xf32> to vector<32x64xf32>
    %82 = arith.subf %67, %81 : vector<32x64xf32>
    %cst_32 = arith.constant 9.99999974E-6 : f32
    %83 = vector.broadcast %cst_32 : f32 to vector<32x1xf32>
    %84 = arith.addf %80, %83 : vector<32x1xf32>
    %85 = math.rsqrt %84 : vector<32x1xf32>
    %86 = vector.broadcast %85 : vector<32x1xf32> to vector<32x64xf32>
    %87 = arith.mulf %82, %86 : vector<32x64xf32>
    %88 = vector.broadcast %68 : vector<1x64xf32> to vector<32x64xf32>
    %89 = arith.mulf %87, %88 : vector<32x64xf32>
    %90 = vector.broadcast %69 : vector<1x64xf32> to vector<32x64xf32>
    %91 = arith.addf %89, %90 : vector<32x64xf32>
    %c0_33 = arith.constant 0 : index
    %c0_34 = arith.constant 0 : index
    %c0_35 = arith.constant 0 : index
    %92 = vector.load %arg8[%c0_33, %c0_34, %c0_35] : memref<1x64x192xbf16, #tpu.memory_space<vmem>>, vector<1x64x192xbf16>
    %93 = vector.shape_cast %92 : vector<1x64x192xbf16> to vector<64x192xbf16>
    %94 = arith.truncf %91 : vector<32x64xf32> to vector<32x64xbf16>
    %cst_36 = arith.constant dense<0.000000e+00> : vector<32x192xf32>
    %95 = tpu.matmul %94, %93, %cst_36 {dimension_numbers = #tpu.dot_dimension_numbers<[1], [0], [0], [1], [0, 0, 1, 1], [], []>} : vector<32x64xbf16>, vector<64x192xbf16>, vector<32x192xf32> -> vector<32x192xf32>
    %c0_37 = arith.constant 0 : index
    %c0_38 = arith.constant 0 : index
    %96 = vector.load %arg2[%c0_37, %c0_38] : memref<16x64xf32, #tpu.memory_space<vmem>>, vector<16x64xf32>
    %c0_39 = arith.constant 0 : index
    %c0_40 = arith.constant 0 : index
    %c0_41 = arith.constant 0 : index
    %97 = vector.load %arg9[%c0_39, %c0_40, %c0_41] : memref<1x64x64xbf16, #tpu.memory_space<vmem>>, vector<1x64x64xbf16>
    %98 = vector.shape_cast %97 : vector<1x64x64xbf16> to vector<64x64xbf16>
    %99 = arith.truncf %96 : vector<16x64xf32> to vector<16x64xbf16>
    %cst_42 = arith.constant dense<0.000000e+00> : vector<16x64xf32>
    %100 = tpu.matmul %99, %98, %cst_42 {dimension_numbers = #tpu.dot_dimension_numbers<[1], [0], [0], [1], [0, 0, 1, 1], [], []>} : vector<16x64xbf16>, vector<64x64xbf16>, vector<16x64xf32> -> vector<16x64xf32>
    %101 = vector.extract_strided_slice %95 {offsets = [0, 0], sizes = [32, 64], strides = [1, 1]} : vector<32x192xf32> to vector<32x64xf32>
    %102 = vector.extract_strided_slice %18 {offsets = [5, 0], sizes = [1, 64], strides = [1, 1]} : vector<21x64xf32> to vector<1x64xf32>
    %103 = vector.broadcast %102 : vector<1x64xf32> to vector<32x64xf32>
    %104 = arith.addf %101, %103 : vector<32x64xf32>
    %105 = vector.extract_strided_slice %95 {offsets = [0, 64], sizes = [32, 64], strides = [1, 1]} : vector<32x192xf32> to vector<32x64xf32>
    %106 = vector.extract_strided_slice %18 {offsets = [6, 0], sizes = [1, 64], strides = [1, 1]} : vector<21x64xf32> to vector<1x64xf32>
    %107 = vector.broadcast %106 : vector<1x64xf32> to vector<32x64xf32>
    %108 = arith.addf %105, %107 : vector<32x64xf32>
    %109 = vector.shape_cast %108 : vector<32x64xf32> to vector<2x16x64xf32>
    %110 = vector.extract_strided_slice %95 {offsets = [0, 128], sizes = [32, 64], strides = [1, 1]} : vector<32x192xf32> to vector<32x64xf32>
    %111 = vector.extract_strided_slice %18 {offsets = [7, 0], sizes = [1, 64], strides = [1, 1]} : vector<21x64xf32> to vector<1x64xf32>
    %112 = vector.broadcast %111 : vector<1x64xf32> to vector<32x64xf32>
    %113 = arith.addf %110, %112 : vector<32x64xf32>
    %114 = vector.shape_cast %113 : vector<32x64xf32> to vector<2x16x64xf32>
    %115 = vector.extract_strided_slice %18 {offsets = [9, 0], sizes = [1, 64], strides = [1, 1]} : vector<21x64xf32> to vector<1x64xf32>
    %116 = vector.extract_strided_slice %18 {offsets = [10, 0], sizes = [1, 64], strides = [1, 1]} : vector<21x64xf32> to vector<1x64xf32>
    %117 = vector.extract_strided_slice %104 {offsets = [0, 0], sizes = [32, 16], strides = [1, 1]} : vector<32x64xf32> to vector<32x16xf32>
    %118 = vector.extract_strided_slice %109 {offsets = [0, 0, 0], sizes = [2, 16, 16], strides = [1, 1, 1]} : vector<2x16x64xf32> to vector<2x16x16xf32>
    %119 = vector.extract_strided_slice %114 {offsets = [0, 0, 0], sizes = [2, 16, 16], strides = [1, 1, 1]} : vector<2x16x64xf32> to vector<2x16x16xf32>
    %120 = vector.extract_strided_slice %100 {offsets = [0, 0], sizes = [16, 16], strides = [1, 1]} : vector<16x64xf32> to vector<16x16xf32>
    %121 = vector.extract_strided_slice %115 {offsets = [0, 0], sizes = [1, 16], strides = [1, 1]} : vector<1x64xf32> to vector<1x16xf32>
    %122 = vector.broadcast %121 : vector<1x16xf32> to vector<32x16xf32>
    %123 = arith.addf %117, %122 : vector<32x16xf32>
    %124 = vector.shape_cast %123 : vector<32x16xf32> to vector<2x16x16xf32>
    %125 = arith.truncf %124 : vector<2x16x16xf32> to vector<2x16x16xbf16>
    %126 = arith.truncf %118 : vector<2x16x16xf32> to vector<2x16x16xbf16>
    "tpu.trace_start"() <{level = 10 : i32, message = "bqd,bkd->bqk"}> : () -> ()
    %cst_43 = arith.constant dense<0.000000e+00> : vector<2x16x16xf32>
    %127 = tpu.matmul %125, %126, %cst_43 {dimension_numbers = #tpu.dot_dimension_numbers<[2], [2], [1], [1], [0, 0, 0, 1, 1, 1], [0], [0]>} : vector<2x16x16xbf16>, vector<2x16x16xbf16>, vector<2x16x16xf32> -> vector<2x16x16xf32>
    "tpu.trace_stop"() : () -> ()
    %128 = vector.extract_strided_slice %116 {offsets = [0, 0], sizes = [1, 16], strides = [1, 1]} : vector<1x64xf32> to vector<1x16xf32>
    %129 = vector.broadcast %128 : vector<1x16xf32> to vector<32x16xf32>
    %130 = arith.addf %117, %129 : vector<32x16xf32>
    %131 = arith.truncf %130 : vector<32x16xf32> to vector<32x16xbf16>
    %132 = arith.truncf %120 : vector<16x16xf32> to vector<16x16xbf16>
    "tpu.trace_start"() <{level = 10 : i32, message = "qd,kd->qk"}> : () -> ()
    %cst_44 = arith.constant dense<0.000000e+00> : vector<32x16xf32>
    %133 = tpu.matmul %131, %132, %cst_44 {dimension_numbers = #tpu.dot_dimension_numbers<[1], [1], [0], [0], [0, 0, 1, 0], [], []>} : vector<32x16xbf16>, vector<16x16xbf16>, vector<32x16xf32> -> vector<32x16xf32>
    "tpu.trace_stop"() : () -> ()
    %134 = vector.shape_cast %133 : vector<32x16xf32> to vector<2x16x16xf32>
    %135 = arith.addf %127, %134 : vector<2x16x16xf32>
    %cst_45 = arith.constant 2.500000e-01 : f32
    %136 = vector.broadcast %cst_45 : f32 to vector<2x16x16xf32>
    %137 = arith.mulf %135, %136 : vector<2x16x16xf32>
    %138 = vector.broadcast %13 : vector<1x1x16xf32> to vector<2x16x16xf32>
    %139 = arith.addf %137, %138 : vector<2x16x16xf32>
    %cst_46 = arith.constant dense<0xFF800000> : vector<2x16xf32>
    %140 = vector.multi_reduction <maximumf>, %139, %cst_46 [2] : vector<2x16x16xf32> to vector<2x16xf32>
    %141 = vector.shape_cast %140 : vector<2x16xf32> to vector<2x16x1xf32>
    %142 = vector.broadcast %141 : vector<2x16x1xf32> to vector<2x16x16xf32>
    %143 = arith.subf %139, %142 : vector<2x16x16xf32>
    %144 = math.exp %143 : vector<2x16x16xf32>
    %cst_47 = arith.constant dense<0.000000e+00> : vector<2x16xf32>
    %145 = vector.multi_reduction <add>, %144, %cst_47 [2] : vector<2x16x16xf32> to vector<2x16xf32>
    %146 = vector.shape_cast %145 : vector<2x16xf32> to vector<2x16x1xf32>
    %147 = tpu.reciprocal %146 {approx = true} : vector<2x16x1xf32> -> vector<2x16x1xf32>
    %148 = vector.broadcast %147 : vector<2x16x1xf32> to vector<2x16x16xf32>
    %149 = arith.mulf %144, %148 : vector<2x16x16xf32>
    %150 = arith.truncf %149 : vector<2x16x16xf32> to vector<2x16x16xbf16>
    %151 = arith.truncf %119 : vector<2x16x16xf32> to vector<2x16x16xbf16>
    "tpu.trace_start"() <{level = 10 : i32, message = "bqk,bkd->bqd"}> : () -> ()
    %cst_48 = arith.constant dense<0.000000e+00> : vector<2x16x16xf32>
    %152 = tpu.matmul %150, %151, %cst_48 {dimension_numbers = #tpu.dot_dimension_numbers<[2], [1], [1], [2], [0, 0, 0, 1, 1, 2], [0], [0]>} : vector<2x16x16xbf16>, vector<2x16x16xbf16>, vector<2x16x16xf32> -> vector<2x16x16xf32>
    "tpu.trace_stop"() : () -> ()
    %153 = vector.extract_strided_slice %104 {offsets = [0, 16], sizes = [32, 16], strides = [1, 1]} : vector<32x64xf32> to vector<32x16xf32>
    %154 = vector.extract_strided_slice %109 {offsets = [0, 0, 16], sizes = [2, 16, 16], strides = [1, 1, 1]} : vector<2x16x64xf32> to vector<2x16x16xf32>
    %155 = vector.extract_strided_slice %114 {offsets = [0, 0, 16], sizes = [2, 16, 16], strides = [1, 1, 1]} : vector<2x16x64xf32> to vector<2x16x16xf32>
    %156 = vector.extract_strided_slice %100 {offsets = [0, 16], sizes = [16, 16], strides = [1, 1]} : vector<16x64xf32> to vector<16x16xf32>
    %157 = vector.extract_strided_slice %115 {offsets = [0, 16], sizes = [1, 16], strides = [1, 1]} : vector<1x64xf32> to vector<1x16xf32>
    %158 = vector.broadcast %157 : vector<1x16xf32> to vector<32x16xf32>
    %159 = arith.addf %153, %158 : vector<32x16xf32>
    %160 = vector.shape_cast %159 : vector<32x16xf32> to vector<2x16x16xf32>
    %161 = arith.truncf %160 : vector<2x16x16xf32> to vector<2x16x16xbf16>
    %162 = arith.truncf %154 : vector<2x16x16xf32> to vector<2x16x16xbf16>
    "tpu.trace_start"() <{level = 10 : i32, message = "bqd,bkd->bqk"}> : () -> ()
    %cst_49 = arith.constant dense<0.000000e+00> : vector<2x16x16xf32>
    %163 = tpu.matmul %161, %162, %cst_49 {dimension_numbers = #tpu.dot_dimension_numbers<[2], [2], [1], [1], [0, 0, 0, 1, 1, 1], [0], [0]>} : vector<2x16x16xbf16>, vector<2x16x16xbf16>, vector<2x16x16xf32> -> vector<2x16x16xf32>
    "tpu.trace_stop"() : () -> ()
    %164 = vector.extract_strided_slice %116 {offsets = [0, 16], sizes = [1, 16], strides = [1, 1]} : vector<1x64xf32> to vector<1x16xf32>
    %165 = vector.broadcast %164 : vector<1x16xf32> to vector<32x16xf32>
    %166 = arith.addf %153, %165 : vector<32x16xf32>
    %167 = arith.truncf %166 : vector<32x16xf32> to vector<32x16xbf16>
    %168 = arith.truncf %156 : vector<16x16xf32> to vector<16x16xbf16>
    "tpu.trace_start"() <{level = 10 : i32, message = "qd,kd->qk"}> : () -> ()
    %cst_50 = arith.constant dense<0.000000e+00> : vector<32x16xf32>
    %169 = tpu.matmul %167, %168, %cst_50 {dimension_numbers = #tpu.dot_dimension_numbers<[1], [1], [0], [0], [0, 0, 1, 0], [], []>} : vector<32x16xbf16>, vector<16x16xbf16>, vector<32x16xf32> -> vector<32x16xf32>
    "tpu.trace_stop"() : () -> ()
    %170 = vector.shape_cast %169 : vector<32x16xf32> to vector<2x16x16xf32>
    %171 = arith.addf %163, %170 : vector<2x16x16xf32>
    %cst_51 = arith.constant 2.500000e-01 : f32
    %172 = vector.broadcast %cst_51 : f32 to vector<2x16x16xf32>
    %173 = arith.mulf %171, %172 : vector<2x16x16xf32>
    %174 = vector.broadcast %13 : vector<1x1x16xf32> to vector<2x16x16xf32>
    %175 = arith.addf %173, %174 : vector<2x16x16xf32>
    %cst_52 = arith.constant dense<0xFF800000> : vector<2x16xf32>
    %176 = vector.multi_reduction <maximumf>, %175, %cst_52 [2] : vector<2x16x16xf32> to vector<2x16xf32>
    %177 = vector.shape_cast %176 : vector<2x16xf32> to vector<2x16x1xf32>
    %178 = vector.broadcast %177 : vector<2x16x1xf32> to vector<2x16x16xf32>
    %179 = arith.subf %175, %178 : vector<2x16x16xf32>
    %180 = math.exp %179 : vector<2x16x16xf32>
    %cst_53 = arith.constant dense<0.000000e+00> : vector<2x16xf32>
    %181 = vector.multi_reduction <add>, %180, %cst_53 [2] : vector<2x16x16xf32> to vector<2x16xf32>
    %182 = vector.shape_cast %181 : vector<2x16xf32> to vector<2x16x1xf32>
    %183 = tpu.reciprocal %182 {approx = true} : vector<2x16x1xf32> -> vector<2x16x1xf32>
    %184 = vector.broadcast %183 : vector<2x16x1xf32> to vector<2x16x16xf32>
    %185 = arith.mulf %180, %184 : vector<2x16x16xf32>
    %186 = arith.truncf %185 : vector<2x16x16xf32> to vector<2x16x16xbf16>
    %187 = arith.truncf %155 : vector<2x16x16xf32> to vector<2x16x16xbf16>
    "tpu.trace_start"() <{level = 10 : i32, message = "bqk,bkd->bqd"}> : () -> ()
    %cst_54 = arith.constant dense<0.000000e+00> : vector<2x16x16xf32>
    %188 = tpu.matmul %186, %187, %cst_54 {dimension_numbers = #tpu.dot_dimension_numbers<[2], [1], [1], [2], [0, 0, 0, 1, 1, 2], [0], [0]>} : vector<2x16x16xbf16>, vector<2x16x16xbf16>, vector<2x16x16xf32> -> vector<2x16x16xf32>
    "tpu.trace_stop"() : () -> ()
    %189 = vector.extract_strided_slice %104 {offsets = [0, 32], sizes = [32, 16], strides = [1, 1]} : vector<32x64xf32> to vector<32x16xf32>
    %190 = vector.extract_strided_slice %109 {offsets = [0, 0, 32], sizes = [2, 16, 16], strides = [1, 1, 1]} : vector<2x16x64xf32> to vector<2x16x16xf32>
    %191 = vector.extract_strided_slice %114 {offsets = [0, 0, 32], sizes = [2, 16, 16], strides = [1, 1, 1]} : vector<2x16x64xf32> to vector<2x16x16xf32>
    %192 = vector.extract_strided_slice %100 {offsets = [0, 32], sizes = [16, 16], strides = [1, 1]} : vector<16x64xf32> to vector<16x16xf32>
    %193 = vector.extract_strided_slice %115 {offsets = [0, 32], sizes = [1, 16], strides = [1, 1]} : vector<1x64xf32> to vector<1x16xf32>
    %194 = vector.broadcast %193 : vector<1x16xf32> to vector<32x16xf32>
    %195 = arith.addf %189, %194 : vector<32x16xf32>
    %196 = vector.shape_cast %195 : vector<32x16xf32> to vector<2x16x16xf32>
    %197 = arith.truncf %196 : vector<2x16x16xf32> to vector<2x16x16xbf16>
    %198 = arith.truncf %190 : vector<2x16x16xf32> to vector<2x16x16xbf16>
    "tpu.trace_start"() <{level = 10 : i32, message = "bqd,bkd->bqk"}> : () -> ()
    %cst_55 = arith.constant dense<0.000000e+00> : vector<2x16x16xf32>
    %199 = tpu.matmul %197, %198, %cst_55 {dimension_numbers = #tpu.dot_dimension_numbers<[2], [2], [1], [1], [0, 0, 0, 1, 1, 1], [0], [0]>} : vector<2x16x16xbf16>, vector<2x16x16xbf16>, vector<2x16x16xf32> -> vector<2x16x16xf32>
    "tpu.trace_stop"() : () -> ()
    %200 = vector.extract_strided_slice %116 {offsets = [0, 32], sizes = [1, 16], strides = [1, 1]} : vector<1x64xf32> to vector<1x16xf32>
    %201 = vector.broadcast %200 : vector<1x16xf32> to vector<32x16xf32>
    %202 = arith.addf %189, %201 : vector<32x16xf32>
    %203 = arith.truncf %202 : vector<32x16xf32> to vector<32x16xbf16>
    %204 = arith.truncf %192 : vector<16x16xf32> to vector<16x16xbf16>
    "tpu.trace_start"() <{level = 10 : i32, message = "qd,kd->qk"}> : () -> ()
    %cst_56 = arith.constant dense<0.000000e+00> : vector<32x16xf32>
    %205 = tpu.matmul %203, %204, %cst_56 {dimension_numbers = #tpu.dot_dimension_numbers<[1], [1], [0], [0], [0, 0, 1, 0], [], []>} : vector<32x16xbf16>, vector<16x16xbf16>, vector<32x16xf32> -> vector<32x16xf32>
    "tpu.trace_stop"() : () -> ()
    %206 = vector.shape_cast %205 : vector<32x16xf32> to vector<2x16x16xf32>
    %207 = arith.addf %199, %206 : vector<2x16x16xf32>
    %cst_57 = arith.constant 2.500000e-01 : f32
    %208 = vector.broadcast %cst_57 : f32 to vector<2x16x16xf32>
    %209 = arith.mulf %207, %208 : vector<2x16x16xf32>
    %210 = vector.broadcast %13 : vector<1x1x16xf32> to vector<2x16x16xf32>
    %211 = arith.addf %209, %210 : vector<2x16x16xf32>
    %cst_58 = arith.constant dense<0xFF800000> : vector<2x16xf32>
    %212 = vector.multi_reduction <maximumf>, %211, %cst_58 [2] : vector<2x16x16xf32> to vector<2x16xf32>
    %213 = vector.shape_cast %212 : vector<2x16xf32> to vector<2x16x1xf32>
    %214 = vector.broadcast %213 : vector<2x16x1xf32> to vector<2x16x16xf32>
    %215 = arith.subf %211, %214 : vector<2x16x16xf32>
    %216 = math.exp %215 : vector<2x16x16xf32>
    %cst_59 = arith.constant dense<0.000000e+00> : vector<2x16xf32>
    %217 = vector.multi_reduction <add>, %216, %cst_59 [2] : vector<2x16x16xf32> to vector<2x16xf32>
    %218 = vector.shape_cast %217 : vector<2x16xf32> to vector<2x16x1xf32>
    %219 = tpu.reciprocal %218 {approx = true} : vector<2x16x1xf32> -> vector<2x16x1xf32>
    %220 = vector.broadcast %219 : vector<2x16x1xf32> to vector<2x16x16xf32>
    %221 = arith.mulf %216, %220 : vector<2x16x16xf32>
    %222 = arith.truncf %221 : vector<2x16x16xf32> to vector<2x16x16xbf16>
    %223 = arith.truncf %191 : vector<2x16x16xf32> to vector<2x16x16xbf16>
    "tpu.trace_start"() <{level = 10 : i32, message = "bqk,bkd->bqd"}> : () -> ()
    %cst_60 = arith.constant dense<0.000000e+00> : vector<2x16x16xf32>
    %224 = tpu.matmul %222, %223, %cst_60 {dimension_numbers = #tpu.dot_dimension_numbers<[2], [1], [1], [2], [0, 0, 0, 1, 1, 2], [0], [0]>} : vector<2x16x16xbf16>, vector<2x16x16xbf16>, vector<2x16x16xf32> -> vector<2x16x16xf32>
    "tpu.trace_stop"() : () -> ()
    %225 = vector.extract_strided_slice %104 {offsets = [0, 48], sizes = [32, 16], strides = [1, 1]} : vector<32x64xf32> to vector<32x16xf32>
    %226 = vector.extract_strided_slice %109 {offsets = [0, 0, 48], sizes = [2, 16, 16], strides = [1, 1, 1]} : vector<2x16x64xf32> to vector<2x16x16xf32>
    %227 = vector.extract_strided_slice %114 {offsets = [0, 0, 48], sizes = [2, 16, 16], strides = [1, 1, 1]} : vector<2x16x64xf32> to vector<2x16x16xf32>
    %228 = vector.extract_strided_slice %100 {offsets = [0, 48], sizes = [16, 16], strides = [1, 1]} : vector<16x64xf32> to vector<16x16xf32>
    %229 = vector.extract_strided_slice %115 {offsets = [0, 48], sizes = [1, 16], strides = [1, 1]} : vector<1x64xf32> to vector<1x16xf32>
    %230 = vector.broadcast %229 : vector<1x16xf32> to vector<32x16xf32>
    %231 = arith.addf %225, %230 : vector<32x16xf32>
    %232 = vector.shape_cast %231 : vector<32x16xf32> to vector<2x16x16xf32>
    %233 = arith.truncf %232 : vector<2x16x16xf32> to vector<2x16x16xbf16>
    %234 = arith.truncf %226 : vector<2x16x16xf32> to vector<2x16x16xbf16>
    "tpu.trace_start"() <{level = 10 : i32, message = "bqd,bkd->bqk"}> : () -> ()
    %cst_61 = arith.constant dense<0.000000e+00> : vector<2x16x16xf32>
    %235 = tpu.matmul %233, %234, %cst_61 {dimension_numbers = #tpu.dot_dimension_numbers<[2], [2], [1], [1], [0, 0, 0, 1, 1, 1], [0], [0]>} : vector<2x16x16xbf16>, vector<2x16x16xbf16>, vector<2x16x16xf32> -> vector<2x16x16xf32>
    "tpu.trace_stop"() : () -> ()
    %236 = vector.extract_strided_slice %116 {offsets = [0, 48], sizes = [1, 16], strides = [1, 1]} : vector<1x64xf32> to vector<1x16xf32>
    %237 = vector.broadcast %236 : vector<1x16xf32> to vector<32x16xf32>
    %238 = arith.addf %225, %237 : vector<32x16xf32>
    %239 = arith.truncf %238 : vector<32x16xf32> to vector<32x16xbf16>
    %240 = arith.truncf %228 : vector<16x16xf32> to vector<16x16xbf16>
    "tpu.trace_start"() <{level = 10 : i32, message = "qd,kd->qk"}> : () -> ()
    %cst_62 = arith.constant dense<0.000000e+00> : vector<32x16xf32>
    %241 = tpu.matmul %239, %240, %cst_62 {dimension_numbers = #tpu.dot_dimension_numbers<[1], [1], [0], [0], [0, 0, 1, 0], [], []>} : vector<32x16xbf16>, vector<16x16xbf16>, vector<32x16xf32> -> vector<32x16xf32>
    "tpu.trace_stop"() : () -> ()
    %242 = vector.shape_cast %241 : vector<32x16xf32> to vector<2x16x16xf32>
    %243 = arith.addf %235, %242 : vector<2x16x16xf32>
    %cst_63 = arith.constant 2.500000e-01 : f32
    %244 = vector.broadcast %cst_63 : f32 to vector<2x16x16xf32>
    %245 = arith.mulf %243, %244 : vector<2x16x16xf32>
    %246 = vector.broadcast %13 : vector<1x1x16xf32> to vector<2x16x16xf32>
    %247 = arith.addf %245, %246 : vector<2x16x16xf32>
    %cst_64 = arith.constant dense<0xFF800000> : vector<2x16xf32>
    %248 = vector.multi_reduction <maximumf>, %247, %cst_64 [2] : vector<2x16x16xf32> to vector<2x16xf32>
    %249 = vector.shape_cast %248 : vector<2x16xf32> to vector<2x16x1xf32>
    %250 = vector.broadcast %249 : vector<2x16x1xf32> to vector<2x16x16xf32>
    %251 = arith.subf %247, %250 : vector<2x16x16xf32>
    %252 = math.exp %251 : vector<2x16x16xf32>
    %cst_65 = arith.constant dense<0.000000e+00> : vector<2x16xf32>
    %253 = vector.multi_reduction <add>, %252, %cst_65 [2] : vector<2x16x16xf32> to vector<2x16xf32>
    %254 = vector.shape_cast %253 : vector<2x16xf32> to vector<2x16x1xf32>
    %255 = tpu.reciprocal %254 {approx = true} : vector<2x16x1xf32> -> vector<2x16x1xf32>
    %256 = vector.broadcast %255 : vector<2x16x1xf32> to vector<2x16x16xf32>
    %257 = arith.mulf %252, %256 : vector<2x16x16xf32>
    %258 = arith.truncf %257 : vector<2x16x16xf32> to vector<2x16x16xbf16>
    %259 = arith.truncf %227 : vector<2x16x16xf32> to vector<2x16x16xbf16>
    "tpu.trace_start"() <{level = 10 : i32, message = "bqk,bkd->bqd"}> : () -> ()
    %cst_66 = arith.constant dense<0.000000e+00> : vector<2x16x16xf32>
    %260 = tpu.matmul %258, %259, %cst_66 {dimension_numbers = #tpu.dot_dimension_numbers<[2], [1], [1], [2], [0, 0, 0, 1, 1, 2], [0], [0]>} : vector<2x16x16xbf16>, vector<2x16x16xbf16>, vector<2x16x16xf32> -> vector<2x16x16xf32>
    "tpu.trace_stop"() : () -> ()
    %261 = tpu.concatenate %152, %188, %224, %260 in 2 : vector<2x16x16xf32>, vector<2x16x16xf32>, vector<2x16x16xf32>, vector<2x16x16xf32> -> vector<2x16x64xf32>
    %262 = vector.shape_cast %261 : vector<2x16x64xf32> to vector<32x64xf32>
    %c0_67 = arith.constant 0 : index
    %c0_68 = arith.constant 0 : index
    %c0_69 = arith.constant 0 : index
    %263 = vector.load %arg10[%c0_67, %c0_68, %c0_69] : memref<1x64x64xbf16, #tpu.memory_space<vmem>>, vector<1x64x64xbf16>
    %264 = vector.shape_cast %263 : vector<1x64x64xbf16> to vector<64x64xbf16>
    %265 = arith.truncf %262 : vector<32x64xf32> to vector<32x64xbf16>
    %cst_70 = arith.constant dense<0.000000e+00> : vector<32x64xf32>
    %266 = tpu.matmul %265, %264, %cst_70 {dimension_numbers = #tpu.dot_dimension_numbers<[1], [0], [0], [1], [0, 0, 1, 1], [], []>} : vector<32x64xbf16>, vector<64x64xbf16>, vector<32x64xf32> -> vector<32x64xf32>
    %267 = arith.addf %67, %266 : vector<32x64xf32>
    %268 = vector.extract_strided_slice %18 {offsets = [8, 0], sizes = [1, 64], strides = [1, 1]} : vector<21x64xf32> to vector<1x64xf32>
    %269 = vector.broadcast %268 : vector<1x64xf32> to vector<32x64xf32>
    %270 = arith.addf %267, %269 : vector<32x64xf32>
    %271 = vector.extract_strided_slice %18 {offsets = [11, 0], sizes = [1, 64], strides = [1, 1]} : vector<21x64xf32> to vector<1x64xf32>
    %272 = vector.extract_strided_slice %18 {offsets = [12, 0], sizes = [1, 64], strides = [1, 1]} : vector<21x64xf32> to vector<1x64xf32>
    %cst_71 = arith.constant dense<0.000000e+00> : vector<32xf32>
    %273 = vector.multi_reduction <add>, %270, %cst_71 [1] : vector<32x64xf32> to vector<32xf32>
    %274 = vector.shape_cast %273 : vector<32xf32> to vector<32x1xf32>
    %cst_72 = arith.constant 6.400000e+01 : f32
    %275 = vector.broadcast %cst_72 : f32 to vector<32x1xf32>
    %276 = arith.divf %274, %275 : vector<32x1xf32>
    %277 = vector.broadcast %276 : vector<32x1xf32> to vector<32x64xf32>
    %278 = arith.subf %270, %277 : vector<32x64xf32>
    %279 = arith.mulf %278, %278 : vector<32x64xf32>
    %cst_73 = arith.constant dense<0.000000e+00> : vector<32xf32>
    %280 = vector.multi_reduction <add>, %279, %cst_73 [1] : vector<32x64xf32> to vector<32xf32>
    %281 = vector.shape_cast %280 : vector<32xf32> to vector<32x1xf32>
    %cst_74 = arith.constant 6.400000e+01 : f32
    %282 = vector.broadcast %cst_74 : f32 to vector<32x1xf32>
    %283 = arith.divf %281, %282 : vector<32x1xf32>
    %284 = vector.broadcast %276 : vector<32x1xf32> to vector<32x64xf32>
    %285 = arith.subf %270, %284 : vector<32x64xf32>
    %cst_75 = arith.constant 9.99999974E-6 : f32
    %286 = vector.broadcast %cst_75 : f32 to vector<32x1xf32>
    %287 = arith.addf %283, %286 : vector<32x1xf32>
    %288 = math.rsqrt %287 : vector<32x1xf32>
    %289 = vector.broadcast %288 : vector<32x1xf32> to vector<32x64xf32>
    %290 = arith.mulf %285, %289 : vector<32x64xf32>
    %291 = vector.broadcast %271 : vector<1x64xf32> to vector<32x64xf32>
    %292 = arith.mulf %290, %291 : vector<32x64xf32>
    %293 = vector.broadcast %272 : vector<1x64xf32> to vector<32x64xf32>
    %294 = arith.addf %292, %293 : vector<32x64xf32>
    %c0_76 = arith.constant 0 : index
    %c0_77 = arith.constant 0 : index
    %c0_78 = arith.constant 0 : index
    %295 = vector.load %arg11[%c0_76, %c0_77, %c0_78] : memref<1x64x128xbf16, #tpu.memory_space<vmem>>, vector<1x64x128xbf16>
    %296 = vector.shape_cast %295 : vector<1x64x128xbf16> to vector<64x128xbf16>
    %297 = arith.truncf %294 : vector<32x64xf32> to vector<32x64xbf16>
    %cst_79 = arith.constant dense<0.000000e+00> : vector<32x128xf32>
    %298 = tpu.matmul %297, %296, %cst_79 {dimension_numbers = #tpu.dot_dimension_numbers<[1], [0], [0], [1], [0, 0, 1, 1], [], []>} : vector<32x64xbf16>, vector<64x128xbf16>, vector<32x128xf32> -> vector<32x128xf32>
    %c0_80 = arith.constant 0 : index
    %c0_81 = arith.constant 0 : index
    %c0_82 = arith.constant 0 : index
    %299 = vector.load %arg4[%c0_80, %c0_81, %c0_82] : memref<1x1x128xf32, #tpu.memory_space<vmem>>, vector<1x1x128xf32>
    %300 = vector.shape_cast %299 : vector<1x1x128xf32> to vector<1x128xf32>
    %301 = vector.broadcast %300 : vector<1x128xf32> to vector<32x128xf32>
    %302 = arith.addf %298, %301 : vector<32x128xf32>
    %303 = vector.extract_strided_slice %302 {offsets = [0, 0], sizes = [32, 64], strides = [1, 1]} : vector<32x128xf32> to vector<32x64xf32>
    %304 = vector.extract_strided_slice %302 {offsets = [0, 64], sizes = [32, 64], strides = [1, 1]} : vector<32x128xf32> to vector<32x64xf32>
    %305 = arith.negf %304 : vector<32x64xf32>
    %306 = math.exp %305 : vector<32x64xf32>
    %cst_83 = arith.constant 1.000000e+00 : f32
    %307 = vector.broadcast %cst_83 : f32 to vector<32x64xf32>
    %308 = arith.addf %307, %306 : vector<32x64xf32>
    %309 = arith.divf %307, %308 : vector<32x64xf32>
    %310 = arith.mulf %303, %309 : vector<32x64xf32>
    %311 = vector.broadcast %6 : vector<32x1xf32> to vector<32x64xf32>
    %312 = arith.mulf %310, %311 : vector<32x64xf32>
    %313 = vector.shape_cast %312 : vector<32x64xf32> to vector<2x16x64xf32>
    %c0_84 = arith.constant 0 : index
    %c8 = arith.constant 8 : index
    %c0_85 = arith.constant 0 : index
    %314 = vector.load %arg26[%c0_84, %c8, %c0_85] : memref<2x32x64xf32, #tpu.memory_space<vmem>>, vector<2x16x64xf32>
    tpu.vector_store %arg26[%c0_84, %c8, %c0_85], %313 {strides = array<i32>} : memref<2x32x64xf32, #tpu.memory_space<vmem>>, vector<2x16x64xf32>,
    %cst_86 = arith.constant 0.000000e+00 : f32
    %315 = vector.broadcast %cst_86 : f32 to vector<2x16x64xf32>
    %c0_87 = arith.constant 0 : index
    %c1 = arith.constant 1 : index
    %c0_88 = arith.constant 0 : index
    %316 = vector.load %arg26[%c0_87, %c1, %c0_88] : memref<2x32x64xf32, #tpu.memory_space<vmem>>, vector<2x16x64xf32>
    %c0_89 = arith.constant 0 : index
    %c0_90 = arith.constant 0 : index
    %c0_91 = arith.constant 0 : index
    %317 = vector.load %arg13[%c0_89, %c0_90, %c0_91] : memref<1x15x64xf32, #tpu.memory_space<vmem>>, vector<1x1x64xf32>
    %318 = vector.shape_cast %317 : vector<1x1x64xf32> to vector<1x64xf32>
    %319 = vector.shape_cast %318 : vector<1x64xf32> to vector<1x1x64xf32>
    %320 = vector.broadcast %319 : vector<1x1x64xf32> to vector<2x16x64xf32>
    %321 = arith.mulf %316, %320 : vector<2x16x64xf32>
    %322 = arith.addf %315, %321 : vector<2x16x64xf32>
    %c0_92 = arith.constant 0 : index
    %c2 = arith.constant 2 : index
    %c0_93 = arith.constant 0 : index
    %323 = vector.load %arg26[%c0_92, %c2, %c0_93] : memref<2x32x64xf32, #tpu.memory_space<vmem>>, vector<2x16x64xf32>
    %c0_94 = arith.constant 0 : index
    %c1_95 = arith.constant 1 : index
    %c0_96 = arith.constant 0 : index
    %324 = vector.load %arg13[%c0_94, %c1_95, %c0_96] : memref<1x15x64xf32, #tpu.memory_space<vmem>>, vector<1x1x64xf32>
    %325 = vector.shape_cast %324 : vector<1x1x64xf32> to vector<1x64xf32>
    %326 = vector.shape_cast %325 : vector<1x64xf32> to vector<1x1x64xf32>
    %327 = vector.broadcast %326 : vector<1x1x64xf32> to vector<2x16x64xf32>
    %328 = arith.mulf %323, %327 : vector<2x16x64xf32>
    %329 = arith.addf %322, %328 : vector<2x16x64xf32>
    %c0_97 = arith.constant 0 : index
    %c3 = arith.constant 3 : index
    %c0_98 = arith.constant 0 : index
    %330 = vector.load %arg26[%c0_97, %c3, %c0_98] : memref<2x32x64xf32, #tpu.memory_space<vmem>>, vector<2x16x64xf32>
    %c0_99 = arith.constant 0 : index
    %c2_100 = arith.constant 2 : index
    %c0_101 = arith.constant 0 : index
    %331 = vector.load %arg13[%c0_99, %c2_100, %c0_101] : memref<1x15x64xf32, #tpu.memory_space<vmem>>, vector<1x1x64xf32>
    %332 = vector.shape_cast %331 : vector<1x1x64xf32> to vector<1x64xf32>
    %333 = vector.shape_cast %332 : vector<1x64xf32> to vector<1x1x64xf32>
    %334 = vector.broadcast %333 : vector<1x1x64xf32> to vector<2x16x64xf32>
    %335 = arith.mulf %330, %334 : vector<2x16x64xf32>
    %336 = arith.addf %329, %335 : vector<2x16x64xf32>
    %c0_102 = arith.constant 0 : index
    %c4 = arith.constant 4 : index
    %c0_103 = arith.constant 0 : index
    %337 = vector.load %arg26[%c0_102, %c4, %c0_103] : memref<2x32x64xf32, #tpu.memory_space<vmem>>, vector<2x16x64xf32>
    %c0_104 = arith.constant 0 : index
    %c3_105 = arith.constant 3 : index
    %c0_106 = arith.constant 0 : index
    %338 = vector.load %arg13[%c0_104, %c3_105, %c0_106] : memref<1x15x64xf32, #tpu.memory_space<vmem>>, vector<1x1x64xf32>
    %339 = vector.shape_cast %338 : vector<1x1x64xf32> to vector<1x64xf32>
    %340 = vector.shape_cast %339 : vector<1x64xf32> to vector<1x1x64xf32>
    %341 = vector.broadcast %340 : vector<1x1x64xf32> to vector<2x16x64xf32>
    %342 = arith.mulf %337, %341 : vector<2x16x64xf32>
    %343 = arith.addf %336, %342 : vector<2x16x64xf32>
    %c0_107 = arith.constant 0 : index
    %c5 = arith.constant 5 : index
    %c0_108 = arith.constant 0 : index
    %344 = vector.load %arg26[%c0_107, %c5, %c0_108] : memref<2x32x64xf32, #tpu.memory_space<vmem>>, vector<2x16x64xf32>
    %c0_109 = arith.constant 0 : index
    %c4_110 = arith.constant 4 : index
    %c0_111 = arith.constant 0 : index
    %345 = vector.load %arg13[%c0_109, %c4_110, %c0_111] : memref<1x15x64xf32, #tpu.memory_space<vmem>>, vector<1x1x64xf32>
    %346 = vector.shape_cast %345 : vector<1x1x64xf32> to vector<1x64xf32>
    %347 = vector.shape_cast %346 : vector<1x64xf32> to vector<1x1x64xf32>
    %348 = vector.broadcast %347 : vector<1x1x64xf32> to vector<2x16x64xf32>
    %349 = arith.mulf %344, %348 : vector<2x16x64xf32>
    %350 = arith.addf %343, %349 : vector<2x16x64xf32>
    %c0_112 = arith.constant 0 : index
    %c6 = arith.constant 6 : index
    %c0_113 = arith.constant 0 : index
    %351 = vector.load %arg26[%c0_112, %c6, %c0_113] : memref<2x32x64xf32, #tpu.memory_space<vmem>>, vector<2x16x64xf32>
    %c0_114 = arith.constant 0 : index
    %c5_115 = arith.constant 5 : index
    %c0_116 = arith.constant 0 : index
    %352 = vector.load %arg13[%c0_114, %c5_115, %c0_116] : memref<1x15x64xf32, #tpu.memory_space<vmem>>, vector<1x1x64xf32>
    %353 = vector.shape_cast %352 : vector<1x1x64xf32> to vector<1x64xf32>
    %354 = vector.shape_cast %353 : vector<1x64xf32> to vector<1x1x64xf32>
    %355 = vector.broadcast %354 : vector<1x1x64xf32> to vector<2x16x64xf32>
    %356 = arith.mulf %351, %355 : vector<2x16x64xf32>
    %357 = arith.addf %350, %356 : vector<2x16x64xf32>
    %c0_117 = arith.constant 0 : index
    %c7 = arith.constant 7 : index
    %c0_118 = arith.constant 0 : index
    %358 = vector.load %arg26[%c0_117, %c7, %c0_118] : memref<2x32x64xf32, #tpu.memory_space<vmem>>, vector<2x16x64xf32>
    %c0_119 = arith.constant 0 : index
    %c6_120 = arith.constant 6 : index
    %c0_121 = arith.constant 0 : index
    %359 = vector.load %arg13[%c0_119, %c6_120, %c0_121] : memref<1x15x64xf32, #tpu.memory_space<vmem>>, vector<1x1x64xf32>
    %360 = vector.shape_cast %359 : vector<1x1x64xf32> to vector<1x64xf32>
    %361 = vector.shape_cast %360 : vector<1x64xf32> to vector<1x1x64xf32>
    %362 = vector.broadcast %361 : vector<1x1x64xf32> to vector<2x16x64xf32>
    %363 = arith.mulf %358, %362 : vector<2x16x64xf32>
    %364 = arith.addf %357, %363 : vector<2x16x64xf32>
    %c0_122 = arith.constant 0 : index
    %c8_123 = arith.constant 8 : index
    %c0_124 = arith.constant 0 : index
    %365 = vector.load %arg26[%c0_122, %c8_123, %c0_124] : memref<2x32x64xf32, #tpu.memory_space<vmem>>, vector<2x16x64xf32>
    %c0_125 = arith.constant 0 : index
    %c7_126 = arith.constant 7 : index
    %c0_127 = arith.constant 0 : index
    %366 = vector.load %arg13[%c0_125, %c7_126, %c0_127] : memref<1x15x64xf32, #tpu.memory_space<vmem>>, vector<1x1x64xf32>
    %367 = vector.shape_cast %366 : vector<1x1x64xf32> to vector<1x64xf32>
    %368 = vector.shape_cast %367 : vector<1x64xf32> to vector<1x1x64xf32>
    %369 = vector.broadcast %368 : vector<1x1x64xf32> to vector<2x16x64xf32>
    %370 = arith.mulf %365, %369 : vector<2x16x64xf32>
    %371 = arith.addf %364, %370 : vector<2x16x64xf32>
    %c0_128 = arith.constant 0 : index
    %c9 = arith.constant 9 : index
    %c0_129 = arith.constant 0 : index
    %372 = vector.load %arg26[%c0_128, %c9, %c0_129] : memref<2x32x64xf32, #tpu.memory_space<vmem>>, vector<2x16x64xf32>
    %c0_130 = arith.constant 0 : index
    %c8_131 = arith.constant 8 : index
    %c0_132 = arith.constant 0 : index
    %373 = vector.load %arg13[%c0_130, %c8_131, %c0_132] : memref<1x15x64xf32, #tpu.memory_space<vmem>>, vector<1x1x64xf32>
    %374 = vector.shape_cast %373 : vector<1x1x64xf32> to vector<1x64xf32>
    %375 = vector.shape_cast %374 : vector<1x64xf32> to vector<1x1x64xf32>
    %376 = vector.broadcast %375 : vector<1x1x64xf32> to vector<2x16x64xf32>
    %377 = arith.mulf %372, %376 : vector<2x16x64xf32>
    %378 = arith.addf %371, %377 : vector<2x16x64xf32>
    %c0_133 = arith.constant 0 : index
    %c10 = arith.constant 10 : index
    %c0_134 = arith.constant 0 : index
    %379 = vector.load %arg26[%c0_133, %c10, %c0_134] : memref<2x32x64xf32, #tpu.memory_space<vmem>>, vector<2x16x64xf32>
    %c0_135 = arith.constant 0 : index
    %c9_136 = arith.constant 9 : index
    %c0_137 = arith.constant 0 : index
    %380 = vector.load %arg13[%c0_135, %c9_136, %c0_137] : memref<1x15x64xf32, #tpu.memory_space<vmem>>, vector<1x1x64xf32>
    %381 = vector.shape_cast %380 : vector<1x1x64xf32> to vector<1x64xf32>
    %382 = vector.shape_cast %381 : vector<1x64xf32> to vector<1x1x64xf32>
    %383 = vector.broadcast %382 : vector<1x1x64xf32> to vector<2x16x64xf32>
    %384 = arith.mulf %379, %383 : vector<2x16x64xf32>
    %385 = arith.addf %378, %384 : vector<2x16x64xf32>
    %c0_138 = arith.constant 0 : index
    %c11 = arith.constant 11 : index
    %c0_139 = arith.constant 0 : index
    %386 = vector.load %arg26[%c0_138, %c11, %c0_139] : memref<2x32x64xf32, #tpu.memory_space<vmem>>, vector<2x16x64xf32>
    %c0_140 = arith.constant 0 : index
    %c10_141 = arith.constant 10 : index
    %c0_142 = arith.constant 0 : index
    %387 = vector.load %arg13[%c0_140, %c10_141, %c0_142] : memref<1x15x64xf32, #tpu.memory_space<vmem>>, vector<1x1x64xf32>
    %388 = vector.shape_cast %387 : vector<1x1x64xf32> to vector<1x64xf32>
    %389 = vector.shape_cast %388 : vector<1x64xf32> to vector<1x1x64xf32>
    %390 = vector.broadcast %389 : vector<1x1x64xf32> to vector<2x16x64xf32>
    %391 = arith.mulf %386, %390 : vector<2x16x64xf32>
    %392 = arith.addf %385, %391 : vector<2x16x64xf32>
    %c0_143 = arith.constant 0 : index
    %c12 = arith.constant 12 : index
    %c0_144 = arith.constant 0 : index
    %393 = vector.load %arg26[%c0_143, %c12, %c0_144] : memref<2x32x64xf32, #tpu.memory_space<vmem>>, vector<2x16x64xf32>
    %c0_145 = arith.constant 0 : index
    %c11_146 = arith.constant 11 : index
    %c0_147 = arith.constant 0 : index
    %394 = vector.load %arg13[%c0_145, %c11_146, %c0_147] : memref<1x15x64xf32, #tpu.memory_space<vmem>>, vector<1x1x64xf32>
    %395 = vector.shape_cast %394 : vector<1x1x64xf32> to vector<1x64xf32>
    %396 = vector.shape_cast %395 : vector<1x64xf32> to vector<1x1x64xf32>
    %397 = vector.broadcast %396 : vector<1x1x64xf32> to vector<2x16x64xf32>
    %398 = arith.mulf %393, %397 : vector<2x16x64xf32>
    %399 = arith.addf %392, %398 : vector<2x16x64xf32>
    %c0_148 = arith.constant 0 : index
    %c13 = arith.constant 13 : index
    %c0_149 = arith.constant 0 : index
    %400 = vector.load %arg26[%c0_148, %c13, %c0_149] : memref<2x32x64xf32, #tpu.memory_space<vmem>>, vector<2x16x64xf32>
    %c0_150 = arith.constant 0 : index
    %c12_151 = arith.constant 12 : index
    %c0_152 = arith.constant 0 : index
    %401 = vector.load %arg13[%c0_150, %c12_151, %c0_152] : memref<1x15x64xf32, #tpu.memory_space<vmem>>, vector<1x1x64xf32>
    %402 = vector.shape_cast %401 : vector<1x1x64xf32> to vector<1x64xf32>
    %403 = vector.shape_cast %402 : vector<1x64xf32> to vector<1x1x64xf32>
    %404 = vector.broadcast %403 : vector<1x1x64xf32> to vector<2x16x64xf32>
    %405 = arith.mulf %400, %404 : vector<2x16x64xf32>
    %406 = arith.addf %399, %405 : vector<2x16x64xf32>
    %c0_153 = arith.constant 0 : index
    %c14 = arith.constant 14 : index
    %c0_154 = arith.constant 0 : index
    %407 = vector.load %arg26[%c0_153, %c14, %c0_154] : memref<2x32x64xf32, #tpu.memory_space<vmem>>, vector<2x16x64xf32>
    %c0_155 = arith.constant 0 : index
    %c13_156 = arith.constant 13 : index
    %c0_157 = arith.constant 0 : index
    %408 = vector.load %arg13[%c0_155, %c13_156, %c0_157] : memref<1x15x64xf32, #tpu.memory_space<vmem>>, vector<1x1x64xf32>
    %409 = vector.shape_cast %408 : vector<1x1x64xf32> to vector<1x64xf32>
    %410 = vector.shape_cast %409 : vector<1x64xf32> to vector<1x1x64xf32>
    %411 = vector.broadcast %410 : vector<1x1x64xf32> to vector<2x16x64xf32>
    %412 = arith.mulf %407, %411 : vector<2x16x64xf32>
    %413 = arith.addf %406, %412 : vector<2x16x64xf32>
    %c0_158 = arith.constant 0 : index
    %c15 = arith.constant 15 : index
    %c0_159 = arith.constant 0 : index
    %414 = vector.load %arg26[%c0_158, %c15, %c0_159] : memref<2x32x64xf32, #tpu.memory_space<vmem>>, vector<2x16x64xf32>
    %c0_160 = arith.constant 0 : index
    %c14_161 = arith.constant 14 : index
    %c0_162 = arith.constant 0 : index
    %415 = vector.load %arg13[%c0_160, %c14_161, %c0_162] : memref<1x15x64xf32, #tpu.memory_space<vmem>>, vector<1x1x64xf32>
    %416 = vector.shape_cast %415 : vector<1x1x64xf32> to vector<1x64xf32>
    %417 = vector.shape_cast %416 : vector<1x64xf32> to vector<1x1x64xf32>
    %418 = vector.broadcast %417 : vector<1x1x64xf32> to vector<2x16x64xf32>
    %419 = arith.mulf %414, %418 : vector<2x16x64xf32>
    %420 = arith.addf %413, %419 : vector<2x16x64xf32>
    %421 = vector.shape_cast %420 : vector<2x16x64xf32> to vector<32x64xf32>
    %422 = vector.extract_strided_slice %18 {offsets = [13, 0], sizes = [1, 64], strides = [1, 1]} : vector<21x64xf32> to vector<1x64xf32>
    %423 = vector.broadcast %422 : vector<1x64xf32> to vector<32x64xf32>
    %424 = arith.mulf %421, %423 : vector<32x64xf32>
    %425 = vector.extract_strided_slice %18 {offsets = [14, 0], sizes = [1, 64], strides = [1, 1]} : vector<21x64xf32> to vector<1x64xf32>
    %426 = vector.broadcast %425 : vector<1x64xf32> to vector<32x64xf32>
    %427 = arith.addf %424, %426 : vector<32x64xf32>
    %428 = arith.negf %427 : vector<32x64xf32>
    %429 = math.exp %428 : vector<32x64xf32>
    %cst_163 = arith.constant 1.000000e+00 : f32
    %430 = vector.broadcast %cst_163 : f32 to vector<32x64xf32>
    %431 = arith.addf %430, %429 : vector<32x64xf32>
    %432 = arith.divf %430, %431 : vector<32x64xf32>
    %433 = arith.mulf %427, %432 : vector<32x64xf32>
    %c0_164 = arith.constant 0 : index
    %c0_165 = arith.constant 0 : index
    %c0_166 = arith.constant 0 : index
    %434 = vector.load %arg12[%c0_164, %c0_165, %c0_166] : memref<1x64x64xbf16, #tpu.memory_space<vmem>>, vector<1x64x64xbf16>
    %435 = vector.shape_cast %434 : vector<1x64x64xbf16> to vector<64x64xbf16>
    %436 = arith.truncf %433 : vector<32x64xf32> to vector<32x64xbf16>
    %cst_167 = arith.constant dense<0.000000e+00> : vector<32x64xf32>
    %437 = tpu.matmul %436, %435, %cst_167 {dimension_numbers = #tpu.dot_dimension_numbers<[1], [0], [0], [1], [0, 0, 1, 1], [], []>} : vector<32x64xbf16>, vector<64x64xbf16>, vector<32x64xf32> -> vector<32x64xf32>
    %438 = arith.addf %270, %437 : vector<32x64xf32>
    %439 = vector.extract_strided_slice %18 {offsets = [15, 0], sizes = [1, 64], strides = [1, 1]} : vector<21x64xf32> to vector<1x64xf32>
    %440 = vector.broadcast %439 : vector<1x64xf32> to vector<32x64xf32>
    %441 = arith.addf %438, %440 : vector<32x64xf32>
    %442 = vector.extract_strided_slice %18 {offsets = [16, 0], sizes = [1, 64], strides = [1, 1]} : vector<21x64xf32> to vector<1x64xf32>
    %443 = vector.extract_strided_slice %18 {offsets = [17, 0], sizes = [1, 64], strides = [1, 1]} : vector<21x64xf32> to vector<1x64xf32>
    %cst_168 = arith.constant dense<0.000000e+00> : vector<32xf32>
    %444 = vector.multi_reduction <add>, %441, %cst_168 [1] : vector<32x64xf32> to vector<32xf32>
    %445 = vector.shape_cast %444 : vector<32xf32> to vector<32x1xf32>
    %cst_169 = arith.constant 6.400000e+01 : f32
    %446 = vector.broadcast %cst_169 : f32 to vector<32x1xf32>
    %447 = arith.divf %445, %446 : vector<32x1xf32>
    %448 = vector.broadcast %447 : vector<32x1xf32> to vector<32x64xf32>
    %449 = arith.subf %441, %448 : vector<32x64xf32>
    %450 = arith.mulf %449, %449 : vector<32x64xf32>
    %cst_170 = arith.constant dense<0.000000e+00> : vector<32xf32>
    %451 = vector.multi_reduction <add>, %450, %cst_170 [1] : vector<32x64xf32> to vector<32xf32>
    %452 = vector.shape_cast %451 : vector<32xf32> to vector<32x1xf32>
    %cst_171 = arith.constant 6.400000e+01 : f32
    %453 = vector.broadcast %cst_171 : f32 to vector<32x1xf32>
    %454 = arith.divf %452, %453 : vector<32x1xf32>
    %455 = vector.broadcast %447 : vector<32x1xf32> to vector<32x64xf32>
    %456 = arith.subf %441, %455 : vector<32x64xf32>
    %cst_172 = arith.constant 9.99999974E-6 : f32
    %457 = vector.broadcast %cst_172 : f32 to vector<32x1xf32>
    %458 = arith.addf %454, %457 : vector<32x1xf32>
    %459 = math.rsqrt %458 : vector<32x1xf32>
    %460 = vector.broadcast %459 : vector<32x1xf32> to vector<32x64xf32>
    %461 = arith.mulf %456, %460 : vector<32x64xf32>
    %462 = vector.broadcast %442 : vector<1x64xf32> to vector<32x64xf32>
    %463 = arith.mulf %461, %462 : vector<32x64xf32>
    %464 = vector.broadcast %443 : vector<1x64xf32> to vector<32x64xf32>
    %465 = arith.addf %463, %464 : vector<32x64xf32>
    %c0_173 = arith.constant 0 : index
    %c1_174 = arith.constant 1 : index
    %c0_175 = arith.constant 0 : index
    %c0_176 = arith.constant 0 : index
    %466 = vector.load %arg6[%c0_173, %c1_174, %c0_175, %c0_176] : memref<1x2x64x2048xbf16, #tpu.memory_space<vmem>>, vector<1x1x64x2048xbf16>
    %467 = vector.shape_cast %466 : vector<1x1x64x2048xbf16> to vector<64x2048xbf16>
    %468 = arith.truncf %465 : vector<32x64xf32> to vector<32x64xbf16>
    %cst_177 = arith.constant dense<0.000000e+00> : vector<32x2048xf32>
    %469 = tpu.matmul %468, %467, %cst_177 {dimension_numbers = #tpu.dot_dimension_numbers<[1], [0], [0], [1], [0, 0, 1, 1], [], []>} : vector<32x64xbf16>, vector<64x2048xbf16>, vector<32x2048xf32> -> vector<32x2048xf32>
    %c0_178 = arith.constant 0 : index
    %c1_179 = arith.constant 1 : index
    %c0_180 = arith.constant 0 : index
    %470 = vector.load %arg5[%c0_178, %c1_179, %c0_180] : memref<1x2x2048xf32, #tpu.memory_space<vmem>>, vector<1x1x2048xf32>
    %471 = vector.shape_cast %470 : vector<1x1x2048xf32> to vector<1x2048xf32>
    %472 = vector.broadcast %471 : vector<1x2048xf32> to vector<32x2048xf32>
    %473 = arith.addf %469, %472 : vector<32x2048xf32>
    %474 = arith.negf %473 : vector<32x2048xf32>
    %475 = math.exp %474 : vector<32x2048xf32>
    %cst_181 = arith.constant 1.000000e+00 : f32
    %476 = vector.broadcast %cst_181 : f32 to vector<32x2048xf32>
    %477 = arith.addf %476, %475 : vector<32x2048xf32>
    %478 = arith.divf %476, %477 : vector<32x2048xf32>
    %479 = arith.mulf %473, %478 : vector<32x2048xf32>
    %c0_182 = arith.constant 0 : index
    %c1_183 = arith.constant 1 : index
    %c0_184 = arith.constant 0 : index
    %c0_185 = arith.constant 0 : index
    %480 = vector.load %arg7[%c0_182, %c1_183, %c0_184, %c0_185] : memref<1x2x2048x64xbf16, #tpu.memory_space<vmem>>, vector<1x1x2048x64xbf16>
    %481 = vector.shape_cast %480 : vector<1x1x2048x64xbf16> to vector<2048x64xbf16>
    %482 = arith.truncf %479 : vector<32x2048xf32> to vector<32x2048xbf16>
    %cst_186 = arith.constant dense<0.000000e+00> : vector<32x64xf32>
    %483 = tpu.matmul %482, %481, %cst_186 {dimension_numbers = #tpu.dot_dimension_numbers<[1], [0], [0], [1], [0, 0, 1, 1], [], []>} : vector<32x2048xbf16>, vector<2048x64xbf16>, vector<32x64xf32> -> vector<32x64xf32>
    %484 = vector.extract_strided_slice %18 {offsets = [18, 0], sizes = [1, 64], strides = [1, 1]} : vector<21x64xf32> to vector<1x64xf32>
    %485 = vector.broadcast %484 : vector<1x64xf32> to vector<32x64xf32>
    %486 = arith.addf %483, %485 : vector<32x64xf32>
    %cst_187 = arith.constant 5.000000e-01 : f32
    %487 = vector.broadcast %cst_187 : f32 to vector<32x64xf32>
    %488 = arith.mulf %487, %486 : vector<32x64xf32>
    %489 = arith.addf %441, %488 : vector<32x64xf32>
    %490 = vector.extract_strided_slice %18 {offsets = [19, 0], sizes = [1, 64], strides = [1, 1]} : vector<21x64xf32> to vector<1x64xf32>
    %491 = vector.extract_strided_slice %18 {offsets = [20, 0], sizes = [1, 64], strides = [1, 1]} : vector<21x64xf32> to vector<1x64xf32>
    %cst_188 = arith.constant dense<0.000000e+00> : vector<32xf32>
    %492 = vector.multi_reduction <add>, %489, %cst_188 [1] : vector<32x64xf32> to vector<32xf32>
    %493 = vector.shape_cast %492 : vector<32xf32> to vector<32x1xf32>
    %cst_189 = arith.constant 6.400000e+01 : f32
    %494 = vector.broadcast %cst_189 : f32 to vector<32x1xf32>
    %495 = arith.divf %493, %494 : vector<32x1xf32>
    %496 = vector.broadcast %495 : vector<32x1xf32> to vector<32x64xf32>
    %497 = arith.subf %489, %496 : vector<32x64xf32>
    %498 = arith.mulf %497, %497 : vector<32x64xf32>
    %cst_190 = arith.constant dense<0.000000e+00> : vector<32xf32>
    %499 = vector.multi_reduction <add>, %498, %cst_190 [1] : vector<32x64xf32> to vector<32xf32>
    %500 = vector.shape_cast %499 : vector<32xf32> to vector<32x1xf32>
    %cst_191 = arith.constant 6.400000e+01 : f32
    %501 = vector.broadcast %cst_191 : f32 to vector<32x1xf32>
    %502 = arith.divf %500, %501 : vector<32x1xf32>
    %503 = vector.broadcast %495 : vector<32x1xf32> to vector<32x64xf32>
    %504 = arith.subf %489, %503 : vector<32x64xf32>
    %cst_192 = arith.constant 9.99999974E-6 : f32
    %505 = vector.broadcast %cst_192 : f32 to vector<32x1xf32>
    %506 = arith.addf %502, %505 : vector<32x1xf32>
    %507 = math.rsqrt %506 : vector<32x1xf32>
    %508 = vector.broadcast %507 : vector<32x1xf32> to vector<32x64xf32>
    %509 = arith.mulf %504, %508 : vector<32x64xf32>
    %510 = vector.broadcast %490 : vector<1x64xf32> to vector<32x64xf32>
    %511 = arith.mulf %509, %510 : vector<32x64xf32>
    %512 = vector.broadcast %491 : vector<1x64xf32> to vector<32x64xf32>
    %513 = arith.addf %511, %512 : vector<32x64xf32>
    %c0_193 = arith.constant 0 : index
    %c0_194 = arith.constant 0 : index
    %514 = vector.load %arg25[%c0_193, %c0_194] : memref<32x64xf32, #tpu.memory_space<vmem>>, vector<32x64xf32>
    tpu.vector_store %arg25[%c0_193, %c0_194], %513 {strides = array<i32>} : memref<32x64xf32, #tpu.memory_space<vmem>>, vector<32x64xf32>,
    %c1_i32 = arith.constant 1 : i32
    %515 = arith.cmpi eq, %arg0, %c1_i32 : i32
    %516 = arith.extui %515 : i1 to i32
    %c0_i32_195 = arith.constant 0 : i32
    %517 = arith.cmpi ne, %516, %c0_i32_195 : i32
    scf.if %517 {
      %c0_196 = arith.constant 0 : index
      %c0_197 = arith.constant 0 : index
      %518 = vector.load %arg18[%c0_196, %c0_197] : memref<3x64xf32, #tpu.memory_space<vmem>>, vector<1x64xf32>
      %c1_198 = arith.constant 1 : index
      %c0_199 = arith.constant 0 : index
      %519 = vector.load %arg18[%c1_198, %c0_199] : memref<3x64xf32, #tpu.memory_space<vmem>>, vector<1x64xf32>
      %cst_200 = arith.constant dense<0.000000e+00> : vector<32xf32>
      %520 = vector.multi_reduction <add>, %513, %cst_200 [1] : vector<32x64xf32> to vector<32xf32>
      %521 = vector.shape_cast %520 : vector<32xf32> to vector<32x1xf32>
      %cst_201 = arith.constant 6.400000e+01 : f32
      %522 = vector.broadcast %cst_201 : f32 to vector<32x1xf32>
      %523 = arith.divf %521, %522 : vector<32x1xf32>
      %524 = vector.broadcast %523 : vector<32x1xf32> to vector<32x64xf32>
      %525 = arith.subf %513, %524 : vector<32x64xf32>
      %526 = arith.mulf %525, %525 : vector<32x64xf32>
      %cst_202 = arith.constant dense<0.000000e+00> : vector<32xf32>
      %527 = vector.multi_reduction <add>, %526, %cst_202 [1] : vector<32x64xf32> to vector<32xf32>
      %528 = vector.shape_cast %527 : vector<32xf32> to vector<32x1xf32>
      %cst_203 = arith.constant 6.400000e+01 : f32
      %529 = vector.broadcast %cst_203 : f32 to vector<32x1xf32>
      %530 = arith.divf %528, %529 : vector<32x1xf32>
      %531 = vector.broadcast %523 : vector<32x1xf32> to vector<32x64xf32>
      %532 = arith.subf %513, %531 : vector<32x64xf32>
      %cst_204 = arith.constant 9.99999974E-6 : f32
      %533 = vector.broadcast %cst_204 : f32 to vector<32x1xf32>
      %534 = arith.addf %530, %533 : vector<32x1xf32>
      %535 = math.rsqrt %534 : vector<32x1xf32>
      %536 = vector.broadcast %535 : vector<32x1xf32> to vector<32x64xf32>
      %537 = arith.mulf %532, %536 : vector<32x64xf32>
      %538 = vector.broadcast %518 : vector<1x64xf32> to vector<32x64xf32>
      %539 = arith.mulf %537, %538 : vector<32x64xf32>
      %540 = vector.broadcast %519 : vector<1x64xf32> to vector<32x64xf32>
      %541 = arith.addf %539, %540 : vector<32x64xf32>
      %542 = vector.shape_cast %541 : vector<32x64xf32> to vector<2x16x64xf32>
      %543 = vector.shape_cast %6 : vector<32x1xf32> to vector<2x16x1xf32>
      %544 = vector.broadcast %543 : vector<2x16x1xf32> to vector<2x16x64xf32>
      %545 = arith.mulf %542, %544 : vector<2x16x64xf32>
      %cst_205 = arith.constant dense<0.000000e+00> : vector<2x64xf32>
      %546 = vector.multi_reduction <add>, %545, %cst_205 [1] : vector<2x16x64xf32> to vector<2x64xf32>
      %547 = vector.shape_cast %546 : vector<2x64xf32> to vector<2x1x64xf32>
      %cst_206 = arith.constant 0.0666666701 : f32
      %548 = vector.broadcast %cst_206 : f32 to vector<2x1x64xf32>
      %549 = arith.mulf %547, %548 : vector<2x1x64xf32>
      %550 = vector.broadcast %549 : vector<2x1x64xf32> to vector<2x16x64xf32>
      %551 = arith.subf %542, %550 : vector<2x16x64xf32>
      %552 = arith.mulf %551, %551 : vector<2x16x64xf32>
      %553 = vector.broadcast %543 : vector<2x16x1xf32> to vector<2x16x64xf32>
      %554 = arith.mulf %552, %553 : vector<2x16x64xf32>
      %cst_207 = arith.constant dense<0.000000e+00> : vector<2x64xf32>
      %555 = vector.multi_reduction <add>, %554, %cst_207 [1] : vector<2x16x64xf32> to vector<2x64xf32>
      %556 = vector.shape_cast %555 : vector<2x64xf32> to vector<2x1x64xf32>
      %cst_208 = arith.constant 0.0666666701 : f32
      %557 = vector.broadcast %cst_208 : f32 to vector<2x1x64xf32>
      %558 = arith.mulf %556, %557 : vector<2x1x64xf32>
      %cst_209 = arith.constant 9.99999996E-13 : f32
      %559 = vector.broadcast %cst_209 : f32 to vector<2x1x64xf32>
      %560 = arith.maximumf %558, %559 : vector<2x1x64xf32>
      %561 = math.sqrt %560 : vector<2x1x64xf32>
      %562 = vector.shape_cast %549 : vector<2x1x64xf32> to vector<2x1x64xf32>
      %563 = vector.broadcast %562 : vector<2x1x64xf32> to vector<2x16x64xf32>
      %564 = vector.shape_cast %561 : vector<2x1x64xf32> to vector<2x1x64xf32>
      %565 = vector.broadcast %564 : vector<2x1x64xf32> to vector<2x16x64xf32>
      %566 = tpu.concatenate %542, %563, %565 in 2 : vector<2x16x64xf32>, vector<2x16x64xf32>, vector<2x16x64xf32> -> vector<2x16x192xf32>
      %567 = vector.shape_cast %566 : vector<2x16x192xf32> to vector<32x192xf32>
      %c0_210 = arith.constant 0 : index
      %c0_211 = arith.constant 0 : index
      %568 = vector.load %arg20[%c0_210, %c0_211] : memref<192x128xbf16, #tpu.memory_space<vmem>>, vector<192x128xbf16>
      %569 = arith.truncf %567 : vector<32x192xf32> to vector<32x192xbf16>
      %cst_212 = arith.constant dense<0.000000e+00> : vector<32x128xf32>
      %570 = tpu.matmul %569, %568, %cst_212 {dimension_numbers = #tpu.dot_dimension_numbers<[1], [0], [0], [1], [0, 0, 1, 1], [], []>} : vector<32x192xbf16>, vector<192x128xbf16>, vector<32x128xf32> -> vector<32x128xf32>
      %c0_213 = arith.constant 0 : index
      %c0_214 = arith.constant 0 : index
      %571 = vector.load %arg19[%c0_213, %c0_214] : memref<5x128xf32, #tpu.memory_space<vmem>>, vector<1x128xf32>
      %572 = vector.broadcast %571 : vector<1x128xf32> to vector<32x128xf32>
      %573 = arith.addf %570, %572 : vector<32x128xf32>
      %cst_215 = arith.constant 0.000000e+00 : f32
      %574 = vector.broadcast %cst_215 : f32 to vector<32x128xf32>
      %575 = arith.maximumf %573, %574 : vector<32x128xf32>
      %c1_216 = arith.constant 1 : index
      %c0_217 = arith.constant 0 : index
      %576 = vector.load %arg19[%c1_216, %c0_217] : memref<5x128xf32, #tpu.memory_space<vmem>>, vector<1x128xf32>
      %577 = vector.broadcast %576 : vector<1x128xf32> to vector<32x128xf32>
      %578 = arith.mulf %575, %577 : vector<32x128xf32>
      %c2_218 = arith.constant 2 : index
      %c0_219 = arith.constant 0 : index
      %579 = vector.load %arg19[%c2_218, %c0_219] : memref<5x128xf32, #tpu.memory_space<vmem>>, vector<1x128xf32>
      %580 = vector.broadcast %579 : vector<1x128xf32> to vector<32x128xf32>
      %581 = arith.addf %578, %580 : vector<32x128xf32>
      %582 = math.tanh %581 : vector<32x128xf32>
      %c0_220 = arith.constant 0 : index
      %c0_221 = arith.constant 0 : index
      %583 = vector.load %arg21[%c0_220, %c0_221] : memref<128x64xbf16, #tpu.memory_space<vmem>>, vector<128x64xbf16>
      %584 = arith.truncf %582 : vector<32x128xf32> to vector<32x128xbf16>
      %cst_222 = arith.constant dense<0.000000e+00> : vector<32x64xf32>
      %585 = tpu.matmul %584, %583, %cst_222 {dimension_numbers = #tpu.dot_dimension_numbers<[1], [0], [0], [1], [0, 0, 1, 1], [], []>} : vector<32x128xbf16>, vector<128x64xbf16>, vector<32x64xf32> -> vector<32x64xf32>
      %c2_223 = arith.constant 2 : index
      %c0_224 = arith.constant 0 : index
      %586 = vector.load %arg18[%c2_223, %c0_224] : memref<3x64xf32, #tpu.memory_space<vmem>>, vector<1x64xf32>
      %587 = vector.broadcast %586 : vector<1x64xf32> to vector<32x64xf32>
      %588 = arith.addf %585, %587 : vector<32x64xf32>
      %589 = vector.shape_cast %588 : vector<32x64xf32> to vector<2x16x64xf32>
      %cst_225 = arith.constant 1.000000e+00 : f32
      %590 = vector.broadcast %cst_225 : f32 to vector<2x16x1xf32>
      %591 = arith.subf %590, %543 : vector<2x16x1xf32>
      %cst_226 = arith.constant -1.000000e+30 : f32
      %592 = vector.broadcast %cst_226 : f32 to vector<2x16x1xf32>
      %593 = arith.mulf %591, %592 : vector<2x16x1xf32>
      %594 = vector.broadcast %593 : vector<2x16x1xf32> to vector<2x16x64xf32>
      %595 = arith.addf %589, %594 : vector<2x16x64xf32>
      %cst_227 = arith.constant dense<0xFF800000> : vector<2x64xf32>
      %596 = vector.multi_reduction <maximumf>, %595, %cst_227 [1] : vector<2x16x64xf32> to vector<2x64xf32>
      %597 = vector.shape_cast %596 : vector<2x64xf32> to vector<2x1x64xf32>
      %598 = vector.broadcast %597 : vector<2x1x64xf32> to vector<2x16x64xf32>
      %599 = arith.subf %595, %598 : vector<2x16x64xf32>
      %600 = math.exp %599 : vector<2x16x64xf32>
      %601 = vector.broadcast %543 : vector<2x16x1xf32> to vector<2x16x64xf32>
      %602 = arith.mulf %600, %601 : vector<2x16x64xf32>
      %cst_228 = arith.constant dense<0.000000e+00> : vector<2x64xf32>
      %603 = vector.multi_reduction <add>, %602, %cst_228 [1] : vector<2x16x64xf32> to vector<2x64xf32>
      %604 = vector.shape_cast %603 : vector<2x64xf32> to vector<2x1x64xf32>
      %605 = tpu.reciprocal %604 {approx = true} : vector<2x1x64xf32> -> vector<2x1x64xf32>
      %606 = vector.broadcast %605 : vector<2x1x64xf32> to vector<2x16x64xf32>
      %607 = arith.mulf %602, %606 : vector<2x16x64xf32>
      %608 = arith.mulf %607, %542 : vector<2x16x64xf32>
      %cst_229 = arith.constant dense<0.000000e+00> : vector<2x64xf32>
      %609 = vector.multi_reduction <add>, %608, %cst_229 [1] : vector<2x16x64xf32> to vector<2x64xf32>
      %610 = vector.shape_cast %609 : vector<2x64xf32> to vector<2x1x64xf32>
      %611 = vector.broadcast %610 : vector<2x1x64xf32> to vector<2x16x64xf32>
      %612 = arith.subf %542, %611 : vector<2x16x64xf32>
      %613 = arith.mulf %612, %612 : vector<2x16x64xf32>
      %614 = arith.mulf %607, %613 : vector<2x16x64xf32>
      %cst_230 = arith.constant dense<0.000000e+00> : vector<2x64xf32>
      %615 = vector.multi_reduction <add>, %614, %cst_230 [1] : vector<2x16x64xf32> to vector<2x64xf32>
      %616 = vector.shape_cast %615 : vector<2x64xf32> to vector<2x1x64xf32>
      %cst_231 = arith.constant 9.99999996E-13 : f32
      %617 = vector.broadcast %cst_231 : f32 to vector<2x1x64xf32>
      %618 = arith.maximumf %616, %617 : vector<2x1x64xf32>
      %619 = math.sqrt %618 : vector<2x1x64xf32>
      %620 = tpu.concatenate %610, %619 in 2 : vector<2x1x64xf32>, vector<2x1x64xf32> -> vector<2x1x128xf32>
      %621 = vector.shape_cast %620 : vector<2x1x128xf32> to vector<2x128xf32>
      %c3_232 = arith.constant 3 : index
      %c0_233 = arith.constant 0 : index
      %622 = vector.load %arg19[%c3_232, %c0_233] : memref<5x128xf32, #tpu.memory_space<vmem>>, vector<1x128xf32>
      %623 = vector.broadcast %622 : vector<1x128xf32> to vector<2x128xf32>
      %624 = arith.mulf %621, %623 : vector<2x128xf32>
      %c4_234 = arith.constant 4 : index
      %c0_235 = arith.constant 0 : index
      %625 = vector.load %arg19[%c4_234, %c0_235] : memref<5x128xf32, #tpu.memory_space<vmem>>, vector<1x128xf32>
      %626 = vector.broadcast %625 : vector<1x128xf32> to vector<2x128xf32>
      %627 = arith.addf %624, %626 : vector<2x128xf32>
      %c0_236 = arith.constant 0 : index
      %c0_237 = arith.constant 0 : index
      %628 = vector.load %arg22[%c0_236, %c0_237] : memref<128x32xbf16, #tpu.memory_space<vmem>>, vector<128x32xbf16>
      %629 = arith.truncf %627 : vector<2x128xf32> to vector<2x128xbf16>
      %cst_238 = arith.constant dense<0.000000e+00> : vector<2x32xf32>
      %630 = tpu.matmul %629, %628, %cst_238 {dimension_numbers = #tpu.dot_dimension_numbers<[1], [0], [0], [1], [0, 0, 1, 1], [], []>} : vector<2x128xbf16>, vector<128x32xbf16>, vector<2x32xf32> -> vector<2x32xf32>
      %c0_239 = arith.constant 0 : index
      %c0_240 = arith.constant 0 : index
      %631 = vector.load %arg23[%c0_239, %c0_240] : memref<1x32xf32, #tpu.memory_space<vmem>>, vector<1x32xf32>
      %632 = vector.broadcast %631 : vector<1x32xf32> to vector<2x32xf32>
      %633 = arith.addf %630, %632 : vector<2x32xf32>
      %c0_241 = arith.constant 0 : index
      %c0_242 = arith.constant 0 : index
      %634 = vector.load %arg24[%c0_241, %c0_242] : memref<2x32xf32, #tpu.memory_space<vmem>>, vector<2x32xf32>
      tpu.vector_store %arg24[%c0_241, %c0_242], %633 {strides = array<i32>} : memref<2x32xf32, #tpu.memory_space<vmem>>, vector<2x32xf32>,
    } else {
    }
    return
  }
  func.func @transform_0(%arg0: i32) -> (i32, i32) {
    %c0_i32 = arith.constant 0 : i32
    %c0_i32_0 = arith.constant 0 : i32
    %c0_i32_1 = arith.constant 0 : i32
    return %c0_i32, %c0_i32_0 : i32, i32
  }
  func.func @transform_1(%arg0: i32) -> (i32, i32) {
    %c0_i32 = arith.constant 0 : i32
    %c0_i32_0 = arith.constant 0 : i32
    %c0_i32_1 = arith.constant 0 : i32
    return %c0_i32, %c0_i32_0 : i32, i32
  }
  func.func @transform_2(%arg0: i32) -> (i32, i32, i32) {
    %c0_i32 = arith.constant 0 : i32
    %c0_i32_0 = arith.constant 0 : i32
    %c0_i32_1 = arith.constant 0 : i32
    return %arg0, %c0_i32, %c0_i32_0 : i32, i32, i32
  }
  func.func @transform_3(%arg0: i32) -> (i32, i32, i32) {
    %c0_i32 = arith.constant 0 : i32
    %c0_i32_0 = arith.constant 0 : i32
    %c0_i32_1 = arith.constant 0 : i32
    return %arg0, %c0_i32, %c0_i32_0 : i32, i32, i32
  }
  func.func @transform_4(%arg0: i32) -> (i32, i32, i32) {
    %c0_i32 = arith.constant 0 : i32
    %c0_i32_0 = arith.constant 0 : i32
    %c0_i32_1 = arith.constant 0 : i32
    return %arg0, %c0_i32, %c0_i32_0 : i32, i32, i32
  }
  func.func @transform_5(%arg0: i32) -> (i32, i32, i32, i32) {
    %c0_i32 = arith.constant 0 : i32
    %c0_i32_0 = arith.constant 0 : i32
    %c0_i32_1 = arith.constant 0 : i32
    %c0_i32_2 = arith.constant 0 : i32
    return %arg0, %c0_i32, %c0_i32_0, %c0_i32_1 : i32, i32, i32, i32
  }
  func.func @transform_6(%arg0: i32) -> (i32, i32, i32, i32) {
    %c0_i32 = arith.constant 0 : i32
    %c0_i32_0 = arith.constant 0 : i32
    %c0_i32_1 = arith.constant 0 : i32
    %c0_i32_2 = arith.constant 0 : i32
    return %arg0, %c0_i32, %c0_i32_0, %c0_i32_1 : i32, i32, i32, i32
  }
  func.func @transform_7(%arg0: i32) -> (i32, i32, i32) {
    %c0_i32 = arith.constant 0 : i32
    %c0_i32_0 = arith.constant 0 : i32
    %c0_i32_1 = arith.constant 0 : i32
    return %arg0, %c0_i32, %c0_i32_0 : i32, i32, i32
  }
  func.func @transform_8(%arg0: i32) -> (i32, i32, i32) {
    %c0_i32 = arith.constant 0 : i32
    %c0_i32_0 = arith.constant 0 : i32
    %c0_i32_1 = arith.constant 0 : i32
    return %arg0, %c0_i32, %c0_i32_0 : i32, i32, i32
  }
  func.func @transform_9(%arg0: i32) -> (i32, i32, i32) {
    %c0_i32 = arith.constant 0 : i32
    %c0_i32_0 = arith.constant 0 : i32
    %c0_i32_1 = arith.constant 0 : i32
    return %arg0, %c0_i32, %c0_i32_0 : i32, i32, i32
  }
  func.func @transform_10(%arg0: i32) -> (i32, i32, i32) {
    %c0_i32 = arith.constant 0 : i32
    %c0_i32_0 = arith.constant 0 : i32
    %c0_i32_1 = arith.constant 0 : i32
    return %arg0, %c0_i32, %c0_i32_0 : i32, i32, i32
  }
  func.func @transform_11(%arg0: i32) -> (i32, i32, i32) {
    %c0_i32 = arith.constant 0 : i32
    %c0_i32_0 = arith.constant 0 : i32
    %c0_i32_1 = arith.constant 0 : i32
    return %arg0, %c0_i32, %c0_i32_0 : i32, i32, i32
  }
  func.func @transform_12(%arg0: i32) -> (i32, i32, i32) {
    %c0_i32 = arith.constant 0 : i32
    %c0_i32_0 = arith.constant 0 : i32
    %c0_i32_1 = arith.constant 0 : i32
    return %arg0, %c0_i32, %c0_i32_0 : i32, i32, i32
  }
  func.func @transform_13(%arg0: i32) -> (i32, i32) {
    %c0_i32 = arith.constant 0 : i32
    %c0_i32_0 = arith.constant 0 : i32
    %c0_i32_1 = arith.constant 0 : i32
    return %c0_i32, %c0_i32_0 : i32, i32
  }
  func.func @transform_14(%arg0: i32) -> (i32, i32) {
    %c0_i32 = arith.constant 0 : i32
    %c0_i32_0 = arith.constant 0 : i32
    %c0_i32_1 = arith.constant 0 : i32
    return %c0_i32, %c0_i32_0 : i32, i32
  }
  func.func @transform_15(%arg0: i32) -> (i32, i32) {
    %c0_i32 = arith.constant 0 : i32
    %c0_i32_0 = arith.constant 0 : i32
    %c0_i32_1 = arith.constant 0 : i32
    return %c0_i32, %c0_i32_0 : i32, i32
  }
  func.func @transform_16(%arg0: i32) -> (i32, i32) {
    %c0_i32 = arith.constant 0 : i32
    %c0_i32_0 = arith.constant 0 : i32
    %c0_i32_1 = arith.constant 0 : i32
    return %c0_i32, %c0_i32_0 : i32, i32
  }
  func.func @transform_17(%arg0: i32) -> (i32, i32) {
    %c0_i32 = arith.constant 0 : i32
    %c0_i32_0 = arith.constant 0 : i32
    %c0_i32_1 = arith.constant 0 : i32
    return %c0_i32, %c0_i32_0 : i32, i32
  }
  func.func @transform_18(%arg0: i32) -> (i32, i32) {
    %c0_i32 = arith.constant 0 : i32
    %c0_i32_0 = arith.constant 0 : i32
    %c0_i32_1 = arith.constant 0 : i32
    return %c0_i32, %c0_i32_0 : i32, i32
  }
  func.func @transform_19(%arg0: i32) -> (i32, i32) {
    %c0_i32 = arith.constant 0 : i32
    %c0_i32_0 = arith.constant 0 : i32
    %c0_i32_1 = arith.constant 0 : i32
    return %c0_i32, %c0_i32_0 : i32, i32
  }
  func.func @transform_20(%arg0: i32) -> (i32, i32) {
    %c0_i32 = arith.constant 0 : i32
    %c0_i32_0 = arith.constant 0 : i32
    %c0_i32_1 = arith.constant 0 : i32
    return %c0_i32, %c0_i32_0 : i32, i32
  }
  func.func @transform_21(%arg0: i32) -> (i32, i32) {
    %c0_i32 = arith.constant 0 : i32
    %c0_i32_0 = arith.constant 0 : i32
    %c0_i32_1 = arith.constant 0 : i32
    return %c0_i32, %c0_i32_0 : i32, i32
  }
  func.func @transform_22(%arg0: i32) -> (i32, i32) {
    %c0_i32 = arith.constant 0 : i32
    %c0_i32_0 = arith.constant 0 : i32
    %c0_i32_1 = arith.constant 0 : i32
    return %c0_i32, %c0_i32_0 : i32, i32
  }
  func.func @transform_23(%arg0: i32) -> (i32, i32) {
    %c0_i32 = arith.constant 0 : i32
    %c0_i32_0 = arith.constant 0 : i32
    %c0_i32_1 = arith.constant 0 : i32
    return %c0_i32, %c0_i32_0 : i32, i32
  }
}

</mosaic_0001>

<bundles_post_ra>
// kernel: conformer_forward.1
= control target key start
LH: loop header
LB: loop body
LE: loop exit
PB: predicated region body
PF: predicated region fallthrough
CT: control target
= control target key end

     0   :  { %s16696_s0 = inlined_call_operand.vmem [shape: f32[32,63], index: 0, kind: input, shape index: {}]   ;;  %s16697_s1 = inlined_call_operand.vmem [shape: f32[16,64], index: 1, kind: input, shape index: {}]   ;;  %s16698_s2 = inlined_call_operand.vmem [shape: f32[2,21,64], index: 2, kind: input, shape index: {}]   ;;  %s16699_s3 = inlined_call_operand.vmem [shape: f32[2,1,128], index: 3, kind: input, shape index: {}]   ;;  %s16700_s4 = inlined_call_operand.vmem [shape: f32[2,2,2048], index: 4, kind: input, shape index: {}]   ;;  %s16701_s5 = inlined_call_operand.vmem [shape: bf16[2,2,64,2048], index: 5, kind: input, shape index: {}]   ;;  %s16702_s6 = inlined_call_operand.vmem [shape: bf16[2,2,2048,64], index: 6, kind: input, shape index: {}]   ;;  %s16703_s7 = inlined_call_operand.vmem [shape: bf16[2,64,192], index: 7, kind: input, shape index: {}]   ;;  %s16704_s8 = inlined_call_operand.vmem [shape: bf16[2,64,64], index: 8, kind: input, shape index: {}]   ;;  %s16705_s9 = inlined_call_operand.vmem [shape: bf16[2,64,64], index: 9, kind: input, shape index: {}]   ;;  %s16706_s10 = inlined_call_operand.vmem [shape: bf16[2,64,128], index: 10, kind: input, shape index: {}]   ;;  %s16707_s11 = inlined_call_operand.vmem [shape: bf16[2,64,64], index: 11, kind: input, shape index: {}]   ;;  %s16708_s12 = inlined_call_operand.vmem [shape: f32[2,15,64], index: 12, kind: input, shape index: {}]   ;;  %s16709_s13 = inlined_call_operand.vmem [shape: bf16[63,448], index: 13, kind: input, shape index: {}]   ;;  %s16710_s14 = inlined_call_operand.vmem [shape: f32[1,448], index: 14, kind: input, shape index: {}]   ;;  %s16711_s15 = inlined_call_operand.vmem [shape: bf16[448,64], index: 15, kind: input, shape index: {}]   ;;  %s16712_s16 = inlined_call_operand.vmem [shape: f32[1,64], index: 16, kind: input, shape index: {}]   ;;  %s16713_s17 = inlined_call_operand.vmem [shape: f32[3,64], index: 17, kind: input, shape index: {}]   ;;  %s16714_s18 = inlined_call_operand.vmem [shape: f32[5,128], index: 18, kind: input, shape index: {}]   ;;  %s16715_s19 = inlined_call_operand.vmem [shape: bf16[192,128], index: 19, kind: input, shape index: {}]   ;;  %s16716_s20 = inlined_call_operand.vmem [shape: bf16[128,64], index: 20, kind: input, shape index: {}]   ;;  %s16717_s21 = inlined_call_operand.vmem [shape: bf16[128,32], index: 21, kind: input, shape index: {}]   ;;  %s16718_s22 = inlined_call_operand.vmem [shape: f32[1,32], index: 22, kind: input, shape index: {}]   ;;  %s16719_s23 = inlined_call_operand.hbm [shape: f32[2,32], index: 23, kind: output, shape index: {}]  }
   0x1   :  { %16777 = sst [smem:[#allocation34_spill]] %s16696_s0 }
   0x2   :  { %16778 = sst [smem:[#allocation35_spill]] %s16697_s1 }
   0x3   :  { %16779 = sst [smem:[#allocation36_spill]] %s16698_s2 }
   0x4   :  { %16780 = sst [smem:[#allocation37_spill]] %s16699_s3 }
   0x5   :  { %16781 = sst [smem:[#allocation38_spill]] %s16700_s4 }
   0x6   :  { %16782 = sst [smem:[#allocation39_spill]] %s16701_s5 }
   0x7   :  { %16783 = sst [smem:[#allocation40_spill]] %s16702_s6 }
   0x8   :  { %16784 = sst [smem:[#allocation41_spill]] %s16703_s7 }
   0x9   :  { %16785 = sst [smem:[#allocation42_spill]] %s16713_s17 }
   0xa   :  { %16786 = sst [smem:[#allocation43_spill]] %s16714_s18 }
   0xb   :  { %16787 = sst [smem:[#allocation44_spill]] %s16715_s19 }
   0xc   :  { %16788 = sst [smem:[#allocation45_spill]] %s16716_s20 }
   0xd   :  { %16789 = sst [smem:[#allocation46_spill]] %s16717_s21 }
   0xe   :  { %16790 = sst [smem:[#allocation47_spill]] %s16718_s22 }
   0xf   :  { %16791 = sst [smem:[#allocation48_spill]] %s16719_s23 }
  0x10   :  { %28 = vsyncpa [#allocation5], 0  ;;  %s13769_s4 = smov 0  }
  0x11 LB: > { %16792 = sst [smem:[#allocation7_spill]] %s13628_s4  ;;  %s13775_s30 = sadd.s32 4294967295, %s13628_s4   ;;  %s13628_s4 = sphi %s13769_s4, %s34_s4  }
  0x12   : > { %p10624_p0 = scmp.ge.s32.totalorder %s13628_s4, 1  ;;  %p731_p1 = scmp.lt.s32.totalorder %s13628_s4, 3 }
  0x14   : > { %p732_p2 = pnand %p10624_p0, %p731_p1 }
  0x16   : > { %735 = sbr.rel (%p732_p2) target bundleno = 8517 (0x2145), region = 112 }
  0x1d   : > { %p838_p3 = scmp.lt.s32.totalorder %s13775_s30, 1  ;;  %v892_v0 = vlaneseq  ;;  %v13630_v5 = vmov -1e+30   ;;  %s16795_s29 = sld [smem:[#allocation36_spill]]  ;;  %v16732_v9 = vmov 0.0  }
  0x1e   : > { %s16796_s5 = sld [smem:[#allocation38_spill]]  ;;  %s16797_s23 = sld [smem:[#allocation39_spill]] }
  0x1f   : > { %s13781_s24 = scalar_select %p838_p3, %s13775_s30, 1  ;;  %v13783_v1 = vshrl.u32 %v892_v0, 7  ;;  %v914_v2 = vand.u32 127, %v892_v0 }
  0x20   : > { %s16798_s17 = sld [smem:[#allocation40_spill]]  ;;  %p10646_p4 = scmp.ne.s32.totalorder %s13775_s30, 0 }
  0x21   : > { %s12473_s25 = smul.u32 24, %s13781_s24  ;;  %v894_v3 = vadd.s32 8, %v13783_v1  ;;  %v896_v4 = vadd.s32 24, %v13783_v1  ;;  %vm915_vm0 = vcmp.lt.s32.totalorder %v914_v2, 15  ;;  %s11690_s6 = sshll.u32 %s13781_s24, 5  ;;  %vm1057_vm3 = vcmask (!%p10646_p4), 1046528  }
  0x22   : > { %s11691_s27 = sshll.u32 %s13781_s24, 10  ;;  %v13794_v6 = vsel %vm915_vm0, 0.0, %v13630_v5  ;;  %s11692_s21 = sshll.u32 %s13781_s24, 11  ;;  %v12507_v12 = vld [vmem:[%s16709_s13 + $0x4] ss:$16 sps:$4 sm:$0xff] (!%p10646_p4)   ;;  %v13632_v16 = vmov (!%p10646_p4), 0  }
  0x23   : > { %16794 = vst [vmem:[#allocation8_spill] sm:$0xff] %v13794_v6  ;;  %s13799_s3 = scalar_lea.vmem %s16795_s29, %s12473_s25  ;;  %v898_v7 = vand.u32 15, %v894_v3  ;;  %v900_v8 = vand.u32 15, %v896_v4  ;;  %s11693_s25 = sshll.u32 %s13781_s24, 6  ;;  %v12509_v13 = vld [vmem:[%s16709_s13 + $0xc] ss:$16 sps:$4 sm:$0xff] (!%p10646_p4)   ;;  %1073 = vmatprep.subr.bf16.mxu0 (!%p10646_p4), %v12507_v12  ;;  %1105 = vmatprep.mubr.bf16.mxu0 (!%p10646_p4), %v13632_v16 }
  0x24   : > { %s13804_s1 = scalar_lea.vmem %s16796_s5, %s11690_s6  ;;  %s13809_s22 = scalar_lea.vmem %s16797_s23, %s11691_s27  ;;  %v12511_v14 = vld [vmem:[%s16709_s13] ss:$16 sps:$4 sm:$0xff] (!%p10646_p4)   ;;  %v12512_v15 = vld [vmem:[%s16709_s13 + $0x8] ss:$16 sps:$4 sm:$0xff] (!%p10646_p4)   ;;  %1126 = vmatprep.subr.bf16.mxu1 (!%p10646_p4), %v12509_v13  ;;  %v12513_v17 = vld [vmem:[%s16709_s13 + $0x24] ss:$16 sps:$4 sm:$0xff] (!%p10646_p4)   ;;  %1158 = vmatprep.mubr.bf16.mxu1 (!%p10646_p4), %v13632_v16 }
  0x25   : > { %vm902_vm1 = vcmp.lt.s32.totalorder %v898_v7, 15  ;;  %vm904_vm2 = vcmp.lt.s32.totalorder %v900_v8, 15  ;;  %s16799_s29 = sld [smem:[#allocation41_spill]]  ;;  %s13826_s2 = scalar_lea.vmem %s16704_s8, %s11690_s6  ;;  %vm1058_vm4 = vcmask (!%p10646_p4), 1047552   ;;  %v13633_v18 = vmov (!%p10646_p4), 65535   ;;  %1074 = vmatpush1.bf16.msra.mxu0 (!%p10646_p4), %v12511_v14  ;;  %1127 = vmatpush1.bf16.msra.mxu1 (!%p10646_p4), %v12512_v15  ;;  %v12531_v39 = vld [vmem:[%s16711_s15 + $0x80] sm:$0xff] (!%p10646_p4)  }
  0x26   : > { %s13815_s7 = scalar_lea.vmem %s16798_s17, %s11692_s21  ;;  %v13829_v10 = vsel %vm902_vm1, 1.0, %v16732_v9  ;;  %v13832_v11 = vsel %vm904_vm2, 1.0, %v16732_v9  ;;  %s13837_s20 = scalar_lea.vmem %s16705_s9, %s11690_s6  ;;  %v1059_v19 = vsel (!%p10646_p4), %vm1057_vm3, 4294967295, %v13633_v18  ;;  %v12515_v20 = vld [vmem:[%s16709_s13 + $0x2c] ss:$16 sps:$4 sm:$0xff] (!%p10646_p4)   ;;  %1075 = vmatprep.subr.bf16.mxu0 (!%p10646_p4), %v12513_v17  ;;  %vm1050_vm5 = vcmask (!%p10646_p4), 515072  }
  0x27   : > { %16800 = vst [vmem:[#allocation9_spill] sm:$0xff] %v13829_v10  ;;  %16801 = vst [vmem:[#allocation10_spill] sm:$0xff] %v13832_v11  ;;  %s13842_s27 = scalar_lea.vmem %s16706_s10, %s11690_s6  ;;  %s11698_s4 = sshll.u32 %s13781_s24, 4  ;;  %v12517_v21 = vld [vmem:[%s16709_s13 + $0x20] ss:$16 sps:$4 sm:$0xff] (!%p10646_p4)   ;;  %1128 = vmatprep.subr.bf16.mxu1 (!%p10646_p4), %v12515_v20  ;;  %v1060_v24 = vsel (!%p10646_p4), %vm1058_vm4, %v1059_v19, 0 }
  0x28   : > { %s13853_s5 = scalar_lea.vmem %s16708_s12, %s11698_s4  ;;  %920 = sbr.rel (%p10646_p4) target bundleno = 507 (0x1fb), region = 116  ;;  %v12518_v22 = vld [vmem:[%s16709_s13 + $0x28] ss:$16 sps:$4 sm:$0xff] (!%p10646_p4)   ;;  %v12519_v23 = vld [vmem:[%s16709_s13 + $0x44] ss:$16 sps:$4 sm:$0xff] (!%p10646_p4)   ;;  %vm921_vm6 = vcmask (!%p10646_p4), 523264  }
  0x29   : > { %v12521_v25 = vld [vmem:[%s16709_s13 + $0x4c] ss:$16 sps:$4 sm:$0xff] (!%p10646_p4)   ;;  %v12523_v26 = vld [vmem:[%s16709_s13 + $0x40] ss:$16 sps:$4 sm:$0xff] (!%p10646_p4)   ;;  %v12524_v27 = vld [vmem:[%s16709_s13 + $0x48] ss:$16 sps:$4 sm:$0xff] (!%p10646_p4)   ;;  %1076 = vmatpush1.bf16.msra.mxu0 (!%p10646_p4), %v12517_v21  ;;  %1129 = vmatpush1.bf16.msra.mxu1 (!%p10646_p4), %v12518_v22 }
  0x2a   : > { %v12525_v28 = vld [vmem:[%s16709_s13 + $0x64] ss:$16 sps:$4 sm:$0xff] (!%p10646_p4)   ;;  %1077 = vmatprep.subr.bf16.mxu0 (!%p10646_p4), %v12519_v23  ;;  %1130 = vmatprep.subr.bf16.mxu1 (!%p10646_p4), %v12521_v25  ;;  %v12527_v29 = vld [vmem:[%s16709_s13 + $0x6c] ss:$16 sps:$4 sm:$0xff] (!%p10646_p4)   ;;  %v12529_v31 = vld [vmem:[%s16709_s13 + $0x60] ss:$16 sps:$4 sm:$0xff] (!%p10646_p4)  }
  0x2b   : > { %s13821_s0 = scalar_lea.vmem %s16799_s29, %s11693_s25  ;;  %s13847_s25 = scalar_lea.vmem %s16707_s11, %s11690_s6  ;;  %v1065_v30 = vand.u32 (!%p10646_p4), %v12525_v28, %v1060_v24  ;;  %v12530_v32 = vld [vmem:[%s16709_s13 + $0x68] ss:$16 sps:$4 sm:$0xff] (!%p10646_p4)   ;;  %v1071_v33 = vand.u32 (!%p10646_p4), %v12527_v29, %v1060_v24  ;;  %v1062_v35 = vand.u32 (!%p10646_p4), %v12529_v31, %v1060_v24  ;;  %v12535_v40 = vld [vmem:[%s16711_s15 + $0x40] sm:$0xff] (!%p10646_p4)   ;;  %v12541_v47 = vld [vmem:[%s16711_s15 + $0x50] sm:$0xff] (!%p10646_p4)   ;;  %v13634_v8 = vmov (!%p10646_p4), 0.0  }
  0x2c   : > { %s16802_s6 = sld [smem:[#allocation34_spill]] (!%p10646_p4)  ;;  %v1068_v36 = vand.u32 (!%p10646_p4), %v12530_v32, %v1060_v24  ;;  %v12536_v41 = vld [vmem:[%s16711_s15] sm:$0xff] (!%p10646_p4)   ;;  %v12538_v44 = vld [vmem:[%s16711_s15 + $0x48] sm:$0xff] (!%p10646_p4)   ;;  %v12533_v49 = vld [vmem:[%s16711_s15 + $0x90] sm:$0xff] (!%p10646_p4)   ;;  %922 = vst.msk [vmem:[#allocation3] sm:$0xff] (!%p10646_p4), %vm921_vm6, %v13634_v8  ;;  %v956_v12 = vsub.s32 (!%p10646_p4), 0, %v13783_v1 }
  0x2d   : > { %1078 = vmatpush1.bf16.msra.mxu0 (!%p10646_p4), %v12523_v26  ;;  %1131 = vmatpush1.bf16.msra.mxu1 (!%p10646_p4), %v12524_v27  ;;  %v12532_v45 = vld [vmem:[%s16711_s15 + $0x88] sm:$0xff] (!%p10646_p4)   ;;  %v12542_v50 = vld [vmem:[%s16711_s15 + $0x10] sm:$0xff] (!%p10646_p4)   ;;  %v12544_v51 = vld [vmem:[%s16711_s15 + $0x58] sm:$0xff] (!%p10646_p4)   ;;  %923 = vst.msk [vmem:[#allocation3 + $0x8] sm:$0xff] (!%p10646_p4), %vm921_vm6, %v13634_v8  ;;  %v964_v13 = vsub.s32 (!%p10646_p4), 2, %v13783_v1  ;;  %v960_v15 = vsub.s32 (!%p10646_p4), 1, %v13783_v1 }
  0x2e   : > { %1079 = vmatprep.subr.bf16.mxu0 (!%p10646_p4), %v1065_v30  ;;  %1132 = vmatprep.subr.bf16.mxu1 (!%p10646_p4), %v1071_v33  ;;  %v12539_v46 = vld [vmem:[%s16711_s15 + $0x8] sm:$0xff] (!%p10646_p4)   ;;  %v12534_v52 = vld [vmem:[%s16711_s15 + $0x98] sm:$0xff] (!%p10646_p4)   ;;  %v12547_v54 = vld [vmem:[%s16711_s15 + $0x60] sm:$0xff] (!%p10646_p4)   ;;  %924 = vst.msk [vmem:[#allocation3 + $0x10] sm:$0xff] (!%p10646_p4), %vm921_vm6, %v13634_v8 }
  0x2f   : > { %v12545_v53 = vld [vmem:[%s16711_s15 + $0x18] sm:$0xff]   ;;  %v12537_v55 = vld [vmem:[%s16711_s15 + $0xa0] sm:$0xff]   ;;  %v12550_v57 = vld [vmem:[%s16711_s15 + $0x68] sm:$0xff]   ;;  %925 = vst.msk [vmem:[#allocation3 + $0x18] sm:$0xff] %vm921_vm6, %v13634_v8 }
  0x30   : > { %v12548_v56 = vld [vmem:[%s16711_s15 + $0x20] sm:$0xff]   ;;  %v12540_v58 = vld [vmem:[%s16711_s15 + $0xa8] sm:$0xff]   ;;  %v12543_v59 = vld [vmem:[%s16711_s15 + $0xb0] sm:$0xff]   ;;  %926 = vst.msk [vmem:[#allocation3 + $0x20] sm:$0xff] %vm921_vm6, %v13634_v8 }
  0x31   : > { %1080 = vmatpush1.bf16.msra.mxu0 %v1062_v35  ;;  %1133 = vmatpush1.bf16.msra.mxu1 %v1068_v36  ;;  %v12546_v60 = vld [vmem:[%s16711_s15 + $0xb8] sm:$0xff]   ;;  %v12549_v61 = vld [vmem:[%s16711_s15 + $0xc0] sm:$0xff]   ;;  %v12551_v62 = vld [vmem:[%s16711_s15 + $0x28] sm:$0xff]   ;;  %927 = vst.msk [vmem:[#allocation3 + $0x28] sm:$0xff] %vm921_vm6, %v13634_v8 }
  0x32   : > { %v930_v34 = vld [vmem:[%s16802_s6] sm:$0xff]  ;;  %v931_v37 = vld [vmem:[%s16802_s6 + $0x8] sm:$0xff]  ;;  %1489 = vmatprep.subr.bf16.mxu1 %v13632_v16  ;;  %v932_v42 = vld [vmem:[%s16802_s6 + $0x10] sm:$0xff]  ;;  %11699 = vmatprep.subr.bf16.mxu0 %v12535_v40  ;;  %928 = vst.msk [vmem:[#allocation3 + $0x30] sm:$0xff] %vm921_vm6, %v13634_v8 }
  0x33   : > { %v950_v38 = vpack.c.bf16 %v931_v37, %v930_v34  ;;  %v933_v43 = vld [vmem:[%s16802_s6 + $0x18] sm:$0xff]  ;;  %v12552_v63 = vld [vmem:[%s16711_s15 + $0xc8] sm:$0xff]   ;;  %v12553_v0 = vld [vmem:[%s16711_s15 + $0x70] sm:$0xff]   ;;  %929 = vst.msk [vmem:[#allocation3 + $0x38] sm:$0xff] %vm921_vm6, %v13634_v8 }
  0x34   : > { %v951_v48 = vpack.c.bf16 %v933_v43, %v932_v42  ;;  %v12554_v2 = vld [vmem:[%s16711_s15 + $0x30] sm:$0xff]   ;;  %v12556_v4 = vld [vmem:[%s16711_s15 + $0x78] sm:$0xff]   ;;  %v952_v14 = vld [vmem:[%s16710_s14] sm:$0xf] }
  0x35   : > { %10663 = vmatmul.mubr.msk.bf16.vlgmr.msra.gmra.mrb[0].mxu0 %vm1050_vm5, %v950_v38  ;;  %10665 = vmatmul.mubr.msk.bf16.vlgmr.msra.gmra.mrb[0].mxu1 %vm1050_vm5, %v950_v38  ;;  %v12555_v3 = vld [vmem:[%s16711_s15 + $0xd0] sm:$0xff]   ;;  %v12557_v5 = vld [vmem:[%s16711_s15 + $0x38] sm:$0xff]   ;;  %v957_v17 = vrot.slane %v952_v14, %v956_v12  ;;  %v965_v18 = vrot.slane %v952_v14, %v964_v13  ;;  %v961_v19 = vrot.slane %v952_v14, %v960_v15 }
  0x36   : > { %1115 = vmatprep.mubr.bf16.mxu0 %v13632_v16  ;;  %1168 = vmatprep.mubr.bf16.mxu1 %v13632_v16  ;;  %v12558_v7 = vld [vmem:[%s16711_s15 + $0xd8] sm:$0xff]  }
  0x37   : > { %1490 = vmatpush1.bf16.msra.mxu1 %v12531_v39  ;;  %11700 = vmatpush3.bf16.msra.mxu0 %v12536_v41 }
  0x38   : > { %1491 = vmatprep.subr.bf16.mxu1 %v13632_v16  ;;  %11701 = vmatprep.subr.bf16.mxu0 %v12538_v44 }
  0x3b   : > { %1492 = vmatpush1.bf16.msra.mxu1 %v12532_v45  ;;  %11702 = vmatpush3.bf16.msra.mxu0 %v12539_v46 }
  0x3c   : > { %1493 = vmatprep.subr.bf16.mxu1 %v13632_v16  ;;  %11703 = vmatprep.subr.bf16.mxu0 %v12541_v47 }
  0x3d   : > { %10664 = vmatmul.mubr.msk.bf16.gmra.mrb[4].mxu0 %vm1050_vm5, %v951_v48  ;;  %10666 = vmatmul.mubr.msk.bf16.gmra.mrb[4].mxu1 %vm1050_vm5, %v951_v48 }
  0x3f   : > { %1494 = vmatpush1.bf16.msra.mxu1 %v12533_v49  ;;  %11704 = vmatpush3.bf16.msra.mxu0 %v12542_v50 }
  0x40   : > { %1495 = vmatprep.subr.bf16.mxu1 %v13632_v16  ;;  %11705 = vmatprep.subr.bf16.mxu0 %v12544_v51 }
  0x43   : > { %1496 = vmatpush1.bf16.msra.mxu1 %v12534_v52  ;;  %11706 = vmatpush3.bf16.msra.mxu0 %v12545_v53 }
  0x44   : > { %1497 = vmatprep.subr.bf16.mxu1 %v13632_v16  ;;  %11707 = vmatprep.subr.bf16.mxu0 %v12547_v54 }
  0x47   : > { %1498 = vmatpush1.bf16.msra.mxu1 %v12537_v55  ;;  %11708 = vmatpush3.bf16.msra.mxu0 %v12548_v56 }
  0x48   : > { %1499 = vmatprep.subr.bf16.mxu1 %v13632_v16  ;;  %11709 = vmatprep.subr.bf16.mxu0 %v12550_v57 }
  0x4b   : > { %1500 = vmatpush1.bf16.msra.mxu1 %v12540_v58  ;;  %11710 = vmatpush3.bf16.msra.mxu0 %v12551_v62 }
  0x4c   : > { %1501 = vmatprep.subr.bf16.mxu1 %v13632_v16  ;;  %11711 = vmatprep.subr.bf16.mxu0 %v12553_v0 }
  0x4f   : > { %1502 = vmatpush1.bf16.msra.mxu1 %v12543_v59  ;;  %11712 = vmatpush3.bf16.msra.mxu0 %v12554_v2 }
  0x50   : > { %1503 = vmatprep.subr.bf16.mxu1 %v13632_v16  ;;  %11713 = vmatprep.subr.bf16.mxu0 %v12556_v4 }
  0x53   : > { %1504 = vmatpush1.bf16.msra.mxu1 %v12546_v60  ;;  %11714 = vmatpush3.bf16.msra.mxu0 %v12557_v5 }
  0x54   : > { %1505 = vmatprep.subr.bf16.mxu1 %v13632_v16 }
  0x57   : > { %1506 = vmatpush1.bf16.msra.mxu1 %v12549_v61 }
  0x58   : > { %1507 = vmatprep.subr.bf16.mxu1 %v13632_v16 }
  0x5b   : > { %1508 = vmatpush1.bf16.msra.mxu1 %v12552_v63 }
  0x5c   : > { %1509 = vmatprep.subr.bf16.mxu1 %v13632_v16 }
  0x5f   : > { %1510 = vmatpush1.bf16.msra.mxu1 %v12555_v3 }
  0x60   : > { %1511 = vmatprep.subr.bf16.mxu1 %v13632_v16  ;;  %v968_v16 = vsub.s32 3, %v13783_v1 }
  0x62   : > { %v969_v20 = vrot.slane %v952_v14, %v968_v16 }
  0x63   : > { %1512 = vmatpush1.bf16.msra.mxu1 %v12558_v7 }
 0x108   : > { %v1107_v21 = vpop.f32.mrb[0].mxu0  ;;  %v1160_v22 = vpop.f32.mrb[0].mxu1 }
 0x109   : > { %v1108_v23 = vadd.f32 %v1107_v21, %v957_v17  ;;  %v1161_v24 = vadd.f32 %v1160_v22, %v965_v18  ;;  %v1109_v25 = vpop.f32.mrb[1].mxu0  ;;  %v1162_v26 = vpop.f32.mrb[1].mxu1 }
 0x10a   : > { %v1110_v27 = vadd.f32 %v1109_v25, %v961_v19  ;;  %v1163_v28 = vadd.f32 %v1162_v26, %v969_v20  ;;  %v1111_v29 = vpop.f32.mrb[2].mxu0  ;;  %v1164_v30 = vpop.f32.mrb[2].mxu1 }
 0x10b   : > { %v1181_v31 = vmax.f32 %v1161_v24, 0.0  ;;  %v1112_v32 = vadd.f32 %v1111_v29, %v957_v17  ;;  %v1165_v33 = vadd.f32 %v1164_v30, %v965_v18  ;;  %v1113_v34 = vpop.f32.mrb[3].mxu0  ;;  %v1166_v35 = vpop.f32.mrb[3].mxu1  ;;  %v1179_v39 = vmax.f32 %v1108_v23, 0.0 }
 0x10c   : > { %v1182_v36 = vmax.f32 %v1163_v28, 0.0  ;;  %v1114_v37 = vadd.f32 %v1113_v34, %v961_v19  ;;  %v1167_v38 = vadd.f32 %v1166_v35, %v969_v20  ;;  %v1180_v42 = vmax.f32 %v1110_v27, 0.0 }
 0x10d   : > { %v1183_v40 = vmax.f32 %v1112_v32, 0.0  ;;  %v1185_v41 = vmax.f32 %v1165_v33, 0.0 }
 0x10e   : > { %v1184_v43 = vmax.f32 %v1114_v37, 0.0  ;;  %v1186_v44 = vmax.f32 %v1167_v38, 0.0 }
 0x10f   : > { %v1251_v45 = vpack.c.bf16 %v1183_v40, %v1179_v39  ;;  %v1253_v46 = vpack.c.bf16 %v1185_v41, %v1181_v31 }
 0x110   : > { %v1252_v47 = vpack.c.bf16 %v1184_v43, %v1180_v42  ;;  %v1254_v48 = vpack.c.bf16 %v1186_v44, %v1182_v36  ;;  %v1117_v49 = vpop.f32.mrb[4].mxu0  ;;  %v1170_v50 = vpop.f32.mrb[4].mxu1 }
 0x111   : > { %v1118_v51 = vadd.f32 %v1117_v49, %v957_v17  ;;  %v1171_v52 = vadd.f32 %v1170_v50, %v965_v18  ;;  %v1119_v53 = vpop.f32.mrb[5].mxu0  ;;  %v1172_v54 = vpop.f32.mrb[5].mxu1 }
 0x112   : > { %v1120_v55 = vadd.f32 %v1119_v53, %v961_v19  ;;  %v1173_v56 = vadd.f32 %v1172_v54, %v969_v20  ;;  %v1121_v57 = vpop.f32.mrb[6].mxu0  ;;  %v1174_v58 = vpop.f32.mrb[6].mxu1  ;;  %1472 = vmatprep.mubr.bf16.mxu0 %v1252_v47  ;;  %10696 = vmatprep.mubr.msk.bf16.mxu1 %vm921_vm6, %v1254_v48 }
 0x113   : > { %v1189_v59 = vmax.f32 %v1171_v52, 0.0  ;;  %v1122_v60 = vadd.f32 %v1121_v57, %v957_v17  ;;  %v1175_v61 = vadd.f32 %v1174_v58, %v965_v18  ;;  %v1123_v62 = vpop.f32.mrb[7].mxu0  ;;  %v1176_v63 = vpop.f32.mrb[7].mxu1  ;;  %1473 = vmatmul.mubr.bf16.vlgmr.msra.gmra.mrb[8].mxu0 %v1251_v45  ;;  %1522 = vmatmul.mubr.bf16.vlgmr.msra.gmra.mrb[8].mxu1 %v1253_v46  ;;  %v1187_v4 = vmax.f32 %v1118_v51, 0.0 }
 0x114   : > { %v1190_v0 = vmax.f32 %v1173_v56, 0.0  ;;  %v1124_v2 = vadd.f32 %v1123_v62, %v961_v19  ;;  %v1177_v3 = vadd.f32 %v1176_v63, %v969_v20  ;;  %v1188_v8 = vmax.f32 %v1120_v55, 0.0  ;;  %v10667_v19 = vld [vmem:[%s16712_s16] ss:$0 sm:$0xff] }
 0x115   : > { %v1191_v5 = vmax.f32 %v1122_v60, 0.0  ;;  %v1193_v7 = vmax.f32 %v1175_v61, 0.0 }
 0x116   : > { %v1192_v12 = vmax.f32 %v1124_v2, 0.0  ;;  %v1194_v13 = vmax.f32 %v1177_v3, 0.0 }
 0x117   : > { %v1255_v14 = vpack.c.bf16 %v1191_v5, %v1187_v4  ;;  %v1257_v15 = vpack.c.bf16 %v1193_v7, %v1189_v59 }
 0x118   : > { %v1256_v16 = vpack.c.bf16 %v1192_v12, %v1188_v8  ;;  %v1258_v21 = vpack.c.bf16 %v1194_v13, %v1190_v0 }
 0x11a   : > { %1480 = vmatprep.mubr.bf16.mxu0 %v1256_v16  ;;  %10697 = vmatprep.mubr.msk.bf16.mxu1 %vm921_vm6, %v1258_v21 }
 0x11b   : > { %1481 = vmatmul.mubr.bf16.gmra.mrb[12].mxu0 %v1255_v14  ;;  %1530 = vmatmul.mubr.bf16.gmra.mrb[12].mxu1 %v1257_v15 }
 0x1e6   : > { %v11715_v17 = vpop.f32.mrb[8].mxu0  ;;  %v1523_v18 = vpop.f32.mrb[8].mxu1 }
 0x1e7   : > { %v11716_v20 = vpop.f32.mrb[9].mxu0  ;;  %v1525_v22 = vpop.f32.mrb[9].mxu1 }
 0x1e8   : > { %v11717_v23 = vadd.f32 %v11716_v20, %v11715_v17  ;;  %v11718_v24 = vpop.f32.mrb[10].mxu0  ;;  %v1526_v25 = vpop.f32.mrb[10].mxu1 }
 0x1e9   : > { %v11719_v26 = vpop.f32.mrb[11].mxu0  ;;  %v1528_v27 = vpop.f32.mrb[11].mxu1 }
 0x1ea   : > { %v1475_v28 = vadd.f32 %v11717_v23, %v10667_v19  ;;  %v11720_v29 = vadd.f32 %v11719_v26, %v11718_v24 }
 0x1ec   : > { %v1524_v30 = vadd.f32 %v1523_v18, %v1475_v28  ;;  %v1478_v31 = vadd.f32 %v11720_v29, %v10667_v19 }
 0x1ee   : > { %v1538_v32 = vmul.f32 8.0, %v1524_v30  ;;  %v1527_v33 = vadd.f32 %v1526_v25, %v1478_v31  ;;  %v11721_v34 = vpop.f32.mrb[12].mxu0  ;;  %v1531_v35 = vpop.f32.mrb[12].mxu1 }
 0x1ef   : > { %v11722_v36 = vpop.f32.mrb[13].mxu0  ;;  %v1533_v37 = vpop.f32.mrb[13].mxu1 }
 0x1f0   : > { %1542 = vst.msk [vmem:[#allocation2] sm:$0xff] %vm921_vm6, %v1538_v32  ;;  %v1539_v38 = vmul.f32 8.0, %v1527_v33  ;;  %v11723_v39 = vadd.f32 %v11722_v36, %v11721_v34  ;;  %v11724_v40 = vpop.f32.mrb[14].mxu0  ;;  %v1534_v41 = vpop.f32.mrb[14].mxu1 }
 0x1f1   : > { %v11725_v42 = vpop.f32.mrb[15].mxu0  ;;  %v1536_v43 = vpop.f32.mrb[15].mxu1 }
 0x1f2   : > { %1543 = vst.msk [vmem:[#allocation2 + $0x8] sm:$0xff] %vm921_vm6, %v1539_v38  ;;  %v1483_v44 = vadd.f32 %v11723_v39, %v10667_v19  ;;  %v11726_v45 = vadd.f32 %v11725_v42, %v11724_v40 }
 0x1f4   : > { %v1532_v46 = vadd.f32 %v1531_v35, %v1483_v44  ;;  %v1486_v47 = vadd.f32 %v11726_v45, %v10667_v19 }
 0x1f6   : > { %v1540_v48 = vmul.f32 8.0, %v1532_v46  ;;  %v1535_v49 = vadd.f32 %v1534_v41, %v1486_v47 }
 0x1f8   : > { %1544 = vst.msk [vmem:[#allocation2 + $0x10] sm:$0xff] %vm921_vm6, %v1540_v48  ;;  %v1541_v50 = vmul.f32 8.0, %v1535_v49 }
 0x1fa   : > { %1545 = vst.msk [vmem:[#allocation2 + $0x18] sm:$0xff] %vm921_vm6, %v1541_v50 }
 0x1fb PF: > { %v1549_v51 = vld [vmem:[#allocation2] sm:$0xff]  ;;  %vm1553_vm7 = vcmask 523264   ;;  %v1550_v53 = vld [vmem:[#allocation2 + $0x8] sm:$0xff]  ;;  %vm13636_vm8 = vmmov 0   ;;  %s16854_s26 = sld [smem:[#allocation35_spill]]  ;;  %s13637_s29 = smov 64  }
 0x1fc   : > { %v1554_v54 = vsel %vm1553_vm7, %v1549_v51, 0.0  ;;  %v1557_v56 = vsel %vm1553_vm7, %v1550_v53, 0.0  ;;  %v1623_v19 = vld [vmem:[%s13809_s22] sm:$0xff]  ;;  %v1624_v22 = vld [vmem:[%s13809_s22 + $0x8] sm:$0xff]  ;;  %vm4739_vm9 = vcmask 130048   ;;  %s13640_s6 = smov 96  }
 0x1fd   : > { %1555 = vadd.xlane.f32.xlu0 %v1554_v54  ;;  %v1631_v20 = vld [vmem:[%s13809_s22 + $0x40] sm:$0xff]  ;;  %v1632_v24 = vld [vmem:[%s13809_s22 + $0x48] sm:$0xff]  ;;  %v1626_v54 = vld [vmem:[%s13809_s22 + $0x18] sm:$0xff]  ;;  %s13641_s17 = smov 32   ;;  %s13642_s18 = smov 80   ;;  %vm6043_vm10 = vcmask 261120  }
 0x1fe   : > { %v10700_v23 = vcombine.high %v1623_v19, %v1631_v20  ;;  %v10702_v25 = vcombine.high %v1624_v22, %v1632_v24  ;;  %v10699_v26 = vcombine.low %v1623_v19, %v1631_v20  ;;  %v10701_v27 = vcombine.low %v1624_v22, %v1632_v24  ;;  %v1639_v28 = vld [vmem:[%s13809_s22 + $0x80] sm:$0xff]  ;;  %v1640_v30 = vld [vmem:[%s13809_s22 + $0x88] sm:$0xff]  ;;  %s13643_s21 = smov 16   ;;  %s16862_s23 = sld [smem:[#allocation37_spill]] }
 0x1ff   : > { %v1551_v52 = vld [vmem:[#allocation2 + $0x10] sm:$0xff]  ;;  %v1647_v29 = vld [vmem:[%s13809_s22 + $0xc0] sm:$0xff]  ;;  %v1648_v32 = vld [vmem:[%s13809_s22 + $0xc8] sm:$0xff]  ;;  %v14095_v20 = vsub.s32 1, %v13783_v1  ;;  %vm6048_vm11 = vcmask 392192   ;;  %p11646_p5 = scmp.ne.s32.totalorder %s13775_s30, 1 }
 0x200   : > { %v1560_v55 = vsel %vm1553_vm7, %v1551_v52, 0.0  ;;  %2100 = vmatprep.subr.bf16.mxu0 %v10700_v23  ;;  %2153 = vmatprep.subr.bf16.mxu1 %v10702_v25  ;;  %v10716_v31 = vcombine.high %v1639_v28, %v1647_v29  ;;  %v10718_v33 = vcombine.high %v1640_v30, %v1648_v32  ;;  %v10715_v34 = vcombine.low %v1639_v28, %v1647_v29  ;;  %v1655_v36 = vld [vmem:[%s13809_s22 + $0x100] sm:$0xff]  ;;  %v1656_v38 = vld [vmem:[%s13809_s22 + $0x108] sm:$0xff] }
 0x201   : > { %v1552_v57 = vld [vmem:[#allocation2 + $0x18] sm:$0xff]  ;;  %1561 = vadd.xlane.f32.xlu1 %v1560_v55  ;;  %1558 = vadd.xlane.f32.xlu0 %v1557_v56  ;;  %v10717_v35 = vcombine.low %v1640_v30, %v1648_v32  ;;  %v1663_v37 = vld [vmem:[%s13809_s22 + $0x140] sm:$0xff]  ;;  %v1664_v40 = vld [vmem:[%s13809_s22 + $0x148] sm:$0xff]  ;;  %16804 = vst [vmem:[#allocation12_spill] sm:$0xff] %v14095_v20  ;;  %vm13647_vm3 = vmmov (!%p11646_p5), 0   ;;  %vm10364_vm5 = vcmask (!%p11646_p5), 1041409  }
 0x202   : > { %v1563_v58 = vsel %vm1553_vm7, %v1552_v57, 0.0  ;;  %2101 = vmatpush1.bf16.msra.mxu0 %v10699_v26  ;;  %2154 = vmatpush1.bf16.msra.mxu1 %v10701_v27  ;;  %v10732_v39 = vcombine.high %v1655_v36, %v1663_v37  ;;  %v10734_v41 = vcombine.high %v1656_v38, %v1664_v40  ;;  %v10731_v42 = vcombine.low %v1655_v36, %v1663_v37  ;;  %v1671_v44 = vld [vmem:[%s13809_s22 + $0x180] sm:$0xff]  ;;  %v1672_v46 = vld [vmem:[%s13809_s22 + $0x188] sm:$0xff]  ;;  %v1634_v56 = vld [vmem:[%s13809_s22 + $0x58] sm:$0xff] }
 0x203   : > { %2102 = vmatprep.subr.bf16.mxu0 %v10716_v31  ;;  %2155 = vmatprep.subr.bf16.mxu1 %v10718_v33  ;;  %v10733_v43 = vcombine.low %v1656_v38, %v1664_v40  ;;  %v1679_v45 = vld [vmem:[%s13809_s22 + $0x1c0] sm:$0xff]  ;;  %v1680_v48 = vld [vmem:[%s13809_s22 + $0x1c8] sm:$0xff]  ;;  %v1641_v30 = vld [vmem:[%s13809_s22 + $0x90] sm:$0xff]  ;;  %vm10456_vm6 = vcmask (!%p11646_p5), 254976  }
 0x204   : > { %v10748_v47 = vcombine.high %v1671_v44, %v1679_v45  ;;  %v10750_v49 = vcombine.high %v1672_v46, %v1680_v48  ;;  %v10747_v50 = vcombine.low %v1671_v44, %v1679_v45  ;;  %v1649_v32 = vld [vmem:[%s13809_s22 + $0xd0] sm:$0xff]  ;;  %v1642_v33 = vld [vmem:[%s13809_s22 + $0x98] sm:$0xff]  ;;  %s16863_s19 = scalar_lea.vmem %s16862_s23, %s13781_s24 }
 0x205   : > { %1564 = vadd.xlane.f32.xlu1 %v1563_v58  ;;  %v1666_v44 = vld [vmem:[%s13809_s22 + $0x158] sm:$0xff] }
 0x206   : > { %2103 = vmatpush1.bf16.msra.mxu0 %v10715_v34  ;;  %2156 = vmatpush1.bf16.msra.mxu1 %v10717_v35  ;;  %v1650_v34 = vld [vmem:[%s13809_s22 + $0xd8] sm:$0xff] }
 0x207   : > { %2104 = vmatprep.subr.bf16.mxu0 %v10732_v39  ;;  %2157 = vmatprep.subr.bf16.mxu1 %v10734_v41  ;;  %v10720_v39 = vcombine.high %v1641_v30, %v1649_v32  ;;  %v10722_v40 = vcombine.high %v1642_v33, %v1650_v34  ;;  %v1657_v41 = vld [vmem:[%s13809_s22 + $0x110] sm:$0xff] }
 0x20a   : > { %2105 = vmatpush1.bf16.msra.mxu0 %v10731_v42  ;;  %2158 = vmatpush1.bf16.msra.mxu1 %v10733_v43  ;;  %v1665_v42 = vld [vmem:[%s13809_s22 + $0x150] sm:$0xff]  ;;  %v1658_v43 = vld [vmem:[%s13809_s22 + $0x118] sm:$0xff] }
 0x20b   : > { %2106 = vmatprep.subr.bf16.mxu0 %v10748_v47  ;;  %2159 = vmatprep.subr.bf16.mxu1 %v10750_v49  ;;  %v10736_v47 = vcombine.high %v1657_v41, %v1665_v42  ;;  %v1673_v49 = vld [vmem:[%s13809_s22 + $0x190] sm:$0xff] }
 0x20e   : > { %2107 = vmatpush1.bf16.msra.mxu0 %v10747_v50  ;;  %v1681_v50 = vld [vmem:[%s13809_s22 + $0x1d0] sm:$0xff] }
 0x28a   : > { %v1556_v59 = vpop.xlane.xlu0 %1555 }
 0x28b   : > { %v1567_v61 = vmul.f32 0.015625, %v1556_v59  ;;  %v10705_v59 = vcombine.low %v1626_v54, %v1634_v56 }
 0x28d   : > { %v14048_v63 = vsub.f32 %v1549_v51, %v1567_v61  ;;  %v10749_v51 = vcombine.low %v1672_v46, %v1680_v48  ;;  %v10738_v48 = vcombine.high %v1658_v43, %v1666_v44 }
 0x28e   : > { %v1562_v60 = vpop.xlane.xlu1 %1561  ;;  %v1559_v2 = vpop.xlane.xlu0 %1558 }
 0x28f   : > { %v1569_v62 = vmul.f32 0.015625, %v1562_v60  ;;  %v1568_v4 = vmul.f32 0.015625, %v1559_v2  ;;  %v1575_v7 = vmul.f32 %v14048_v63, %v14048_v63  ;;  %2160 = vmatpush1.bf16.msra.mxu1 %v10749_v51  ;;  %v10706_v60 = vcombine.high %v1626_v54, %v1634_v56  ;;  %v1674_v51 = vld [vmem:[%s13809_s22 + $0x198] sm:$0xff] }
 0x290   : > { %v10735_v54 = vcombine.low %v1657_v41, %v1665_v42  ;;  %v1638_v41 = vld [vmem:[%s13809_s22 + $0x78] sm:$0xff] }
 0x291   : > { %v14050_v0 = vsub.f32 %v1551_v52, %v1569_v62  ;;  %v14056_v12 = vsub.f32 %v1550_v53, %v1568_v4  ;;  %v1579_v14 = vsel %vm1553_vm7, %v1575_v7, 0.0  ;;  %v1625_v52 = vld [vmem:[%s13809_s22 + $0x10] sm:$0xff]  ;;  %2259 = vmatprep.subr.bf16.mxu1 %v10706_v60  ;;  %v1627_v60 = vld [vmem:[%s13809_s22 + $0x20] sm:$0xff] }
 0x292   : > { %v1565_v3 = vpop.xlane.xlu1 %1564  ;;  %1580 = vadd.xlane.f32.xlu0 %v1579_v14  ;;  %v1633_v53 = vld [vmem:[%s13809_s22 + $0x50] sm:$0xff] }
 0x293   : > { %v1570_v5 = vmul.f32 0.015625, %v1565_v3  ;;  %v1577_v8 = vmul.f32 %v14050_v0, %v14050_v0  ;;  %v1576_v16 = vmul.f32 %v14056_v12, %v14056_v12  ;;  %v10704_v55 = vcombine.high %v1625_v52, %v1633_v53 }
 0x294   : > { %v10703_v58 = vcombine.low %v1625_v52, %v1633_v53  ;;  %v1682_v52 = vld [vmem:[%s13809_s22 + $0x1d8] sm:$0xff] }
 0x295   : > { %v14058_v13 = vsub.f32 %v1552_v57, %v1570_v5  ;;  %v1585_v15 = vsel %vm1553_vm7, %v1577_v8, 0.0  ;;  %v1582_v17 = vsel %vm1553_vm7, %v1576_v16, 0.0  ;;  %v16730_v57 = vmov 0   ;;  %2206 = vmatprep.subr.bf16.mxu0 %v10704_v55 }
 0x296   : > { %1586 = vadd.xlane.f32.xlu0 %v1585_v15  ;;  %1583 = vadd.xlane.f32.xlu1 %v1582_v17  ;;  %v14091_v17 = vsub.s32 0, %v13783_v1  ;;  %v10737_v55 = vcombine.low %v1658_v43, %v1666_v44 }
 0x297   : > { %v1578_v21 = vmul.f32 %v14058_v13, %v14058_v13  ;;  %2132 = vmatprep.mubr.bf16.mxu0 %v16730_v57  ;;  %2185 = vmatprep.mubr.bf16.mxu1 %v16730_v57 }
 0x298   : > { %16803 = vst [vmem:[#allocation11_spill] sm:$0xff] %v14091_v17 }
 0x299   : > { %v1588_v18 = vsel %vm1553_vm7, %v1578_v21, 0.0 }
 0x29a   : > { %1589 = vadd.xlane.f32.xlu1 %v1588_v18  ;;  %v1546_v18 = vld [vmem:[%s13799_s3] sm:$0xff] }
 0x29b   : > { %v1610_v23 = vrot.slane %v1546_v18, %v14091_v17  ;;  %v1618_v26 = vrot.slane %v1546_v18, %v14095_v20 }
 0x31f   : > { %v1581_v61 = vpop.xlane.xlu0 %1580 }
 0x320   : > { %v1591_v62 = vmul.f32 0.015625, %v1581_v61  ;;  %v1635_v61 = vld [vmem:[%s13809_s22 + $0x60] sm:$0xff] }
 0x322   : > { %v1595_v2 = vadd.f32 1e-05, %v1591_v62  ;;  %v1628_v62 = vld [vmem:[%s13809_s22 + $0x28] sm:$0xff] }
 0x323   : > { %v1584_v3 = vpop.xlane.xlu1 %1583  ;;  %v1587_v4 = vpop.xlane.xlu0 %1586 }
 0x324   : > { %12873 = vrsqrt.f32 %v1595_v2  ;;  %v1592_v5 = vmul.f32 0.015625, %v1584_v3  ;;  %v1593_v7 = vmul.f32 0.015625, %v1587_v4  ;;  %v1636_v2 = vld [vmem:[%s13809_s22 + $0x68] sm:$0xff]  ;;  %v10751_v3 = vcombine.low %v1673_v49, %v1681_v50 }
 0x325   : > { %v10753_v4 = vcombine.low %v1674_v51, %v1682_v52  ;;  %v10709_v18 = vcombine.low %v1628_v62, %v1636_v2 }
 0x326   : > { %v1596_v8 = vadd.f32 1e-05, %v1592_v5  ;;  %v1597_v14 = vadd.f32 1e-05, %v1593_v7  ;;  %v10708_v5 = vcombine.high %v1627_v60, %v1635_v61  ;;  %v10710_v7 = vcombine.high %v1628_v62, %v1636_v2  ;;  %v1677_v62 = vld [vmem:[%s13809_s22 + $0x1b0] sm:$0xff] }
 0x327   : > { %v1590_v15 = vpop.xlane.xlu1 %1589  ;;  %v1685_v2 = vld [vmem:[%s13809_s22 + $0x1f0] sm:$0xff] }
 0x328   : > { %12875 = vrsqrt.f32 %v1596_v8  ;;  %v1594_v16 = vmul.f32 0.015625, %v1590_v15  ;;  %v1643_v8 = vld [vmem:[%s13809_s22 + $0xa0] sm:$0xff]  ;;  %v1644_v15 = vld [vmem:[%s13809_s22 + $0xa8] sm:$0xff] }
 0x329   : > { %12877 = vrsqrt.f32 %v1597_v14  ;;  %v1651_v14 = vld [vmem:[%s13809_s22 + $0xe0] sm:$0xff] }
 0x32a   : > { %v1598_v21 = vadd.f32 1e-05, %v1594_v16  ;;  %v1652_v16 = vld [vmem:[%s13809_s22 + $0xe8] sm:$0xff] }
 0x32c   : > { %12879 = vrsqrt.f32 %v1598_v21  ;;  %v10707_v21 = vcombine.low %v1627_v60, %v1635_v61 }
 0x32e   : > { %v12874_v19 = vpop.eup %12873 }
 0x32f   : > { %v1603_v22 = vmul.f32 %v12874_v19, %v14048_v63  ;;  %v10724_v19 = vcombine.high %v1643_v8, %v1651_v14 }
 0x331   : > { %v1611_v25 = vmul.f32 %v1610_v23, %v1603_v22  ;;  %v10726_v22 = vcombine.high %v1644_v15, %v1652_v16 }
 0x332   : > { %v12876_v24 = vpop.eup %12875 }
 0x333   : > { %v1604_v27 = vmul.f32 %v12876_v24, %v14056_v12  ;;  %v12878_v28 = vpop.eup %12877  ;;  %v1619_v63 = vadd.f32 %v1618_v26, %v1611_v25  ;;  %v1667_v24 = vld [vmem:[%s13809_s22 + $0x160] sm:$0xff]  ;;  %v1660_v25 = vld [vmem:[%s13809_s22 + $0x128] sm:$0xff] }
 0x334   : > { %v1605_v36 = vmul.f32 %v12878_v28, %v14050_v0  ;;  %v10719_v0 = vcombine.low %v1641_v30, %v1649_v32  ;;  %v10725_v28 = vcombine.low %v1644_v15, %v1652_v16  ;;  %v1683_v32 = vld [vmem:[%s13809_s22 + $0x1e0] sm:$0xff]  ;;  %v10759_v15 = vcombine.low %v1677_v62, %v1685_v2 }
 0x335   : > { %v1612_v29 = vmul.f32 %v1610_v23, %v1604_v27  ;;  %v10723_v27 = vcombine.low %v1643_v8, %v1651_v14  ;;  %v10760_v8 = vcombine.high %v1677_v62, %v1685_v2 }
 0x336   : > { %v12880_v31 = vpop.eup %12879  ;;  %v1613_v45 = vmul.f32 %v1610_v23, %v1605_v36 }
 0x337   : > { %v1620_v35 = vadd.f32 %v1618_v26, %v1612_v29  ;;  %v1606_v37 = vmul.f32 %v12880_v31, %v14058_v13  ;;  %v10721_v13 = vcombine.low %v1642_v33, %v1650_v34  ;;  %v1675_v31 = vld [vmem:[%s13809_s22 + $0x1a0] sm:$0xff]  ;;  %v1676_v33 = vld [vmem:[%s13809_s22 + $0x1a8] sm:$0xff] }
 0x338   : > { %v1621_v53 = vadd.f32 %v1618_v26, %v1613_v45  ;;  %v1684_v34 = vld [vmem:[%s13809_s22 + $0x1e8] sm:$0xff]  ;;  %v10756_v36 = vcombine.high %v1675_v31, %v1683_v32  ;;  %v10755_v42 = vcombine.low %v1675_v31, %v1683_v32  ;;  %v12603_v31 = vld [vmem:[%s13815_s7 + $0x18] sm:$0xff]  }
 0x339   : > { %v14107_v38 = vpack.c.bf16 %v1620_v35, %v1619_v63  ;;  %v1614_v12 = vmul.f32 %v1610_v23, %v1606_v37  ;;  %v1659_v23 = vld [vmem:[%s13809_s22 + $0x120] sm:$0xff]  ;;  %v10758_v37 = vcombine.high %v1676_v33, %v1684_v34  ;;  %v10757_v43 = vcombine.low %v1676_v33, %v1684_v34  ;;  %v12604_v32 = vld [vmem:[%s13815_s7 + $0x98] sm:$0xff]  }
 0x33a   : > { %v10740_v29 = vcombine.high %v1659_v23, %v1667_v24  ;;  %v10739_v63 = vcombine.low %v1659_v23, %v1667_v24  ;;  %v12594_v23 = vld [vmem:[%s13815_s7 + $0xc8] sm:$0xff]   ;;  %v12605_v33 = vld [vmem:[%s13815_s7 + $0x60] sm:$0xff]  }
 0x33b   : > { %10763 = vmatmul.mubr.msk.bf16.vlgmr.msra.gmra.mrb[0].mxu0 %vm1553_vm7, %v14107_v38  ;;  %10765 = vmatmul.mubr.msk.bf16.vlgmr.msra.gmra.mrb[0].mxu1 %vm1553_vm7, %v14107_v38  ;;  %v1622_v46 = vadd.f32 %v1618_v26, %v1614_v12  ;;  %v1668_v26 = vld [vmem:[%s13809_s22 + $0x168] sm:$0xff]  ;;  %v1629_v12 = vld [vmem:[%s13809_s22 + $0x30] sm:$0xff]  ;;  %v12606_v34 = vld [vmem:[%s13815_s7 + $0xe0] sm:$0xff]  }
 0x33c   : > { %2207 = vmatpush1.bf16.msra.mxu0 %v10703_v58  ;;  %2260 = vmatpush1.bf16.msra.mxu1 %v10705_v59  ;;  %v10752_v58 = vcombine.high %v1673_v49, %v1681_v50  ;;  %v10754_v59 = vcombine.high %v1674_v51, %v1682_v52  ;;  %v10742_v30 = vcombine.high %v1660_v25, %v1668_v26  ;;  %v1661_v52 = vld [vmem:[%s13809_s22 + $0x130] sm:$0xff]  ;;  %v12595_v24 = vld [vmem:[%s13815_s7 + $0x8] sm:$0xff]  }
 0x33d   : > { %2208 = vmatprep.subr.bf16.mxu0 %v10720_v39  ;;  %2261 = vmatprep.subr.bf16.mxu1 %v10722_v40  ;;  %v14123_v56 = vpack.c.bf16 %v1622_v46, %v1621_v53  ;;  %v10741_v35 = vcombine.low %v1660_v25, %v1668_v26  ;;  %v1637_v39 = vld [vmem:[%s13809_s22 + $0x70] sm:$0xff]  ;;  %v1630_v40 = vld [vmem:[%s13809_s22 + $0x38] sm:$0xff]  ;;  %v12596_v25 = vld [vmem:[%s13815_s7 + $0x88] sm:$0xff]  }
 0x33e   : > { %2142 = vmatprep.mubr.bf16.mxu0 %v16730_v57  ;;  %2195 = vmatprep.mubr.bf16.mxu1 %v16730_v57  ;;  %v10712_v44 = vcombine.high %v1629_v12, %v1637_v39  ;;  %v10714_v45 = vcombine.high %v1630_v40, %v1638_v41  ;;  %v1646_v46 = vld [vmem:[%s13809_s22 + $0xb8] sm:$0xff]  ;;  %v10713_v49 = vcombine.low %v1630_v40, %v1638_v41  ;;  %v1669_v53 = vld [vmem:[%s13809_s22 + $0x170] sm:$0xff] }
 0x33f   : > { %v10744_v60 = vcombine.high %v1661_v52, %v1669_v53  ;;  %v12598_v26 = vld [vmem:[%s13815_s7 + $0xd0] sm:$0xff]  }
 0x340   : > { %2209 = vmatpush1.bf16.msra.mxu0 %v10719_v0  ;;  %2262 = vmatpush1.bf16.msra.mxu1 %v10721_v13  ;;  %v1645_v0 = vld [vmem:[%s13809_s22 + $0xb0] sm:$0xff] }
 0x341   : > { %2210 = vmatprep.subr.bf16.mxu0 %v10736_v47  ;;  %2263 = vmatprep.subr.bf16.mxu1 %v10738_v48  ;;  %v1653_v13 = vld [vmem:[%s13809_s22 + $0xf0] sm:$0xff]  ;;  %v1654_v47 = vld [vmem:[%s13809_s22 + $0xf8] sm:$0xff]  ;;  %v10711_v48 = vcombine.low %v1629_v12, %v1637_v39  ;;  %v12611_v12 = vld [vmem:[%s13815_s7 + $0x28] sm:$0xff]  }
 0x342   : > { %v10728_v50 = vcombine.high %v1645_v0, %v1653_v13  ;;  %v10730_v51 = vcombine.high %v1646_v46, %v1654_v47  ;;  %v12612_v39 = vld [vmem:[%s13815_s7 + $0xa8] sm:$0xff]   ;;  %v12613_v40 = vld [vmem:[%s13815_s7 + $0x70] sm:$0xff]  }
 0x343   : > { %10764 = vmatmul.mubr.msk.bf16.gmra.mrb[4].mxu0 %vm1553_vm7, %v14123_v56  ;;  %10766 = vmatmul.mubr.msk.bf16.gmra.mrb[4].mxu1 %vm1553_vm7, %v14123_v56  ;;  %v12614_v41 = vld [vmem:[%s13815_s7 + $0xf0] sm:$0xff]  }
 0x344   : > { %2211 = vmatpush1.bf16.msra.mxu0 %v10735_v54  ;;  %2264 = vmatpush1.bf16.msra.mxu1 %v10737_v55  ;;  %v1662_v54 = vld [vmem:[%s13809_s22 + $0x138] sm:$0xff] }
 0x345   : > { %2212 = vmatprep.subr.bf16.mxu0 %v10752_v58  ;;  %2265 = vmatprep.subr.bf16.mxu1 %v10754_v59  ;;  %v1670_v55 = vld [vmem:[%s13809_s22 + $0x178] sm:$0xff]  ;;  %v10727_v58 = vcombine.low %v1645_v0, %v1653_v13  ;;  %v10729_v59 = vcombine.low %v1646_v46, %v1654_v47  ;;  %v12621_v46 = vld [vmem:[%s13815_s7 + $0x140] sm:$0xff]  }
 0x346   : > { %2238 = vmatprep.mubr.bf16.mxu0 %v16730_v57  ;;  %2291 = vmatprep.mubr.bf16.mxu1 %v16730_v57  ;;  %v10746_v61 = vcombine.high %v1662_v54, %v1670_v55  ;;  %v12619_v0 = vld [vmem:[%s13815_s7 + $0x38] sm:$0xff]   ;;  %v12622_v47 = vld [vmem:[%s13815_s7 + $0x1c0] sm:$0xff]  }
 0x347   : > { %v12620_v13 = vld [vmem:[%s13815_s7 + $0xb8] sm:$0xff]  }
 0x348   : > { %2213 = vmatpush1.bf16.msra.mxu0 %v10751_v3  ;;  %2266 = vmatpush1.bf16.msra.mxu1 %v10753_v4  ;;  %v1678_v3 = vld [vmem:[%s13809_s22 + $0x1b8] sm:$0xff] }
 0x349   : > { %2312 = vmatprep.subr.bf16.mxu0 %v10708_v5  ;;  %2365 = vmatprep.subr.bf16.mxu1 %v10710_v7  ;;  %v1686_v4 = vld [vmem:[%s13809_s22 + $0x1f8] sm:$0xff]  ;;  %v10743_v5 = vcombine.low %v1661_v52, %v1669_v53  ;;  %v10745_v7 = vcombine.low %v1662_v54, %v1670_v55 }
 0x34a   : > { %v10762_v14 = vcombine.high %v1678_v3, %v1686_v4  ;;  %v10761_v16 = vcombine.low %v1678_v3, %v1686_v4 }
 0x34b   : > { %10767 = vmatmul.mubr.msk.bf16.vlgmr.msra.gmra.mrb[8].mxu0 %vm1553_vm7, %v14107_v38  ;;  %10769 = vmatmul.mubr.msk.bf16.vlgmr.msra.gmra.mrb[8].mxu1 %vm1553_vm7, %v14107_v38 }
 0x34c   : > { %2313 = vmatpush1.bf16.msra.mxu0 %v10707_v21  ;;  %2366 = vmatpush1.bf16.msra.mxu1 %v10709_v18  ;;  %v12589_v21 = vld [vmem:[%s13815_s7 + $0x40] sm:$0xff]  }
 0x34d   : > { %2314 = vmatprep.subr.bf16.mxu0 %v10724_v19  ;;  %2367 = vmatprep.subr.bf16.mxu1 %v10726_v22  ;;  %v12590_v18 = vld [vmem:[%s13815_s7 + $0xc0] sm:$0xff]  }
 0x34e   : > { %2248 = vmatprep.mubr.bf16.mxu0 %v16730_v57  ;;  %2301 = vmatprep.mubr.bf16.mxu1 %v16730_v57  ;;  %v12591_v19 = vld [vmem:[%s13815_s7] sm:$0xff]  }
 0x34f   : > { %v12592_v22 = vld [vmem:[%s13815_s7 + $0x80] sm:$0xff]  }
 0x350   : > { %2315 = vmatpush1.bf16.msra.mxu0 %v10723_v27  ;;  %2368 = vmatpush1.bf16.msra.mxu1 %v10725_v28  ;;  %v12599_v27 = vld [vmem:[%s13815_s7 + $0x10] sm:$0xff]  }
 0x351   : > { %2316 = vmatprep.subr.bf16.mxu0 %v10740_v29  ;;  %2369 = vmatprep.subr.bf16.mxu1 %v10742_v30  ;;  %v12600_v28 = vld [vmem:[%s13815_s7 + $0x90] sm:$0xff]   ;;  %v12601_v29 = vld [vmem:[%s13815_s7 + $0x58] sm:$0xff]  }
 0x352   : > { %v12602_v30 = vld [vmem:[%s13815_s7 + $0xd8] sm:$0xff]  }
 0x353   : > { %10768 = vmatmul.mubr.msk.bf16.gmra.mrb[12].mxu0 %vm1553_vm7, %v14123_v56  ;;  %10770 = vmatmul.mubr.msk.bf16.gmra.mrb[12].mxu1 %vm1553_vm7, %v14123_v56 }
 0x354   : > { %2317 = vmatpush1.bf16.msra.mxu0 %v10739_v63  ;;  %2370 = vmatpush1.bf16.msra.mxu1 %v10741_v35  ;;  %v12607_v63 = vld [vmem:[%s13815_s7 + $0x20] sm:$0xff]  }
 0x355   : > { %2318 = vmatprep.subr.bf16.mxu0 %v10756_v36  ;;  %2371 = vmatprep.subr.bf16.mxu1 %v10758_v37  ;;  %v12608_v35 = vld [vmem:[%s13815_s7 + $0xa0] sm:$0xff]   ;;  %v12609_v36 = vld [vmem:[%s13815_s7 + $0x68] sm:$0xff]  }
 0x356   : > { %2344 = vmatprep.mubr.bf16.mxu0 %v16730_v57  ;;  %2397 = vmatprep.mubr.bf16.mxu1 %v16730_v57  ;;  %v12610_v37 = vld [vmem:[%s13815_s7 + $0xe8] sm:$0xff]  }
 0x358   : > { %2319 = vmatpush1.bf16.msra.mxu0 %v10755_v42  ;;  %2372 = vmatpush1.bf16.msra.mxu1 %v10757_v43  ;;  %v12615_v42 = vld [vmem:[%s13815_s7 + $0x30] sm:$0xff]  }
 0x359   : > { %2418 = vmatprep.subr.bf16.mxu0 %v10712_v44  ;;  %2471 = vmatprep.subr.bf16.mxu1 %v10714_v45  ;;  %v12616_v43 = vld [vmem:[%s13815_s7 + $0xb0] sm:$0xff]   ;;  %v12617_v44 = vld [vmem:[%s13815_s7 + $0x78] sm:$0xff]  }
 0x35a   : > { %v12618_v45 = vld [vmem:[%s13815_s7 + $0xf8] sm:$0xff]  }
 0x35b   : > { %10771 = vmatmul.mubr.msk.bf16.vlgmr.msra.gmra.mrb[16].mxu0 %vm1553_vm7, %v14107_v38  ;;  %10773 = vmatmul.mubr.msk.bf16.vlgmr.msra.gmra.mrb[16].mxu1 %vm1553_vm7, %v14107_v38 }
 0x35c   : > { %2419 = vmatpush1.bf16.msra.mxu0 %v10711_v48  ;;  %2472 = vmatpush1.bf16.msra.mxu1 %v10713_v49  ;;  %v14232_v48 = vsub.s32 2, %v13783_v1  ;;  %v14235_v49 = vld [vmem:[%s13804_s1] ss:$2 sm:$0xff] }
 0x35d   : > { %2420 = vmatprep.subr.bf16.mxu0 %v10728_v50  ;;  %2473 = vmatprep.subr.bf16.mxu1 %v10730_v51  ;;  %v14238_v50 = vsub.s32 3, %v13783_v1  ;;  %v1697_v51 = vrot.slane %v14235_v49, %v14091_v17  ;;  %v14248_v53 = vrot.slane %v14235_v49, %v14095_v20 }
 0x35e   : > { %2354 = vmatprep.mubr.bf16.mxu0 %v16730_v57  ;;  %2407 = vmatprep.mubr.bf16.mxu1 %v16730_v57  ;;  %16805 = vst [vmem:[#allocation13_spill] sm:$0xff] %v14232_v48  ;;  %v14244_v52 = vrot.slane %v14235_v49, %v14232_v48 }
 0x35f   : > { %16806 = vst [vmem:[#allocation14_spill] sm:$0xff] %v14238_v50  ;;  %v14252_v54 = vrot.slane %v14235_v49, %v14238_v50 }
 0x360   : > { %2421 = vmatpush1.bf16.msra.mxu0 %v10727_v58  ;;  %2474 = vmatpush1.bf16.msra.mxu1 %v10729_v59 }
 0x361   : > { %2422 = vmatprep.subr.bf16.mxu0 %v10744_v60  ;;  %2475 = vmatprep.subr.bf16.mxu1 %v10746_v61 }
 0x363   : > { %10772 = vmatmul.mubr.msk.bf16.gmra.mrb[20].mxu0 %vm1553_vm7, %v14123_v56  ;;  %10774 = vmatmul.mubr.msk.bf16.gmra.mrb[20].mxu1 %vm1553_vm7, %v14123_v56 }
 0x364   : > { %2423 = vmatpush1.bf16.msra.mxu0 %v10743_v5  ;;  %2476 = vmatpush1.bf16.msra.mxu1 %v10745_v7 }
 0x365   : > { %2424 = vmatprep.subr.bf16.mxu0 %v10760_v8  ;;  %2477 = vmatprep.subr.bf16.mxu1 %v10762_v14 }
 0x366   : > { %2450 = vmatprep.mubr.bf16.mxu0 %v16730_v57  ;;  %2503 = vmatprep.mubr.bf16.mxu1 %v16730_v57 }
 0x368   : > { %2425 = vmatpush1.bf16.msra.mxu0 %v10759_v15  ;;  %2478 = vmatpush1.bf16.msra.mxu1 %v10761_v16 }
 0x369   : > { %11727 = vmatprep.subr.bf16.mxu0 %v12589_v21  ;;  %11755 = vmatprep.subr.bf16.mxu1 %v12590_v18 }
 0x36b   : > { %10775 = vmatmul.mubr.msk.bf16.vlgmr.msra.gmra.mrb[24].mxu0 %vm1553_vm7, %v14107_v38  ;;  %10777 = vmatmul.mubr.msk.bf16.vlgmr.msra.gmra.mrb[24].mxu1 %vm1553_vm7, %v14107_v38  ;;  %v12593_v38 = vld [vmem:[%s13815_s7 + $0x48] sm:$0xff]  }
 0x36c   : > { %2460 = vmatprep.mubr.bf16.mxu0 %v16730_v57  ;;  %2513 = vmatprep.mubr.bf16.mxu1 %v16730_v57 }
 0x36d   : > { %11728 = vmatpush3.bf16.msra.mxu0 %v12591_v19  ;;  %11756 = vmatpush3.bf16.msra.mxu1 %v12592_v22 }
 0x36e   : > { %11729 = vmatprep.subr.bf16.mxu0 %v12593_v38  ;;  %11757 = vmatprep.subr.bf16.mxu1 %v12594_v23 }
 0x371   : > { %11730 = vmatpush3.bf16.msra.mxu0 %v12595_v24  ;;  %11758 = vmatpush3.bf16.msra.mxu1 %v12596_v25 }
 0x372   : > { %11759 = vmatprep.subr.bf16.mxu1 %v12598_v26 }
 0x373   : > { %10776 = vmatmul.mubr.msk.bf16.gmra.mrb[28].mxu0 %vm1553_vm7, %v14123_v56  ;;  %10778 = vmatmul.mubr.msk.bf16.gmra.mrb[28].mxu1 %vm1553_vm7, %v14123_v56  ;;  %v12597_v56 = vld [vmem:[%s13815_s7 + $0x50] sm:$0xff]  }
 0x374   : > { %11731 = vmatprep.subr.bf16.mxu0 %v12597_v56 }
 0x375   : > { %11732 = vmatpush3.bf16.msra.mxu0 %v12599_v27  ;;  %11760 = vmatpush3.bf16.msra.mxu1 %v12600_v28 }
 0x376   : > { %11733 = vmatprep.subr.bf16.mxu0 %v12601_v29  ;;  %11761 = vmatprep.subr.bf16.mxu1 %v12602_v30 }
 0x379   : > { %11734 = vmatpush3.bf16.msra.mxu0 %v12603_v31  ;;  %11762 = vmatpush3.bf16.msra.mxu1 %v12604_v32 }
 0x37a   : > { %11735 = vmatprep.subr.bf16.mxu0 %v12605_v33  ;;  %11763 = vmatprep.subr.bf16.mxu1 %v12606_v34 }
 0x37d   : > { %11736 = vmatpush3.bf16.msra.mxu0 %v12607_v63  ;;  %11764 = vmatpush3.bf16.msra.mxu1 %v12608_v35 }
 0x37e   : > { %11737 = vmatprep.subr.bf16.mxu0 %v12609_v36  ;;  %11765 = vmatprep.subr.bf16.mxu1 %v12610_v37 }
 0x381   : > { %11738 = vmatpush3.bf16.msra.mxu0 %v12611_v12  ;;  %11766 = vmatpush3.bf16.msra.mxu1 %v12612_v39 }
 0x382   : > { %11739 = vmatprep.subr.bf16.mxu0 %v12613_v40  ;;  %11767 = vmatprep.subr.bf16.mxu1 %v12614_v41 }
 0x385   : > { %11740 = vmatpush3.bf16.msra.mxu0 %v12615_v42  ;;  %11768 = vmatpush3.bf16.msra.mxu1 %v12616_v43 }
 0x386   : > { %11741 = vmatprep.subr.bf16.mxu0 %v12617_v44  ;;  %11769 = vmatprep.subr.bf16.mxu1 %v12618_v45 }
 0x389   : > { %11742 = vmatpush3.bf16.msra.mxu0 %v12619_v0  ;;  %11770 = vmatpush3.bf16.msra.mxu1 %v12620_v13 }
 0x38a   : > { %11783 = vmatprep.subr.bf16.mxu0 %v12621_v46  ;;  %11811 = vmatprep.subr.bf16.mxu1 %v12622_v47 }
 0x40e   : > { %v2134_v55 = vpop.f32.mrb[0].mxu0  ;;  %v2187_v58 = vpop.f32.mrb[0].mxu1 }
 0x40f   : > { %v14254_v59 = vadd.f32 %v2134_v55, %v1697_v51  ;;  %v14257_v60 = vadd.f32 %v2187_v58, %v14244_v52  ;;  %v2136_v61 = vpop.f32.mrb[1].mxu0  ;;  %v2189_v62 = vpop.f32.mrb[1].mxu1 }
 0x410   : > { %v14260_v2 = vadd.f32 %v2136_v61, %v14248_v53  ;;  %v14263_v3 = vadd.f32 %v2189_v62, %v14252_v54  ;;  %v2138_v4 = vpop.f32.mrb[2].mxu0  ;;  %v2191_v5 = vpop.f32.mrb[2].mxu1  ;;  %v14303_v62 = vsub.s32 4, %v13783_v1 }
 0x411   : > { %v10779_v7 = vmul.f32 -1.442695, %v14254_v59  ;;  %v10781_v8 = vmul.f32 -1.442695, %v14257_v60  ;;  %v14267_v14 = vadd.f32 %v2138_v4, %v1697_v51  ;;  %v14270_v15 = vadd.f32 %v2191_v5, %v14244_v52  ;;  %v2140_v16 = vpop.f32.mrb[3].mxu0  ;;  %v2193_v21 = vpop.f32.mrb[3].mxu1 }
 0x412   : > { %v10780_v18 = vmul.f32 -1.442695, %v14260_v2  ;;  %v10782_v19 = vmul.f32 -1.442695, %v14263_v3  ;;  %v14275_v22 = vadd.f32 %v2140_v16, %v14248_v53  ;;  %v14278_v38 = vadd.f32 %v2193_v21, %v14252_v54  ;;  %16807 = vst [vmem:[#allocation15_spill] sm:$0xff] %v14303_v62 }
 0x413   : > { %12881 = vpow2.f32 %v10779_v7  ;;  %v10795_v23 = vmul.f32 -1.442695, %v14267_v14  ;;  %v10797_v24 = vmul.f32 -1.442695, %v14270_v15  ;;  %v14308_v16 = vsub.s32 6, %v13783_v1 }
 0x414   : > { %12883 = vpow2.f32 %v10781_v8  ;;  %v10796_v25 = vmul.f32 -1.442695, %v14275_v22  ;;  %v10798_v56 = vmul.f32 -1.442695, %v14278_v38  ;;  %v14311_v21 = vsub.s32 5, %v13783_v1 }
 0x415   : > { %12885 = vpow2.f32 %v10780_v18  ;;  %16808 = vst [vmem:[#allocation16_spill] sm:$0xff] %v14308_v16 }
 0x416   : > { %12887 = vpow2.f32 %v10782_v19  ;;  %v2144_v26 = vpop.f32.mrb[4].mxu0  ;;  %v2197_v27 = vpop.f32.mrb[4].mxu1  ;;  %16809 = vst [vmem:[#allocation17_spill] sm:$0xff] %v14311_v21 }
 0x417   : > { %12889 = vpow2.f32 %v10795_v23  ;;  %v14284_v28 = vadd.f32 %v2144_v26, %v1697_v51  ;;  %v14287_v29 = vadd.f32 %v2197_v27, %v14244_v52  ;;  %v2146_v30 = vpop.f32.mrb[5].mxu0  ;;  %v2199_v31 = vpop.f32.mrb[5].mxu1 }
 0x418   : > { %12891 = vpow2.f32 %v10797_v24  ;;  %v14290_v32 = vadd.f32 %v2146_v30, %v14248_v53  ;;  %v14293_v33 = vadd.f32 %v2199_v31, %v14252_v54  ;;  %v2148_v34 = vpop.f32.mrb[6].mxu0  ;;  %v2201_v63 = vpop.f32.mrb[6].mxu1  ;;  %v14316_v24 = vsub.s32 7, %v13783_v1 }
 0x419   : > { %12893 = vpow2.f32 %v10796_v25  ;;  %v10811_v35 = vmul.f32 -1.442695, %v14284_v28  ;;  %v10813_v36 = vmul.f32 -1.442695, %v14287_v29  ;;  %v14297_v37 = vadd.f32 %v2148_v34, %v1697_v51  ;;  %v2150_v12 = vpop.f32.mrb[7].mxu0  ;;  %v2203_v39 = vpop.f32.mrb[7].mxu1 }
 0x41a   : > { %12895 = vpow2.f32 %v10798_v56  ;;  %v10812_v40 = vmul.f32 -1.442695, %v14290_v32  ;;  %v10814_v41 = vmul.f32 -1.442695, %v14293_v33  ;;  %16810 = vst [vmem:[#allocation18_spill] sm:$0xff] %v14316_v24  ;;  %v14319_v31 = vadd.f32 %v2201_v63, %v14244_v52 }
 0x41b   : > { %12897 = vpow2.f32 %v10811_v35  ;;  %v10827_v42 = vmul.f32 -1.442695, %v14297_v37  ;;  %v14323_v34 = vrot.slane %v14235_v49, %v14303_v62  ;;  %v14327_v1 = vrot.slane %v14235_v49, %v14308_v16 }
 0x41c   : > { %12899 = vpow2.f32 %v10813_v36  ;;  %v14334_v52 = vadd.f32 %v2150_v12, %v14248_v53  ;;  %v14338_v63 = vrot.slane %v14235_v49, %v14316_v24  ;;  %v10829_v53 = vmul.f32 -1.442695, %v14319_v31 }
 0x41d   : > { %v12882_v43 = vpop.eup %12881  ;;  %12901 = vpow2.f32 %v10812_v40  ;;  %v14331_v40 = vrot.slane %v14235_v49, %v14311_v21 }
 0x41e   : > { %v12884_v44 = vpop.eup %12883  ;;  %v2716_v45 = vadd.f32 1.0, %v12882_v43  ;;  %12903 = vpow2.f32 %v10814_v41  ;;  %v2240_v0 = vpop.f32.mrb[8].mxu0 }
 0x41f   : > { %v2293_v13 = vpop.f32.mrb[8].mxu1  ;;  %v12886_v46 = vpop.eup %12885  ;;  %v2718_v47 = vadd.f32 1.0, %v12884_v44  ;;  %12905 = vpow2.f32 %v10827_v42  ;;  %v14347_v12 = vadd.f32 %v2240_v0, %v14323_v34 }
 0x420   : > { %v2242_v51 = vpop.f32.mrb[9].mxu0  ;;  %v2295_v55 = vpop.f32.mrb[9].mxu1  ;;  %12907 = vrcp.f32 %v2716_v45  ;;  %v2717_v61 = vadd.f32 1.0, %v12886_v46  ;;  %v14341_v46 = vadd.f32 %v2203_v39, %v14252_v54  ;;  %v14354_v54 = vadd.f32 %v2293_v13, %v14327_v1 }
 0x421   : > { %v12888_v58 = vpop.eup %12887  ;;  %v2244_v4 = vpop.f32.mrb[10].mxu0  ;;  %12909 = vrcp.f32 %v2718_v47  ;;  %v14357_v39 = vadd.f32 %v2242_v51, %v14331_v40 }
 0x422   : > { %v14305_v5 = vpop.f32.mrb[10].mxu1  ;;  %v12890_v7 = vpop.eup %12889  ;;  %v2719_v8 = vadd.f32 1.0, %v12888_v58  ;;  %12911 = vrcp.f32 %v2717_v61  ;;  %v10830_v13 = vmul.f32 -1.442695, %v14341_v46  ;;  %v14371_v51 = vadd.f32 %v2244_v4, %v14323_v34 }
 0x423   : > { %v14313_v18 = vpop.f32.mrb[11].mxu0  ;;  %v12892_v19 = vpop.eup %12891  ;;  %v2732_v23 = vadd.f32 1.0, %v12890_v7 }
 0x424   : > { %v2299_v25 = vpop.f32.mrb[11].mxu1  ;;  %v12894_v56 = vpop.eup %12893  ;;  %12913 = vrcp.f32 %v2719_v8  ;;  %v2734_v26 = vadd.f32 1.0, %v12892_v19  ;;  %v14383_v4 = vadd.f32 %v14313_v18, %v14331_v40 }
 0x425   : > { %v12896_v27 = vpop.eup %12895  ;;  %12915 = vrcp.f32 %v2732_v23  ;;  %v2733_v30 = vadd.f32 1.0, %v12894_v56 }
 0x426   : > { %v12898_v35 = vpop.eup %12897  ;;  %12917 = vrcp.f32 %v2734_v26  ;;  %v2735_v36 = vadd.f32 1.0, %v12896_v27  ;;  %v2250_v43 = vpop.f32.mrb[12].mxu0  ;;  %16812 = vst [vmem:[#allocation20_spill] sm:$0xff] %v14383_v4 }
 0x427   : > { %v12900_v41 = vpop.eup %12899  ;;  %12919 = vrcp.f32 %v2733_v30  ;;  %v2748_v42 = vadd.f32 1.0, %v12898_v35  ;;  %v2303_v47 = vpop.f32.mrb[12].mxu1  ;;  %v10828_v30 = vmul.f32 -1.442695, %v14334_v52  ;;  %v14365_v35 = vadd.f32 %v2295_v55, %v14338_v63 }
 0x428   : > { %v12902_v44 = vpop.eup %12901  ;;  %12921 = vrcp.f32 %v2735_v36  ;;  %v2750_v45 = vadd.f32 1.0, %v12900_v41  ;;  %v14343_v58 = vpop.f32.mrb[13].mxu0  ;;  %v10784_v55 = vmul.f32 -1.442695, %v14357_v39 }
 0x429   : > { %v12904_v61 = vpop.eup %12903  ;;  %12923 = vrcp.f32 %v2748_v42  ;;  %v2749_v7 = vadd.f32 1.0, %v12902_v44  ;;  %v14349_v49 = vpop.f32.mrb[13].mxu1  ;;  %16811 = vst [vmem:[#allocation19_spill] sm:$0xff] %v14365_v35  ;;  %v10783_v44 = vmul.f32 -1.442695, %v14347_v12 }
 0x42a   : > { %v14351_v8 = vpop.f32.mrb[14].mxu0  ;;  %v12906_v19 = vpop.eup %12905  ;;  %12925 = vrcp.f32 %v2750_v45  ;;  %v2751_v23 = vadd.f32 1.0, %v12904_v61  ;;  %v10785_v61 = vmul.f32 -1.442695, %v14354_v54 }
 0x42b   : > { %v14359_v56 = vpop.f32.mrb[14].mxu1  ;;  %v14361_v26 = vpop.f32.mrb[15].mxu0  ;;  %12927 = vrcp.f32 %v2749_v7  ;;  %v2764_v0 = vadd.f32 1.0, %v12906_v19  ;;  %v14378_v7 = vadd.f32 %v14305_v5, %v14327_v1 }
 0x42c   : > { %v12908_v27 = vpop.eup %12907  ;;  %v14367_v36 = vpop.f32.mrb[15].mxu1  ;;  %12929 = vrcp.f32 %v2751_v23  ;;  %v10786_v23 = vmul.f32 -1.442695, %v14365_v35  ;;  %v12626_v35 = vld [vmem:[%s13815_s7 + $0x1c8] sm:$0xff]  }
 0x42d   : > { %v12910_v41 = vpop.eup %12909  ;;  %12931 = vrcp.f32 %v2764_v0  ;;  %v14386_v0 = vadd.f32 %v2299_v25, %v14338_v63  ;;  %v14393_v10 = vmul.f32 %v12908_v27, %v14254_v59  ;;  %v14410_v59 = vadd.f32 %v2250_v43, %v14323_v34 }
 0x42e   : > { %v12912_v42 = vpop.eup %12911  ;;  %12933 = vpow2.f32 %v10829_v53  ;;  %v14388_v53 = vpop.f32.mrb[16].mxu0  ;;  %v14404_v6 = vmul.f32 %v12910_v41, %v14257_v60  ;;  %v10801_v21 = vmul.f32 -1.442695, %v14378_v7  ;;  %v14420_v60 = vadd.f32 %v2303_v47, %v14327_v1 }
 0x42f   : > { %v12914_v45 = vpop.eup %12913  ;;  %12935 = vpow2.f32 %v10828_v30  ;;  %16813 = vst [vmem:[#allocation21_spill] sm:$0xff] %v14386_v0  ;;  %v14390_v57 = vpop.f32.mrb[16].mxu1  ;;  %v10799_v30 = vmul.f32 -1.442695, %v14371_v51  ;;  %16814 = vst [vmem:[#allocation22_spill] sm:$0xff] %v14410_v59 }
 0x430   : > { %v12916_v19 = vpop.eup %12915  ;;  %12937 = vpow2.f32 %v10830_v13  ;;  %v14399_v11 = vpop.f32.mrb[17].mxu0  ;;  %16815 = vst [vmem:[#allocation23_spill] sm:$0xff] %v14420_v60 }
 0x431   : > { %v12918_v9 = vpop.eup %12917  ;;  %v14396_v5 = vmul.f32 %v12916_v19, %v14267_v14  ;;  %v14401_v18 = vpop.f32.mrb[17].mxu1  ;;  %12939 = vpow2.f32 %v10783_v44  ;;  %v10800_v44 = vmul.f32 -1.442695, %v14383_v4 }
 0x432   : > { %v12920_v25 = vpop.eup %12919  ;;  %v14407_v24 = vmul.f32 %v12918_v9, %v14270_v15  ;;  %v14412_v14 = vpop.f32.mrb[18].mxu0  ;;  %12941 = vpow2.f32 %v10785_v61 }
 0x433   : > { %v14414_v27 = vpop.f32.mrb[18].mxu1  ;;  %v12922_v13 = vpop.eup %12921  ;;  %v3228_v19 = vpack.c.bf16 %v14396_v5, %v14393_v10  ;;  %12943 = vpow2.f32 %v10784_v55  ;;  %v10802_v10 = vmul.f32 -1.442695, %v14386_v0  ;;  %v2925_v47 = vmul.f32 %v12920_v25, %v14275_v22 }
 0x434   : > { %v14422_v9 = vpop.f32.mrb[19].mxu0  ;;  %v14424_v15 = vpop.f32.mrb[19].mxu1  ;;  %v3230_v41 = vpack.c.bf16 %v14407_v24, %v14404_v6  ;;  %12945 = vpow2.f32 %v10786_v23  ;;  %v2927_v5 = vmul.f32 %v12922_v13, %v14278_v38  ;;  %v10817_v6 = vmul.f32 -1.442695, %v14420_v60 }
 0x435   : > { %16816 = vst [vmem:[#allocation24_spill] sm:$0xff] %v14424_v15  ;;  %v14426_v43 = vpop.eup %12923  ;;  %12947 = vpow2.f32 %v10799_v30  ;;  %v10815_v15 = vmul.f32 -1.442695, %v14410_v59  ;;  %v2909_v55 = vmul.f32 %v12912_v42, %v14260_v2  ;;  %v2911_v23 = vmul.f32 %v12914_v45, %v14263_v3  ;;  %v14449_v30 = vld [vmem:[%s13804_s1 + $0x10] ss:$2 sm:$0xff]  ;;  %v12623_v45 = vld [vmem:[%s13815_s7 + $0x100] sm:$0xff]  }
 0x436   : > { %v14431_v16 = vpop.eup %12925  ;;  %12949 = vpow2.f32 %v10801_v21  ;;  %v14444_v0 = vpop.f32.mrb[20].mxu0 }
 0x437   : > { %v14434_v61 = vpop.eup %12927  ;;  %12951 = vpow2.f32 %v10800_v44  ;;  %16817 = vst [vmem:[#allocation25_spill] sm:$0xff] %v14444_v0  ;;  %v14446_v22 = vpop.f32.mrb[20].mxu1  ;;  %v3229_v42 = vpack.c.bf16 %v2925_v47, %v2909_v55  ;;  %v3231_v3 = vpack.c.bf16 %v2927_v5, %v2911_v23  ;;  %v12624_v44 = vld [vmem:[%s13815_s7 + $0x180] sm:$0xff]   ;;  %v12625_v0 = vld [vmem:[%s13815_s7 + $0x148] sm:$0xff]   ;;  %v14469_v47 = vrot.slane %v14449_v30, %v14091_v17 }
 0x438   : > { %v14439_v62 = vpop.eup %12929  ;;  %16818 = vst [vmem:[#allocation26_spill] sm:$0xff] %v14446_v22  ;;  %12953 = vpow2.f32 %v10802_v10  ;;  %v14451_v21 = vpop.f32.mrb[21].mxu0  ;;  %v14473_v55 = vrot.slane %v14449_v30, %v14232_v48  ;;  %v14477_v23 = vrot.slane %v14449_v30, %v14095_v20 }
 0x439   : > { %v12932_v24 = vpop.eup %12931  ;;  %16819 = vst [vmem:[#allocation27_spill] sm:$0xff] %v14451_v21  ;;  %v14453_v25 = vpop.f32.mrb[21].mxu1  ;;  %12955 = vpow2.f32 %v10815_v15  ;;  %4064 = vmatprep.mubr.bf16.mxu0 %v3229_v42  ;;  %4113 = vmatprep.mubr.bf16.mxu1 %v3231_v3  ;;  %v12628_v42 = vld [vmem:[%s13815_s7 + $0x188] sm:$0xff]  }
 0x43a   : > { %v12934_v38 = vpop.eup %12933  ;;  %16820 = vst [vmem:[#allocation28_spill] sm:$0xff] %v14453_v25  ;;  %v14457_v60 = vpop.f32.mrb[22].mxu0  ;;  %12957 = vpow2.f32 %v10817_v6  ;;  %4065 = vmatmul.mubr.bf16.vlgmr.msra.gmra.mrb[32].mxu0 %v3228_v19  ;;  %4114 = vmatmul.mubr.bf16.vlgmr.msra.gmra.mrb[32].mxu1 %v3230_v41  ;;  %v14490_v19 = vmul.f32 %v12932_v24, %v14297_v37  ;;  %v14500_v37 = vadd.f32 %v14359_v56, %v14327_v1  ;;  %v12631_v1 = vld [vmem:[%s13815_s7 + $0x110] sm:$0xff]  }
 0x43b   : > { %v12936_v13 = vpop.eup %12935  ;;  %v2766_v2 = vadd.f32 1.0, %v12934_v38  ;;  %v14459_v59 = vpop.f32.mrb[22].mxu1  ;;  %11784 = vmatpush3.bf16.msra.mxu0 %v12623_v45  ;;  %11812 = vmatpush3.bf16.msra.mxu1 %v12624_v44  ;;  %v14504_v24 = vrot.slane %v14449_v30, %v14238_v50  ;;  %v12632_v56 = vld [vmem:[%s13815_s7 + $0x190] sm:$0xff]  }
 0x43c   : > { %v12938_v10 = vpop.eup %12937  ;;  %v2765_v22 = vadd.f32 1.0, %v12936_v13  ;;  %v14463_v4 = vpop.f32.mrb[23].mxu0  ;;  %11785 = vmatprep.subr.bf16.mxu0 %v12625_v0  ;;  %11813 = vmatprep.subr.bf16.mxu1 %v12626_v35  ;;  %v14512_v0 = vmul.f32 %v14426_v43, %v14284_v28 }
 0x43d   : > { %v14465_v21 = vpop.f32.mrb[23].mxu1  ;;  %v12940_v25 = vpop.eup %12939  ;;  %12959 = vrcp.f32 %v2766_v2  ;;  %v2767_v15 = vadd.f32 1.0, %v12938_v10  ;;  %v14481_v2 = vadd.f32 %v14343_v58, %v14331_v40  ;;  %v14494_v10 = vadd.f32 %v14351_v8, %v14323_v34  ;;  %v12629_v58 = vld [vmem:[%s13815_s7 + $0x150] sm:$0xff]  }
 0x43e   : > { %v12942_v5 = vpop.eup %12941  ;;  %12961 = vrcp.f32 %v2765_v22  ;;  %v2720_v6 = vadd.f32 1.0, %v12940_v25  ;;  %v14485_v22 = vadd.f32 %v14349_v49, %v14338_v63  ;;  %v12627_v25 = vld [vmem:[%s13815_s7 + $0x108] sm:$0xff]   ;;  %v12630_v49 = vld [vmem:[%s13815_s7 + $0x1d0] sm:$0xff]   ;;  %v14506_v34 = vpop.f32.mrb[24].mxu0 }
 0x43f   : > { %v12944_v38 = vpop.eup %12943  ;;  %12963 = vrcp.f32 %v2767_v15  ;;  %v2722_v13 = vadd.f32 1.0, %v12942_v5  ;;  %v14508_v8 = vpop.f32.mrb[24].mxu1  ;;  %v14516_v5 = vadd.f32 %v14361_v26, %v14331_v40  ;;  %v10816_v28 = vmul.f32 -1.442695, %v14481_v2  ;;  %11786 = vmatpush3.bf16.msra.mxu0 %v12627_v25  ;;  %11814 = vmatpush3.bf16.msra.mxu1 %v12628_v42 }
 0x440   : > { %v12946_v3 = vpop.eup %12945  ;;  %12965 = vrcp.f32 %v2720_v6  ;;  %v2721_v41 = vadd.f32 1.0, %v12944_v38  ;;  %v12633_v6 = vld [vmem:[%s13815_s7 + $0x158] sm:$0xff]   ;;  %v14521_v38 = vpop.f32.mrb[25].mxu0  ;;  %v10818_v43 = vmul.f32 -1.442695, %v14485_v22  ;;  %11787 = vmatprep.subr.bf16.mxu0 %v12629_v58  ;;  %11815 = vmatprep.subr.bf16.mxu1 %v12630_v49 }
 0x441   : > { %v12948_v45 = vpop.eup %12947  ;;  %12967 = vrcp.f32 %v2722_v13  ;;  %v2723_v44 = vadd.f32 1.0, %v12946_v3  ;;  %v14523_v13 = vpop.f32.mrb[25].mxu1  ;;  %v10833_v42 = vmul.f32 -1.442695, %v14500_v37  ;;  %v10832_v20 = vmul.f32 -1.442695, %v14516_v5 }
 0x442   : > { %v12950_v35 = vpop.eup %12949  ;;  %12969 = vrcp.f32 %v2721_v41  ;;  %v2736_v15 = vadd.f32 1.0, %v12948_v45  ;;  %v14527_v41 = vpop.f32.mrb[26].mxu0  ;;  %v10831_v45 = vmul.f32 -1.442695, %v14494_v10 }
 0x443   : > { %v12952_v3 = vpop.eup %12951  ;;  %12971 = vrcp.f32 %v2723_v44  ;;  %v2738_v17 = vadd.f32 1.0, %v12950_v35  ;;  %v12634_v44 = vld [vmem:[%s13815_s7 + $0x1d8] sm:$0xff]   ;;  %v14533_v35 = vpop.f32.mrb[26].mxu1  ;;  %11788 = vmatpush3.bf16.msra.mxu0 %v12631_v1  ;;  %11816 = vmatpush3.bf16.msra.mxu1 %v12632_v56  ;;  %v2941_v1 = vmul.f32 %v14434_v61, %v14290_v32 }
 0x444   : > { %v12954_v40 = vpop.eup %12953  ;;  %12973 = vrcp.f32 %v2736_v15  ;;  %v2737_v26 = vadd.f32 1.0, %v12952_v3  ;;  %16821 = vst [vmem:[#allocation29_spill] sm:$0xff] %v14533_v35  ;;  %v14535_v50 = vpop.f32.mrb[27].mxu0  ;;  %v14540_v15 = vadd.f32 %v14367_v36, %v14338_v63  ;;  %v14551_v63 = vadd.f32 %v14390_v57, %v14473_v55  ;;  %11789 = vmatprep.subr.bf16.mxu0 %v12633_v6  ;;  %11817 = vmatprep.subr.bf16.mxu1 %v12634_v44  ;;  %v12637_v57 = vld [vmem:[%s13815_s7 + $0x160] sm:$0xff]  }
 0x445   : > { %16822 = vst [vmem:[#allocation30_spill] sm:$0xff] %v14535_v50  ;;  %v12956_v48 = vpop.eup %12955  ;;  %12975 = vrcp.f32 %v2738_v17  ;;  %v2739_v25 = vadd.f32 1.0, %v12954_v40  ;;  %v14542_v58 = vpop.f32.mrb[27].mxu1  ;;  %v14547_v50 = vadd.f32 %v14388_v53, %v14469_v47  ;;  %v14555_v36 = vadd.f32 %v14399_v11, %v14477_v23  ;;  %v12638_v11 = vld [vmem:[%s13815_s7 + $0x1e0] sm:$0xff]  }
 0x446   : > { %16823 = vst [vmem:[#allocation31_spill] sm:$0xff] %v14542_v58  ;;  %v12958_v49 = vpop.eup %12957  ;;  %12977 = vrcp.f32 %v2737_v26  ;;  %v2752_v3 = vadd.f32 1.0, %v12956_v48  ;;  %v12635_v48 = vld [vmem:[%s13815_s7 + $0x118] sm:$0xff]   ;;  %v2942_v53 = vmul.f32 %v14431_v16, %v14287_v29  ;;  %v14573_v29 = vadd.f32 %v14412_v14, %v14469_v47  ;;  %v14575_v16 = vpop.f32.mrb[28].mxu0 }
 0x447   : > { %v12960_v17 = vpop.eup %12959  ;;  %12979 = vrcp.f32 %v2739_v25  ;;  %v2754_v40 = vadd.f32 1.0, %v12958_v49  ;;  %v12636_v26 = vld [vmem:[%s13815_s7 + $0x198] sm:$0xff]   ;;  %v14564_v49 = vadd.f32 %v14401_v18, %v14504_v24  ;;  %v2943_v6 = vmul.f32 %v14439_v62, %v14293_v33  ;;  %v14582_v61 = vpop.f32.mrb[29].mxu0  ;;  %11790 = vmatpush3.bf16.msra.mxu0 %v12635_v48  ;;  %v12639_v33 = vld [vmem:[%s13815_s7 + $0x120] sm:$0xff]   ;;  %v12641_v48 = vld [vmem:[%s13815_s7 + $0x168] sm:$0xff]  }
 0x448   : > { %v12962_v58 = vpop.eup %12961  ;;  %v2958_v25 = vmul.f32 %v12960_v17, %v14319_v31  ;;  %12981 = vrcp.f32 %v2752_v3  ;;  %v14577_v31 = vpop.f32.mrb[28].mxu1  ;;  %v10834_v14 = vmul.f32 -1.442695, %v14540_v15  ;;  %v14589_v3 = vadd.f32 %v14414_v27, %v14473_v55  ;;  %11818 = vmatpush3.bf16.msra.mxu1 %v12636_v26  ;;  %11791 = vmatprep.subr.bf16.mxu0 %v12637_v57  ;;  %v12640_v27 = vld [vmem:[%s13815_s7 + $0x1a0] sm:$0xff]  }
 0x449   : > { %v12964_v35 = vpop.eup %12963  ;;  %v2957_v56 = vmul.f32 %v12962_v58, %v14334_v52  ;;  %12983 = vrcp.f32 %v2754_v40  ;;  %v14584_v52 = vpop.f32.mrb[29].mxu1  ;;  %11819 = vmatprep.subr.bf16.mxu1 %v12638_v11  ;;  %v10790_v57 = vmul.f32 -1.442695, %v14564_v49  ;;  %v10803_v11 = vmul.f32 -1.442695, %v14573_v29 }
 0x44a   : > { %v12966_v18 = vpop.eup %12965  ;;  %v2959_v44 = vmul.f32 %v12964_v35, %v14341_v46  ;;  %12985 = vpow2.f32 %v10816_v28  ;;  %v3246_v32 = vpack.c.bf16 %v2958_v25, %v2942_v53  ;;  %v14592_v62 = vpop.f32.mrb[30].mxu0  ;;  %v14599_v35 = vadd.f32 %v14422_v9, %v14477_v23 }
 0x44b   : > { %v12968_v58 = vpop.eup %12967  ;;  %12987 = vpow2.f32 %v10818_v43  ;;  %v3245_v17 = vpack.c.bf16 %v2957_v56, %v2941_v1  ;;  %v14594_v46 = vpop.f32.mrb[30].mxu1  ;;  %v10787_v43 = vmul.f32 -1.442695, %v14547_v50  ;;  %v10789_v1 = vmul.f32 -1.442695, %v14551_v63  ;;  %11792 = vmatpush3.bf16.msra.mxu0 %v12639_v33  ;;  %v12657_v33 = vld [vmem:[%s13815_s7 + $0x248] sm:$0xff]  }
 0x44c   : > { %v12970_v28 = vpop.eup %12969  ;;  %12989 = vpow2.f32 %v10831_v45  ;;  %v3247_v40 = vpack.c.bf16 %v2959_v44, %v2943_v6  ;;  %v14603_v26 = vpop.f32.mrb[31].mxu0  ;;  %v12642_v45 = vld [vmem:[%s13815_s7 + $0x1e8] sm:$0xff]   ;;  %v10788_v9 = vmul.f32 -1.442695, %v14555_v36  ;;  %v16825_v6 = vpack.c.bf16 %v14490_v19, %v14512_v0  ;;  %11820 = vmatpush3.bf16.msra.mxu1 %v12640_v27  ;;  %11793 = vmatprep.subr.bf16.mxu0 %v12641_v48 }
 0x44d   : > { %v14605_v53 = vpop.f32.mrb[31].mxu1  ;;  %v12972_v25 = vpop.eup %12971  ;;  %12991 = vpow2.f32 %v10833_v42  ;;  %4072 = vmatprep.mubr.bf16.mxu0 %v3245_v17  ;;  %v14616_v44 = vmul.f32 %v12966_v18, %v14347_v12  ;;  %v14624_v19 = vmul.f32 %v12968_v58, %v14354_v54  ;;  %v10804_v12 = vmul.f32 -1.442695, %v14599_v35  ;;  %v12645_v18 = vld [vmem:[%s13815_s7 + $0x170] sm:$0xff]   ;;  %11821 = vmatprep.subr.bf16.mxu1 %v12642_v45 }
 0x44e   : > { %16824 = vst [vmem:[#allocation32_spill] sm:$0xff] %v14605_v53  ;;  %v12974_v56 = vpop.eup %12973  ;;  %12993 = vpow2.f32 %v10832_v20  ;;  %4121 = vmatprep.mubr.bf16.mxu1 %v3247_v40  ;;  %4073 = vmatmul.mubr.bf16.gmra.mrb[36].mxu0 %v16825_v6  ;;  %v10805_v20 = vmul.f32 -1.442695, %v14589_v3  ;;  %v12643_v53 = vld [vmem:[%s13815_s7 + $0x128] sm:$0xff]  }
 0x44f   : > { %v12976_v42 = vpop.eup %12975  ;;  %v14619_v17 = vmul.f32 %v12974_v56, %v14371_v51  ;;  %12995 = vpow2.f32 %v10834_v14  ;;  %4122 = vmatmul.mubr.bf16.gmra.mrb[36].mxu1 %v3246_v32  ;;  %v12644_v51 = vld [vmem:[%s13815_s7 + $0x1a8] sm:$0xff]   ;;  %v2913_v32 = vmul.f32 %v12970_v28, %v14357_v39  ;;  %11794 = vmatpush3.bf16.msra.mxu0 %v12643_v53 }
 0x450   : > { %v12978_v40 = vpop.eup %12977  ;;  %v14627_v0 = vmul.f32 %v12976_v42, %v14378_v7  ;;  %12997 = vpow2.f32 %v10787_v43  ;;  %v16826_v56 = vld [vmem:[#allocation20_spill] sm:$0xff]  ;;  %v12646_v7 = vld [vmem:[%s13815_s7 + $0x1f0] sm:$0xff]   ;;  %v16827_v43 = vld [vmem:[#allocation19_spill] sm:$0xff]  ;;  %11822 = vmatpush3.bf16.msra.mxu1 %v12644_v51  ;;  %11795 = vmatprep.subr.bf16.mxu0 %v12645_v18 }
 0x451   : > { %v12980_v14 = vpop.eup %12979  ;;  %v2929_v54 = vmul.f32 %v12978_v40, %v16826_v56  ;;  %12999 = vpow2.f32 %v10789_v1  ;;  %v2915_v27 = vmul.f32 %v12972_v25, %v16827_v43  ;;  %v16828_v6 = vld [vmem:[#allocation21_spill] sm:$0xff]  ;;  %v12649_v25 = vld [vmem:[%s13815_s7 + $0x178] sm:$0xff]   ;;  %11823 = vmatprep.subr.bf16.mxu1 %v12646_v7 }
 0x452   : > { %v14637_v58 = vpop.eup %12981  ;;  %v2931_v42 = vmul.f32 %v12980_v14, %v16828_v6  ;;  %13001 = vpow2.f32 %v10788_v9  ;;  %v12647_v1 = vld [vmem:[%s13815_s7 + $0x130] sm:$0xff]   ;;  %v12650_v9 = vld [vmem:[%s13815_s7 + $0x1f8] sm:$0xff]  }
 0x453   : > { %v14643_v39 = vpop.eup %12983  ;;  %13003 = vpow2.f32 %v10790_v57  ;;  %v3233_v28 = vpack.c.bf16 %v2929_v54, %v2913_v32  ;;  %v12648_v56 = vld [vmem:[%s13815_s7 + $0x1b0] sm:$0xff]   ;;  %11796 = vmatpush3.bf16.msra.mxu0 %v12647_v1  ;;  %v12651_v51 = vld [vmem:[%s13815_s7 + $0x138] sm:$0xff]   ;;  %v12653_v54 = vld [vmem:[%s13815_s7 + $0x240] sm:$0xff]  }
 0x454   : > { %v12986_v45 = vpop.eup %12985  ;;  %13005 = vpow2.f32 %v10803_v11  ;;  %v3235_v40 = vpack.c.bf16 %v2931_v42, %v2915_v27  ;;  %11824 = vmatpush3.bf16.msra.mxu1 %v12648_v56  ;;  %11797 = vmatprep.subr.bf16.mxu0 %v12649_v25  ;;  %v16830_v1 = vld [vmem:[#allocation16_spill] sm:$0xff]  ;;  %v16831_v25 = vld [vmem:[#allocation17_spill] sm:$0xff] }
 0x455   : > { %v12988_v43 = vpop.eup %12987  ;;  %v2753_v48 = vadd.f32 1.0, %v12986_v45  ;;  %13007 = vpow2.f32 %v10805_v20  ;;  %4162 = vmatprep.mubr.bf16.mxu0 %v3233_v28  ;;  %v12652_v20 = vld [vmem:[%s13815_s7 + $0x1b8] sm:$0xff]   ;;  %11825 = vmatprep.subr.bf16.mxu1 %v12650_v9  ;;  %v14659_v45 = vrot.slane %v14449_v30, %v16830_v1 }
 0x456   : > { %v12990_v57 = vpop.eup %12989  ;;  %v2755_v14 = vadd.f32 1.0, %v12988_v43  ;;  %13009 = vpow2.f32 %v10804_v12  ;;  %4211 = vmatprep.mubr.bf16.mxu1 %v3235_v40  ;;  %v12654_v12 = vld [vmem:[%s13815_s7 + $0x2c0] sm:$0xff]   ;;  %v14663_v43 = vrot.slane %v14449_v30, %v16831_v25  ;;  %v16832_v9 = vld [vmem:[#allocation18_spill] sm:$0xff] }
 0x457   : > { %v12992_v53 = vpop.eup %12991  ;;  %13011 = vrcp.f32 %v2753_v48  ;;  %v2768_v11 = vadd.f32 1.0, %v12990_v57  ;;  %v16829_v48 = vld [vmem:[#allocation15_spill] sm:$0xff]  ;;  %v14667_v57 = vrot.slane %v14449_v30, %v16832_v9  ;;  %11798 = vmatpush3.bf16.msra.mxu0 %v12651_v51  ;;  %v16835_v9 = vld [vmem:[#allocation26_spill] sm:$0xff] }
 0x458   : > { %v12994_v18 = vpop.eup %12993  ;;  %13013 = vrcp.f32 %v2755_v14  ;;  %v2770_v32 = vadd.f32 1.0, %v12992_v53  ;;  %v14655_v28 = vrot.slane %v14449_v30, %v16829_v48  ;;  %v12655_v14 = vld [vmem:[%s13815_s7 + $0x200] sm:$0xff]   ;;  %11826 = vmatpush3.bf16.msra.mxu1 %v12652_v20  ;;  %11839 = vmatprep.subr.bf16.mxu0 %v12653_v54  ;;  %v14682_v25 = vadd.f32 %v16835_v9, %v14473_v55  ;;  %v12665_v1 = vld [vmem:[%s13815_s7 + $0x258] sm:$0xff]  }
 0x459   : > { %v12996_v7 = vpop.eup %12995  ;;  %13015 = vrcp.f32 %v2768_v11  ;;  %v2769_v27 = vadd.f32 1.0, %v12994_v18  ;;  %v16833_v18 = vld [vmem:[#allocation24_spill] sm:$0xff]  ;;  %11867 = vmatprep.subr.bf16.mxu1 %v12654_v12  ;;  %v16839_v9 = vpack.c.bf16 %v14619_v17, %v14616_v44 }
 0x45a   : > { %v12998_v6 = vpop.eup %12997  ;;  %13017 = vrcp.f32 %v2770_v32  ;;  %v2771_v42 = vadd.f32 1.0, %v12996_v7  ;;  %v14672_v32 = vadd.f32 %v16833_v18, %v14504_v24  ;;  %v16834_v7 = vld [vmem:[#allocation25_spill] sm:$0xff]  ;;  %v16837_v54 = vld [vmem:[#allocation28_spill] sm:$0xff] }
 0x45b   : > { %v13000_v40 = vpop.eup %12999  ;;  %13019 = vrcp.f32 %v2769_v27  ;;  %v2724_v56 = vadd.f32 1.0, %v12998_v6  ;;  %v14676_v27 = vadd.f32 %v16834_v7, %v14469_v47  ;;  %v12656_v6 = vld [vmem:[%s13815_s7 + $0x280] sm:$0xff]   ;;  %v12658_v18 = vld [vmem:[%s13815_s7 + $0x2c8] sm:$0xff]   ;;  %v14691_v48 = vadd.f32 %v16837_v54, %v14504_v24  ;;  %4163 = vmatmul.mubr.bf16.vlgmr.msra.gmra.mrb[40].mxu0 %v16839_v9 }
 0x45c   : > { %v13002_v53 = vpop.eup %13001  ;;  %13021 = vrcp.f32 %v2771_v42  ;;  %v2726_v11 = vadd.f32 1.0, %v13000_v40  ;;  %v16836_v42 = vld [vmem:[#allocation27_spill] sm:$0xff]  ;;  %11840 = vmatpush3.bf16.msra.mxu0 %v12655_v14  ;;  %v12660_v44 = vld [vmem:[%s13815_s7 + $0x288] sm:$0xff]   ;;  %v12662_v14 = vld [vmem:[%s13815_s7 + $0x2d0] sm:$0xff]  }
 0x45d   : > { %v13004_v30 = vpop.eup %13003  ;;  %13023 = vrcp.f32 %v2724_v56  ;;  %v2725_v51 = vadd.f32 1.0, %v13002_v53  ;;  %v14686_v40 = vadd.f32 %v16836_v42, %v14477_v23  ;;  %16838 = vst [vmem:[#allocation20_spill] sm:$0xff] %v14691_v48  ;;  %v14695_v56 = vadd.f32 %v14457_v60, %v14469_v47  ;;  %v12659_v47 = vld [vmem:[%s13815_s7 + $0x208] sm:$0xff]   ;;  %11841 = vmatprep.subr.bf16.mxu0 %v12657_v33 }
 0x45e   : > { %v13006_v7 = vpop.eup %13005  ;;  %13025 = vrcp.f32 %v2726_v11  ;;  %v2727_v20 = vadd.f32 1.0, %v13004_v30  ;;  %v14702_v11 = vadd.f32 %v14459_v59, %v14473_v55  ;;  %v14706_v30 = vadd.f32 %v14463_v4, %v14477_v23  ;;  %v12661_v55 = vld [vmem:[%s13815_s7 + $0x250] sm:$0xff]  }
 0x45f   : > { %v13008_v53 = vpop.eup %13007  ;;  %13027 = vrcp.f32 %v2725_v51  ;;  %v2740_v12 = vadd.f32 1.0, %v13006_v7  ;;  %v16841_v60 = vpack.c.bf16 %v14627_v0, %v14624_v19  ;;  %v10806_v42 = vmul.f32 -1.442695, %v14672_v32 }
 0x460   : > { %16840 = vst [vmem:[#allocation19_spill] sm:$0xff] %v14706_v30  ;;  %v13010_v17 = vpop.eup %13009  ;;  %13029 = vrcp.f32 %v2727_v20  ;;  %v2742_v51 = vadd.f32 1.0, %v13008_v53  ;;  %v10819_v59 = vmul.f32 -1.442695, %v14676_v27  ;;  %v10821_v19 = vmul.f32 -1.442695, %v14682_v25  ;;  %11842 = vmatpush3.bf16.msra.mxu0 %v12659_v47 }
 0x461   : > { %4212 = vmatmul.mubr.bf16.vlgmr.msra.gmra.mrb[40].mxu1 %v16841_v60  ;;  %v13012_v4 = vpop.eup %13011  ;;  %13031 = vrcp.f32 %v2740_v12  ;;  %v2741_v23 = vadd.f32 1.0, %v13010_v17  ;;  %v10820_v0 = vmul.f32 -1.442695, %v14686_v40  ;;  %v10822_v20 = vmul.f32 -1.442695, %v14691_v48  ;;  %v12663_v12 = vld [vmem:[%s13815_s7 + $0x210] sm:$0xff]   ;;  %11843 = vmatprep.subr.bf16.mxu0 %v12661_v55 }
 0x462   : > { %11868 = vmatpush3.bf16.msra.mxu1 %v12656_v6  ;;  %v13014_v7 = vpop.eup %13013  ;;  %13033 = vrcp.f32 %v2742_v51  ;;  %v10835_v54 = vmul.f32 -1.442695, %v14695_v56  ;;  %v14723_v33 = vadd.f32 %v14465_v21, %v14504_v24  ;;  %v10837_v9 = vmul.f32 -1.442695, %v14702_v11  ;;  %v16842_v17 = vld [vmem:[#allocation22_spill] sm:$0xff]  ;;  %v16843_v48 = vld [vmem:[#allocation23_spill] sm:$0xff] }
 0x463   : > { %11869 = vmatprep.subr.bf16.mxu1 %v12658_v18  ;;  %v13016_v6 = vpop.eup %13015  ;;  %13035 = vrcp.f32 %v2741_v23  ;;  %v10836_v53 = vmul.f32 -1.442695, %v14706_v30  ;;  %v14729_v18 = vadd.f32 %v14506_v34, %v14655_v28  ;;  %v2944_v51 = vmul.f32 %v14637_v58, %v16842_v17  ;;  %v12664_v23 = vld [vmem:[%s13815_s7 + $0x290] sm:$0xff]  }
 0x464   : > { %v13018_v60 = vpop.eup %13017  ;;  %v2960_v21 = vmul.f32 %v13016_v6, %v14494_v10  ;;  %13037 = vpow2.f32 %v10806_v42  ;;  %v14737_v24 = vadd.f32 %v14508_v8, %v14659_v45  ;;  %v2946_v47 = vmul.f32 %v14643_v39, %v16843_v48  ;;  %v12666_v10 = vld [vmem:[%s13815_s7 + $0x2d8] sm:$0xff]   ;;  %11844 = vmatpush3.bf16.msra.mxu0 %v12663_v12 }
 0x465   : > { %v13020_v34 = vpop.eup %13019  ;;  %v2962_v30 = vmul.f32 %v13018_v60, %v14500_v37  ;;  %13039 = vpow2.f32 %v10819_v59  ;;  %v14746_v58 = vadd.f32 %v14521_v38, %v14663_v43  ;;  %v2945_v8 = vmul.f32 %v13012_v4, %v14481_v2  ;;  %11845 = vmatprep.subr.bf16.mxu0 %v12665_v1 }
 0x466   : > { %11870 = vmatpush3.bf16.msra.mxu1 %v12660_v44  ;;  %v13022_v42 = vpop.eup %13021  ;;  %v2961_v44 = vmul.f32 %v13020_v34, %v14516_v5  ;;  %13041 = vpow2.f32 %v10821_v19  ;;  %v3248_v55 = vpack.c.bf16 %v2960_v21, %v2944_v51  ;;  %v2947_v39 = vmul.f32 %v13014_v7, %v14485_v22  ;;  %v12667_v22 = vld [vmem:[%s13815_s7 + $0x218] sm:$0xff]   ;;  %v12670_v7 = vld [vmem:[%s13815_s7 + $0x2e0] sm:$0xff]  }
 0x467   : > { %11871 = vmatprep.subr.bf16.mxu1 %v12662_v14  ;;  %v13024_v6 = vpop.eup %13023  ;;  %v2963_v37 = vmul.f32 %v13022_v42, %v14540_v15  ;;  %13043 = vpow2.f32 %v10820_v0  ;;  %v3250_v48 = vpack.c.bf16 %v2962_v30, %v2946_v47  ;;  %v10838_v59 = vmul.f32 -1.442695, %v14723_v33  ;;  %v12668_v19 = vld [vmem:[%s13815_s7 + $0x298] sm:$0xff]   ;;  %v12669_v0 = vld [vmem:[%s13815_s7 + $0x260] sm:$0xff]  }
 0x468   : > { %v13026_v38 = vpop.eup %13025  ;;  %13045 = vpow2.f32 %v10822_v20  ;;  %v14756_v2 = vadd.f32 %v14523_v13, %v14667_v57  ;;  %v3249_v5 = vpack.c.bf16 %v2961_v44, %v2945_v8  ;;  %v10791_v15 = vmul.f32 -1.442695, %v14729_v18  ;;  %11846 = vmatpush3.bf16.msra.mxu0 %v12667_v22 }
 0x469   : > { %v13028_v4 = vpop.eup %13027  ;;  %13047 = vpow2.f32 %v10835_v54  ;;  %v3251_v30 = vpack.c.bf16 %v2963_v37, %v2947_v39  ;;  %v10793_v13 = vmul.f32 -1.442695, %v14737_v24  ;;  %v10792_v1 = vmul.f32 -1.442695, %v14746_v58  ;;  %11847 = vmatprep.subr.bf16.mxu0 %v12669_v0  ;;  %v12676_v37 = vld [vmem:[%s13815_s7 + $0x2a8] sm:$0xff]  }
 0x46a   : > { %11872 = vmatpush3.bf16.msra.mxu1 %v12664_v23  ;;  %v14762_v14 = vpop.eup %13029  ;;  %13049 = vpow2.f32 %v10837_v9  ;;  %4170 = vmatprep.mubr.bf16.mxu0 %v3249_v5  ;;  %v14768_v12 = vmul.f32 %v13024_v6, %v14547_v50  ;;  %v10794_v9 = vmul.f32 -1.442695, %v14756_v2  ;;  %v14776_v51 = vmul.f32 %v13026_v38, %v14551_v63  ;;  %v12672_v50 = vld [vmem:[%s13815_s7 + $0x2a0] sm:$0xff]   ;;  %v12674_v63 = vld [vmem:[%s13815_s7 + $0x2e8] sm:$0xff]   ;;  %v12678_v5 = vld [vmem:[%s13815_s7 + $0x2f0] sm:$0xff]  }
 0x46b   : > { %11873 = vmatprep.subr.bf16.mxu1 %v12666_v10  ;;  %v13032_v20 = vpop.eup %13031  ;;  %13051 = vpow2.f32 %v10836_v53  ;;  %4219 = vmatprep.mubr.bf16.mxu1 %v3251_v30  ;;  %v12671_v53 = vld [vmem:[%s13815_s7 + $0x220] sm:$0xff]   ;;  %v2917_v34 = vmul.f32 %v13028_v4, %v14555_v36  ;;  %v12675_v6 = vld [vmem:[%s13815_s7 + $0x228] sm:$0xff]  }
 0x46c   : > { %4171 = vmatmul.mubr.bf16.gmra.mrb[44].mxu0 %v3248_v55  ;;  %v13034_v54 = vpop.eup %13033  ;;  %v14771_v60 = vmul.f32 %v13032_v20, %v14573_v29  ;;  %13053 = vpow2.f32 %v10838_v59  ;;  %4220 = vmatmul.mubr.bf16.gmra.mrb[44].mxu1 %v3250_v48  ;;  %v12673_v29 = vld [vmem:[%s13815_s7 + $0x268] sm:$0xff]   ;;  %v12677_v48 = vld [vmem:[%s13815_s7 + $0x270] sm:$0xff]  }
 0x46d   : > { %v13036_v17 = vpop.eup %13035  ;;  %v14779_v21 = vmul.f32 %v13034_v54, %v14589_v3  ;;  %13055 = vpow2.f32 %v10791_v15  ;;  %11848 = vmatpush3.bf16.msra.mxu0 %v12671_v53  ;;  %v12680_v20 = vld [vmem:[%s13815_s7 + $0x2b0] sm:$0xff]  }
 0x46e   : > { %11874 = vmatpush3.bf16.msra.mxu1 %v12668_v19  ;;  %v13038_v23 = vpop.eup %13037  ;;  %v3236_v47 = vpack.c.bf16 %v14771_v60, %v14768_v12  ;;  %v2933_v10 = vmul.f32 %v13036_v17, %v14599_v35  ;;  %13057 = vpow2.f32 %v10793_v13  ;;  %11849 = vmatprep.subr.bf16.mxu0 %v12673_v29  ;;  %v12679_v19 = vld [vmem:[%s13815_s7 + $0x230] sm:$0xff]  }
 0x46f   : > { %11875 = vmatprep.subr.bf16.mxu1 %v12670_v7  ;;  %v13040_v3 = vpop.eup %13039  ;;  %v3238_v42 = vpack.c.bf16 %v14779_v21, %v14776_v51  ;;  %v2743_v8 = vadd.f32 1.0, %v13038_v23  ;;  %13059 = vpow2.f32 %v10792_v1  ;;  %v14797_v7 = vadd.f32 %v14527_v41, %v14655_v28  ;;  %v12681_v1 = vld [vmem:[%s13815_s7 + $0x278] sm:$0xff]   ;;  %v16844_v53 = vld [vmem:[#allocation29_spill] sm:$0xff] }
 0x470   : > { %v13042_v44 = vpop.eup %13041  ;;  %v2756_v55 = vadd.f32 1.0, %v13040_v3  ;;  %13061 = vpow2.f32 %v10794_v9  ;;  %v3237_v36 = vpack.c.bf16 %v2933_v10, %v2917_v34  ;;  %v14803_v17 = vadd.f32 %v16844_v53, %v14659_v45  ;;  %v12682_v23 = vld [vmem:[%s13815_s7 + $0x2f8] sm:$0xff]   ;;  %v12690_v53 = vld [vmem:[%s13815_s7 + $0x3c8] sm:$0xff]  }
 0x471   : > { %v13044_v39 = vpop.eup %13043  ;;  %13063 = vrcp.f32 %v2743_v8  ;;  %v2758_v35 = vadd.f32 1.0, %v13042_v44  ;;  %11850 = vmatpush3.bf16.msra.mxu0 %v12675_v6  ;;  %v12683_v3 = vld [vmem:[%s13815_s7 + $0x238] sm:$0xff]  }
 0x472   : > { %11876 = vmatpush3.bf16.msra.mxu1 %v12672_v50  ;;  %v13046_v38 = vpop.eup %13045  ;;  %13065 = vrcp.f32 %v2756_v55  ;;  %v2757_v59 = vadd.f32 1.0, %v13044_v39  ;;  %4260 = vmatprep.mubr.bf16.mxu0 %v3237_v36  ;;  %v16845_v50 = vld [vmem:[#allocation30_spill] sm:$0xff]  ;;  %v10807_v55 = vmul.f32 -1.442695, %v14797_v7  ;;  %v16846_v36 = vld [vmem:[#allocation31_spill] sm:$0xff] }
 0x473   : > { %11877 = vmatprep.subr.bf16.mxu1 %v12674_v63  ;;  %v13048_v22 = vpop.eup %13047  ;;  %13067 = vrcp.f32 %v2758_v35  ;;  %v2759_v4 = vadd.f32 1.0, %v13046_v38  ;;  %11851 = vmatprep.subr.bf16.mxu0 %v12677_v48  ;;  %v14807_v29 = vadd.f32 %v16845_v50, %v14663_v43  ;;  %v14814_v6 = vadd.f32 %v16846_v36, %v14667_v57  ;;  %v12684_v39 = vld [vmem:[%s13815_s7 + $0x2b8] sm:$0xff]   ;;  %v12685_v35 = vld [vmem:[%s13815_s7 + $0x340] sm:$0xff]  }
 0x474   : > { %v13050_v15 = vpop.eup %13049  ;;  %13069 = vrcp.f32 %v2757_v59  ;;  %v2772_v30 = vadd.f32 1.0, %v13048_v22  ;;  %v10809_v38 = vmul.f32 -1.442695, %v14803_v17  ;;  %v12686_v22 = vld [vmem:[%s13815_s7 + $0x3c0] sm:$0xff]  }
 0x475   : > { %v13052_v0 = vpop.eup %13051  ;;  %13071 = vrcp.f32 %v2759_v4  ;;  %v2774_v13 = vadd.f32 1.0, %v13050_v15  ;;  %11852 = vmatpush3.bf16.msra.mxu0 %v12679_v19  ;;  %v10808_v59 = vmul.f32 -1.442695, %v14807_v29  ;;  %v14829_v15 = vadd.f32 %v14577_v31, %v14659_v45  ;;  %v16848_v36 = vld [vmem:[#allocation19_spill] sm:$0xff] }
 0x476   : > { %11878 = vmatpush3.bf16.msra.mxu1 %v12676_v37  ;;  %v13054_v54 = vpop.eup %13053  ;;  %13073 = vrcp.f32 %v2772_v30  ;;  %v2773_v9 = vadd.f32 1.0, %v13052_v0  ;;  %11853 = vmatprep.subr.bf16.mxu0 %v12681_v1  ;;  %v14833_v30 = vadd.f32 %v14582_v61, %v14663_v43  ;;  %v14837_v19 = vadd.f32 %v14584_v52, %v14667_v57 }
 0x477   : > { %11879 = vmatprep.subr.bf16.mxu1 %v12678_v5  ;;  %v13056_v41 = vpop.eup %13055  ;;  %13075 = vrcp.f32 %v2774_v13  ;;  %v2775_v34 = vadd.f32 1.0, %v13054_v54  ;;  %v14824_v5 = vadd.f32 %v14575_v16, %v14655_v28  ;;  %v2919_v16 = vmul.f32 %v14762_v14, %v14564_v49  ;;  %v12689_v49 = vld [vmem:[%s13815_s7 + $0x348] sm:$0xff]   ;;  %v12688_v54 = vld [vmem:[%s13815_s7 + $0x380] sm:$0xff]  }
 0x478   : > { %v13058_v10 = vpop.eup %13057  ;;  %13077 = vrcp.f32 %v2773_v9  ;;  %v2728_v63 = vadd.f32 1.0, %v13056_v41  ;;  %v14844_v31 = vadd.f32 %v14592_v62, %v14655_v28  ;;  %v10810_v1 = vmul.f32 -1.442695, %v14814_v6 }
 0x479   : > { %v13060_v8 = vpop.eup %13059  ;;  %13079 = vrcp.f32 %v2775_v34  ;;  %v2730_v44 = vadd.f32 1.0, %v13058_v10  ;;  %11854 = vmatpush3.bf16.msra.mxu0 %v12683_v3  ;;  %v14850_v52 = vadd.f32 %v14594_v46, %v14659_v45  ;;  %v10823_v62 = vmul.f32 -1.442695, %v14824_v5  ;;  %v12691_v34 = vld [vmem:[%s13815_s7 + $0x308] sm:$0xff]  }
 0x47a   : > { %11880 = vmatpush3.bf16.msra.mxu1 %v12680_v20  ;;  %v14818_v37 = vpop.eup %13061  ;;  %v2729_v48 = vadd.f32 1.0, %v13060_v8  ;;  %13081 = vrcp.f32 %v2728_v63  ;;  %v12687_v20 = vld [vmem:[%s13815_s7 + $0x300] sm:$0xff]   ;;  %11895 = vmatprep.subr.bf16.mxu0 %v12685_v35  ;;  %v14856_v28 = vadd.f32 %v14603_v26, %v14663_v43  ;;  %v10825_v46 = vmul.f32 -1.442695, %v14829_v15 }
 0x47b   : > { %11881 = vmatprep.subr.bf16.mxu1 %v12682_v23  ;;  %v13064_v4 = vpop.eup %13063  ;;  %13083 = vrcp.f32 %v2730_v44  ;;  %v10824_v45 = vmul.f32 -1.442695, %v14833_v30  ;;  %v10826_v26 = vmul.f32 -1.442695, %v14837_v19  ;;  %v10839_v43 = vmul.f32 -1.442695, %v14844_v31 }
 0x47c   : > { %v13066_v0 = vpop.eup %13065  ;;  %v2935_v13 = vmul.f32 %v13064_v4, %v14672_v32  ;;  %13085 = vrcp.f32 %v2729_v48  ;;  %4261 = vmatmul.mubr.bf16.vlgmr.msra.gmra.mrb[48].mxu0 %v3236_v47  ;;  %v16847_v23 = vld [vmem:[#allocation32_spill] sm:$0xff]  ;;  %v10841_v47 = vmul.f32 -1.442695, %v14850_v52  ;;  %v2731_v4 = vadd.f32 1.0, %v14818_v37 }
 0x47d   : > { %v13068_v61 = vpop.eup %13067  ;;  %13087 = vpow2.f32 %v10807_v55  ;;  %v14869_v41 = vadd.f32 %v16847_v23, %v14667_v57  ;;  %11896 = vmatpush3.bf16.msra.mxu0 %v12687_v20  ;;  %v2948_v12 = vmul.f32 %v13066_v0, %v14676_v27  ;;  %v12693_v57 = vld [vmem:[%s13815_s7 + $0x350] sm:$0xff]   ;;  %v10840_v27 = vmul.f32 -1.442695, %v14856_v28  ;;  %v12698_v20 = vld [vmem:[%s13815_s7 + $0x3d8] sm:$0xff]   ;;  %v12703_v23 = vld [vmem:[%s13815_s7 + $0x320] sm:$0xff]  }
 0x47e   : > { %11882 = vmatpush3.bf16.msra.mxu1 %v12684_v39  ;;  %v13070_v32 = vpop.eup %13069  ;;  %v3239_v14 = vpack.c.bf16 %v2935_v13, %v2919_v16  ;;  %13089 = vpow2.f32 %v10809_v38  ;;  %11897 = vmatprep.subr.bf16.mxu0 %v12689_v49  ;;  %v2950_v3 = vmul.f32 %v13068_v61, %v14682_v25  ;;  %v16849_v39 = vld [vmem:[#allocation20_spill] sm:$0xff]  ;;  %v12697_v16 = vld [vmem:[%s13815_s7 + $0x358] sm:$0xff]  }
 0x47f   : > { %11923 = vmatprep.subr.bf16.mxu1 %v12686_v22  ;;  %v13072_v9 = vpop.eup %13071  ;;  %13091 = vpow2.f32 %v10808_v59  ;;  %v2949_v55 = vmul.f32 %v13070_v32, %v14686_v40  ;;  %v10842_v40 = vmul.f32 -1.442695, %v14869_v41  ;;  %v12695_v59 = vld [vmem:[%s13815_s7 + $0x310] sm:$0xff]   ;;  %v12699_v49 = vld [vmem:[%s13815_s7 + $0x318] sm:$0xff]  }
 0x480   : > { %v13074_v50 = vpop.eup %13073  ;;  %4309 = vmatprep.mubr.bf16.mxu1 %v3239_v14  ;;  %13093 = vpow2.f32 %v10810_v1  ;;  %v2951_v35 = vmul.f32 %v13072_v9, %v16849_v39  ;;  %v12700_v14 = vld [vmem:[%s13815_s7 + $0x398] sm:$0xff]  }
 0x481   : > { %v13076_v10 = vpop.eup %13075  ;;  %v2964_v60 = vmul.f32 %v13074_v50, %v14695_v56  ;;  %4310 = vmatmul.mubr.bf16.vlgmr.msra.gmra.mrb[48].mxu1 %v3238_v42  ;;  %13095 = vpow2.f32 %v10823_v62  ;;  %v12692_v56 = vld [vmem:[%s13815_s7 + $0x388] sm:$0xff]   ;;  %v12694_v42 = vld [vmem:[%s13815_s7 + $0x3d0] sm:$0xff]   ;;  %11898 = vmatpush3.bf16.msra.mxu0 %v12691_v34 }
 0x482   : > { %v13078_v63 = vpop.eup %13077  ;;  %v2966_v8 = vmul.f32 %v13076_v10, %v14702_v11  ;;  %11924 = vmatpush3.bf16.msra.mxu1 %v12688_v54  ;;  %13097 = vpow2.f32 %v10825_v46  ;;  %11899 = vmatprep.subr.bf16.mxu0 %v12693_v57  ;;  %v12701_v54 = vld [vmem:[%s13815_s7 + $0x360] sm:$0xff]  }
 0x483   : > { %v13080_v44 = vpop.eup %13079  ;;  %v2965_v51 = vmul.f32 %v13078_v63, %v16848_v36  ;;  %11925 = vmatprep.subr.bf16.mxu1 %v12690_v53  ;;  %v3252_v21 = vpack.c.bf16 %v2964_v60, %v2948_v12  ;;  %13099 = vpow2.f32 %v10824_v45  ;;  %v12702_v45 = vld [vmem:[%s13815_s7 + $0x3e0] sm:$0xff]   ;;  %v12705_v60 = vld [vmem:[%s13815_s7 + $0x368] sm:$0xff]  }
 0x484   : > { %v2967_v25 = vmul.f32 %v13080_v44, %v14723_v33  ;;  %v3254_v11 = vpack.c.bf16 %v2966_v8, %v2950_v3  ;;  %v14888_v48 = vpop.eup %13081  ;;  %13101 = vpow2.f32 %v10826_v26  ;;  %v12696_v33 = vld [vmem:[%s13815_s7 + $0x390] sm:$0xff]   ;;  %v12704_v12 = vld [vmem:[%s13815_s7 + $0x3a0] sm:$0xff]   ;;  %v12706_v63 = vld [vmem:[%s13815_s7 + $0x3e8] sm:$0xff]  }
 0x485   : > { %v3253_v38 = vpack.c.bf16 %v2965_v51, %v2949_v55  ;;  %v14892_v22 = vpop.eup %13083  ;;  %13103 = vpow2.f32 %v10839_v43  ;;  %11900 = vmatpush3.bf16.msra.mxu0 %v12695_v59  ;;  %v12707_v44 = vld [vmem:[%s13815_s7 + $0x328] sm:$0xff]  }
 0x486   : > { %v3255_v0 = vpack.c.bf16 %v2967_v25, %v2951_v35  ;;  %11926 = vmatpush3.bf16.msra.mxu1 %v12692_v56  ;;  %v14897_v13 = vpop.eup %13085  ;;  %13105 = vpow2.f32 %v10841_v47  ;;  %11901 = vmatprep.subr.bf16.mxu0 %v12697_v16  ;;  %v12708_v51 = vld [vmem:[%s13815_s7 + $0x3a8] sm:$0xff]   ;;  %v12710_v35 = vld [vmem:[%s13815_s7 + $0x3f0] sm:$0xff]   ;;  %v12713_v16 = vld [vmem:[%s13815_s7 + $0x378] sm:$0xff]  }
 0x487   : > { %4268 = vmatprep.mubr.bf16.mxu0 %v3253_v38  ;;  %11927 = vmatprep.subr.bf16.mxu1 %v12694_v42  ;;  %v13088_v61 = vpop.eup %13087  ;;  %13107 = vpow2.f32 %v10840_v27  ;;  %v12711_v38 = vld [vmem:[%s13815_s7 + $0x330] sm:$0xff]  }
 0x488   : > { %4317 = vmatprep.mubr.bf16.mxu1 %v3255_v0  ;;  %4269 = vmatmul.mubr.bf16.gmra.mrb[52].mxu0 %v3252_v21  ;;  %v13090_v1 = vpop.eup %13089  ;;  %v2744_v37 = vadd.f32 1.0, %v13088_v61  ;;  %13109 = vpow2.f32 %v10842_v40  ;;  %v12709_v21 = vld [vmem:[%s13815_s7 + $0x370] sm:$0xff]   ;;  %v2922_v61 = vmul.f32 %v14892_v22, %v14737_v24  ;;  %v12715_v24 = vld [vmem:[%s13815_s7 + $0x338] sm:$0xff]  }
 0x489   : > { %4318 = vmatmul.mubr.bf16.gmra.mrb[52].mxu1 %v3254_v11  ;;  %v13092_v32 = vpop.eup %13091  ;;  %13111 = vrcp.f32 %v2731_v4  ;;  %v2746_v62 = vadd.f32 1.0, %v13090_v1  ;;  %11902 = vmatpush3.bf16.msra.mxu0 %v12699_v49  ;;  %v2920_v4 = vmul.f32 %v14888_v48, %v14729_v18  ;;  %v2921_v18 = vmul.f32 %v14897_v13, %v14746_v58 }
 0x48a   : > { %11928 = vmatpush3.bf16.msra.mxu1 %v12696_v33  ;;  %v13094_v9 = vpop.eup %13093  ;;  %13113 = vrcp.f32 %v2744_v37  ;;  %v2745_v46 = vadd.f32 1.0, %v13092_v32  ;;  %11903 = vmatprep.subr.bf16.mxu0 %v12701_v54  ;;  %v12712_v33 = vld [vmem:[%s13815_s7 + $0x3b0] sm:$0xff]   ;;  %v12714_v37 = vld [vmem:[%s13815_s7 + $0x3f8] sm:$0xff]  }
 0x48b   : > { %11929 = vmatprep.subr.bf16.mxu1 %v12698_v20  ;;  %v13096_v53 = vpop.eup %13095  ;;  %13115 = vrcp.f32 %v2746_v62  ;;  %v2747_v50 = vadd.f32 1.0, %v13094_v9  ;;  %v12716_v9 = vld [vmem:[%s13815_s7 + $0x3b8] sm:$0xff]  }
 0x48c   : > { %v13098_v26 = vpop.eup %13097  ;;  %13117 = vrcp.f32 %v2745_v46  ;;  %v2760_v43 = vadd.f32 1.0, %v13096_v53 }
 0x48d   : > { %v13100_v34 = vpop.eup %13099  ;;  %13119 = vrcp.f32 %v2747_v50  ;;  %v2762_v10 = vadd.f32 1.0, %v13098_v26  ;;  %11904 = vmatpush3.bf16.msra.mxu0 %v12703_v23 }
 0x48e   : > { %11930 = vmatpush3.bf16.msra.mxu1 %v12700_v14  ;;  %v13102_v47 = vpop.eup %13101  ;;  %13121 = vrcp.f32 %v2760_v43  ;;  %v2761_v57 = vadd.f32 1.0, %v13100_v34  ;;  %11905 = vmatprep.subr.bf16.mxu0 %v12705_v60  ;;  %v16850_v43 = vmov 0.0  }
 0x48f   : > { %11931 = vmatprep.subr.bf16.mxu1 %v12702_v45  ;;  %v13104_v3 = vpop.eup %13103  ;;  %13123 = vrcp.f32 %v2762_v10  ;;  %v2763_v8 = vadd.f32 1.0, %v13102_v47 }
 0x490   : > { %v13106_v27 = vpop.eup %13105  ;;  %13125 = vrcp.f32 %v2761_v57  ;;  %v2776_v56 = vadd.f32 1.0, %v13104_v3 }
 0x491   : > { %v13108_v55 = vpop.eup %13107  ;;  %13127 = vrcp.f32 %v2763_v8  ;;  %v2778_v36 = vadd.f32 1.0, %v13106_v27  ;;  %11906 = vmatpush3.bf16.msra.mxu0 %v12707_v44 }
 0x492   : > { %11932 = vmatpush3.bf16.msra.mxu1 %v12704_v12  ;;  %v13110_v42 = vpop.eup %13109  ;;  %13129 = vrcp.f32 %v2776_v56  ;;  %v2777_v39 = vadd.f32 1.0, %v13108_v55  ;;  %11907 = vmatprep.subr.bf16.mxu0 %v12709_v21 }
 0x493   : > { %11933 = vmatprep.subr.bf16.mxu1 %v12706_v63  ;;  %v13112_v25 = vpop.eup %13111  ;;  %13131 = vrcp.f32 %v2778_v36  ;;  %v2779_v11 = vadd.f32 1.0, %v13110_v42  ;;  %v16852_v63 = vld [vmem:[#allocation13_spill] sm:$0xff] }
 0x494   : > { %v13114_v40 = vpop.eup %13113  ;;  %13133 = vrcp.f32 %v2777_v39  ;;  %v2923_v62 = vmul.f32 %v13112_v25, %v14756_v2 }
 0x495   : > { %v13116_v59 = vpop.eup %13115  ;;  %v2936_v0 = vmul.f32 %v13114_v40, %v14797_v7  ;;  %13135 = vrcp.f32 %v2779_v11  ;;  %11908 = vmatpush3.bf16.msra.mxu0 %v12711_v38 }
 0x496   : > { %11934 = vmatpush3.bf16.msra.mxu1 %v12708_v51  ;;  %v13118_v20 = vpop.eup %13117  ;;  %v2938_v1 = vmul.f32 %v13116_v59, %v14803_v17  ;;  %11909 = vmatprep.subr.bf16.mxu0 %v12713_v16 }
 0x497   : > { %11935 = vmatprep.subr.bf16.mxu1 %v12710_v35  ;;  %v13120_v49 = vpop.eup %13119  ;;  %v3240_v7 = vpack.c.bf16 %v2936_v0, %v2920_v4  ;;  %v2937_v48 = vmul.f32 %v13118_v20, %v14807_v29 }
 0x498   : > { %v13122_v32 = vpop.eup %13121  ;;  %v3242_v14 = vpack.c.bf16 %v2938_v1, %v2922_v61  ;;  %v2939_v54 = vmul.f32 %v13120_v49, %v14814_v6 }
 0x499   : > { %v13124_v22 = vpop.eup %13123  ;;  %v3241_v17 = vpack.c.bf16 %v2937_v48, %v2921_v18  ;;  %11910 = vmatpush3.bf16.msra.mxu0 %v12715_v24  ;;  %v2952_v2 = vmul.f32 %v13122_v32, %v14824_v5 }
 0x49a   : > { %11936 = vmatpush3.bf16.msra.mxu1 %v12712_v33  ;;  %v13126_v46 = vpop.eup %13125  ;;  %v3243_v45 = vpack.c.bf16 %v2939_v54, %v2923_v62  ;;  %v2954_v50 = vmul.f32 %v13124_v22, %v14829_v15 }
 0x49b   : > { %11937 = vmatprep.subr.bf16.mxu1 %v12714_v37  ;;  %v13128_v58 = vpop.eup %13127  ;;  %4358 = vmatprep.mubr.bf16.mxu0 %v3241_v17  ;;  %v2953_v34 = vmul.f32 %v13126_v46, %v14833_v30 }
 0x49c   : > { %v13130_v13 = vpop.eup %13129  ;;  %4407 = vmatprep.mubr.bf16.mxu1 %v3243_v45  ;;  %4359 = vmatmul.mubr.bf16.vlgmr.msra.gmra.mrb[56].mxu0 %v3240_v7  ;;  %v2955_v5 = vmul.f32 %v13128_v58, %v14837_v19 }
 0x49d   : > { %v13132_v29 = vpop.eup %13131  ;;  %v2968_v6 = vmul.f32 %v13130_v13, %v14844_v31 }
 0x49e   : > { %11938 = vmatpush3.bf16.msra.mxu1 %v12716_v9  ;;  %v13134_v53 = vpop.eup %13133  ;;  %v2970_v26 = vmul.f32 %v13132_v29, %v14850_v52  ;;  %v16851_v52 = vmov 0  }
 0x49f   : > { %12261 = vmatprep.subr.bf16.mxu1 %v16850_v43  ;;  %v13136_v23 = vpop.eup %13135  ;;  %v2969_v10 = vmul.f32 %v13134_v53, %v14856_v28  ;;  %v3256_v12 = vpack.c.bf16 %v2968_v6, %v2952_v2  ;;  %v14940_v28 = vld [vmem:[%s13799_s3] sm:$0xff] }
 0x4a0   : > { %v2971_v31 = vmul.f32 %v13136_v23, %v14869_v41  ;;  %v3258_v60 = vpack.c.bf16 %v2970_v26, %v2954_v50  ;;  %v3263_v3 = vrot.slane %v14940_v28, %v16852_v63 }
 0x4a1   : > { %4408 = vmatmul.mubr.bf16.vlgmr.msra.gmra.mrb[56].mxu1 %v3242_v14  ;;  %v3257_v47 = vpack.c.bf16 %v2969_v10, %v2953_v34 }
 0x4a2   : > { %v3259_v15 = vpack.c.bf16 %v2971_v31, %v2955_v5 }
 0x4a3   : > { %4366 = vmatprep.mubr.bf16.mxu0 %v3257_v47 }
 0x4a4   : > { %4415 = vmatprep.mubr.bf16.mxu1 %v3259_v15  ;;  %4367 = vmatmul.mubr.bf16.gmra.mrb[60].mxu0 %v3256_v12 }
 0x4a5   : > { %4588 = vmatprep.mubr.bf16.mxu0 %v16851_v52 }
 0x4a9   : > { %4416 = vmatmul.mubr.bf16.gmra.mrb[60].mxu1 %v3258_v60 }
 0x4aa   : > { %12269 = vmatprep.mubr.msk.bf16.mxu1 %vm13636_vm8, %v16850_v43 }
 0x50d   : > { %v11743_v30 = vpop.f32.mrb[32].mxu0  ;;  %v11771_v57 = vpop.f32.mrb[32].mxu1 }
 0x50e   : > { %v11744_v19 = vpop.f32.mrb[33].mxu0  ;;  %v11772_v8 = vpop.f32.mrb[33].mxu1 }
 0x50f   : > { %v11745_v41 = vadd.f32 %v11744_v19, %v11743_v30  ;;  %v11773_v27 = vadd.f32 %v11772_v8, %v11771_v57  ;;  %v11746_v56 = vpop.f32.mrb[34].mxu0  ;;  %v11774_v44 = vpop.f32.mrb[34].mxu1 }
 0x510   : > { %v11747_v55 = vpop.f32.mrb[35].mxu0  ;;  %v11775_v36 = vpop.f32.mrb[35].mxu1 }
 0x511   : > { %v4067_v51 = vadd.f32 %v11745_v41, %v3263_v3  ;;  %v11748_v21 = vadd.f32 %v11747_v55, %v11746_v56  ;;  %v11776_v42 = vadd.f32 %v11775_v36, %v11774_v44 }
 0x513   : > { %v4116_v39 = vadd.f32 %v11773_v27, %v4067_v51  ;;  %v4070_v35 = vadd.f32 %v11748_v21, %v3263_v3 }
 0x515   : > { %v4119_v25 = vadd.f32 %v11776_v42, %v4070_v35 }
 0x521   : > { %v11749_v11 = vpop.f32.mrb[36].mxu0 }
 0x522   : > { %v11777_v40 = vpop.f32.mrb[36].mxu1  ;;  %v11750_v38 = vpop.f32.mrb[37].mxu0 }
 0x523   : > { %v11751_v59 = vadd.f32 %v11750_v38, %v11749_v11  ;;  %v11778_v4 = vpop.f32.mrb[37].mxu1  ;;  %v11752_v0 = vpop.f32.mrb[38].mxu0 }
 0x524   : > { %v11779_v33 = vadd.f32 %v11778_v4, %v11777_v40  ;;  %v11780_v16 = vpop.f32.mrb[38].mxu1  ;;  %v11753_v20 = vpop.f32.mrb[39].mxu0 }
 0x525   : > { %v4075_v61 = vadd.f32 %v11751_v59, %v3263_v3  ;;  %v11754_v1 = vadd.f32 %v11753_v20, %v11752_v0  ;;  %v11781_v37 = vpop.f32.mrb[39].mxu1 }
 0x526   : > { %v11782_v49 = vadd.f32 %v11781_v37, %v11780_v16 }
 0x527   : > { %v4124_v18 = vadd.f32 %v11779_v33, %v4075_v61  ;;  %v4078_v7 = vadd.f32 %v11754_v1, %v3263_v3 }
 0x529   : > { %v4127_v48 = vadd.f32 %v11782_v49, %v4078_v7 }
 0x52e   : > { %v11799_v32 = vpop.f32.mrb[40].mxu0 }
 0x52f   : > { %v11800_v14 = vpop.f32.mrb[41].mxu0 }
 0x530   : > { %v11801_v54 = vadd.f32 %v11800_v14, %v11799_v32  ;;  %v11802_v22 = vpop.f32.mrb[42].mxu0 }
 0x531   : > { %v11803_v46 = vpop.f32.mrb[43].mxu0 }
 0x532   : > { %v4165_v45 = vadd.f32 %v11801_v54, %v4116_v39  ;;  %v11804_v58 = vadd.f32 %v11803_v46, %v11802_v22 }
 0x534   : > { %v11827_v62 = vpop.f32.mrb[40].mxu1  ;;  %v4168_v6 = vadd.f32 %v11804_v58, %v4119_v25 }
 0x535   : > { %v11828_v24 = vpop.f32.mrb[41].mxu1 }
 0x536   : > { %v11829_v17 = vadd.f32 %v11828_v24, %v11827_v62  ;;  %v11830_v9 = vpop.f32.mrb[42].mxu1 }
 0x537   : > { %v11831_v13 = vpop.f32.mrb[43].mxu1 }
 0x538   : > { %v11832_v29 = vadd.f32 %v11831_v13, %v11830_v9  ;;  %v4214_v2 = vadd.f32 %v11829_v17, %v4165_v45 }
 0x53a   : > { %v4217_v53 = vadd.f32 %v11832_v29, %v4168_v6 }
 0x53f   : > { %v11805_v50 = vpop.f32.mrb[44].mxu0  ;;  %v11833_v26 = vpop.f32.mrb[44].mxu1 }
 0x540   : > { %v11806_v23 = vpop.f32.mrb[45].mxu0  ;;  %v11834_v10 = vpop.f32.mrb[45].mxu1 }
 0x541   : > { %v11807_v34 = vadd.f32 %v11806_v23, %v11805_v50  ;;  %v11808_v12 = vpop.f32.mrb[46].mxu0  ;;  %v11835_v5 = vadd.f32 %v11834_v10, %v11833_v26  ;;  %v11836_v31 = vpop.f32.mrb[46].mxu1 }
 0x542   : > { %v11809_v60 = vpop.f32.mrb[47].mxu0  ;;  %v11837_v30 = vpop.f32.mrb[47].mxu1 }
 0x543   : > { %v4173_v47 = vadd.f32 %v11807_v34, %v4124_v18  ;;  %v11810_v15 = vadd.f32 %v11809_v60, %v11808_v12  ;;  %v11838_v57 = vadd.f32 %v11837_v30, %v11836_v31 }
 0x545   : > { %v4222_v3 = vadd.f32 %v11835_v5, %v4173_v47  ;;  %v4176_v19 = vadd.f32 %v11810_v15, %v4127_v48 }
 0x547   : > { %v4225_v8 = vadd.f32 %v11838_v57, %v4176_v19  ;;  %v13522_v57 = vld [vmem:[#allocation2] sm:$0xff] }
 0x54f   : > { %v11855_v41 = vpop.f32.mrb[48].mxu0 }
 0x550   : > { %v11856_v27 = vpop.f32.mrb[49].mxu0 }
 0x551   : > { %v11857_v44 = vadd.f32 %v11856_v27, %v11855_v41  ;;  %v11858_v55 = vpop.f32.mrb[50].mxu0 }
 0x552   : > { %v11859_v51 = vpop.f32.mrb[51].mxu0 }
 0x553   : > { %v4263_v21 = vadd.f32 %v11857_v44, %v4214_v2  ;;  %v11860_v35 = vadd.f32 %v11859_v51, %v11858_v55 }
 0x554   : > { %v11883_v56 = vpop.f32.mrb[48].mxu1 }
 0x555   : > { %v11884_v36 = vpop.f32.mrb[49].mxu1  ;;  %v4266_v40 = vadd.f32 %v11860_v35, %v4217_v53 }
 0x556   : > { %v11885_v42 = vadd.f32 %v11884_v36, %v11883_v56  ;;  %v11886_v39 = vpop.f32.mrb[50].mxu1  ;;  %v13523_v36 = vld [vmem:[#allocation2 + $0x8] sm:$0xff] }
 0x557   : > { %v11887_v25 = vpop.f32.mrb[51].mxu1 }
 0x558   : > { %v4312_v11 = vadd.f32 %v11885_v42, %v4263_v21  ;;  %v11888_v38 = vadd.f32 %v11887_v25, %v11886_v39 }
 0x55a   : > { %v4315_v59 = vadd.f32 %v11888_v38, %v4266_v40  ;;  %v13524_v38 = vld [vmem:[#allocation2 + $0x10] sm:$0xff] }
 0x55b   : > { %v11861_v4 = vpop.f32.mrb[52].mxu0 }
 0x55c   : > { %v11889_v0 = vpop.f32.mrb[52].mxu1  ;;  %v11862_v33 = vpop.f32.mrb[53].mxu0 }
 0x55d   : > { %v11863_v16 = vadd.f32 %v11862_v33, %v11861_v4  ;;  %v11890_v20 = vpop.f32.mrb[53].mxu1  ;;  %v11864_v61 = vpop.f32.mrb[54].mxu0 }
 0x55e   : > { %v11891_v1 = vadd.f32 %v11890_v20, %v11889_v0  ;;  %v11892_v37 = vpop.f32.mrb[54].mxu1  ;;  %v11865_v49 = vpop.f32.mrb[55].mxu0  ;;  %v13525_v0 = vld [vmem:[#allocation2 + $0x18] sm:$0xff] }
 0x55f   : > { %v4271_v18 = vadd.f32 %v11863_v16, %v4222_v3  ;;  %v11866_v7 = vadd.f32 %v11865_v49, %v11864_v61  ;;  %v11893_v48 = vpop.f32.mrb[55].mxu1 }
 0x560   : > { %v11894_v32 = vadd.f32 %v11893_v48, %v11892_v37 }
 0x561   : > { %v4320_v62 = vadd.f32 %v11891_v1, %v4271_v18  ;;  %v4274_v14 = vadd.f32 %v11866_v7, %v4225_v8 }
 0x563   : > { %v4323_v54 = vadd.f32 %v11894_v32, %v4274_v14 }
 0x56f   : > { %v11911_v24 = vpop.f32.mrb[56].mxu0 }
 0x570   : > { %v11912_v17 = vpop.f32.mrb[57].mxu0 }
 0x571   : > { %v11913_v9 = vadd.f32 %v11912_v17, %v11911_v24  ;;  %v11914_v45 = vpop.f32.mrb[58].mxu0 }
 0x572   : > { %v11915_v29 = vpop.f32.mrb[59].mxu0 }
 0x573   : > { %v4361_v2 = vadd.f32 %v11913_v9, %v4312_v11  ;;  %v11916_v6 = vadd.f32 %v11915_v29, %v11914_v45  ;;  %v12717_v29 = vld [vmem:[%s13821_s0] ss:$8 sps:$4 sm:$0xff]  }
 0x574   : > { %v11939_v22 = vpop.f32.mrb[56].mxu1 }
 0x575   : > { %v11940_v46 = vpop.f32.mrb[57].mxu1  ;;  %v4364_v23 = vadd.f32 %v11916_v6, %v4315_v59  ;;  %v12722_v6 = vld [vmem:[%s13821_s0 + $0x14] ss:$8 sps:$4 sm:$0xff]  }
 0x576   : > { %v11941_v58 = vadd.f32 %v11940_v46, %v11939_v22  ;;  %v11942_v13 = vpop.f32.mrb[58].mxu1 }
 0x577   : > { %v11943_v53 = vpop.f32.mrb[59].mxu1  ;;  %v11917_v12 = vpop.f32.mrb[60].mxu0 }
 0x578   : > { %v11944_v50 = vadd.f32 %v11943_v53, %v11942_v13  ;;  %v4410_v26 = vadd.f32 %v11941_v58, %v4361_v2  ;;  %v11918_v31 = vpop.f32.mrb[61].mxu0  ;;  %v12719_v2 = vld [vmem:[%s13821_s0 + $0x4] ss:$8 sps:$4 sm:$0xff]  }
 0x579   : > { %v11919_v47 = vadd.f32 %v11918_v31, %v11917_v12  ;;  %v11920_v30 = vpop.f32.mrb[62].mxu0  ;;  %4556 = vmatprep.subr.bf16.mxu0 %v12719_v2  ;;  %v12723_v53 = vld [vmem:[%s13826_s2] sm:$0xff]   ;;  %v12731_v12 = vld [vmem:[%s13826_s2 + $0x10] sm:$0xff]   ;;  %v1547_v2 = vld [vmem:[%s13799_s3 + $0x8] sm:$0xff] }
 0x57a   : > { %v4424_v34 = vmul.f32 0.5, %v4410_v26  ;;  %v4413_v10 = vadd.f32 %v11944_v50, %v4364_v23  ;;  %v11921_v41 = vpop.f32.mrb[63].mxu0  ;;  %4557 = vmatpush1.bf16.msra.mxu0 %v12717_v29  ;;  %v12720_v50 = vld [vmem:[%s13821_s0 + $0x10] ss:$8 sps:$4 sm:$0xff]   ;;  %12262 = vmatpush3.bf16.msra.mxu1 %v12723_v53  ;;  %v12726_v26 = vld [vmem:[%s13821_s0 + $0x24] ss:$8 sps:$4 sm:$0xff]  }
 0x57b   : > { %v4369_v27 = vadd.f32 %v11919_v47, %v4320_v62  ;;  %v11922_v56 = vadd.f32 %v11921_v41, %v11920_v30  ;;  %4558 = vmatprep.subr.bf16.mxu0 %v12722_v6  ;;  %v12727_v23 = vld [vmem:[%s13826_s2 + $0x8] sm:$0xff]   ;;  %12263 = vmatprep.subr.bf16.mxu1 %v16850_v43  ;;  %v12732_v47 = vld [vmem:[%s13826_s2 + $0x18] sm:$0xff]   ;;  %s13639_s2 = smov 48  }
 0x57c   : > { %v11945_v5 = vpop.f32.mrb[60].mxu1  ;;  %v4425_v60 = vmul.f32 0.5, %v4413_v10  ;;  %v14944_v3 = vadd.f32 %v13522_v57, %v4424_v34  ;;  %v12724_v34 = vld [vmem:[%s13821_s0 + $0x20] ss:$8 sps:$4 sm:$0xff]   ;;  %v12730_v10 = vld [vmem:[%s13821_s0 + $0x34] ss:$8 sps:$4 sm:$0xff]  }
 0x57d   : > { %v11946_v15 = vpop.f32.mrb[61].mxu1  ;;  %v4372_v39 = vadd.f32 %v11922_v56, %v4323_v54  ;;  %v4610_v30 = vld [vmem:[%s16854_s26 + $0x8] sm:$0xff] }
 0x57e   : > { %v11947_v19 = vadd.f32 %v11946_v15, %v11945_v5  ;;  %v11948_v8 = vpop.f32.mrb[62].mxu1  ;;  %v4432_v55 = vsel %vm1553_vm7, %v14944_v3, 0.0  ;;  %v14948_v51 = vadd.f32 %v13523_v36, %v4425_v60  ;;  %4559 = vmatpush1.bf16.msra.mxu0 %v12720_v50  ;;  %12264 = vmatpush3.bf16.msra.mxu1 %v12727_v23  ;;  %v16853_v5 = vld [vmem:[#allocation16_spill] sm:$0xff]  ;;  %v12728_v60 = vld [vmem:[%s13821_s0 + $0x30] ss:$8 sps:$4 sm:$0xff]   ;;  %s13638_s0 = smov 112  }
 0x57f   : > { %v11949_v44 = vpop.f32.mrb[63].mxu1  ;;  %4433 = vadd.xlane.f32.xlu0 %v4432_v55  ;;  %4560 = vmatprep.subr.bf16.mxu0 %v12726_v26  ;;  %v4699_v31 = vrot.slane %v14940_v28, %v16853_v5  ;;  %v4609_v15 = vld [vmem:[%s16854_s26] sm:$0xff]  ;;  %v16857_v6 = vld [vmem:[#allocation17_spill] sm:$0xff] }
 0x580   : > { %v11950_v21 = vadd.f32 %v11949_v44, %v11948_v8  ;;  %v4418_v42 = vadd.f32 %v11947_v19, %v4369_v27  ;;  %v4435_v35 = vsel %vm1553_vm7, %v14948_v51, 0.0  ;;  %12265 = vmatprep.subr.bf16.mxu1 %v16850_v43  ;;  %v4619_v57 = vpack.c.bf16 %v4610_v30, %v4609_v15  ;;  %v16858_v26 = vld [vmem:[#allocation12_spill] sm:$0xff] }
 0x581   : > { %4436 = vadd.xlane.f32.xlu1 %v4435_v35  ;;  %v4691_v53 = vrot.slane %v14940_v28, %v16857_v6  ;;  %v4719_v23 = vrot.slane %v1547_v2, %v16858_v26 }
 0x582   : > { %v4426_v25 = vmul.f32 0.5, %v4418_v42  ;;  %v4421_v11 = vadd.f32 %v11950_v21, %v4372_v39  ;;  %4561 = vmatpush1.bf16.msra.mxu0 %v12724_v34  ;;  %12266 = vmatpush3.bf16.msra.mxu1 %v12731_v12 }
 0x583   : > { %4562 = vmatprep.subr.bf16.mxu0 %v12730_v10  ;;  %12267 = vmatprep.subr.bf16.mxu1 %v16850_v43  ;;  %v16859_v10 = vld [vmem:[#allocation18_spill] sm:$0xff] }
 0x584   : > { %v4427_v40 = vmul.f32 0.5, %v4421_v11  ;;  %v14952_v59 = vadd.f32 %v13524_v38, %v4426_v25  ;;  %v16855_v25 = vld [vmem:[#allocation14_spill] sm:$0xff]  ;;  %v4711_v12 = vrot.slane %v14940_v28, %v16859_v10 }
 0x585   : > { %v4487_v11 = vrot.slane %v14940_v28, %v16855_v25 }
 0x586   : > { %v4438_v4 = vsel %vm1553_vm7, %v14952_v59, 0.0  ;;  %v14956_v33 = vadd.f32 %v13525_v0, %v4427_v40  ;;  %4563 = vmatpush1.bf16.msra.mxu0 %v12728_v60  ;;  %12268 = vmatpush3.bf16.msra.mxu1 %v12732_v47  ;;  %v16856_v0 = vld [vmem:[#allocation15_spill] sm:$0xff]  ;;  %v4731_v60 = vrot.slane %v1547_v2, %v16852_v63 }
 0x587   : > { %4439 = vadd.xlane.f32.xlu0 %v4438_v4  ;;  %12279 = vmatprep.subr.bf16.mxu0 %v16850_v43 }
 0x588   : > { %v4441_v16 = vsel %vm1553_vm7, %v14956_v33, 0.0 }
 0x589   : > { %4442 = vadd.xlane.f32.xlu1 %v4441_v16  ;;  %12270 = vmatmul.mubr.msk.bf16.vlgmr.msra.gmra.mrb[64].mxu1 %vm1553_vm7, %v4619_v57  ;;  %v4495_v16 = vrot.slane %v14940_v28, %v16856_v0 }
 0x60c   : > { %v4434_v20 = vpop.xlane.xlu0 %4433 }
 0x60d   : > { %v4444_v61 = vmul.f32 0.015625, %v4434_v20 }
 0x60e   : > { %v4437_v1 = vpop.xlane.xlu1 %4436 }
 0x60f   : > { %v14961_v37 = vsub.f32 %v14944_v3, %v4444_v61  ;;  %v4445_v49 = vmul.f32 0.015625, %v4437_v1 }
 0x611   : > { %v14964_v18 = vsub.f32 %v14948_v51, %v4445_v49  ;;  %v4452_v7 = vmul.f32 %v14961_v37, %v14961_v37 }
 0x613   : > { %v4456_v48 = vsel %vm1553_vm7, %v4452_v7, 0.0  ;;  %v4453_v32 = vmul.f32 %v14964_v18, %v14964_v18 }
 0x614   : > { %4457 = vadd.xlane.f32.xlu0 %v4456_v48  ;;  %v4440_v62 = vpop.xlane.xlu0 %4439 }
 0x615   : > { %v4446_v14 = vmul.f32 0.015625, %v4440_v62  ;;  %v4459_v54 = vsel %vm1553_vm7, %v4453_v32, 0.0 }
 0x616   : > { %4460 = vadd.xlane.f32.xlu1 %v4459_v54  ;;  %v4443_v24 = vpop.xlane.xlu1 %4442 }
 0x617   : > { %v14973_v22 = vsub.f32 %v14952_v59, %v4446_v14  ;;  %v4447_v17 = vmul.f32 0.015625, %v4443_v24 }
 0x619   : > { %v14976_v9 = vsub.f32 %v14956_v33, %v4447_v17  ;;  %v4454_v46 = vmul.f32 %v14973_v22, %v14973_v22 }
 0x61b   : > { %v4462_v45 = vsel %vm1553_vm7, %v4454_v46, 0.0  ;;  %v4455_v58 = vmul.f32 %v14976_v9, %v14976_v9 }
 0x61c   : > { %4463 = vadd.xlane.f32.xlu0 %v4462_v45 }
 0x61d   : > { %v4465_v13 = vsel %vm1553_vm7, %v4455_v58, 0.0 }
 0x61e   : > { %4466 = vadd.xlane.f32.xlu1 %v4465_v13 }
 0x632   : > { %4701 = vrot.lane.b32.xlu0 %v4699_v31, %s13637_s29 }
 0x6a1   : > { %v4458_v19 = vpop.xlane.xlu0 %4457 }
 0x6a2   : > { %v4468_v8 = vmul.f32 0.015625, %v4458_v19 }
 0x6a3   : > { %v4461_v41 = vpop.xlane.xlu1 %4460 }
 0x6a4   : > { %v4472_v27 = vadd.f32 1e-05, %v4468_v8  ;;  %v4469_v56 = vmul.f32 0.015625, %v4461_v41 }
 0x6a6   : > { %13137 = vrsqrt.f32 %v4472_v27  ;;  %v4473_v44 = vadd.f32 1e-05, %v4469_v56 }
 0x6a8   : > { %13139 = vrsqrt.f32 %v4473_v44 }
 0x6a9   : > { %v4464_v55 = vpop.xlane.xlu0 %4463 }
 0x6aa   : > { %v4470_v36 = vmul.f32 0.015625, %v4464_v55 }
 0x6ab   : > { %v4467_v21 = vpop.xlane.xlu1 %4466 }
 0x6ac   : > { %v4474_v42 = vadd.f32 1e-05, %v4470_v36  ;;  %v4471_v39 = vmul.f32 0.015625, %v4467_v21 }
 0x6ad   : > { %v4702_v34 = vpop.permute.xlu0 %4701 }
 0x6ae   : > { %13141 = vrsqrt.f32 %v4474_v42  ;;  %v4475_v35 = vadd.f32 1e-05, %v4471_v39 }
 0x6b0   : > { %v13138_v40 = vpop.eup %13137  ;;  %13143 = vrsqrt.f32 %v4475_v35 }
 0x6b1   : > { %v4480_v38 = vmul.f32 %v13138_v40, %v14961_v37 }
 0x6b2   : > { %v13140_v4 = vpop.eup %13139 }
 0x6b3   : > { %v4488_v20 = vmul.f32 %v4487_v11, %v4480_v38  ;;  %v4481_v61 = vmul.f32 %v13140_v4, %v14964_v18 }
 0x6b5   : > { %v4489_v1 = vmul.f32 %v4487_v11, %v4481_v61  ;;  %v4496_v49 = vadd.f32 %v4495_v16, %v4488_v20 }
 0x6b7   : > { %v4497_v7 = vadd.f32 %v4495_v16, %v4489_v1 }
 0x6b8   : > { %v13142_v48 = vpop.eup %13141 }
 0x6b9   : > { %v4482_v32 = vmul.f32 %v13142_v48, %v14973_v22  ;;  %v4508_v62 = vpack.c.bf16 %v4497_v7, %v4496_v49  ;;  %v4681_v22 = vpop.f32.mrb[64].mxu1 }
 0x6ba   : > { %v13144_v14 = vpop.eup %13143  ;;  %v12271_v45 = vpop.f32.mrb[65].mxu1 }
 0x6bb   : > { %v4483_v54 = vmul.f32 %v13144_v14, %v14976_v9  ;;  %10979 = vmatmul.mubr.msk.bf16.vlgmr.msra.gmra.mrb[64].mxu0 %vm1553_vm7, %v4508_v62  ;;  %v4490_v37 = vmul.f32 %v4487_v11, %v4482_v32  ;;  %v4684_v58 = vpop.f32.mrb[66].mxu1 }
 0x6bc   : > { %4598 = vmatprep.mubr.bf16.mxu0 %v16851_v52  ;;  %v15025_v9 = vpack.c.bf16 %v4684_v58, %v4681_v22  ;;  %v12272_v13 = vpop.f32.mrb[67].mxu1 }
 0x6bd   : > { %v4491_v24 = vmul.f32 %v4487_v11, %v4483_v54  ;;  %v4498_v17 = vadd.f32 %v4495_v16, %v4490_v37 }
 0x6be   : > { %12469 = vmatprep.subr.msk.bf16.mxu1 %vm4739_vm9, %v15025_v9  ;;  %v4747_v29 = vsel %vm4739_vm9, %v15025_v9, 0 }
 0x6bf   : > { %v4499_v46 = vadd.f32 %v4495_v16, %v4491_v24  ;;  %12274 = vmatpush3.bf16.xpose.msra.mxu1 %v4747_v29 }
 0x6c0   : > { %12285 = vmatprep.subr.bf16.mxu1 %v16850_v43 }
 0x6c1   : > { %v4509_v18 = vpack.c.bf16 %v4499_v46, %v4498_v17 }
 0x6c3   : > { %10980 = vmatmul.mubr.msk.bf16.gmra.mrb[68].mxu0 %vm1553_vm7, %v4509_v18 }
 0x6c4   : > { %12281 = vmatprep.mubr.msk.bf16.mxu0 %vm13636_vm8, %v16850_v43 }
 0x78e   : > { %v4590_v50 = vpop.f32.mrb[64].mxu0 }
 0x78f   : > { %v4692_v31 = vadd.f32 %v4691_v53, %v4590_v50  ;;  %v4592_v47 = vpop.f32.mrb[65].mxu0  ;;  %v4704_v57 = vadd.f32 %v4702_v34, %v4590_v50 }
 0x790   : > { %v4594_v15 = vpop.f32.mrb[66].mxu0  ;;  %v4712_v27 = vadd.f32 %v4711_v12, %v4592_v47 }
 0x791   : > { %v4693_v30 = vadd.f32 %v4691_v53, %v4594_v15  ;;  %v4705_v19 = vadd.f32 %v4702_v34, %v4594_v15  ;;  %v4596_v8 = vpop.f32.mrb[67].mxu0  ;;  %v4720_v41 = vadd.f32 %v4719_v23, %v4692_v31  ;;  %v4732_v44 = vadd.f32 %v4731_v60, %v4692_v31 }
 0x792   : > { %v4713_v56 = vadd.f32 %v4711_v12, %v4596_v8 }
 0x793   : > { %v4721_v55 = vadd.f32 %v4719_v23, %v4693_v30  ;;  %v15039_v36 = vpack.c.bf16 %v4705_v19, %v4704_v57  ;;  %v4733_v21 = vadd.f32 %v4731_v60, %v4693_v30 }
 0x794   : > { %v15041_v42 = vpack.c.bf16 %v4713_v56, %v4712_v27 }
 0x795   : > { %v15043_v28 = vpack.c.bf16 %v4721_v55, %v4720_v41  ;;  %v15045_v39 = vpack.c.bf16 %v4733_v21, %v4732_v44  ;;  %4799 = vrot.lane.b32.xlu1 %v15039_v36, %s13637_s29 }
 0x796   : > { %v4600_v35 = vpop.f32.mrb[68].mxu0 }
 0x797   : > { %v4694_v11 = vadd.f32 %v4691_v53, %v4600_v35  ;;  %v4602_v40 = vpop.f32.mrb[69].mxu0  ;;  %12275 = vmatprep.mubr.msk.bf16.mxu1 %vm4739_vm9, %v15045_v39  ;;  %v4706_v4 = vadd.f32 %v4702_v34, %v4600_v35 }
 0x798   : > { %v4604_v38 = vpop.f32.mrb[70].mxu0  ;;  %v4714_v49 = vadd.f32 %v4711_v12, %v4602_v40 }
 0x799   : > { %v4695_v16 = vadd.f32 %v4691_v53, %v4604_v38  ;;  %v4707_v20 = vadd.f32 %v4702_v34, %v4604_v38  ;;  %v4606_v61 = vpop.f32.mrb[71].mxu0  ;;  %v4722_v1 = vadd.f32 %v4719_v23, %v4694_v11  ;;  %v4734_v48 = vadd.f32 %v4731_v60, %v4694_v11 }
 0x79a   : > { %v4715_v7 = vadd.f32 %v4711_v12, %v4606_v61 }
 0x79b   : > { %v4723_v32 = vadd.f32 %v4719_v23, %v4695_v16  ;;  %v15051_v62 = vpack.c.bf16 %v4707_v20, %v4706_v4  ;;  %v4735_v14 = vadd.f32 %v4731_v60, %v4695_v16  ;;  %v16860_v60 = vld [vmem:[#allocation8_spill] sm:$0xff] }
 0x79c   : > { %v15053_v54 = vpack.c.bf16 %v4715_v7, %v4714_v49 }
 0x79d   : > { %v15055_v37 = vpack.c.bf16 %v4723_v32, %v4722_v1  ;;  %v15057_v24 = vpack.c.bf16 %v4735_v14, %v4734_v48  ;;  %4849 = vrot.lane.b32.xlu1 %v15051_v62, %s13637_s29 }
 0x79f   : > { %12276 = vmatmul.mubr.msk.bf16.vlgmr.msra.gmra.mrb[68].mxu1 %vm4739_vm9, %v15057_v24 }
 0x7a0   : > { %12287 = vmatprep.mubr.msk.bf16.mxu1 %vm13636_vm8, %v16850_v43 }
 0x807   : > { %v4800_v17 = vpop.permute.xlu1 %4799 }
 0x808   : > { %v4805_v46 = vsel %vm4739_vm9, %v4800_v17, 0 }
 0x809   : > { %12280 = vmatpush3.bf16.xpose.msra.mxu0 %v4805_v46 }
 0x80a   : > { %12291 = vmatprep.subr.bf16.mxu0 %v16850_v43 }
 0x80f   : > { %v4850_v18 = vpop.permute.xlu1 %4849 }
 0x810   : > { %v4855_v22 = vsel %vm4739_vm9, %v4850_v18, 0  ;;  %12282 = vmatmul.mubr.msk.bf16.vlgmr.msra.gmra.mrb[72].mxu0 %vm4739_vm9, %v15043_v28 }
 0x811   : > { %12286 = vmatpush3.bf16.xpose.msra.mxu1 %v4855_v22  ;;  %12292 = vmatpush3.bf16.msra.mxu0 %v15041_v42 }
 0x812   : > { %12297 = vmatprep.subr.bf16.mxu1 %v16850_v43  ;;  %12293 = vmatprep.mubr.msk.bf16.mxu0 %vm13636_vm8, %v16850_v43 }
 0x818   : > { %12288 = vmatmul.mubr.msk.bf16.vlgmr.msra.gmra.mrb[72].mxu1 %vm4739_vm9, %v15055_v37 }
 0x819   : > { %12298 = vmatpush3.bf16.msra.mxu1 %v15053_v54  ;;  %12299 = vmatprep.mubr.msk.bf16.mxu1 %vm13636_vm8, %v16850_v43 }
 0x81a   : > { %12309 = vmatprep.subr.bf16.mxu1 %v16850_v43 }
 0x872   : > { %v12277_v45 = vpop.f32.mrb[68].mxu1 }
 0x873   : > { %v4783_v58 = vpop.f32.mrb[69].mxu1 }
 0x874   : > { %v12278_v13 = vpop.f32.mrb[70].mxu1 }
 0x875   : > { %v4786_v29 = vpop.f32.mrb[71].mxu1 }
 0x8e3   : > { %v4841_v2 = vpop.f32.mrb[72].mxu0 }
 0x8e4   : > { %v4842_v53 = vadd.f32 %v4841_v2, %v4783_v58  ;;  %v12283_v50 = vpop.f32.mrb[73].mxu0 }
 0x8e5   : > { %v4844_v23 = vpop.f32.mrb[74].mxu0 }
 0x8e6   : > { %v4898_v34 = vmul.f32 0.25, %v4842_v53  ;;  %v4845_v12 = vadd.f32 %v4844_v23, %v4786_v29  ;;  %v12284_v31 = vpop.f32.mrb[75].mxu0 }
 0x8e8   : > { %v4902_v47 = vadd.f32 %v4898_v34, %v16860_v60  ;;  %v4899_v15 = vmul.f32 0.25, %v4845_v12 }
 0x8ea   : > { %v4903_v30 = vadd.f32 %v4899_v15, %v16860_v60  ;;  %v4906_v57 = vsel %vm4739_vm9, %v4902_v47, -inf }
 0x8eb   : > { %4907 = vmax.xlane.f32.xlu1 %v4906_v57  ;;  %v4891_v19 = vpop.f32.mrb[72].mxu1 }
 0x8ec   : > { %v4892_v8 = vadd.f32 %v12277_v45, %v4891_v19  ;;  %v12289_v41 = vpop.f32.mrb[73].mxu1  ;;  %v4909_v27 = vsel %vm4739_vm9, %v4903_v30, -inf }
 0x8ed   : > { %4910 = vmax.xlane.f32.xlu0 %v4909_v27  ;;  %v4894_v56 = vpop.f32.mrb[74].mxu1 }
 0x8ee   : > { %v4900_v44 = vmul.f32 0.25, %v4892_v8  ;;  %v4895_v55 = vadd.f32 %v12278_v13, %v4894_v56  ;;  %v12290_v21 = vpop.f32.mrb[75].mxu1 }
 0x8f0   : > { %v4904_v35 = vadd.f32 %v4900_v44, %v16860_v60  ;;  %v4901_v11 = vmul.f32 0.25, %v4895_v55 }
 0x8f2   : > { %v4905_v40 = vadd.f32 %v4901_v11, %v16860_v60  ;;  %v4912_v38 = vsel %vm4739_vm9, %v4904_v35, -inf }
 0x8f3   : > { %4913 = vmax.xlane.f32.xlu0 %v4912_v38 }
 0x8f4   : > { %v4915_v4 = vsel %vm4739_vm9, %v4905_v40, -inf }
 0x8f7   : > { %4916 = vmax.xlane.f32.xlu0 %v4915_v4 }
 0x978   : > { %v4908_v16 = vpop.xlane.xlu1 %4907 }
 0x979   : > { %v4918_v20 = vsub.f32 %v4902_v47, %v4908_v16 }
 0x97a   : > { %v4911_v61 = vpop.xlane.xlu0 %4910 }
 0x97b   : > { %v4922_v1 = vmul.f32 1.442695, %v4918_v20  ;;  %v4919_v49 = vsub.f32 %v4903_v30, %v4911_v61 }
 0x97d   : > { %13145 = vpow2.f32 %v4922_v1  ;;  %v4924_v7 = vmul.f32 1.442695, %v4919_v49 }
 0x97f   : > { %13147 = vpow2.f32 %v4924_v7 }
 0x980   : > { %v4914_v48 = vpop.xlane.xlu0 %4913 }
 0x981   : > { %v4920_v29 = vsub.f32 %v4904_v35, %v4914_v48 }
 0x983   : > { %v4926_v2 = vmul.f32 1.442695, %v4920_v29 }
 0x984   : > { %v4917_v32 = vpop.xlane.xlu0 %4916 }
 0x985   : > { %v4921_v14 = vsub.f32 %v4905_v40, %v4917_v32 }
 0x987   : > { %v13146_v17 = vpop.eup %13145  ;;  %v4928_v46 = vmul.f32 1.442695, %v4921_v14 }
 0x988   : > { %v4930_v18 = vsel %vm4739_vm9, %v13146_v17, 0.0 }
 0x989   : > { %v13148_v22 = vpop.eup %13147  ;;  %13149 = vpow2.f32 %v4928_v46  ;;  %4931 = vadd.xlane.f32.xlu1 %v4930_v18 }
 0x98a   : > { %v4933_v45 = vsel %vm4739_vm9, %v13148_v22, 0.0  ;;  %13151 = vpow2.f32 %v4926_v2 }
 0x98b   : > { %4934 = vadd.xlane.f32.xlu0 %v4933_v45 }
 0x993   : > { %v13150_v58 = vpop.eup %13149 }
 0x994   : > { %v4939_v13 = vsel %vm4739_vm9, %v13150_v58, 0.0  ;;  %v13152_v53 = vpop.eup %13151 }
 0x995   : > { %4940 = vadd.xlane.f32.xlu0 %v4939_v13  ;;  %v4936_v50 = vsel %vm4739_vm9, %v13152_v53, 0.0 }
 0x99a   : > { %5049 = vrot.lane.b32.xlu1 %v15025_v9, %s13638_s0 }
 0x9ab   : > { %5044 = vrot.lane.b32.xlu0 %v15045_v39, %s13638_s0 }
 0x9af   : > { %5110 = vrot.lane.b32.xlu0 %v15043_v28, %s13638_s0 }
 0x9be   : > { %4937 = vadd.xlane.f32.xlu1 %v4936_v50 }
 0x9cf   : > { %5112 = vrot.lane.b32.xlu1 %v15039_v36, %s13639_s2 }
 0x9d3   : > { %5046 = vrot.lane.b32.xlu1 %v15057_v24, %s13638_s0 }
 0x9d7   : > { %5164 = vrot.lane.b32.xlu1 %v15051_v62, %s13639_s2 }
 0x9db   : > { %5162 = vrot.lane.b32.xlu1 %v15055_v37, %s13638_s0 }
 0xa16   : > { %v4932_v23 = vpop.xlane.xlu1 %4931 }
 0xa17   : > { %13153 = vrcp.f32 %v4932_v23 }
 0xa18   : > { %v4935_v34 = vpop.xlane.xlu0 %4934 }
 0xa19   : > { %13155 = vrcp.f32 %v4935_v34 }
 0xa1a   : > { %v5050_v12 = vpop.permute.xlu1 %5049 }
 0xa1b   : > { %12470 = vmatprep.subr.msk.bf16.mxu0 %vm4739_vm9, %v5050_v12  ;;  %v5058_v8 = vsel %vm4739_vm9, %v5050_v12, 0 }
 0xa21   : > { %v13154_v31 = vpop.eup %13153 }
 0xa22   : > { %v4941_v47 = vpop.xlane.xlu0 %4940  ;;  %v4946_v30 = vmul.f32 %v13154_v31, %v13146_v17 }
 0xa23   : > { %v13156_v15 = vpop.eup %13155  ;;  %13157 = vrcp.f32 %v4941_v47 }
 0xa24   : > { %v4947_v57 = vmul.f32 %v13156_v15, %v13148_v22 }
 0xa26   : > { %v4950_v19 = vpack.c.bf16 %v4947_v57, %v4946_v30  ;;  %v5045_v41 = vpop.permute.xlu0 %5044 }
 0xa28   : > { %12294 = vmatmul.mubr.msk.bf16.vlgmr.msra.gmra.mrb[76].mxu0 %vm4739_vm9, %v4950_v19 }
 0xa29   : > { %12304 = vmatpush3.bf16.xpose.msra.mxu0 %v5058_v8  ;;  %12305 = vmatprep.mubr.msk.bf16.mxu0 %vm4739_vm9, %v5045_v41 }
 0xa2a   : > { %12315 = vmatprep.subr.bf16.mxu0 %v16850_v43  ;;  %v5111_v61 = vpop.permute.xlu0 %5110 }
 0xa2d   : > { %v13158_v55 = vpop.eup %13157 }
 0xa2e   : > { %v4949_v35 = vmul.f32 %v13158_v55, %v13150_v58 }
 0xa4b   : > { %v4938_v27 = vpop.xlane.xlu1 %4937 }
 0xa4c   : > { %13159 = vrcp.f32 %v4938_v27 }
 0xa4f   : > { %v5113_v56 = vpop.permute.xlu1 %5112 }
 0xa50   : > { %v5118_v16 = vsel %vm4739_vm9, %v5113_v56, 0 }
 0xa53   : > { %v5047_v44 = vpop.permute.xlu1 %5046 }
 0xa54   : > { %12306 = vmatmul.mubr.msk.bf16.vlgmr.msra.gmra.mrb[80].mxu0 %vm4739_vm9, %v5047_v44 }
 0xa55   : > { %12317 = vmatprep.mubr.msk.bf16.mxu0 %vm13636_vm8, %v16850_v43 }
 0xa56   : > { %v13160_v21 = vpop.eup %13159 }
 0xa57   : > { %v4948_v11 = vmul.f32 %v13160_v21, %v13152_v53  ;;  %v5165_v40 = vpop.permute.xlu1 %5164 }
 0xa58   : > { %v5170_v38 = vsel %vm4739_vm9, %v5165_v40, 0 }
 0xa59   : > { %12316 = vmatpush3.bf16.xpose.msra.mxu0 %v5170_v38  ;;  %v4951_v4 = vpack.c.bf16 %v4949_v35, %v4948_v11 }
 0xa5a   : > { %12327 = vmatprep.subr.bf16.mxu0 %v16850_v43 }
 0xa5b   : > { %12300 = vmatmul.mubr.msk.bf16.vlgmr.msra.gmra.mrb[76].mxu1 %vm4739_vm9, %v4951_v4  ;;  %v5163_v20 = vpop.permute.xlu1 %5162 }
 0xa5c   : > { %12310 = vmatpush3.bf16.xpose.msra.mxu1 %v5118_v16  ;;  %12311 = vmatprep.mubr.msk.bf16.mxu1 %vm13636_vm8, %v16850_v43 }
 0xa5d   : > { %12321 = vmatprep.subr.bf16.mxu1 %v16850_v43 }
 0xa60   : > { %12318 = vmatmul.mubr.msk.bf16.vlgmr.msra.gmra.mrb[84].mxu0 %vm4739_vm9, %v5163_v20 }
 0xa61   : > { %12329 = vmatprep.mubr.msk.bf16.mxu0 %vm13636_vm8, %v16850_v43 }
 0xa63   : > { %12312 = vmatmul.mubr.msk.bf16.vlgmr.msra.gmra.mrb[80].mxu1 %vm4739_vm9, %v5111_v61 }
 0xa64   : > { %12323 = vmatprep.mubr.msk.bf16.mxu1 %vm13636_vm8, %v16850_v43 }
 0xafb   : > { %v15127_v1 = vpop.f32.mrb[76].mxu0 }
 0xafc   : > { %v12295_v49 = vpop.f32.mrb[77].mxu0 }
 0xafd   : > { %v15129_v7 = vpop.f32.mrb[78].mxu0 }
 0xafe   : > { %v12296_v48 = vpop.f32.mrb[79].mxu0 }
 0xb27   : > { %v12307_v32 = vpop.f32.mrb[80].mxu0 }
 0xb28   : > { %v5094_v14 = vpop.f32.mrb[81].mxu0 }
 0xb29   : > { %v12308_v17 = vpop.f32.mrb[82].mxu0 }
 0xb2a   : > { %v5097_v46 = vpop.f32.mrb[83].mxu0 }
 0xb2e   : > { %v15131_v18 = vpop.f32.mrb[76].mxu1 }
 0xb2f   : > { %v12301_v22 = vpop.f32.mrb[77].mxu1 }
 0xb30   : > { %v15133_v45 = vpop.f32.mrb[78].mxu1 }
 0xb31   : > { %v12302_v58 = vpop.f32.mrb[79].mxu1 }
 0xb33   : > { %v5206_v13 = vpop.f32.mrb[84].mxu0 }
 0xb34   : > { %v5207_v29 = vadd.f32 %v12307_v32, %v5206_v13  ;;  %v12319_v2 = vpop.f32.mrb[85].mxu0 }
 0xb35   : > { %v5209_v53 = vpop.f32.mrb[86].mxu0 }
 0xb36   : > { %v5210_v50 = vadd.f32 %v12308_v17, %v5209_v53  ;;  %v5154_v23 = vpop.f32.mrb[80].mxu1  ;;  %v12320_v34 = vpop.f32.mrb[87].mxu0  ;;  %v5215_v15 = vmul.f32 0.25, %v5207_v29 }
 0xb37   : > { %v5155_v12 = vadd.f32 %v5154_v23, %v5094_v14  ;;  %v12313_v31 = vpop.f32.mrb[81].mxu1 }
 0xb38   : > { %v5157_v47 = vpop.f32.mrb[82].mxu1  ;;  %v5219_v27 = vadd.f32 %v5215_v15, %v16860_v60  ;;  %v5216_v56 = vmul.f32 0.25, %v5210_v50 }
 0xb39   : > { %v5213_v30 = vmul.f32 0.25, %v5155_v12  ;;  %v5158_v57 = vadd.f32 %v5157_v47, %v5097_v46  ;;  %v12314_v19 = vpop.f32.mrb[83].mxu1 }
 0xb3a   : > { %v5220_v35 = vadd.f32 %v5216_v56, %v16860_v60  ;;  %v5227_v11 = vsel %vm4739_vm9, %v5219_v27, -inf }
 0xb3b   : > { %v5217_v8 = vadd.f32 %v5213_v30, %v16860_v60  ;;  %v5214_v41 = vmul.f32 0.25, %v5158_v57 }
 0xb3c   : > { %v5230_v40 = vsel %vm4739_vm9, %v5220_v35, -inf }
 0xb3d   : > { %v5218_v44 = vadd.f32 %v5214_v41, %v16860_v60  ;;  %v5221_v55 = vsel %vm4739_vm9, %v5217_v8, -inf }
 0xb3e   : > { %5222 = vmax.xlane.f32.xlu0 %v5221_v55 }
 0xb3f   : > { %v5224_v21 = vsel %vm4739_vm9, %v5218_v44, -inf }
 0xb40   : > { %5225 = vmax.xlane.f32.xlu1 %v5224_v21 }
 0xb42   : > { %5228 = vmax.xlane.f32.xlu0 %v5227_v11 }
 0xb46   : > { %5231 = vmax.xlane.f32.xlu0 %v5230_v40 }
 0xb51   : > { %5316 = vrot.lane.b32.xlu1 %v15053_v54, %s13638_s0 }
 0xb55   : > { %5367 = vrot.lane.b32.xlu1 %v15025_v9, %s13640_s6 }
 0xb59   : > { %5429 = vrot.lane.b32.xlu1 %v15039_v36, %s13641_s17 }
 0xbcb   : > { %v5223_v38 = vpop.xlane.xlu0 %5222 }
 0xbcc   : > { %v5233_v4 = vsub.f32 %v5217_v8, %v5223_v38 }
 0xbcd   : > { %v5226_v16 = vpop.xlane.xlu1 %5225 }
 0xbce   : > { %v5237_v20 = vmul.f32 1.442695, %v5233_v4  ;;  %v5234_v61 = vsub.f32 %v5218_v44, %v5226_v16 }
 0xbcf   : > { %v5229_v49 = vpop.xlane.xlu0 %5228 }
 0xbd0   : > { %13161 = vpow2.f32 %v5237_v20  ;;  %v5239_v48 = vmul.f32 1.442695, %v5234_v61  ;;  %v5235_v32 = vsub.f32 %v5219_v27, %v5229_v49 }
 0xbd1   : > { %v5317_v14 = vpop.permute.xlu1 %5316 }
 0xbd2   : > { %13163 = vpow2.f32 %v5239_v48  ;;  %v5241_v17 = vmul.f32 1.442695, %v5235_v32  ;;  %12328 = vmatpush3.bf16.msra.mxu0 %v5317_v14 }
 0xbd3   : > { %v5232_v46 = vpop.xlane.xlu0 %5231  ;;  %12339 = vmatprep.subr.bf16.mxu0 %v16850_v43 }
 0xbd4   : > { %13165 = vpow2.f32 %v5241_v17  ;;  %v5236_v22 = vsub.f32 %v5220_v35, %v5232_v46 }
 0xbd5   : > { %v5368_v31 = vpop.permute.xlu1 %5367 }
 0xbd6   : > { %v5243_v58 = vmul.f32 1.442695, %v5236_v22  ;;  %v5376_v11 = vsel %vm4739_vm9, %v5368_v31, 0 }
 0xbd8   : > { %13167 = vpow2.f32 %v5243_v58 }
 0xbd9   : > { %v5430_v47 = vpop.permute.xlu1 %5429 }
 0xbda   : > { %v13162_v13 = vpop.eup %13161  ;;  %v5435_v61 = vsel %vm4739_vm9, %v5430_v47, 0 }
 0xbdb   : > { %v5245_v29 = vsel %vm4739_vm9, %v13162_v13, 0.0 }
 0xbdc   : > { %v13164_v2 = vpop.eup %13163  ;;  %5246 = vadd.xlane.f32.xlu0 %v5245_v29 }
 0xbdd   : > { %v5248_v53 = vsel %vm4739_vm9, %v13164_v2, 0.0 }
 0xbde   : > { %v13166_v50 = vpop.eup %13165  ;;  %5249 = vadd.xlane.f32.xlu1 %v5248_v53 }
 0xbdf   : > { %v5251_v23 = vsel %vm4739_vm9, %v13166_v50, 0.0 }
 0xbe0   : > { %5252 = vadd.xlane.f32.xlu0 %v5251_v23 }
 0xbe2   : > { %v13168_v34 = vpop.eup %13167 }
 0xbe3   : > { %v5254_v12 = vsel %vm4739_vm9, %v13168_v34, 0.0 }
 0xbe4   : > { %5255 = vadd.xlane.f32.xlu1 %v5254_v12 }
 0xbf5   : > { %5365 = vrot.lane.b32.xlu1 %v15057_v24, %s13640_s6 }
 0xbf6   : > { %5268 = vrot.lane.b32.xlu0 %v15041_v42, %s13638_s0 }
 0xbf9   : > { %5427 = vrot.lane.b32.xlu1 %v15043_v28, %s13640_s6 }
 0xbfa   : > { %5363 = vrot.lane.b32.xlu0 %v15045_v39, %s13640_s6 }
 0xbfe   : > { %5480 = vrot.lane.b32.xlu0 %v15051_v62, %s13641_s17 }
 0xc02   : > { %5478 = vrot.lane.b32.xlu0 %v15055_v37, %s13640_s6 }
 0xc69   : > { %v5247_v15 = vpop.xlane.xlu0 %5246 }
 0xc6a   : > { %13169 = vrcp.f32 %v5247_v15 }
 0xc6b   : > { %v5250_v30 = vpop.xlane.xlu1 %5249 }
 0xc6c   : > { %13171 = vrcp.f32 %v5250_v30 }
 0xc6d   : > { %v5253_v57 = vpop.xlane.xlu0 %5252 }
 0xc6e   : > { %13173 = vrcp.f32 %v5253_v57 }
 0xc71   : > { %v5269_v19 = vpop.permute.xlu0 %5268  ;;  %v5256_v8 = vpop.xlane.xlu1 %5255 }
 0xc72   : > { %13175 = vrcp.f32 %v5256_v8  ;;  %12322 = vmatpush3.bf16.msra.mxu1 %v5269_v19 }
 0xc73   : > { %12471 = vmatprep.subr.msk.bf16.mxu1 %vm4739_vm9, %v5368_v31 }
 0xc74   : > { %v13170_v41 = vpop.eup %13169 }
 0xc75   : > { %v5261_v56 = vmul.f32 %v13170_v41, %v13162_v13  ;;  %v5364_v35 = vpop.permute.xlu0 %5363  ;;  %v5366_v49 = vpop.permute.xlu1 %5365 }
 0xc76   : > { %v13172_v27 = vpop.eup %13171 }
 0xc77   : > { %v5262_v44 = vmul.f32 %v13172_v27, %v13164_v2 }
 0xc78   : > { %v13174_v21 = vpop.eup %13173 }
 0xc79   : > { %v5265_v55 = vpack.c.bf16 %v5262_v44, %v5261_v56  ;;  %v5263_v38 = vmul.f32 %v13174_v21, %v13166_v50  ;;  %v5481_v20 = vpop.permute.xlu0 %5480  ;;  %v5428_v32 = vpop.permute.xlu1 %5427 }
 0xc7a   : > { %v5486_v48 = vsel %vm4739_vm9, %v5481_v20, 0 }
 0xc7b   : > { %12324 = vmatmul.mubr.msk.bf16.vlgmr.msra.gmra.mrb[84].mxu1 %vm4739_vm9, %v5265_v55 }
 0xc7c   : > { %v13176_v40 = vpop.eup %13175  ;;  %12334 = vmatpush3.bf16.xpose.msra.mxu1 %v5376_v11  ;;  %12335 = vmatprep.mubr.msk.bf16.mxu1 %vm4739_vm9, %v5364_v35 }
 0xc7d   : > { %v5264_v4 = vmul.f32 %v13176_v40, %v13168_v34  ;;  %12345 = vmatprep.subr.bf16.mxu1 %v16850_v43  ;;  %v5479_v14 = vpop.permute.xlu0 %5478 }
 0xc7f   : > { %v5266_v16 = vpack.c.bf16 %v5264_v4, %v5263_v38 }
 0xc81   : > { %12330 = vmatmul.mubr.msk.bf16.vlgmr.msra.gmra.mrb[88].mxu0 %vm4739_vm9, %v5266_v16 }
 0xc82   : > { %12340 = vmatpush3.bf16.xpose.msra.mxu0 %v5435_v61  ;;  %12341 = vmatprep.mubr.msk.bf16.mxu0 %vm13636_vm8, %v16850_v43 }
 0xc83   : > { %12336 = vmatmul.mubr.msk.bf16.vlgmr.msra.gmra.mrb[88].mxu1 %vm4739_vm9, %v5366_v49  ;;  %12351 = vmatprep.subr.bf16.mxu0 %v16850_v43 }
 0xc84   : > { %12346 = vmatpush3.bf16.xpose.msra.mxu1 %v5486_v48  ;;  %12347 = vmatprep.mubr.msk.bf16.mxu1 %vm13636_vm8, %v16850_v43 }
 0xc85   : > { %12357 = vmatprep.subr.bf16.mxu1 %v16850_v43 }
 0xc89   : > { %12342 = vmatmul.mubr.msk.bf16.vlgmr.msra.gmra.mrb[92].mxu0 %vm4739_vm9, %v5428_v32 }
 0xc8a   : > { %12353 = vmatprep.mubr.msk.bf16.mxu0 %vm13636_vm8, %v16850_v43 }
 0xc8b   : > { %12348 = vmatmul.mubr.msk.bf16.vlgmr.msra.gmra.mrb[92].mxu1 %vm4739_vm9, %v5479_v14 }
 0xc8c   : > { %12359 = vmatprep.mubr.msk.bf16.mxu1 %vm13636_vm8, %v16850_v43 }
 0xd4e   : > { %v15187_v17 = vpop.f32.mrb[84].mxu1 }
 0xd4f   : > { %v12325_v46 = vpop.f32.mrb[85].mxu1 }
 0xd50   : > { %v15189_v22 = vpop.f32.mrb[86].mxu1 }
 0xd51   : > { %v12559_v58 = vpack.i.bf16 %v15189_v22, %v15187_v17  ;;  %v12326_v13 = vpop.f32.mrb[87].mxu1 }
 0xd54   : > { %v15193_v29 = vpop.f32.mrb[88].mxu0 }
 0xd55   : > { %v12331_v2 = vpop.f32.mrb[89].mxu0 }
 0xd56   : > { %v15195_v53 = vpop.f32.mrb[90].mxu0  ;;  %v12337_v50 = vpop.f32.mrb[88].mxu1 }
 0xd57   : > { %v12564_v23 = vpack.i.bf16 %v15195_v53, %v15193_v29  ;;  %v12332_v34 = vpop.f32.mrb[91].mxu0  ;;  %v5412_v12 = vpop.f32.mrb[89].mxu1 }
 0xd58   : > { %v12338_v31 = vpop.f32.mrb[90].mxu1 }
 0xd59   : > { %v5415_v47 = vpop.f32.mrb[91].mxu1 }
 0xd5c   : > { %v5471_v15 = vpop.f32.mrb[92].mxu0 }
 0xd5d   : > { %v5472_v30 = vadd.f32 %v5471_v15, %v5412_v12  ;;  %v12343_v57 = vpop.f32.mrb[93].mxu0 }
 0xd5e   : > { %v5474_v19 = vpop.f32.mrb[94].mxu0  ;;  %v5522_v8 = vpop.f32.mrb[92].mxu1 }
 0xd5f   : > { %v5529_v41 = vmul.f32 0.25, %v5472_v30  ;;  %v5475_v27 = vadd.f32 %v5474_v19, %v5415_v47  ;;  %v5523_v56 = vadd.f32 %v12337_v50, %v5522_v8  ;;  %v12344_v44 = vpop.f32.mrb[95].mxu0  ;;  %v12349_v55 = vpop.f32.mrb[93].mxu1 }
 0xd60   : > { %v5525_v21 = vpop.f32.mrb[94].mxu1 }
 0xd61   : > { %v5533_v35 = vadd.f32 %v5529_v41, %v16860_v60  ;;  %v5530_v11 = vmul.f32 0.25, %v5475_v27  ;;  %v5531_v40 = vmul.f32 0.25, %v5523_v56  ;;  %v5526_v38 = vadd.f32 %v12338_v31, %v5525_v21  ;;  %v12350_v4 = vpop.f32.mrb[95].mxu1 }
 0xd63   : > { %v5534_v16 = vadd.f32 %v5530_v11, %v16860_v60  ;;  %v5537_v20 = vsel %vm4739_vm9, %v5533_v35, -inf  ;;  %v5535_v61 = vadd.f32 %v5531_v40, %v16860_v60  ;;  %v5532_v49 = vmul.f32 0.25, %v5526_v38 }
 0xd64   : > { %5538 = vmax.xlane.f32.xlu1 %v5537_v20 }
 0xd65   : > { %v5540_v48 = vsel %vm4739_vm9, %v5534_v16, -inf  ;;  %v5536_v32 = vadd.f32 %v5532_v49, %v16860_v60  ;;  %v5543_v14 = vsel %vm4739_vm9, %v5535_v61, -inf }
 0xd66   : > { %5541 = vmax.xlane.f32.xlu0 %v5540_v48 }
 0xd67   : > { %v5546_v46 = vsel %vm4739_vm9, %v5536_v32, -inf }
 0xd6a   : > { %5544 = vmax.xlane.f32.xlu0 %v5543_v14 }
 0xd6e   : > { %5547 = vmax.xlane.f32.xlu0 %v5546_v46 }
 0xd75   : > { %5583 = vrot.lane.b32.xlu1 %v15041_v42, %s13640_s6 }
 0xdf1   : > { %v5539_v13 = vpop.xlane.xlu1 %5538 }
 0xdf2   : > { %v5549_v2 = vsub.f32 %v5533_v35, %v5539_v13 }
 0xdf3   : > { %v5542_v50 = vpop.xlane.xlu0 %5541 }
 0xdf4   : > { %v5553_v34 = vmul.f32 1.442695, %v5549_v2  ;;  %v5550_v12 = vsub.f32 %v5534_v16, %v5542_v50 }
 0xdf5   : > { %v5584_v31 = vpop.permute.xlu1 %5583 }
 0xdf6   : > { %13177 = vpow2.f32 %v5553_v34  ;;  %v5555_v47 = vmul.f32 1.442695, %v5550_v12  ;;  %12352 = vmatpush3.bf16.msra.mxu0 %v5584_v31 }
 0xdf7   : > { %v5545_v8 = vpop.xlane.xlu0 %5544 }
 0xdf8   : > { %13179 = vpow2.f32 %v5555_v47  ;;  %v5551_v44 = vsub.f32 %v5535_v61, %v5545_v8 }
 0xdfa   : > { %v5557_v55 = vmul.f32 1.442695, %v5551_v44 }
 0xdfb   : > { %v5548_v41 = vpop.xlane.xlu0 %5547 }
 0xdfc   : > { %v5552_v27 = vsub.f32 %v5536_v32, %v5548_v41 }
 0xdfe   : > { %v5559_v56 = vmul.f32 1.442695, %v5552_v27 }
 0xe00   : > { %v13178_v15 = vpop.eup %13177  ;;  %13181 = vpow2.f32 %v5559_v56 }
 0xe01   : > { %v5561_v30 = vsel %vm4739_vm9, %v13178_v15, 0.0  ;;  %13183 = vpow2.f32 %v5557_v55 }
 0xe02   : > { %v13180_v57 = vpop.eup %13179  ;;  %5562 = vadd.xlane.f32.xlu1 %v5561_v30 }
 0xe03   : > { %v5564_v19 = vsel %vm4739_vm9, %v13180_v57, 0.0 }
 0xe04   : > { %5565 = vadd.xlane.f32.xlu0 %v5564_v19 }
 0xe0a   : > { %v13182_v21 = vpop.eup %13181 }
 0xe13   : > { %5681 = vrot.lane.b32.xlu1 %v15025_v9, %s13642_s18  ;;  %v5570_v9 = vsel %vm4739_vm9, %v13182_v21, 0.0 }
 0xe17   : > { %5677 = vrot.lane.b32.xlu1 %v15045_v39, %s13642_s18  ;;  %v13184_v39 = vpop.eup %13183 }
 0xe18   : > { %v5567_v35 = vsel %vm4739_vm9, %v13184_v39, 0.0 }
 0xe1a   : > { %5630 = vrot.lane.b32.xlu0 %v15053_v54, %s13640_s6 }
 0xe1b   : > { %5743 = vrot.lane.b32.xlu1 %v15039_v36, %s13643_s21 }
 0xe39   : > { %5571 = vadd.xlane.f32.xlu0 %v5570_v9 }
 0xe3f   : > { %5568 = vadd.xlane.f32.xlu1 %v5567_v35 }
 0xe4f   : > { %5679 = vrot.lane.b32.xlu0 %v15057_v24, %s13642_s18 }
 0xe50   : > { %5794 = vrot.lane.b32.xlu1 %v15051_v62, %s13643_s21 }
 0xe53   : > { %5741 = vrot.lane.b32.xlu0 %v15043_v28, %s13642_s18 }
 0xe54   : > { %5792 = vrot.lane.b32.xlu1 %v15055_v37, %s13642_s18 }
 0xe8f   : > { %v5563_v36 = vpop.xlane.xlu1 %5562 }
 0xe90   : > { %13185 = vrcp.f32 %v5563_v36 }
 0xe91   : > { %v5566_v11 = vpop.xlane.xlu0 %5565 }
 0xe92   : > { %13187 = vrcp.f32 %v5566_v11 }
 0xe93   : > { %v5682_v40 = vpop.permute.xlu1 %5681 }
 0xe94   : > { %12472 = vmatprep.subr.msk.bf16.mxu0 %vm4739_vm9, %v5682_v40  ;;  %v5690_v28 = vsel %vm4739_vm9, %v5682_v40, 0 }
 0xe95   : > { %v5631_v38 = vpop.permute.xlu0 %5630 }
 0xe96   : > { %12358 = vmatpush3.bf16.msra.mxu1 %v5631_v38 }
 0xe97   : > { %12369 = vmatprep.subr.bf16.mxu1 %v16850_v43  ;;  %v5678_v61 = vpop.permute.xlu1 %5677 }
 0xe9a   : > { %v13186_v24 = vpop.eup %13185 }
 0xe9b   : > { %v5577_v62 = vmul.f32 %v13186_v24, %v13178_v15  ;;  %v5744_v49 = vpop.permute.xlu1 %5743 }
 0xe9c   : > { %v13188_v4 = vpop.eup %13187  ;;  %v5749_v47 = vsel %vm4739_vm9, %v5744_v49, 0 }
 0xe9d   : > { %v5578_v16 = vmul.f32 %v13188_v4, %v13180_v57 }
 0xe9f   : > { %v5581_v20 = vpack.c.bf16 %v5578_v16, %v5577_v62 }
 0xea1   : > { %12354 = vmatmul.mubr.msk.bf16.vlgmr.msra.gmra.mrb[96].mxu0 %vm4739_vm9, %v5581_v20 }
 0xea2   : > { %12364 = vmatpush3.bf16.xpose.msra.mxu0 %v5690_v28  ;;  %12365 = vmatprep.mubr.msk.bf16.mxu0 %vm4739_vm9, %v5678_v61 }
 0xea3   : > { %12375 = vmatprep.subr.bf16.mxu0 %v16850_v43 }
 0xec6   : > { %v5572_v37 = vpop.xlane.xlu0 %5571 }
 0xec7   : > { %13189 = vrcp.f32 %v5572_v37 }
 0xeca   : > { %v5680_v48 = vpop.permute.xlu0 %5679 }
 0xecb   : > { %12366 = vmatmul.mubr.msk.bf16.vlgmr.msra.gmra.mrb[100].mxu0 %vm4739_vm9, %v5680_v48 }
 0xecc   : > { %v5569_v32 = vpop.xlane.xlu1 %5568  ;;  %12377 = vmatprep.mubr.msk.bf16.mxu0 %vm13636_vm8, %v16850_v43 }
 0xecd   : > { %13191 = vrcp.f32 %v5569_v32 }
 0xece   : > { %v5742_v15 = vpop.permute.xlu0 %5741 }
 0xed0   : > { %v5795_v14 = vpop.permute.xlu1 %5794 }
 0xed1   : > { %v5800_v46 = vsel %vm4739_vm9, %v5795_v14, 0  ;;  %v13190_v13 = vpop.eup %13189 }
 0xed2   : > { %12376 = vmatpush3.bf16.xpose.msra.mxu0 %v5800_v46  ;;  %v5580_v50 = vmul.f32 %v13190_v13, %v13182_v21 }
 0xed3   : > { %12387 = vmatprep.subr.bf16.mxu0 %v16850_v43 }
 0xed4   : > { %v5793_v12 = vpop.permute.xlu1 %5792 }
 0xed7   : > { %v13192_v2 = vpop.eup %13191 }
 0xed8   : > { %v5579_v34 = vmul.f32 %v13192_v2, %v13184_v39 }
 0xed9   : > { %12378 = vmatmul.mubr.msk.bf16.vlgmr.msra.gmra.mrb[104].mxu0 %vm4739_vm9, %v5793_v12 }
 0xeda   : > { %v5582_v31 = vpack.c.bf16 %v5580_v50, %v5579_v34  ;;  %12389 = vmatprep.mubr.msk.bf16.mxu0 %vm13636_vm8, %v16850_v43 }
 0xedc   : > { %12360 = vmatmul.mubr.msk.bf16.vlgmr.msra.gmra.mrb[96].mxu1 %vm4739_vm9, %v5582_v31 }
 0xedd   : > { %12370 = vmatpush3.bf16.xpose.msra.mxu1 %v5749_v47  ;;  %12371 = vmatprep.mubr.msk.bf16.mxu1 %vm13636_vm8, %v16850_v43 }
 0xede   : > { %12381 = vmatprep.subr.bf16.mxu1 %v16850_v43 }
 0xee4   : > { %12372 = vmatmul.mubr.msk.bf16.vlgmr.msra.gmra.mrb[100].mxu1 %vm4739_vm9, %v5742_v15 }
 0xee5   : > { %12383 = vmatprep.mubr.msk.bf16.mxu1 %vm13636_vm8, %v16850_v43 }
 0xf74   : > { %v15251_v30 = vpop.f32.mrb[96].mxu0 }
 0xf75   : > { %v12355_v57 = vpop.f32.mrb[97].mxu0 }
 0xf76   : > { %v15253_v19 = vpop.f32.mrb[98].mxu0 }
 0xf77   : > { %v12569_v8 = vpack.i.bf16 %v15253_v19, %v15251_v30  ;;  %v12356_v41 = vpop.f32.mrb[99].mxu0 }
 0xf9e   : > { %v12367_v27 = vpop.f32.mrb[100].mxu0 }
 0xf9f   : > { %v5726_v56 = vpop.f32.mrb[101].mxu0 }
 0xfa0   : > { %v12368_v44 = vpop.f32.mrb[102].mxu0 }
 0xfa1   : > { %v5729_v55 = vpop.f32.mrb[103].mxu0 }
 0xfac   : > { %v5836_v21 = vpop.f32.mrb[104].mxu0 }
 0xfad   : > { %v5837_v9 = vadd.f32 %v12367_v27, %v5836_v21  ;;  %v12379_v39 = vpop.f32.mrb[105].mxu0 }
 0xfae   : > { %v5839_v35 = vpop.f32.mrb[106].mxu0 }
 0xfaf   : > { %v5840_v36 = vadd.f32 %v12368_v44, %v5839_v35  ;;  %v5670_v11 = vpop.f32.mrb[96].mxu1  ;;  %v12380_v43 = vpop.f32.mrb[107].mxu0  ;;  %v5845_v61 = vmul.f32 0.25, %v5837_v9 }
 0xfb0   : > { %v12361_v40 = vpop.f32.mrb[97].mxu1 }
 0xfb1   : > { %v5673_v38 = vpop.f32.mrb[98].mxu1  ;;  %v5849_v46 = vadd.f32 %v5845_v61, %v16860_v60  ;;  %v5846_v13 = vmul.f32 0.25, %v5840_v36 }
 0xfb2   : > { %v12574_v24 = vpack.i.bf16 %v5673_v38, %v5670_v11  ;;  %v12362_v4 = vpop.f32.mrb[99].mxu1 }
 0xfb3   : > { %v5850_v12 = vadd.f32 %v5846_v13, %v16860_v60  ;;  %v5857_v31 = vsel %vm4739_vm9, %v5849_v46, -inf  ;;  %v12736_v13 = vld [vmem:[%s13837_s20 + $0x18] sm:$0xff]  }
 0xfb5   : > { %v5860_v47 = vsel %vm4739_vm9, %v5850_v12, -inf }
 0xfb7   : > { %v5785_v62 = vpop.f32.mrb[100].mxu1 }
 0xfb8   : > { %v5786_v16 = vadd.f32 %v5785_v62, %v5726_v56  ;;  %v12373_v20 = vpop.f32.mrb[101].mxu1 }
 0xfb9   : > { %v5788_v28 = vpop.f32.mrb[102].mxu1 }
 0xfba   : > { %v5843_v37 = vmul.f32 0.25, %v5786_v16  ;;  %v5789_v49 = vadd.f32 %v5788_v28, %v5729_v55  ;;  %v12374_v48 = vpop.f32.mrb[103].mxu1 }
 0xfbb   : > { %v12734_v48 = vld [vmem:[%s13837_s20 + $0x8] sm:$0xff]  }
 0xfbc   : > { %v5847_v32 = vadd.f32 %v5843_v37, %v16860_v60  ;;  %v5844_v14 = vmul.f32 0.25, %v5789_v49  ;;  %v12733_v49 = vld [vmem:[%s13837_s20] sm:$0xff]  }
 0xfbe   : > { %v5848_v2 = vadd.f32 %v5844_v14, %v16860_v60  ;;  %v5851_v50 = vsel %vm4739_vm9, %v5847_v32, -inf }
 0xfbf   : > { %5852 = vmax.xlane.f32.xlu0 %v5851_v50 }
 0xfc0   : > { %v5854_v34 = vsel %vm4739_vm9, %v5848_v2, -inf }
 0xfc1   : > { %5855 = vmax.xlane.f32.xlu1 %v5854_v34 }
 0xfc3   : > { %5858 = vmax.xlane.f32.xlu0 %v5857_v31 }
 0xfc7   : > { %5861 = vmax.xlane.f32.xlu0 %v5860_v47 }
0x104c   : > { %v5853_v15 = vpop.xlane.xlu0 %5852 }
0x104d   : > { %v5863_v57 = vsub.f32 %v5847_v32, %v5853_v15  ;;  %v12735_v32 = vld [vmem:[%s13837_s20 + $0x10] sm:$0xff]  }
0x104e   : > { %v5856_v41 = vpop.xlane.xlu1 %5855 }
0x104f   : > { %v5867_v27 = vmul.f32 1.442695, %v5863_v57  ;;  %v5864_v56 = vsub.f32 %v5848_v2, %v5856_v41 }
0x1050   : > { %v5859_v44 = vpop.xlane.xlu0 %5858 }
0x1051   : > { %13193 = vpow2.f32 %v5867_v27  ;;  %v5869_v55 = vmul.f32 1.442695, %v5864_v56  ;;  %v5865_v21 = vsub.f32 %v5849_v46, %v5859_v44 }
0x1053   : > { %13195 = vpow2.f32 %v5869_v55  ;;  %v5871_v9 = vmul.f32 1.442695, %v5865_v21 }
0x1054   : > { %v5862_v39 = vpop.xlane.xlu0 %5861 }
0x1055   : > { %13197 = vpow2.f32 %v5871_v9  ;;  %v5866_v60 = vsub.f32 %v5850_v12, %v5862_v39 }
0x1057   : > { %v5873_v35 = vmul.f32 1.442695, %v5866_v60 }
0x1059   : > { %13199 = vpow2.f32 %v5873_v35 }
0x105b   : > { %v13194_v36 = vpop.eup %13193 }
0x105c   : > { %v5875_v11 = vsel %vm4739_vm9, %v13194_v36, 0.0 }
0x105d   : > { %v13196_v43 = vpop.eup %13195  ;;  %5876 = vadd.xlane.f32.xlu0 %v5875_v11 }
0x105e   : > { %v5878_v40 = vsel %vm4739_vm9, %v13196_v43, 0.0 }
0x105f   : > { %v13198_v38 = vpop.eup %13197  ;;  %5879 = vadd.xlane.f32.xlu1 %v5878_v40 }
0x1060   : > { %v5881_v4 = vsel %vm4739_vm9, %v13198_v38, 0.0 }
0x1061   : > { %5882 = vadd.xlane.f32.xlu0 %v5881_v4 }
0x1063   : > { %v13200_v62 = vpop.eup %13199 }
0x1064   : > { %v5884_v16 = vsel %vm4739_vm9, %v13200_v62, 0.0 }
0x1065   : > { %5885 = vadd.xlane.f32.xlu1 %v5884_v16 }
0x1076   : > { %5944 = vrot.lane.b32.xlu1 %v15053_v54, %s13642_s18 }
0x1077   : > { %5897 = vrot.lane.b32.xlu0 %v15041_v42, %s13642_s18  ;;  %s16920_s18 = sld [smem:[#allocation45_spill]] (!%p11646_p5) }
0x107a   : > { %12560 = vrot.lane.b32.xlu1 %v12559_v58, %s13643_s21 }
0x107b   : > { %12570 = vrot.lane.b32.xlu0 %v12569_v8, %s13641_s17 }
0x107e   : > { %12565 = vrot.lane.b32.xlu1 %v12564_v23, %s13643_s21  ;;  %s16921_s21 = sld [smem:[#allocation43_spill]] (!%p11646_p5) }
0x1082   : > { %12575 = vrot.lane.b32.xlu1 %v12574_v24, %s13641_s17  ;;  %s16923_s17 = sld [smem:[#allocation47_spill]] (!%p11646_p5) }
0x10ea   : > { %v5877_v54 = vpop.xlane.xlu0 %5876 }
0x10eb   : > { %13201 = vrcp.f32 %v5877_v54 }
0x10ec   : > { %v5880_v42 = vpop.xlane.xlu1 %5879 }
0x10ed   : > { %13203 = vrcp.f32 %v5880_v42 }
0x10ee   : > { %v5883_v20 = vpop.xlane.xlu0 %5882 }
0x10ef   : > { %13205 = vrcp.f32 %v5883_v20 }
0x10f2   : > { %v5898_v17 = vpop.permute.xlu0 %5897  ;;  %v5886_v22 = vpop.xlane.xlu1 %5885 }
0x10f3   : > { %13207 = vrcp.f32 %v5886_v22  ;;  %12382 = vmatpush3.bf16.msra.mxu1 %v5898_v17 }
0x10f4   : > { %12393 = vmatprep.subr.bf16.mxu1 %v12733_v49 }
0x10f5   : > { %v13202_v58 = vpop.eup %13201 }
0x10f6   : > { %v5945_v30 = vpop.permute.xlu1 %5944  ;;  %v5891_v29 = vmul.f32 %v13202_v58, %v13194_v36  ;;  %v12571_v55 = vpop.permute.xlu0 %12570 }
0x10f7   : > { %v13204_v19 = vpop.eup %13203  ;;  %12388 = vmatpush3.bf16.msra.mxu0 %v5945_v30  ;;  %v12573_v39 = vunpack.i.h.bf16 %v12571_v55  ;;  %v12572_v60 = vunpack.i.l.bf16 %v12571_v55 }
0x10f8   : > { %v5892_v53 = vmul.f32 %v13204_v19, %v13196_v43 }
0x10f9   : > { %v13206_v8 = vpop.eup %13205 }
0x10fa   : > { %v5895_v23 = vpack.c.bf16 %v5892_v53, %v5891_v29  ;;  %v5893_v28 = vmul.f32 %v13206_v8, %v13198_v38  ;;  %v12561_v41 = vpop.permute.xlu1 %12560 }
0x10fb   : > { %v12563_v27 = vunpack.i.h.bf16 %v12561_v41  ;;  %v12562_v56 = vunpack.i.l.bf16 %v12561_v41 }
0x10fc   : > { %12384 = vmatmul.mubr.msk.bf16.vlgmr.msra.gmra.mrb[104].mxu1 %vm4739_vm9, %v5895_v23 }
0x10fd   : > { %v13208_v24 = vpop.eup %13207  ;;  %12394 = vmatpush3.bf16.msra.mxu1 %v12733_v49  ;;  %v6040_v21 = vsel %vm4739_vm9, %v15129_v7, %v12563_v27  ;;  %v6039_v9 = vsel %vm4739_vm9, %v15127_v1, %v12562_v56 }
0x10fe   : > { %v5894_v61 = vmul.f32 %v13208_v24, %v13200_v62  ;;  %12395 = vmatprep.subr.bf16.mxu1 %v12734_v48  ;;  %v12566_v44 = vpop.permute.xlu1 %12565  ;;  %v6044_v40 = vsel %vm6043_vm10, %v6039_v9, %v12572_v60  ;;  %v6045_v38 = vsel %vm6043_vm10, %v6040_v21, %v12573_v39 }
0x10ff   : > { %v12568_v4 = vunpack.i.h.bf16 %v12566_v44  ;;  %v12567_v62 = vunpack.i.l.bf16 %v12566_v44 }
0x1100   : > { %v5896_v37 = vpack.c.bf16 %v5894_v61, %v5893_v28  ;;  %v15313_v28 = vld [vmem:[%s13799_s3 + $0x8] sm:$0xff] }
0x1101   : > { %12396 = vmatpush3.bf16.msra.mxu1 %v12734_v48  ;;  %v6042_v17 = vsel %vm4739_vm9, %v15133_v45, %v12568_v4  ;;  %v6041_v22 = vsel %vm4739_vm9, %v15131_v18, %v12567_v62  ;;  %v16861_v45 = vld [vmem:[#allocation11_spill] sm:$0xff]  ;;  %v12738_v62 = vld [vmem:[%s13842_s27 + $0x8] sm:$0xff]  }
0x1102   : > { %12390 = vmatmul.mubr.msk.bf16.vlgmr.msra.gmra.mrb[108].mxu0 %vm4739_vm9, %v5896_v37  ;;  %12397 = vmatprep.subr.bf16.mxu1 %v12735_v32  ;;  %v12576_v36 = vpop.permute.xlu1 %12575  ;;  %v6149_v61 = vrot.slane %v15313_v28, %v16861_v45  ;;  %v12737_v4 = vld [vmem:[%s13842_s27] sm:$0xff]  }
0x1103   : > { %v12578_v54 = vunpack.i.h.bf16 %v12576_v36  ;;  %v12577_v1 = vunpack.i.l.bf16 %v12576_v36  ;;  %12405 = vmatprep.subr.bf16.mxu0 %v12737_v4 }
0x1104   : > { %12406 = vmatpush3.bf16.msra.mxu0 %v12737_v4 }
0x1105   : > { %12398 = vmatpush3.bf16.msra.mxu1 %v12735_v32  ;;  %v6046_v19 = vsel %vm6043_vm10, %v6041_v22, %v12577_v1  ;;  %v6047_v29 = vsel %vm6043_vm10, %v6042_v17, %v12578_v54  ;;  %12407 = vmatprep.subr.bf16.mxu0 %v12738_v62 }
0x1106   : > { %12399 = vmatprep.subr.bf16.mxu1 %v12736_v13 }
0x1108   : > { %12408 = vmatpush3.bf16.msra.mxu0 %v12738_v62 }
0x1109   : > { %12400 = vmatpush3.bf16.msra.mxu1 %v12736_v13 }
0x11cf   : > { %v5937_v14 = vpop.f32.mrb[104].mxu1 }
0x11d0   : > { %v12385_v46 = vpop.f32.mrb[105].mxu1 }
0x11d1   : > { %v5940_v2 = vpop.f32.mrb[106].mxu1 }
0x11d2   : > { %v12579_v50 = vpack.i.bf16 %v5940_v2, %v5937_v14  ;;  %v12386_v34 = vpop.f32.mrb[107].mxu1 }
0x11d4   : > { %12580 = vrot.lane.b32.xlu0 %v12579_v50, %s13639_s2 }
0x11d5   : > { %v5984_v12 = vpop.f32.mrb[108].mxu0 }
0x11d6   : > { %v12391_v31 = vpop.f32.mrb[109].mxu0 }
0x11d7   : > { %v5987_v47 = vpop.f32.mrb[110].mxu0 }
0x11d8   : > { %v12584_v15 = vpack.i.bf16 %v5987_v47, %v5984_v12  ;;  %v12392_v57 = vpop.f32.mrb[111].mxu0 }
0x11da   : > { %12585 = vrot.lane.b32.xlu1 %v12584_v15, %s13639_s2  ;;  %s13645_s2 = smov (!%p11646_p5), 64  }
0x1246   : > { %v12581_v35 = vpop.permute.xlu0 %12580 }
0x1247   : > { %v12583_v11 = vunpack.i.h.bf16 %v12581_v35  ;;  %v12582_v43 = vunpack.i.l.bf16 %v12581_v35 }
0x1249   : > { %v6049_v16 = vsel %vm6048_vm11, %v6044_v40, %v12582_v43  ;;  %v6050_v7 = vsel %vm6048_vm11, %v6045_v38, %v12583_v11 }
0x124a   : > { %v6061_v42 = vpack.c.bf16 %v6050_v7, %v6049_v16  ;;  %v12739_v16 = vld [vmem:[%s13842_s27 + $0x10] sm:$0xff]   ;;  %v12740_v7 = vld [vmem:[%s13842_s27 + $0x18] sm:$0xff]  }
0x124b   : > { %12409 = vmatprep.subr.bf16.mxu0 %v12739_v16 }
0x124c   : > { %v12586_v20 = vpop.permute.xlu1 %12585  ;;  %12401 = vmatprep.mubr.msk.bf16.mxu1 %vm1553_vm7, %v6061_v42  ;;  %12410 = vmatpush3.bf16.msra.mxu0 %v12739_v16 }
0x124d   : > { %v12588_v58 = vunpack.i.h.bf16 %v12586_v20  ;;  %v12587_v30 = vunpack.i.l.bf16 %v12586_v20  ;;  %12411 = vmatprep.subr.bf16.mxu0 %v12740_v7 }
0x124f   : > { %v6051_v53 = vsel %vm6048_vm11, %v6046_v19, %v12587_v30  ;;  %v6052_v23 = vsel %vm6048_vm11, %v6047_v29, %v12588_v58 }
0x1250   : > { %v6062_v8 = vpack.c.bf16 %v6052_v23, %v6051_v53  ;;  %12412 = vmatpush3.bf16.msra.mxu0 %v12740_v7 }
0x1252   : > { %12402 = vmatmul.mubr.msk.bf16.vlgmr.msra.gmra.mrb[108].mxu1 %vm1553_vm7, %v6062_v8  ;;  %v6209_v8 = vrot.slane %v15313_v28, %v16855_v25 }
0x1325   : > { %v12403_v24 = vpop.f32.mrb[108].mxu1 }
0x1326   : > { %v6127_v18 = vpop.f32.mrb[109].mxu1  ;;  %v6144_v37 = vadd.f32 %v12403_v24, %v14952_v59 }
0x1327   : > { %v6142_v49 = vadd.f32 %v6127_v18, %v14944_v3  ;;  %v12404_v48 = vpop.f32.mrb[110].mxu1 }
0x1328   : > { %v6130_v32 = vpop.f32.mrb[111].mxu1  ;;  %v15322_v13 = vadd.f32 %v6149_v61, %v6144_v37  ;;  %v6145_v2 = vadd.f32 %v12404_v48, %v14956_v33  ;;  %v6217_v48 = vrot.slane %v15313_v28, %v16856_v0 }
0x1329   : > { %v15319_v14 = vadd.f32 %v6149_v61, %v6142_v49  ;;  %v6143_v46 = vadd.f32 %v6130_v32, %v14948_v51 }
0x132a   : > { %v15331_v3 = vadd.f32 %v6149_v61, %v6145_v2  ;;  %v6160_v12 = vsel %vm1553_vm7, %v15322_v13, 0.0 }
0x132b   : > { %v15325_v50 = vadd.f32 %v6149_v61, %v6143_v46  ;;  %v6154_v34 = vsel %vm1553_vm7, %v15319_v14, 0.0 }
0x132c   : > { %6155 = vadd.xlane.f32.xlu0 %v6154_v34  ;;  %v6163_v51 = vsel %vm1553_vm7, %v15331_v3, 0.0 }
0x132d   : > { %v6157_v59 = vsel %vm1553_vm7, %v15325_v50, 0.0 }
0x132e   : > { %6158 = vadd.xlane.f32.xlu1 %v6157_v59 }
0x1330   : > { %6161 = vadd.xlane.f32.xlu0 %v6160_v12 }
0x1334   : > { %6164 = vadd.xlane.f32.xlu0 %v6163_v51 }
0x13b9   : > { %v6156_v33 = vpop.xlane.xlu0 %6155 }
0x13ba   : > { %v6166_v31 = vmul.f32 0.015625, %v6156_v33 }
0x13bb   : > { %v6159_v47 = vpop.xlane.xlu1 %6158 }
0x13bc   : > { %v6170_v15 = vsub.f32 %v15319_v14, %v6166_v31  ;;  %v6167_v57 = vmul.f32 0.015625, %v6159_v47 }
0x13bd   : > { %v6162_v41 = vpop.xlane.xlu0 %6161 }
0x13be   : > { %v6171_v27 = vsub.f32 %v15325_v50, %v6167_v57  ;;  %v6168_v56 = vmul.f32 0.015625, %v6162_v41  ;;  %v6174_v44 = vmul.f32 %v6170_v15, %v6170_v15 }
0x13c0   : > { %v6172_v55 = vsub.f32 %v15322_v13, %v6168_v56  ;;  %v6178_v21 = vsel %vm1553_vm7, %v6174_v44, 0.0  ;;  %v6175_v9 = vmul.f32 %v6171_v27, %v6171_v27 }
0x13c1   : > { %6179 = vadd.xlane.f32.xlu0 %v6178_v21  ;;  %v6165_v39 = vpop.xlane.xlu0 %6164 }
0x13c2   : > { %v6169_v60 = vmul.f32 0.015625, %v6165_v39  ;;  %v6181_v35 = vsel %vm1553_vm7, %v6175_v9, 0.0  ;;  %v6176_v36 = vmul.f32 %v6172_v55, %v6172_v55 }
0x13c3   : > { %6182 = vadd.xlane.f32.xlu1 %v6181_v35 }
0x13c4   : > { %v6173_v11 = vsub.f32 %v15331_v3, %v6169_v60  ;;  %v6184_v43 = vsel %vm1553_vm7, %v6176_v36, 0.0 }
0x13c5   : > { %6185 = vadd.xlane.f32.xlu0 %v6184_v43 }
0x13c6   : > { %v6177_v40 = vmul.f32 %v6173_v11, %v6173_v11 }
0x13c8   : > { %v6187_v38 = vsel %vm1553_vm7, %v6177_v40, 0.0 }
0x13c9   : > { %6188 = vadd.xlane.f32.xlu1 %v6187_v38 }
0x144e   : > { %v6180_v54 = vpop.xlane.xlu0 %6179 }
0x144f   : > { %v6190_v1 = vmul.f32 0.015625, %v6180_v54 }
0x1450   : > { %v6183_v42 = vpop.xlane.xlu1 %6182 }
0x1451   : > { %v6194_v20 = vadd.f32 1e-05, %v6190_v1  ;;  %v6191_v17 = vmul.f32 0.015625, %v6183_v42 }
0x1452   : > { %v6186_v22 = vpop.xlane.xlu0 %6185 }
0x1453   : > { %13209 = vrsqrt.f32 %v6194_v20  ;;  %v6195_v58 = vadd.f32 1e-05, %v6191_v17  ;;  %v6192_v30 = vmul.f32 0.015625, %v6186_v22 }
0x1455   : > { %13211 = vrsqrt.f32 %v6195_v58  ;;  %v6196_v19 = vadd.f32 1e-05, %v6192_v30  ;;  %v12741_v58 = vld [vmem:[%s13847_s25] sm:$0xff]   ;;  %v12742_v30 = vld [vmem:[%s13847_s25 + $0x8] sm:$0xff]  }
0x1456   : > { %v6189_v29 = vpop.xlane.xlu1 %6188  ;;  %12417 = vmatprep.subr.bf16.mxu1 %v12741_v58 }
0x1457   : > { %13213 = vrsqrt.f32 %v6196_v19  ;;  %v6193_v53 = vmul.f32 0.015625, %v6189_v29  ;;  %12418 = vmatpush3.bf16.msra.mxu1 %v12741_v58  ;;  %v12743_v29 = vld [vmem:[%s13847_s25 + $0x10] sm:$0xff]  }
0x1458   : > { %12419 = vmatprep.subr.bf16.mxu1 %v12742_v30 }
0x1459   : > { %v6197_v23 = vadd.f32 1e-05, %v6193_v53  ;;  %v12744_v53 = vld [vmem:[%s13847_s25 + $0x18] sm:$0xff]  }
0x145b   : > { %13215 = vrsqrt.f32 %v6197_v23  ;;  %12420 = vmatpush3.bf16.msra.mxu1 %v12742_v30  ;;  %v15410_v30 = vld [vmem:[%s13853_s5 + $0x5] ss:$0 sm:$0xff] }
0x145c   : > { %12421 = vmatprep.subr.bf16.mxu1 %v12743_v29 }
0x145d   : > { %v13210_v24 = vpop.eup %13209 }
0x145e   : > { %v6202_v61 = vmul.f32 %v13210_v24, %v6170_v15 }
0x145f   : > { %v13212_v18 = vpop.eup %13211  ;;  %12422 = vmatpush3.bf16.msra.mxu1 %v12743_v29 }
0x1460   : > { %v6203_v37 = vmul.f32 %v13212_v18, %v6171_v27  ;;  %v6210_v49 = vmul.f32 %v6209_v8, %v6202_v61  ;;  %v11016_v27 = vld [vmem:[%s16863_s19] ss:$0 sm:$0xff]  ;;  %12423 = vmatprep.subr.bf16.mxu1 %v12744_v53  ;;  %v16864_v18 = vld [vmem:[#allocation10_spill] sm:$0xff] }
0x1461   : > { %v13214_v32 = vpop.eup %13213 }
0x1462   : > { %v6204_v46 = vmul.f32 %v13214_v32, %v6172_v55  ;;  %v6211_v2 = vmul.f32 %v6209_v8, %v6203_v37  ;;  %v6218_v34 = vadd.f32 %v6217_v48, %v6210_v49  ;;  %v16865_v49 = vld [vmem:[#allocation9_spill] sm:$0xff] }
0x1463   : > { %12424 = vmatpush3.bf16.msra.mxu1 %v12744_v53 }
0x1464   : > { %v6219_v59 = vadd.f32 %v6217_v48, %v6211_v2  ;;  %v6212_v51 = vmul.f32 %v6209_v8, %v6204_v46 }
0x1465   : > { %v13216_v12 = vpop.eup %13215 }
0x1466   : > { %v6205_v33 = vmul.f32 %v13216_v12, %v6173_v11  ;;  %v6230_v31 = vpack.c.bf16 %v6219_v59, %v6218_v34  ;;  %v6220_v15 = vadd.f32 %v6217_v48, %v6212_v51  ;;  %v11027_v59 = vld [vmem:[%s13853_s5] ss:$0 sm:$0xff]  ;;  %v15377_v12 = vld [vmem:[%s13853_s5 + $0x1] ss:$0 sm:$0xff]  ;;  %v15380_v51 = vld [vmem:[%s13853_s5 + $0x2] ss:$0 sm:$0xff] }
0x1468   : > { %v6213_v47 = vmul.f32 %v6209_v8, %v6205_v33  ;;  %12413 = vmatprep.mubr.msk.bf16.mxu0 %vm1553_vm7, %v6230_v31 }
0x146a   : > { %v6221_v57 = vadd.f32 %v6217_v48, %v6213_v47 }
0x146c   : > { %v6231_v41 = vpack.c.bf16 %v6221_v57, %v6220_v15 }
0x146e   : > { %12414 = vmatmul.mubr.msk.bf16.vlgmr.msra.gmra.mrb[112].mxu0 %vm1553_vm7, %v6231_v41 }
0x146f   : > { %7335 = vmatprep.mubr.bf16.mxu0 %v16851_v52 }
0x1541   : > { %v12415_v56 = vpop.f32.mrb[112].mxu0 }
0x1542   : > { %v6303_v44 = vpop.f32.mrb[113].mxu0  ;;  %v6312_v9 = vadd.f32 %v12415_v56, %v11016_v27 }
0x1543   : > { %v6304_v55 = vadd.f32 %v11016_v27, %v6303_v44  ;;  %v12416_v21 = vpop.f32.mrb[114].mxu0 }
0x1544   : > { %v6315_v39 = vadd.f32 %v12416_v21, %v11016_v27  ;;  %v6306_v60 = vpop.f32.mrb[115].mxu0  ;;  %v11025_v40 = vmul.f32 -1.442695, %v6312_v9 }
0x1545   : > { %v11023_v35 = vmul.f32 -1.442695, %v6304_v55  ;;  %v6307_v36 = vadd.f32 %v11016_v27, %v6306_v60 }
0x1546   : > { %v11026_v11 = vmul.f32 -1.442695, %v6315_v39 }
0x1547   : > { %13217 = vpow2.f32 %v11023_v35  ;;  %v11024_v43 = vmul.f32 -1.442695, %v6307_v36 }
0x1548   : > { %13219 = vpow2.f32 %v11026_v11 }
0x1549   : > { %13221 = vpow2.f32 %v11024_v43 }
0x154a   : > { %13223 = vpow2.f32 %v11025_v40 }
0x1551   : > { %v13218_v38 = vpop.eup %13217 }
0x1552   : > { %v13220_v4 = vpop.eup %13219  ;;  %v6330_v54 = vadd.f32 1.0, %v13218_v38 }
0x1553   : > { %v13222_v62 = vpop.eup %13221  ;;  %v6333_v16 = vadd.f32 1.0, %v13220_v4 }
0x1554   : > { %v6331_v7 = vadd.f32 1.0, %v13222_v62  ;;  %v13224_v1 = vpop.eup %13223 }
0x1555   : > { %13225 = vrcp.f32 %v6333_v16  ;;  %v6332_v42 = vadd.f32 1.0, %v13224_v1 }
0x1556   : > { %13227 = vrcp.f32 %v6331_v7 }
0x1557   : > { %13229 = vrcp.f32 %v6330_v54 }
0x1558   : > { %13231 = vrcp.f32 %v6332_v42 }
0x155f   : > { %v13226_v20 = vpop.eup %13225 }
0x1560   : > { %v13228_v17 = vpop.eup %13227  ;;  %6352 = vrot.lane.b32.xlu1 %v13226_v20, %s13637_s29 }
0x1561   : > { %6348 = vrot.lane.b32.xlu0 %v13228_v17, %s13637_s29  ;;  %v13230_v22 = vpop.eup %13229 }
0x1562   : > { %v13232_v19 = vpop.eup %13231 }
0x1564   : > { %6346 = vrot.lane.b32.xlu1 %v13230_v22, %s13637_s29 }
0x1568   : > { %6350 = vrot.lane.b32.xlu1 %v13232_v19, %s13637_s29 }
0x15d2   : > { %v6353_v23 = vpop.permute.xlu1 %6352 }
0x15d3   : > { %v6361_v8 = vmul.f32 %v6353_v23, %v6315_v39  ;;  %v6349_v24 = vpop.permute.xlu0 %6348 }
0x15d4   : > { %v6359_v61 = vmul.f32 %v6349_v24, %v6307_v36  ;;  %v15399_v36 = vld [vmem:[%s13853_s5 + $0x4] ss:$0 sm:$0xff] }
0x15d5   : > { %v6365_v37 = vmul.f32 %v16864_v18, %v6361_v8 }
0x15d6   : > { %v6363_v48 = vmul.f32 %v16865_v49, %v6359_v61  ;;  %v6347_v32 = vpop.permute.xlu1 %6346  ;;  %v15419_v49 = vld [vmem:[%s13853_s5 + $0x6] ss:$0 sm:$0xff] }
0x15d7   : > { %6369 = vst.msk [vmem:[#allocation3 + $0x30] sm:$0xff] %vm1553_vm7, %v6365_v37  ;;  %v6358_v46 = vmul.f32 %v6347_v32, %v6304_v55 }
0x15d8   : > { %6367 = vst.msk [vmem:[#allocation3 + $0x10] sm:$0xff] %vm1553_vm7, %v6363_v48 }
0x15d9   : > { %6366 = vst.msk [vmem:[#allocation3 + $0x8] sm:$0xff] %vm1553_vm7, %v6358_v46 }
0x15da   : > { %v6351_v2 = vpop.permute.xlu1 %6350 }
0x15db   : > { %v6360_v34 = vmul.f32 %v6351_v2, %v6312_v9  ;;  %v15393_v9 = vld [vmem:[%s13853_s5 + $0x3] ss:$0 sm:$0xff] }
0x15dd   : > { %6368 = vst.msk [vmem:[#allocation3 + $0x28] sm:$0xff] %vm1553_vm7, %v6360_v34 }
0x15e0   : > { %v6370_v33 = vld [vmem:[#allocation3 + $0x1] sm:$0xff]  ;;  %v15382_v57 = vld [vmem:[#allocation3 + $0x9] sm:$0xff] }
0x15e1   : > { %v6387_v31 = vld [vmem:[#allocation3 + $0x2] sm:$0xff]  ;;  %v6379_v15 = vmul.f32 %v11027_v59, %v6370_v33  ;;  %v15384_v41 = vld [vmem:[#allocation3 + $0xa] sm:$0xff]  ;;  %v6380_v44 = vmul.f32 %v11027_v59, %v15382_v57 }
0x15e2   : > { %v6404_v47 = vld [vmem:[#allocation3 + $0x3] sm:$0xff]  ;;  %v6396_v27 = vmul.f32 %v15377_v12, %v6387_v31  ;;  %v15387_v56 = vld [vmem:[#allocation3 + $0xb] sm:$0xff]  ;;  %v6397_v55 = vmul.f32 %v15377_v12, %v15384_v41 }
0x15e3   : > { %v6421_v21 = vld [vmem:[#allocation3 + $0x4] sm:$0xff]  ;;  %v6413_v60 = vmul.f32 %v15380_v51, %v6404_v47  ;;  %v15396_v35 = vld [vmem:[#allocation3 + $0xc] sm:$0xff]  ;;  %v6414_v38 = vmul.f32 %v15380_v51, %v15387_v56 }
0x15e4   : > { %v6400_v39 = vadd.f32 %v6396_v27, %v6379_v15  ;;  %v6372_v11 = vld [vmem:[#allocation3 + $0x21] sm:$0xff]  ;;  %v6401_v40 = vadd.f32 %v6397_v55, %v6380_v44  ;;  %v6430_v1 = vmul.f32 %v15393_v9, %v6421_v21  ;;  %v15405_v42 = vld [vmem:[#allocation3 + $0xd] sm:$0xff]  ;;  %v6431_v22 = vmul.f32 %v15393_v9, %v15396_v35 }
0x15e5   : > { %v6389_v43 = vld [vmem:[#allocation3 + $0x22] sm:$0xff]  ;;  %v6381_v62 = vmul.f32 %v11027_v59, %v6372_v11  ;;  %v15414_v8 = vld [vmem:[#allocation3 + $0xe] sm:$0xff]  ;;  %v6448_v18 = vmul.f32 %v15399_v36, %v15405_v42 }
0x15e6   : > { %v6438_v4 = vld [vmem:[#allocation3 + $0x5] sm:$0xff]  ;;  %v6398_v7 = vmul.f32 %v15377_v12, %v6389_v43  ;;  %v6417_v54 = vadd.f32 %v6413_v60, %v6400_v39  ;;  %v6418_v20 = vadd.f32 %v6414_v38, %v6401_v40  ;;  %v15423_v33 = vld [vmem:[#allocation3 + $0xf] sm:$0xff]  ;;  %v6465_v15 = vmul.f32 %v15410_v30, %v15414_v8 }
0x15e7   : > { %v6406_v16 = vld [vmem:[#allocation3 + $0x23] sm:$0xff]  ;;  %v6447_v23 = vmul.f32 %v15399_v36, %v6438_v4  ;;  %v6490_v60 = vld [vmem:[#allocation3 + $0x10] sm:$0xff] }
0x15e8   : > { %v6423_v17 = vld [vmem:[#allocation3 + $0x24] sm:$0xff]  ;;  %v6402_v19 = vadd.f32 %v6398_v7, %v6381_v62  ;;  %v6415_v29 = vmul.f32 %v15380_v51, %v6406_v16  ;;  %v6434_v53 = vadd.f32 %v6430_v1, %v6417_v54  ;;  %v6435_v24 = vadd.f32 %v6431_v22, %v6418_v20  ;;  %v6506_v20 = vld [vmem:[#allocation3 + $0x11] sm:$0xff] }
0x15e9   : > { %v6455_v58 = vld [vmem:[#allocation3 + $0x6] sm:$0xff]  ;;  %v6432_v46 = vmul.f32 %v15393_v9, %v6423_v17  ;;  %v6482_v62 = vmul.f32 %v15419_v49, %v15423_v33 }
0x15ea   : > { %v6440_v61 = vld [vmem:[#allocation3 + $0x25] sm:$0xff]  ;;  %v6419_v32 = vadd.f32 %v6415_v29, %v6402_v19  ;;  %v6451_v2 = vadd.f32 %v6447_v23, %v6434_v53  ;;  %v6464_v34 = vmul.f32 %v15410_v30, %v6455_v58  ;;  %v6452_v31 = vadd.f32 %v6448_v18, %v6435_v24 }
0x15eb   : > { %v6472_v37 = vld [vmem:[#allocation3 + $0x7] sm:$0xff]  ;;  %v6449_v55 = vmul.f32 %v15399_v36, %v6440_v61  ;;  %v15442_v29 = vrot.slane %v15313_v28, %v16857_v6 }
0x15ec   : > { %v6373_v48 = vld [vmem:[#allocation3 + $0x29] sm:$0xff]  ;;  %v6436_v44 = vadd.f32 %v6432_v46, %v6419_v32  ;;  %v6468_v21 = vadd.f32 %v6464_v34, %v6451_v2  ;;  %v6481_v39 = vmul.f32 %v15419_v49, %v6472_v37  ;;  %v15430_v11 = vld [vmem:[%s13853_s5 + $0x7] ss:$0 sm:$0xff]  ;;  %v6469_v38 = vadd.f32 %v6465_v15, %v6452_v31  ;;  %v15437_v17 = vld [vmem:[%s13853_s5 + $0x8] ss:$0 sm:$0xff] }
0x15ed   : > { %v6457_v47 = vld [vmem:[#allocation3 + $0x26] sm:$0xff]  ;;  %v6382_v40 = vmul.f32 %v11027_v59, %v6373_v48  ;;  %v6499_v59 = vmul.f32 %v15430_v11, %v6490_v60  ;;  %v6513_v18 = vmul.f32 %v15437_v17, %v15382_v57  ;;  %v6521_v37 = vld [vmem:[#allocation3 + $0x12] sm:$0xff]  ;;  %v6514_v34 = vmul.f32 %v15437_v17, %v6506_v20 }
0x15ee   : > { %v6489_v27 = vld [vmem:[#allocation3 + $0x8] sm:$0xff]  ;;  %v6453_v16 = vadd.f32 %v6449_v55, %v6436_v44  ;;  %v6466_v7 = vmul.f32 %v15410_v30, %v6457_v47  ;;  %v6485_v54 = vadd.f32 %v6481_v39, %v6468_v21  ;;  %v6486_v58 = vadd.f32 %v6482_v62, %v6469_v38  ;;  %v6536_v55 = vld [vmem:[#allocation3 + $0x13] sm:$0xff] }
0x15ef   : > { %v6390_v43 = vld [vmem:[#allocation3 + $0x2a] sm:$0xff]  ;;  %v6498_v1 = vmul.f32 %v15430_v11, %v6489_v27  ;;  %v15449_v32 = vld [vmem:[%s13853_s5 + $0x9] ss:$0 sm:$0xff] }
0x15f0   : > { %v6474_v4 = vld [vmem:[#allocation3 + $0x27] sm:$0xff]  ;;  %v6399_v53 = vmul.f32 %v15377_v12, %v6390_v43  ;;  %v6470_v23 = vadd.f32 %v6466_v7, %v6453_v16  ;;  %v6503_v2 = vadd.f32 %v6499_v59, %v6486_v58  ;;  %v6528_v44 = vmul.f32 %v15449_v32, %v15384_v41  ;;  %v6551_v16 = vld [vmem:[#allocation3 + $0x14] sm:$0xff] }
0x15f1   : > { %v6407_v22 = vld [vmem:[#allocation3 + $0x2b] sm:$0xff]  ;;  %v6483_v24 = vmul.f32 %v15419_v49, %v6474_v4  ;;  %v6502_v61 = vadd.f32 %v6498_v1, %v6485_v54  ;;  %v15457_v57 = vld [vmem:[%s13853_s5 + $0xa] ss:$0 sm:$0xff]  ;;  %v6529_v60 = vmul.f32 %v15449_v32, %v6521_v37  ;;  %v6515_v54 = vmul.f32 %v15437_v17, %v6373_v48 }
0x15f2   : > { %v6491_v19 = vld [vmem:[#allocation3 + $0x28] sm:$0xff]  ;;  %v6403_v31 = vadd.f32 %v6399_v53, %v6382_v40  ;;  %v6416_v47 = vmul.f32 %v15380_v51, %v6407_v22  ;;  %v6518_v39 = vadd.f32 %v6514_v34, %v6503_v2  ;;  %v6543_v62 = vmul.f32 %v15457_v57, %v15387_v56  ;;  %v6566_v53 = vld [vmem:[#allocation3 + $0x15] sm:$0xff] }
0x15f3   : > { %v6424_v46 = vld [vmem:[#allocation3 + $0x2c] sm:$0xff]  ;;  %v6487_v12 = vadd.f32 %v6483_v24, %v6470_v23  ;;  %v6500_v15 = vmul.f32 %v15430_v11, %v6491_v19  ;;  %v6517_v27 = vadd.f32 %v6513_v18, %v6502_v61  ;;  %v15464_v7 = vld [vmem:[%s13853_s5 + $0xb] ss:$0 sm:$0xff]  ;;  %v6544_v20 = vmul.f32 %v15457_v57, %v6536_v55 }
0x15f4   : > { %v6441_v21 = vld [vmem:[#allocation3 + $0x2d] sm:$0xff]  ;;  %v6420_v38 = vadd.f32 %v6416_v47, %v6403_v31  ;;  %v6433_v40 = vmul.f32 %v15393_v9, %v6424_v46  ;;  %v6533_v1 = vadd.f32 %v6529_v60, %v6518_v39  ;;  %v6558_v9 = vmul.f32 %v15464_v7, %v15396_v35  ;;  %v15472_v23 = vld [vmem:[%s13853_s5 + $0xc] ss:$0 sm:$0xff]  ;;  %v6581_v31 = vld [vmem:[#allocation3 + $0x16] sm:$0xff] }
0x15f5   : > { %v6504_v51 = vadd.f32 %v6500_v15, %v6487_v12  ;;  %v6532_v4 = vadd.f32 %v6528_v44, %v6517_v27  ;;  %v6458_v41 = vld [vmem:[#allocation3 + $0x2e] sm:$0xff]  ;;  %v6450_v19 = vmul.f32 %v15399_v36, %v6441_v21  ;;  %v6530_v61 = vmul.f32 %v15449_v32, %v6390_v43  ;;  %v11040_v35 = vld [vmem:[%s13853_s5 + $0xd] ss:$0 sm:$0xff] }
0x15f6   : > { %v6437_v58 = vadd.f32 %v6433_v40, %v6420_v38  ;;  %v6475_v56 = vld [vmem:[#allocation3 + $0x2f] sm:$0xff]  ;;  %v6548_v18 = vadd.f32 %v6544_v20, %v6533_v1  ;;  %v6559_v48 = vmul.f32 %v15464_v7, %v6551_v16  ;;  %v6467_v2 = vmul.f32 %v15410_v30, %v6458_v41  ;;  %v6596_v30 = vld [vmem:[#allocation3 + $0x17] sm:$0xff]  ;;  %v11041_v38 = vld [vmem:[%s13853_s5 + $0xe] ss:$0 sm:$0xff]  ;;  %s16917_s5 = sld [smem:[#allocation42_spill]] (!%p11646_p5) }
0x15f7   : > { %v6547_v59 = vadd.f32 %v6543_v62, %v6532_v4  ;;  %v6519_v24 = vadd.f32 %v6515_v54, %v6504_v51  ;;  %v6573_v36 = vmul.f32 %v15472_v23, %v15405_v42  ;;  %v6492_v47 = vld [vmem:[#allocation3 + $0x30] sm:$0xff]  ;;  %v6545_v15 = vmul.f32 %v15457_v57, %v6407_v22 }
0x15f8   : > { %v6454_v37 = vadd.f32 %v6450_v19, %v6437_v58  ;;  %v6563_v27 = vadd.f32 %v6559_v48, %v6548_v18  ;;  %v6574_v43 = vmul.f32 %v15472_v23, %v6566_v53  ;;  %v6484_v55 = vmul.f32 %v15419_v49, %v6475_v56  ;;  %v6507_v40 = vld [vmem:[#allocation3 + $0x31] sm:$0xff] }
0x15f9   : > { %v6562_v34 = vadd.f32 %v6558_v9, %v6547_v59  ;;  %v6534_v12 = vadd.f32 %v6530_v61, %v6519_v24  ;;  %v6588_v60 = vmul.f32 %v11040_v35, %v15414_v8  ;;  %v6560_v42 = vmul.f32 %v15464_v7, %v6424_v46  ;;  %v6522_v20 = vld [vmem:[#allocation3 + $0x32] sm:$0xff] }
0x15fa   : > { %v6471_v44 = vadd.f32 %v6467_v2, %v6454_v37  ;;  %v6578_v4 = vadd.f32 %v6574_v43, %v6563_v27  ;;  %v6589_v62 = vmul.f32 %v11040_v35, %v6581_v31  ;;  %v6501_v22 = vmul.f32 %v15430_v11, %v6492_v47  ;;  %v6537_v24 = vld [vmem:[#allocation3 + $0x33] sm:$0xff] }
0x15fb   : > { %v6577_v39 = vadd.f32 %v6573_v36, %v6562_v34  ;;  %v6549_v51 = vadd.f32 %v6545_v15, %v6534_v12  ;;  %v6603_v1 = vmul.f32 %v11041_v38, %v15423_v33  ;;  %v6575_v49 = vmul.f32 %v15472_v23, %v6441_v21  ;;  %v6552_v2 = vld [vmem:[#allocation3 + $0x34] sm:$0xff] }
0x15fc   : > { %v6488_v16 = vadd.f32 %v6484_v55, %v6471_v44  ;;  %v6593_v19 = vadd.f32 %v6589_v62, %v6578_v4  ;;  %v6604_v8 = vmul.f32 %v11041_v38, %v6596_v30  ;;  %v6516_v9 = vmul.f32 %v15437_v17, %v6507_v40  ;;  %v6567_v12 = vld [vmem:[#allocation3 + $0x35] sm:$0xff] }
0x15fd   : > { %v6592_v54 = vadd.f32 %v6588_v60, %v6577_v39  ;;  %v6564_v58 = vadd.f32 %v6560_v42, %v6549_v51  ;;  %v6622_v46 = vrot.slane %v15313_v28, %v16853_v5  ;;  %v6590_v18 = vmul.f32 %v11040_v35, %v6458_v41  ;;  %v6582_v55 = vld [vmem:[#allocation3 + $0x36] sm:$0xff] }
0x15fe   : > { %v6505_v59 = vadd.f32 %v6501_v22, %v6488_v16  ;;  %v6608_v11 = vadd.f32 %v6604_v8, %v6593_v19  ;;  %v6531_v33 = vmul.f32 %v15449_v32, %v6522_v20  ;;  %v6605_v34 = vmul.f32 %v11041_v38, %v6475_v56  ;;  %v6597_v30 = vld [vmem:[#allocation3 + $0x37] sm:$0xff] }
0x15ff   : > { %v6607_v53 = vadd.f32 %v6603_v1, %v6592_v54  ;;  %v6579_v61 = vadd.f32 %v6575_v49, %v6564_v58  ;;  %v6546_v17 = vmul.f32 %v15457_v57, %v6537_v24  ;;  %v6561_v41 = vmul.f32 %v15464_v7, %v6552_v2 }
0x1600   : > { %v6520_v48 = vadd.f32 %v6516_v9, %v6505_v59  ;;  %v6616_v36 = vmul.f32 %v15442_v29, %v6608_v11  ;;  %v6576_v56 = vmul.f32 %v15472_v23, %v6567_v12  ;;  %v6591_v51 = vmul.f32 %v11040_v35, %v6582_v55 }
0x1601   : > { %v6615_v37 = vmul.f32 %v15442_v29, %v6607_v53  ;;  %v6594_v21 = vadd.f32 %v6590_v18, %v6579_v61  ;;  %v6606_v4 = vmul.f32 %v11041_v38, %v6597_v30 }
0x1602   : > { %v6535_v31 = vadd.f32 %v6531_v33, %v6520_v48  ;;  %v6624_v27 = vadd.f32 %v6622_v46, %v6616_v36  ;;  %v6751_v33 = vrot.slane %v15313_v28, %v16859_v10 }
0x1603   : > { %v6623_v47 = vadd.f32 %v6622_v46, %v6615_v37  ;;  %v6609_v15 = vadd.f32 %v6605_v34, %v6594_v21 }
0x1604   : > { %v6550_v43 = vadd.f32 %v6546_v17, %v6535_v31  ;;  %v11043_v39 = vmul.f32 -1.442695, %v6624_v27 }
0x1605   : > { %v11042_v44 = vmul.f32 -1.442695, %v6623_v47  ;;  %v6617_v32 = vmul.f32 %v15442_v29, %v6609_v15 }
0x1606   : > { %v6565_v60 = vadd.f32 %v6561_v41, %v6550_v43 }
0x1607   : > { %13233 = vpow2.f32 %v11042_v44  ;;  %v6625_v40 = vadd.f32 %v6622_v46, %v6617_v32 }
0x1608   : > { %13235 = vpow2.f32 %v11043_v39  ;;  %v6580_v57 = vadd.f32 %v6576_v56, %v6565_v60 }
0x1609   : > { %v11044_v62 = vmul.f32 -1.442695, %v6625_v40 }
0x160a   : > { %v6595_v42 = vadd.f32 %v6591_v51, %v6580_v57 }
0x160b   : > { %13237 = vpow2.f32 %v11044_v62 }
0x160c   : > { %v6610_v16 = vadd.f32 %v6606_v4, %v6595_v42 }
0x160e   : > { %v6618_v7 = vmul.f32 %v15442_v29, %v6610_v16 }
0x1610   : > { %v6626_v22 = vadd.f32 %v6622_v46, %v6618_v7 }
0x1611   : > { %v13234_v54 = vpop.eup %13233 }
0x1612   : > { %v13236_v1 = vpop.eup %13235  ;;  %v6639_v20 = vadd.f32 1.0, %v13234_v54  ;;  %v11045_v58 = vmul.f32 -1.442695, %v6626_v22 }
0x1613   : > { %v6640_v49 = vadd.f32 1.0, %v13236_v1  ;;  %v11052_v1 = vld [vmem:[%s13809_s22 + $0x200] sm:$0xff] }
0x1614   : > { %13239 = vrcp.f32 %v6639_v20  ;;  %v11060_v20 = vld [vmem:[%s13809_s22 + $0x240] sm:$0xff] }
0x1615   : > { %13241 = vrcp.f32 %v6640_v49  ;;  %v13238_v23 = vpop.eup %13237  ;;  %v11118_v49 = vcombine.low %v11052_v1, %v11060_v20 }
0x1616   : > { %13243 = vpow2.f32 %v11045_v58  ;;  %v6641_v19 = vadd.f32 1.0, %v13238_v23  ;;  %v11053_v58 = vld [vmem:[%s13809_s22 + $0x208] sm:$0xff]  ;;  %v11119_v23 = vcombine.high %v11052_v1, %v11060_v20 }
0x1618   : > { %13245 = vrcp.f32 %v6641_v19  ;;  %v11061_v19 = vld [vmem:[%s13809_s22 + $0x248] sm:$0xff]  ;;  %7303 = vmatprep.subr.bf16.mxu0 %v11119_v23  ;;  %v1548_v23 = vld [vmem:[%s13799_s3 + $0x10] sm:$0x1f] }
0x1619   : > { %7304 = vmatpush1.bf16.msra.mxu0 %v11118_v49 }
0x161e   : > { %v13240_v8 = vpop.eup %13239 }
0x161f   : > { %v13242_v35 = vpop.eup %13241  ;;  %v6651_v59 = vmul.f32 %v13240_v8, %v6623_v47  ;;  %v11068_v8 = vld [vmem:[%s13809_s22 + $0x280] sm:$0xff] }
0x1620   : > { %v13244_v38 = vpop.eup %13243  ;;  %v6652_v9 = vmul.f32 %v13242_v35, %v6624_v27  ;;  %v11076_v35 = vld [vmem:[%s13809_s22 + $0x2c0] sm:$0xff] }
0x1621   : > { %v6642_v53 = vadd.f32 1.0, %v13244_v38  ;;  %v11121_v38 = vcombine.high %v11053_v58, %v11061_v19 }
0x1622   : > { %v6663_v29 = vpack.c.bf16 %v6652_v9, %v6651_v59  ;;  %v13246_v46 = vpop.eup %13245  ;;  %v11120_v59 = vcombine.low %v11053_v58, %v11061_v19  ;;  %v11135_v9 = vcombine.high %v11068_v8, %v11076_v35 }
0x1623   : > { %13247 = vrcp.f32 %v6642_v53  ;;  %v6653_v24 = vmul.f32 %v13246_v46, %v6625_v40  ;;  %v11069_v53 = vld [vmem:[%s13809_s22 + $0x288] sm:$0xff]  ;;  %v11084_v46 = vld [vmem:[%s13809_s22 + $0x300] sm:$0xff]  ;;  %7356 = vmatprep.subr.bf16.mxu1 %v11121_v38 }
0x1624   : > { %12425 = vmatprep.mubr.msk.bf16.mxu1 %vm1553_vm7, %v6663_v29  ;;  %v11077_v29 = vld [vmem:[%s13809_s22 + $0x2c8] sm:$0xff]  ;;  %7305 = vmatprep.subr.bf16.mxu0 %v11135_v9  ;;  %v6819_v9 = vrot.slane %v1548_v23, %v16858_v26 }
0x162d   : > { %v13248_v61 = vpop.eup %13247 }
0x162e   : > { %v6654_v18 = vmul.f32 %v13248_v61, %v6626_v22  ;;  %v11092_v61 = vld [vmem:[%s13809_s22 + $0x340] sm:$0xff] }
0x1630   : > { %v6664_v11 = vpack.c.bf16 %v6654_v18, %v6653_v24  ;;  %v11137_v24 = vcombine.high %v11069_v53, %v11077_v29  ;;  %v11085_v18 = vld [vmem:[%s13809_s22 + $0x308] sm:$0xff] }
0x1632   : > { %12426 = vmatmul.mubr.msk.bf16.vlgmr.msra.gmra.mrb[112].mxu1 %vm1553_vm7, %v6664_v11  ;;  %v11093_v11 = vld [vmem:[%s13809_s22 + $0x348] sm:$0xff] }
0x1633   : > { %7388 = vmatprep.mubr.bf16.mxu1 %v16851_v52  ;;  %7357 = vmatpush1.bf16.msra.mxu1 %v11120_v59 }
0x1634   : > { %7358 = vmatprep.subr.bf16.mxu1 %v11137_v24 }
0x1705   : > { %v12427_v48 = vpop.f32.mrb[112].mxu1 }
0x1706   : > { %v6729_v37 = vpop.f32.mrb[113].mxu1  ;;  %v6746_v2 = vadd.f32 %v12427_v48, %v15322_v13  ;;  %v11134_v48 = vcombine.low %v11068_v8, %v11076_v35  ;;  %v6811_v8 = vrot.slane %v1548_v23, %v16861_v45 }
0x1707   : > { %v6744_v21 = vadd.f32 %v6729_v37, %v15319_v14  ;;  %v12428_v34 = vpop.f32.mrb[114].mxu1  ;;  %v11151_v37 = vcombine.high %v11084_v46, %v11092_v61 }
0x1708   : > { %v6732_v36 = vpop.f32.mrb[115].mxu1  ;;  %v15510_v47 = vadd.f32 %v6751_v33, %v6746_v2  ;;  %v6747_v12 = vadd.f32 %v12428_v34, %v15331_v3  ;;  %v11100_v2 = vld [vmem:[%s13809_s22 + $0x380] sm:$0xff]  ;;  %v15566_v34 = vld [vmem:[%s13809_s22 + $0x250] sm:$0xff]  ;;  %7306 = vmatpush1.bf16.msra.mxu0 %v11134_v48  ;;  %v11079_v48 = vld [vmem:[%s13809_s22 + $0x2d8] sm:$0xff] }
0x1709   : > { %v15507_v31 = vadd.f32 %v6751_v33, %v6744_v21  ;;  %v6745_v17 = vadd.f32 %v6732_v36, %v15325_v50  ;;  %v15563_v21 = vld [vmem:[%s13809_s22 + $0x210] sm:$0xff]  ;;  %v11153_v36 = vcombine.high %v11085_v18, %v11093_v11  ;;  %7307 = vmatprep.subr.bf16.mxu0 %v11151_v37 }
0x170a   : > { %16867 = vst [vmem:[#allocation24_spill] sm:$0xff] %v15510_v47  ;;  %v15519_v14 = vadd.f32 %v6751_v33, %v6747_v12  ;;  %v6762_v27 = vsel %vm1553_vm7, %v15510_v47, 0.0  ;;  %v11122_v12 = vcombine.low %v15563_v21, %v15566_v34 }
0x170b   : > { %16866 = vst [vmem:[#allocation21_spill] sm:$0xff] %v15507_v31  ;;  %v15513_v15 = vadd.f32 %v6751_v33, %v6745_v17  ;;  %v6756_v28 = vsel %vm1553_vm7, %v15507_v31, 0.0  ;;  %v11136_v33 = vcombine.low %v11069_v53, %v11077_v29  ;;  %v11108_v17 = vld [vmem:[%s13809_s22 + $0x3c0] sm:$0xff] }
0x170c   : > { %6757 = vadd.xlane.f32.xlu0 %v6756_v28  ;;  %16869 = vst [vmem:[#allocation26_spill] sm:$0xff] %v15519_v14  ;;  %v6765_v50 = vsel %vm1553_vm7, %v15519_v14, 0.0  ;;  %v15572_v28 = vld [vmem:[%s13809_s22 + $0x218] sm:$0xff] }
0x170d   : > { %16868 = vst [vmem:[#allocation25_spill] sm:$0xff] %v15513_v15  ;;  %v6759_v13 = vsel %vm1553_vm7, %v15513_v15, 0.0  ;;  %7359 = vmatpush1.bf16.msra.mxu1 %v11136_v33 }
0x170e   : > { %6760 = vadd.xlane.f32.xlu1 %v6759_v13  ;;  %v15575_v13 = vld [vmem:[%s13809_s22 + $0x258] sm:$0xff]  ;;  %7360 = vmatprep.subr.bf16.mxu1 %v11153_v36 }
0x1710   : > { %6763 = vadd.xlane.f32.xlu0 %v6762_v27  ;;  %v11101_v27 = vld [vmem:[%s13809_s22 + $0x388] sm:$0xff] }
0x1714   : > { %6766 = vadd.xlane.f32.xlu0 %v6765_v50  ;;  %v11109_v50 = vld [vmem:[%s13809_s22 + $0x3c8] sm:$0xff] }
0x1799   : > { %v6758_v3 = vpop.xlane.xlu0 %6757 }
0x179a   : > { %v6768_v43 = vmul.f32 0.015625, %v6758_v3  ;;  %v11124_v3 = vcombine.low %v15572_v28, %v15575_v13 }
0x179b   : > { %v6761_v41 = vpop.xlane.xlu1 %6760 }
0x179c   : > { %v15526_v44 = vsub.f32 %v15507_v31, %v6768_v43  ;;  %v6769_v55 = vmul.f32 0.015625, %v6761_v41  ;;  %v11150_v43 = vcombine.low %v11084_v46, %v11092_v61  ;;  %v11152_v41 = vcombine.low %v11085_v18, %v11093_v11  ;;  %v11070_v61 = vld [vmem:[%s13809_s22 + $0x290] sm:$0xff]  ;;  %v11071_v11 = vld [vmem:[%s13809_s22 + $0x298] sm:$0xff] }
0x179d   : > { %v6764_v32 = vpop.xlane.xlu0 %6763  ;;  %v11078_v18 = vld [vmem:[%s13809_s22 + $0x2d0] sm:$0xff] }
0x179e   : > { %v15529_v39 = vsub.f32 %v15513_v15, %v6769_v55  ;;  %v6770_v60 = vmul.f32 0.015625, %v6764_v32  ;;  %v6776_v56 = vmul.f32 %v15526_v44, %v15526_v44  ;;  %v11167_v55 = vcombine.high %v11100_v2, %v11108_v17  ;;  %7308 = vmatpush1.bf16.msra.mxu0 %v11150_v43  ;;  %7361 = vmatpush1.bf16.msra.mxu1 %v11152_v41  ;;  %v11094_v43 = vld [vmem:[%s13809_s22 + $0x350] sm:$0xff]  ;;  %v11087_v41 = vld [vmem:[%s13809_s22 + $0x318] sm:$0xff] }
0x179f   : > { %v11169_v32 = vcombine.high %v11101_v27, %v11109_v50 }
0x17a0   : > { %v15534_v30 = vsub.f32 %v15510_v47, %v6770_v60  ;;  %v6780_v40 = vsel %vm1553_vm7, %v6776_v56, 0.0  ;;  %v6777_v57 = vmul.f32 %v15529_v39, %v15529_v39  ;;  %v11166_v60 = vcombine.low %v11100_v2, %v11108_v17  ;;  %7309 = vmatprep.subr.bf16.mxu0 %v11167_v55  ;;  %v11095_v55 = vld [vmem:[%s13809_s22 + $0x358] sm:$0xff] }
0x17a1   : > { %6781 = vadd.xlane.f32.xlu0 %v6780_v40  ;;  %v6767_v51 = vpop.xlane.xlu0 %6766  ;;  %v11168_v56 = vcombine.low %v11101_v27, %v11109_v50  ;;  %v11123_v40 = vcombine.high %v15563_v21, %v15566_v34  ;;  %7362 = vmatprep.subr.bf16.mxu1 %v11169_v32  ;;  %v11139_v27 = vcombine.high %v11070_v61, %v11078_v18  ;;  %v11086_v50 = vld [vmem:[%s13809_s22 + $0x310] sm:$0xff]  ;;  %v11103_v34 = vld [vmem:[%s13809_s22 + $0x398] sm:$0xff] }
0x17a2   : > { %v6771_v42 = vmul.f32 0.015625, %v6767_v51  ;;  %v6783_v4 = vsel %vm1553_vm7, %v6777_v57, 0.0  ;;  %v6778_v62 = vmul.f32 %v15534_v30, %v15534_v30  ;;  %v11125_v57 = vcombine.high %v15572_v28, %v15575_v13  ;;  %7310 = vmatpush1.bf16.msra.mxu0 %v11166_v60  ;;  %v11110_v21 = vld [vmem:[%s13809_s22 + $0x3d0] sm:$0xff] }
0x17a3   : > { %6784 = vadd.xlane.f32.xlu1 %v6783_v4  ;;  %7363 = vmatpush1.bf16.msra.mxu1 %v11168_v56  ;;  %v11154_v13 = vcombine.low %v11086_v50, %v11094_v43 }
0x17a4   : > { %v15543_v16 = vsub.f32 %v15519_v14, %v6771_v42  ;;  %v6786_v7 = vsel %vm1553_vm7, %v6778_v62, 0.0  ;;  %7409 = vmatprep.subr.bf16.mxu0 %v11123_v40  ;;  %7462 = vmatprep.subr.bf16.mxu1 %v11125_v57  ;;  %v11155_v40 = vcombine.high %v11086_v50, %v11094_v43  ;;  %v11157_v57 = vcombine.high %v11087_v41, %v11095_v55 }
0x17a5   : > { %6787 = vadd.xlane.f32.xlu0 %v6786_v7 }
0x17a6   : > { %v6779_v22 = vmul.f32 %v15543_v16, %v15543_v16 }
0x17a8   : > { %v6789_v54 = vsel %vm1553_vm7, %v6779_v22, 0.0 }
0x17a9   : > { %6790 = vadd.xlane.f32.xlu1 %v6789_v54 }
0x182e   : > { %v6782_v51 = vpop.xlane.xlu0 %6781 }
0x182f   : > { %v6792_v42 = vmul.f32 0.015625, %v6782_v51  ;;  %v11102_v51 = vld [vmem:[%s13809_s22 + $0x390] sm:$0xff] }
0x1830   : > { %v6785_v4 = vpop.xlane.xlu1 %6784 }
0x1831   : > { %v6796_v62 = vadd.f32 1e-05, %v6792_v42  ;;  %v6793_v7 = vmul.f32 0.015625, %v6785_v4  ;;  %v11171_v4 = vcombine.high %v11102_v51, %v11110_v21 }
0x1832   : > { %v6788_v22 = vpop.xlane.xlu0 %6787 }
0x1833   : > { %13249 = vrsqrt.f32 %v6796_v62  ;;  %v6797_v54 = vadd.f32 1e-05, %v6793_v7  ;;  %v6794_v1 = vmul.f32 0.015625, %v6788_v22  ;;  %v11056_v7 = vld [vmem:[%s13809_s22 + $0x220] sm:$0xff] }
0x1834   : > { %v11064_v22 = vld [vmem:[%s13809_s22 + $0x260] sm:$0xff] }
0x1835   : > { %13251 = vrsqrt.f32 %v6797_v54  ;;  %v6798_v20 = vadd.f32 1e-05, %v6794_v1  ;;  %v11057_v54 = vld [vmem:[%s13809_s22 + $0x228] sm:$0xff] }
0x1836   : > { %v6791_v58 = vpop.xlane.xlu1 %6790  ;;  %v11065_v1 = vld [vmem:[%s13809_s22 + $0x268] sm:$0xff] }
0x1837   : > { %13253 = vrsqrt.f32 %v6798_v20  ;;  %v6795_v49 = vmul.f32 0.015625, %v6791_v58  ;;  %v11170_v20 = vcombine.low %v11102_v51, %v11110_v21  ;;  %v11129_v23 = vcombine.high %v11057_v54, %v11065_v1  ;;  %v11074_v51 = vld [vmem:[%s13809_s22 + $0x2b0] sm:$0xff] }
0x1838   : > { %v11082_v21 = vld [vmem:[%s13809_s22 + $0x2f0] sm:$0xff] }
0x1839   : > { %v6799_v19 = vadd.f32 1e-05, %v6795_v49  ;;  %v11127_v49 = vcombine.high %v11056_v7, %v11064_v22 }
0x183b   : > { %13255 = vrsqrt.f32 %v6799_v19  ;;  %v11072_v19 = vld [vmem:[%s13809_s22 + $0x2a0] sm:$0xff] }
0x183d   : > { %v13250_v35 = vpop.eup %13249 }
0x183e   : > { %v6804_v59 = vmul.f32 %v13250_v35, %v15526_v44  ;;  %v11073_v35 = vld [vmem:[%s13809_s22 + $0x2a8] sm:$0xff] }
0x183f   : > { %v13252_v38 = vpop.eup %13251 }
0x1840   : > { %v6812_v53 = vmul.f32 %v6811_v8, %v6804_v59  ;;  %v6805_v29 = vmul.f32 %v13252_v38, %v15529_v39  ;;  %v11141_v39 = vcombine.high %v11071_v11, %v11079_v48  ;;  %v11081_v59 = vld [vmem:[%s13809_s22 + $0x2e8] sm:$0xff]  ;;  %v11126_v38 = vcombine.low %v11056_v7, %v11064_v22  ;;  %v11098_v7 = vld [vmem:[%s13809_s22 + $0x370] sm:$0xff]  ;;  %v11091_v22 = vld [vmem:[%s13809_s22 + $0x338] sm:$0xff] }
0x1841   : > { %v13254_v46 = vpop.eup %13253 }
0x1842   : > { %v6813_v24 = vmul.f32 %v6811_v8, %v6805_v29  ;;  %v6820_v33 = vadd.f32 %v6819_v9, %v6812_v53  ;;  %v6806_v44 = vmul.f32 %v13254_v46, %v15534_v30  ;;  %v11138_v30 = vcombine.low %v11070_v61, %v11078_v18  ;;  %v11088_v46 = vld [vmem:[%s13809_s22 + $0x320] sm:$0xff]  ;;  %v11089_v61 = vld [vmem:[%s13809_s22 + $0x328] sm:$0xff] }
0x1843   : > { %v11145_v29 = vcombine.high %v11073_v35, %v11081_v59  ;;  %v11097_v18 = vld [vmem:[%s13809_s22 + $0x368] sm:$0xff] }
0x1844   : > { %v6821_v37 = vadd.f32 %v6819_v9, %v6813_v24  ;;  %v6814_v32 = vmul.f32 %v6811_v8, %v6806_v44  ;;  %v11096_v24 = vld [vmem:[%s13809_s22 + $0x360] sm:$0xff]  ;;  %v11160_v50 = vcombine.low %v11089_v61, %v11097_v18 }
0x1845   : > { %v13256_v2 = vpop.eup %13255  ;;  %v11104_v44 = vld [vmem:[%s13809_s22 + $0x3a0] sm:$0xff] }
0x1846   : > { %v15595_v36 = vpack.c.bf16 %v6821_v37, %v6820_v33  ;;  %v6807_v17 = vmul.f32 %v13256_v2, %v15543_v16  ;;  %v11140_v16 = vcombine.low %v11071_v11, %v11079_v48  ;;  %v6822_v28 = vadd.f32 %v6819_v9, %v6814_v32  ;;  %v11112_v2 = vld [vmem:[%s13809_s22 + $0x3e0] sm:$0xff]  ;;  %v11066_v32 = vld [vmem:[%s13809_s22 + $0x270] sm:$0xff] }
0x1847   : > { %v11144_v48 = vcombine.low %v11073_v35, %v11081_v59  ;;  %v11159_v33 = vcombine.high %v11088_v46, %v11096_v24  ;;  %v11161_v37 = vcombine.high %v11089_v61, %v11097_v18  ;;  %v11175_v43 = vcombine.high %v11104_v44, %v11112_v2  ;;  %v11115_v35 = vld [vmem:[%s13809_s22 + $0x3f8] sm:$0xff]  ;;  %v12746_v61 = vld [vmem:[%s13815_s7 + $0x4c0] sm:$0xff]  }
0x1848   : > { %v6815_v60 = vmul.f32 %v6811_v8, %v6807_v17  ;;  %11182 = vmatmul.mubr.msk.bf16.vlgmr.msra.gmra.mrb[116].mxu0 %vm1553_vm7, %v15595_v36  ;;  %11184 = vmatmul.mubr.msk.bf16.vlgmr.msra.gmra.mrb[116].mxu1 %vm1553_vm7, %v15595_v36  ;;  %v11080_v8 = vld [vmem:[%s13809_s22 + $0x2e0] sm:$0xff]  ;;  %v11105_v17 = vld [vmem:[%s13809_s22 + $0x3a8] sm:$0xff] }
0x1849   : > { %7410 = vmatpush1.bf16.msra.mxu0 %v11122_v12  ;;  %7463 = vmatpush1.bf16.msra.mxu1 %v11124_v3  ;;  %v11111_v12 = vld [vmem:[%s13809_s22 + $0x3d8] sm:$0xff]  ;;  %v11156_v3 = vcombine.low %v11087_v41, %v11095_v55  ;;  %v11143_v53 = vcombine.high %v11072_v19, %v11080_v8  ;;  %v11142_v11 = vcombine.low %v11072_v19, %v11080_v8  ;;  %v11058_v55 = vld [vmem:[%s13809_s22 + $0x230] sm:$0xff]  ;;  %v12747_v18 = vld [vmem:[%s13815_s7 + $0x400] sm:$0xff]  }
0x184a   : > { %v6823_v56 = vadd.f32 %v6819_v9, %v6815_v60  ;;  %7411 = vmatprep.subr.bf16.mxu0 %v11139_v27  ;;  %7464 = vmatprep.subr.bf16.mxu1 %v11141_v39  ;;  %v11173_v62 = vcombine.high %v11103_v34, %v11111_v12  ;;  %v11172_v58 = vcombine.low %v11103_v34, %v11111_v12  ;;  %v11113_v27 = vld [vmem:[%s13809_s22 + $0x3e8] sm:$0xff]  ;;  %v11059_v60 = vld [vmem:[%s13809_s22 + $0x238] sm:$0xff]  ;;  %v11114_v19 = vld [vmem:[%s13809_s22 + $0x3f0] sm:$0xff] }
0x184b   : > { %7345 = vmatprep.mubr.bf16.mxu0 %v16851_v52  ;;  %7398 = vmatprep.mubr.bf16.mxu1 %v16851_v52  ;;  %v11128_v9 = vcombine.low %v11057_v54, %v11065_v1  ;;  %v11158_v39 = vcombine.low %v11088_v46, %v11096_v24  ;;  %v11177_v41 = vcombine.high %v11105_v17, %v11113_v27  ;;  %v11075_v34 = vld [vmem:[%s13809_s22 + $0x2b8] sm:$0xff]  ;;  %v12745_v24 = vld [vmem:[%s13815_s7 + $0x440] sm:$0xff]  }
0x184c   : > { %v15618_v42 = vpack.c.bf16 %v6823_v56, %v6822_v28  ;;  %v11176_v56 = vcombine.low %v11105_v17, %v11113_v27  ;;  %v11083_v12 = vld [vmem:[%s13809_s22 + $0x2f8] sm:$0xff]  ;;  %v11130_v28 = vcombine.low %v11058_v55, %v11066_v32  ;;  %v11146_v1 = vcombine.low %v11074_v51, %v11082_v21 }
0x184d   : > { %7412 = vmatpush1.bf16.msra.mxu0 %v11138_v30  ;;  %7465 = vmatpush1.bf16.msra.mxu1 %v11140_v16  ;;  %v11067_v30 = vld [vmem:[%s13809_s22 + $0x278] sm:$0xff]  ;;  %v11174_v16 = vcombine.low %v11104_v44, %v11112_v2  ;;  %v12755_v44 = vld [vmem:[%s13815_s7 + $0x410] sm:$0xff]  }
0x184e   : > { %7413 = vmatprep.subr.bf16.mxu0 %v11155_v40  ;;  %7466 = vmatprep.subr.bf16.mxu1 %v11157_v57  ;;  %v11131_v40 = vcombine.high %v11058_v55, %v11066_v32  ;;  %v11133_v57 = vcombine.high %v11059_v60, %v11067_v30  ;;  %v11099_v54 = vld [vmem:[%s13809_s22 + $0x378] sm:$0xff]  ;;  %v12756_v2 = vld [vmem:[%s13815_s7 + $0x490] sm:$0xff]   ;;  %v12763_v55 = vld [vmem:[%s13815_s7 + $0x420] sm:$0xff]  }
0x184f   : > { %v11107_v8 = vld [vmem:[%s13809_s22 + $0x3b8] sm:$0xff]  ;;  %v12764_v32 = vld [vmem:[%s13815_s7 + $0x4a0] sm:$0xff]  }
0x1850   : > { %11183 = vmatmul.mubr.msk.bf16.gmra.mrb[120].mxu0 %vm1553_vm7, %v15618_v42  ;;  %11185 = vmatmul.mubr.msk.bf16.gmra.mrb[120].mxu1 %vm1553_vm7, %v15618_v42  ;;  %v11180_v46 = vcombine.low %v11107_v8, %v11115_v35  ;;  %v12757_v17 = vld [vmem:[%s13815_s7 + $0x458] sm:$0xff]  }
0x1851   : > { %7414 = vmatpush1.bf16.msra.mxu0 %v11154_v13  ;;  %7467 = vmatpush1.bf16.msra.mxu1 %v11156_v3  ;;  %v11132_v13 = vcombine.low %v11059_v60, %v11067_v30  ;;  %v11147_v3 = vcombine.high %v11074_v51, %v11082_v21  ;;  %v12758_v27 = vld [vmem:[%s13815_s7 + $0x4d8] sm:$0xff]   ;;  %v12765_v60 = vld [vmem:[%s13815_s7 + $0x468] sm:$0xff]   ;;  %v12771_v51 = vld [vmem:[%s13815_s7 + $0x430] sm:$0xff]  }
0x1852   : > { %7415 = vmatprep.subr.bf16.mxu0 %v11171_v4  ;;  %7468 = vmatprep.subr.bf16.mxu1 %v11173_v62  ;;  %v11149_v4 = vcombine.high %v11075_v34, %v11083_v12  ;;  %v11090_v62 = vld [vmem:[%s13809_s22 + $0x330] sm:$0xff]  ;;  %v12766_v30 = vld [vmem:[%s13815_s7 + $0x4e8] sm:$0xff]  }
0x1853   : > { %7441 = vmatprep.mubr.bf16.mxu0 %v16851_v52  ;;  %7494 = vmatprep.mubr.bf16.mxu1 %v16851_v52  ;;  %v11162_v59 = vcombine.low %v11090_v62, %v11098_v7  ;;  %v12772_v21 = vld [vmem:[%s13815_s7 + $0x4b0] sm:$0xff]  }
0x1855   : > { %7416 = vmatpush1.bf16.msra.mxu0 %v11170_v20  ;;  %7469 = vmatpush1.bf16.msra.mxu1 %v11172_v58  ;;  %v11148_v20 = vcombine.low %v11075_v34, %v11083_v12  ;;  %v11163_v58 = vcombine.high %v11090_v62, %v11098_v7  ;;  %v12773_v34 = vld [vmem:[%s13815_s7 + $0x478] sm:$0xff]   ;;  %v15727_v62 = vld [vmem:[%s13804_s1 + $0x1] ss:$2 sm:$0xff] }
0x1856   : > { %7515 = vmatprep.subr.bf16.mxu0 %v11127_v49  ;;  %7568 = vmatprep.subr.bf16.mxu1 %v11129_v23  ;;  %v11165_v49 = vcombine.high %v11091_v22, %v11099_v54  ;;  %v11106_v23 = vld [vmem:[%s13809_s22 + $0x3b0] sm:$0xff]  ;;  %v12774_v12 = vld [vmem:[%s13815_s7 + $0x4f8] sm:$0xff]   ;;  %v6900_v7 = vrot.slane %v15727_v62, %v16861_v45 }
0x1858   : > { %11186 = vmatmul.mubr.msk.bf16.vlgmr.msra.gmra.mrb[124].mxu0 %vm1553_vm7, %v15595_v36  ;;  %11188 = vmatmul.mubr.msk.bf16.vlgmr.msra.gmra.mrb[124].mxu1 %vm1553_vm7, %v15595_v36 }
0x1859   : > { %7516 = vmatpush1.bf16.msra.mxu0 %v11126_v38  ;;  %7569 = vmatpush1.bf16.msra.mxu1 %v11128_v9  ;;  %v11164_v38 = vcombine.low %v11091_v22, %v11099_v54  ;;  %v11179_v9 = vcombine.high %v11106_v23, %v11114_v19  ;;  %v15733_v22 = vrot.slane %v15727_v62, %v16852_v63 }
0x185a   : > { %7517 = vmatprep.subr.bf16.mxu0 %v11143_v53  ;;  %7570 = vmatprep.subr.bf16.mxu1 %v11145_v29  ;;  %v11181_v53 = vcombine.high %v11107_v8, %v11115_v35  ;;  %v11178_v29 = vcombine.low %v11106_v23, %v11114_v19  ;;  %v15737_v54 = vrot.slane %v15727_v62, %v16858_v26 }
0x185b   : > { %7451 = vmatprep.mubr.bf16.mxu0 %v16851_v52  ;;  %7504 = vmatprep.mubr.bf16.mxu1 %v16851_v52 }
0x185d   : > { %7518 = vmatpush1.bf16.msra.mxu0 %v11142_v11  ;;  %7571 = vmatpush1.bf16.msra.mxu1 %v11144_v48  ;;  %v12748_v11 = vld [vmem:[%s13815_s7 + $0x480] sm:$0xff]   ;;  %v12750_v48 = vld [vmem:[%s13815_s7 + $0x4c8] sm:$0xff]  }
0x185e   : > { %7519 = vmatprep.subr.bf16.mxu0 %v11159_v33  ;;  %7572 = vmatprep.subr.bf16.mxu1 %v11161_v37  ;;  %v12753_v33 = vld [vmem:[%s13815_s7 + $0x450] sm:$0xff]  }
0x185f   : > { %v12754_v37 = vld [vmem:[%s13815_s7 + $0x4d0] sm:$0xff]  }
0x1860   : > { %11187 = vmatmul.mubr.msk.bf16.gmra.mrb[128].mxu0 %vm1553_vm7, %v15618_v42  ;;  %11189 = vmatmul.mubr.msk.bf16.gmra.mrb[128].mxu1 %vm1553_vm7, %v15618_v42 }
0x1861   : > { %7520 = vmatpush1.bf16.msra.mxu0 %v11158_v39  ;;  %7573 = vmatpush1.bf16.msra.mxu1 %v11160_v50  ;;  %v12759_v39 = vld [vmem:[%s13815_s7 + $0x418] sm:$0xff]  }
0x1862   : > { %7521 = vmatprep.subr.bf16.mxu0 %v11175_v43  ;;  %7574 = vmatprep.subr.bf16.mxu1 %v11177_v41  ;;  %v12760_v50 = vld [vmem:[%s13815_s7 + $0x498] sm:$0xff]   ;;  %v12761_v43 = vld [vmem:[%s13815_s7 + $0x460] sm:$0xff]  }
0x1863   : > { %7547 = vmatprep.mubr.bf16.mxu0 %v16851_v52  ;;  %7600 = vmatprep.mubr.bf16.mxu1 %v16851_v52  ;;  %v12762_v41 = vld [vmem:[%s13815_s7 + $0x4e0] sm:$0xff]  }
0x1865   : > { %7522 = vmatpush1.bf16.msra.mxu0 %v11174_v16  ;;  %7575 = vmatpush1.bf16.msra.mxu1 %v11176_v56  ;;  %v12767_v16 = vld [vmem:[%s13815_s7 + $0x428] sm:$0xff]  }
0x1866   : > { %7621 = vmatprep.subr.bf16.mxu0 %v11131_v40  ;;  %7674 = vmatprep.subr.bf16.mxu1 %v11133_v57  ;;  %v12768_v56 = vld [vmem:[%s13815_s7 + $0x4a8] sm:$0xff]   ;;  %v12769_v40 = vld [vmem:[%s13815_s7 + $0x470] sm:$0xff]  }
0x1867   : > { %v12770_v57 = vld [vmem:[%s13815_s7 + $0x4f0] sm:$0xff]  }
0x1868   : > { %11190 = vmatmul.mubr.msk.bf16.vlgmr.msra.gmra.mrb[132].mxu0 %vm1553_vm7, %v15595_v36  ;;  %11192 = vmatmul.mubr.msk.bf16.vlgmr.msra.gmra.mrb[132].mxu1 %vm1553_vm7, %v15595_v36 }
0x1869   : > { %7622 = vmatpush1.bf16.msra.mxu0 %v11130_v28  ;;  %7675 = vmatpush1.bf16.msra.mxu1 %v11132_v13  ;;  %v12775_v28 = vld [vmem:[%s13815_s7 + $0x438] sm:$0xff]  }
0x186a   : > { %7623 = vmatprep.subr.bf16.mxu0 %v11147_v3  ;;  %7676 = vmatprep.subr.bf16.mxu1 %v11149_v4  ;;  %v12776_v13 = vld [vmem:[%s13815_s7 + $0x4b8] sm:$0xff]   ;;  %v12777_v3 = vld [vmem:[%s13815_s7 + $0x540] sm:$0xff]  }
0x186b   : > { %7557 = vmatprep.mubr.bf16.mxu0 %v16851_v52  ;;  %7610 = vmatprep.mubr.bf16.mxu1 %v16851_v52  ;;  %v12778_v4 = vld [vmem:[%s13815_s7 + $0x5c0] sm:$0xff]  }
0x186d   : > { %7624 = vmatpush1.bf16.msra.mxu0 %v11146_v1  ;;  %7677 = vmatpush1.bf16.msra.mxu1 %v11148_v20  ;;  %v15741_v1 = vrot.slane %v15727_v62, %v16855_v25 }
0x186e   : > { %7625 = vmatprep.subr.bf16.mxu0 %v11163_v58  ;;  %7678 = vmatprep.subr.bf16.mxu1 %v11165_v49 }
0x1870   : > { %11191 = vmatmul.mubr.msk.bf16.gmra.mrb[136].mxu0 %vm1553_vm7, %v15618_v42  ;;  %11193 = vmatmul.mubr.msk.bf16.gmra.mrb[136].mxu1 %vm1553_vm7, %v15618_v42 }
0x1871   : > { %7626 = vmatpush1.bf16.msra.mxu0 %v11162_v59  ;;  %7679 = vmatpush1.bf16.msra.mxu1 %v11164_v38 }
0x1872   : > { %7627 = vmatprep.subr.bf16.mxu0 %v11179_v9  ;;  %7680 = vmatprep.subr.bf16.mxu1 %v11181_v53 }
0x1873   : > { %7653 = vmatprep.mubr.bf16.mxu0 %v16851_v52  ;;  %7706 = vmatprep.mubr.bf16.mxu1 %v16851_v52 }
0x1875   : > { %7628 = vmatpush1.bf16.msra.mxu0 %v11178_v29  ;;  %7681 = vmatpush1.bf16.msra.mxu1 %v11180_v46 }
0x1876   : > { %12018 = vmatprep.subr.bf16.mxu0 %v12745_v24  ;;  %12046 = vmatprep.subr.bf16.mxu1 %v12746_v61 }
0x1878   : > { %11194 = vmatmul.mubr.msk.bf16.vlgmr.msra.gmra.mrb[140].mxu0 %vm1553_vm7, %v15595_v36  ;;  %11196 = vmatmul.mubr.msk.bf16.vlgmr.msra.gmra.mrb[140].mxu1 %vm1553_vm7, %v15595_v36  ;;  %v12749_v36 = vld [vmem:[%s13815_s7 + $0x448] sm:$0xff]  }
0x1879   : > { %7663 = vmatprep.mubr.bf16.mxu0 %v16851_v52  ;;  %7716 = vmatprep.mubr.bf16.mxu1 %v16851_v52  ;;  %v12751_v52 = vld [vmem:[%s13815_s7 + $0x408] sm:$0xff]  }
0x187a   : > { %12019 = vmatpush3.bf16.msra.mxu0 %v12747_v18  ;;  %12047 = vmatpush3.bf16.msra.mxu1 %v12748_v11 }
0x187b   : > { %12020 = vmatprep.subr.bf16.mxu0 %v12749_v36  ;;  %12048 = vmatprep.subr.bf16.mxu1 %v12750_v48 }
0x187e   : > { %12021 = vmatpush3.bf16.msra.mxu0 %v12751_v52 }
0x187f   : > { %12022 = vmatprep.subr.bf16.mxu0 %v12753_v33 }
0x1880   : > { %11195 = vmatmul.mubr.msk.bf16.gmra.mrb[144].mxu0 %vm1553_vm7, %v15618_v42  ;;  %11197 = vmatmul.mubr.msk.bf16.gmra.mrb[144].mxu1 %vm1553_vm7, %v15618_v42  ;;  %v12752_v42 = vld [vmem:[%s13815_s7 + $0x488] sm:$0xff]  }
0x1881   : > { %12049 = vmatpush3.bf16.msra.mxu1 %v12752_v42 }
0x1882   : > { %12050 = vmatprep.subr.bf16.mxu1 %v12754_v37  ;;  %12023 = vmatpush3.bf16.msra.mxu0 %v12755_v44 }
0x1883   : > { %12024 = vmatprep.subr.bf16.mxu0 %v12757_v17 }
0x1885   : > { %12051 = vmatpush3.bf16.msra.mxu1 %v12756_v2 }
0x1886   : > { %12052 = vmatprep.subr.bf16.mxu1 %v12758_v27  ;;  %12025 = vmatpush3.bf16.msra.mxu0 %v12759_v39 }
0x1887   : > { %12026 = vmatprep.subr.bf16.mxu0 %v12761_v43 }
0x1889   : > { %12053 = vmatpush3.bf16.msra.mxu1 %v12760_v50 }
0x188a   : > { %12054 = vmatprep.subr.bf16.mxu1 %v12762_v41  ;;  %12027 = vmatpush3.bf16.msra.mxu0 %v12763_v55 }
0x188b   : > { %12028 = vmatprep.subr.bf16.mxu0 %v12765_v60 }
0x188d   : > { %12055 = vmatpush3.bf16.msra.mxu1 %v12764_v32 }
0x188e   : > { %12056 = vmatprep.subr.bf16.mxu1 %v12766_v30  ;;  %12029 = vmatpush3.bf16.msra.mxu0 %v12767_v16 }
0x188f   : > { %12030 = vmatprep.subr.bf16.mxu0 %v12769_v40 }
0x1891   : > { %12057 = vmatpush3.bf16.msra.mxu1 %v12768_v56 }
0x1892   : > { %12058 = vmatprep.subr.bf16.mxu1 %v12770_v57  ;;  %12031 = vmatpush3.bf16.msra.mxu0 %v12771_v51 }
0x1893   : > { %12032 = vmatprep.subr.bf16.mxu0 %v12773_v34 }
0x1895   : > { %12059 = vmatpush3.bf16.msra.mxu1 %v12772_v21 }
0x1896   : > { %12060 = vmatprep.subr.bf16.mxu1 %v12774_v12  ;;  %12033 = vmatpush3.bf16.msra.mxu0 %v12775_v28 }
0x1897   : > { %12074 = vmatprep.subr.bf16.mxu0 %v12777_v3 }
0x1899   : > { %12061 = vmatpush3.bf16.msra.mxu1 %v12776_v13 }
0x189a   : > { %12102 = vmatprep.subr.bf16.mxu1 %v12778_v4 }
0x191b   : > { %v7337_v20 = vpop.f32.mrb[116].mxu0  ;;  %v7390_v58 = vpop.f32.mrb[116].mxu1 }
0x191c   : > { %v15743_v49 = vadd.f32 %v7337_v20, %v6900_v7  ;;  %v15746_v23 = vadd.f32 %v7390_v58, %v15733_v22  ;;  %v7339_v19 = vpop.f32.mrb[117].mxu0  ;;  %v7392_v8 = vpop.f32.mrb[117].mxu1 }
0x191d   : > { %v15749_v35 = vadd.f32 %v7339_v19, %v15737_v54  ;;  %v15752_v59 = vadd.f32 %v7392_v8, %v15741_v1  ;;  %v7341_v38 = vpop.f32.mrb[118].mxu0  ;;  %v7394_v9 = vpop.f32.mrb[118].mxu1 }
0x191e   : > { %v11198_v53 = vmul.f32 -1.442695, %v15743_v49  ;;  %v11200_v29 = vmul.f32 -1.442695, %v15746_v23  ;;  %v15756_v46 = vadd.f32 %v7341_v38, %v6900_v7  ;;  %v15759_v24 = vadd.f32 %v7394_v9, %v15733_v22  ;;  %v7343_v61 = vpop.f32.mrb[119].mxu0  ;;  %v7396_v18 = vpop.f32.mrb[119].mxu1 }
0x191f   : > { %v11199_v11 = vmul.f32 -1.442695, %v15749_v35  ;;  %v11201_v36 = vmul.f32 -1.442695, %v15752_v59  ;;  %v15764_v48 = vadd.f32 %v7343_v61, %v15737_v54  ;;  %v15767_v52 = vadd.f32 %v7396_v18, %v15741_v1 }
0x1920   : > { %13257 = vpow2.f32 %v11198_v53  ;;  %v11214_v42 = vmul.f32 -1.442695, %v15756_v46  ;;  %v11216_v33 = vmul.f32 -1.442695, %v15759_v24 }
0x1921   : > { %13259 = vpow2.f32 %v11200_v29  ;;  %v11215_v37 = vmul.f32 -1.442695, %v15764_v48  ;;  %v11217_v44 = vmul.f32 -1.442695, %v15767_v52 }
0x1922   : > { %13261 = vpow2.f32 %v11199_v11 }
0x1923   : > { %13263 = vpow2.f32 %v11201_v36  ;;  %v7347_v2 = vpop.f32.mrb[120].mxu0  ;;  %v7400_v17 = vpop.f32.mrb[120].mxu1 }
0x1924   : > { %13265 = vpow2.f32 %v11214_v42  ;;  %v15773_v27 = vadd.f32 %v7347_v2, %v6900_v7  ;;  %v15776_v39 = vadd.f32 %v7400_v17, %v15733_v22  ;;  %v7349_v50 = vpop.f32.mrb[121].mxu0  ;;  %v7402_v43 = vpop.f32.mrb[121].mxu1 }
0x1925   : > { %13267 = vpow2.f32 %v11216_v33  ;;  %v15779_v41 = vadd.f32 %v7349_v50, %v15737_v54  ;;  %v15782_v55 = vadd.f32 %v7402_v43, %v15741_v1  ;;  %v7351_v32 = vpop.f32.mrb[122].mxu0  ;;  %v7404_v60 = vpop.f32.mrb[122].mxu1  ;;  %v15800_v50 = vrot.slane %v15727_v62, %v16856_v0 }
0x1926   : > { %13269 = vpow2.f32 %v11215_v37  ;;  %v11230_v30 = vmul.f32 -1.442695, %v15773_v27  ;;  %v11232_v16 = vmul.f32 -1.442695, %v15776_v39  ;;  %v15786_v56 = vadd.f32 %v7351_v32, %v6900_v7  ;;  %v7353_v40 = vpop.f32.mrb[123].mxu0  ;;  %v7406_v57 = vpop.f32.mrb[123].mxu1 }
0x1927   : > { %13271 = vpow2.f32 %v11217_v44  ;;  %v11231_v51 = vmul.f32 -1.442695, %v15779_v41  ;;  %v11233_v21 = vmul.f32 -1.442695, %v15782_v55  ;;  %v15796_v17 = vadd.f32 %v7404_v60, %v15733_v22 }
0x1928   : > { %13273 = vpow2.f32 %v11230_v30  ;;  %v11246_v34 = vmul.f32 -1.442695, %v15786_v56  ;;  %v15804_v30 = vrot.slane %v15727_v62, %v16853_v5  ;;  %v15811_v22 = vadd.f32 %v7353_v40, %v15737_v54 }
0x1929   : > { %13275 = vpow2.f32 %v11232_v16  ;;  %v15808_v16 = vrot.slane %v15727_v62, %v16857_v6  ;;  %v15815_v60 = vrot.slane %v15727_v62, %v16859_v10  ;;  %v11248_v54 = vmul.f32 -1.442695, %v15796_v17 }
0x192a   : > { %v13258_v12 = vpop.eup %13257  ;;  %13277 = vpow2.f32 %v11231_v51 }
0x192b   : > { %v13260_v28 = vpop.eup %13259  ;;  %v7919_v13 = vadd.f32 1.0, %v13258_v12  ;;  %13279 = vpow2.f32 %v11233_v21  ;;  %v7443_v3 = vpop.f32.mrb[124].mxu0 }
0x192c   : > { %v7496_v4 = vpop.f32.mrb[124].mxu1  ;;  %v13262_v7 = vpop.eup %13261  ;;  %v7921_v20 = vadd.f32 1.0, %v13260_v28  ;;  %13281 = vpow2.f32 %v11246_v34  ;;  %v15824_v40 = vadd.f32 %v7443_v3, %v15800_v50 }
0x192d   : > { %v7445_v58 = vpop.f32.mrb[125].mxu0  ;;  %v7498_v19 = vpop.f32.mrb[125].mxu1  ;;  %13283 = vrcp.f32 %v7919_v13  ;;  %v7920_v38 = vadd.f32 1.0, %v13262_v7  ;;  %v15818_v13 = vadd.f32 %v7406_v57, %v15741_v1  ;;  %v15831_v1 = vadd.f32 %v7496_v4, %v15804_v30 }
0x192e   : > { %v13264_v8 = vpop.eup %13263  ;;  %v7447_v9 = vpop.f32.mrb[126].mxu0  ;;  %13285 = vrcp.f32 %v7921_v20  ;;  %v15834_v57 = vadd.f32 %v7445_v58, %v15808_v16 }
0x192f   : > { %v15791_v53 = vpop.f32.mrb[126].mxu1  ;;  %v13266_v29 = vpop.eup %13265  ;;  %v7922_v61 = vadd.f32 1.0, %v13264_v8  ;;  %13287 = vrcp.f32 %v7920_v38  ;;  %v11249_v4 = vmul.f32 -1.442695, %v15818_v13  ;;  %v15848_v58 = vadd.f32 %v7447_v9, %v15800_v50 }
0x1930   : > { %v15793_v18 = vpop.f32.mrb[127].mxu0  ;;  %v13268_v11 = vpop.eup %13267  ;;  %v7935_v36 = vadd.f32 1.0, %v13266_v29 }
0x1931   : > { %v7502_v42 = vpop.f32.mrb[127].mxu1  ;;  %v13270_v33 = vpop.eup %13269  ;;  %13289 = vrcp.f32 %v7922_v61  ;;  %v7937_v37 = vadd.f32 1.0, %v13268_v11  ;;  %v15860_v9 = vadd.f32 %v15793_v18, %v15808_v16 }
0x1932   : > { %v13272_v44 = vpop.eup %13271  ;;  %13291 = vrcp.f32 %v7935_v36  ;;  %v7936_v2 = vadd.f32 1.0, %v13270_v33 }
0x1933   : > { %v13274_v43 = vpop.eup %13273  ;;  %13293 = vrcp.f32 %v7937_v37  ;;  %v7938_v32 = vadd.f32 1.0, %v13272_v44  ;;  %v7453_v34 = vpop.f32.mrb[128].mxu0  ;;  %v11247_v44 = vmul.f32 -1.442695, %v15811_v22  ;;  %16871 = vst [vmem:[#allocation28_spill] sm:$0xff] %v15860_v9 }
0x1934   : > { %v13276_v51 = vpop.eup %13275  ;;  %13295 = vrcp.f32 %v7936_v2  ;;  %v7951_v21 = vadd.f32 1.0, %v13274_v43  ;;  %v7506_v7 = vpop.f32.mrb[128].mxu1  ;;  %v15842_v2 = vadd.f32 %v7498_v19, %v15815_v60  ;;  %v11203_v19 = vmul.f32 -1.442695, %v15834_v57 }
0x1935   : > { %v13278_v12 = vpop.eup %13277  ;;  %13297 = vrcp.f32 %v7938_v32  ;;  %v7953_v28 = vadd.f32 1.0, %v13276_v51  ;;  %v15820_v20 = vpop.f32.mrb[129].mxu0 }
0x1936   : > { %v13280_v8 = vpop.eup %13279  ;;  %13299 = vrcp.f32 %v7951_v21  ;;  %v7952_v38 = vadd.f32 1.0, %v13278_v12  ;;  %v15826_v62 = vpop.f32.mrb[129].mxu1  ;;  %16870 = vst [vmem:[#allocation27_spill] sm:$0xff] %v15842_v2  ;;  %v11202_v21 = vmul.f32 -1.442695, %v15824_v40 }
0x1937   : > { %v15828_v29 = vpop.f32.mrb[130].mxu0  ;;  %v13282_v61 = vpop.eup %13281  ;;  %13301 = vrcp.f32 %v7953_v28  ;;  %v7954_v11 = vadd.f32 1.0, %v13280_v8  ;;  %v11204_v28 = vmul.f32 -1.442695, %v15831_v1  ;;  %v15855_v8 = vadd.f32 %v15791_v53, %v15804_v30 }
0x1938   : > { %v15836_v36 = vpop.f32.mrb[130].mxu1  ;;  %v15838_v33 = vpop.f32.mrb[131].mxu0  ;;  %13303 = vrcp.f32 %v7952_v38  ;;  %v7967_v3 = vadd.f32 1.0, %v13282_v61  ;;  %v11205_v61 = vmul.f32 -1.442695, %v15842_v2  ;;  %v12782_v2 = vld [vmem:[%s13815_s7 + $0x5c8] sm:$0xff]  }
0x1939   : > { %v13284_v37 = vpop.eup %13283  ;;  %v15844_v43 = vpop.f32.mrb[131].mxu1  ;;  %13305 = vrcp.f32 %v7954_v11  ;;  %v15863_v11 = vadd.f32 %v7502_v42, %v15815_v60  ;;  %v11220_v6 = vmul.f32 -1.442695, %v15855_v8 }
0x193a   : > { %v13286_v32 = vpop.eup %13285  ;;  %13307 = vrcp.f32 %v7967_v3  ;;  %v15870_v47 = vmul.f32 %v13284_v37, %v15743_v49  ;;  %v15887_v49 = vadd.f32 %v7453_v34, %v15800_v50 }
0x193b   : > { %v13288_v51 = vpop.eup %13287  ;;  %13309 = vpow2.f32 %v11248_v54  ;;  %16872 = vst [vmem:[#allocation22_spill] sm:$0xff] %v15863_v11  ;;  %v15865_v54 = vpop.f32.mrb[132].mxu0  ;;  %v15881_v31 = vmul.f32 %v13286_v32, %v15746_v23  ;;  %v15897_v23 = vadd.f32 %v7506_v7, %v15804_v30 }
0x193c   : > { %v13290_v12 = vpop.eup %13289  ;;  %13311 = vpow2.f32 %v11247_v44  ;;  %v15867_v3 = vpop.f32.mrb[132].mxu1  ;;  %v11218_v44 = vmul.f32 -1.442695, %v15848_v58  ;;  %16873 = vst [vmem:[#allocation23_spill] sm:$0xff] %v15887_v49 }
0x193d   : > { %v13292_v38 = vpop.eup %13291  ;;  %13313 = vpow2.f32 %v11249_v4  ;;  %v15876_v15 = vpop.f32.mrb[133].mxu0  ;;  %16874 = vst [vmem:[#allocation29_spill] sm:$0xff] %v15897_v23 }
0x193e   : > { %v13294_v14 = vpop.eup %13293  ;;  %v15873_v53 = vmul.f32 %v13292_v38, %v15756_v46  ;;  %v15878_v18 = vpop.f32.mrb[133].mxu1  ;;  %13315 = vpow2.f32 %v11202_v21  ;;  %v11219_v21 = vmul.f32 -1.442695, %v15860_v9 }
0x193f   : > { %v13296_v42 = vpop.eup %13295  ;;  %v15884_v10 = vmul.f32 %v13294_v14, %v15759_v24  ;;  %v15889_v46 = vpop.f32.mrb[134].mxu0  ;;  %13317 = vpow2.f32 %v11204_v28 }
0x1940   : > { %v15891_v37 = vpop.f32.mrb[134].mxu1  ;;  %v13298_v4 = vpop.eup %13297  ;;  %v8432_v38 = vpack.c.bf16 %v15873_v53, %v15870_v47  ;;  %13319 = vpow2.f32 %v11203_v19  ;;  %v11221_v47 = vmul.f32 -1.442695, %v15863_v11  ;;  %v8128_v7 = vmul.f32 %v13296_v42, %v15764_v48 }
0x1941   : > { %v15899_v14 = vpop.f32.mrb[135].mxu0  ;;  %v15901_v24 = vpop.f32.mrb[135].mxu1  ;;  %v8434_v32 = vpack.c.bf16 %v15884_v10, %v15881_v31  ;;  %13321 = vpow2.f32 %v11205_v61  ;;  %v8130_v53 = vmul.f32 %v13298_v4, %v15767_v52  ;;  %v11236_v10 = vmul.f32 -1.442695, %v15897_v23 }
0x1942   : > { %16875 = vst [vmem:[#allocation30_spill] sm:$0xff] %v15901_v24  ;;  %v15903_v34 = vpop.eup %13299  ;;  %13323 = vpow2.f32 %v11218_v44  ;;  %v11234_v24 = vmul.f32 -1.442695, %v15887_v49  ;;  %v8112_v19 = vmul.f32 %v13288_v51, %v15749_v35  ;;  %v8114_v61 = vmul.f32 %v13290_v12, %v15752_v59  ;;  %v15926_v44 = vld [vmem:[%s13804_s1 + $0x11] ss:$2 sm:$0xff]  ;;  %v12779_v12 = vld [vmem:[%s13815_s7 + $0x500] sm:$0xff]  }
0x1943   : > { %v15908_v5 = vpop.eup %13301  ;;  %13325 = vpow2.f32 %v11220_v6  ;;  %v15921_v11 = vpop.f32.mrb[136].mxu0  ;;  %s16922_s1 = sld [smem:[#allocation46_spill]] (!%p11646_p5) }
0x1944   : > { %v15911_v28 = vpop.eup %13303  ;;  %13327 = vpow2.f32 %v11219_v21  ;;  %16876 = vst [vmem:[#allocation31_spill] sm:$0xff] %v15921_v11  ;;  %v15923_v48 = vpop.f32.mrb[136].mxu1  ;;  %v8433_v51 = vpack.c.bf16 %v8128_v7, %v8112_v19  ;;  %v8435_v59 = vpack.c.bf16 %v8130_v53, %v8114_v61  ;;  %v12780_v21 = vld [vmem:[%s13815_s7 + $0x580] sm:$0xff]   ;;  %v12781_v11 = vld [vmem:[%s13815_s7 + $0x548] sm:$0xff]   ;;  %v15946_v7 = vrot.slane %v15926_v44, %v16861_v45 }
0x1945   : > { %v15916_v0 = vpop.eup %13305  ;;  %16877 = vst [vmem:[#allocation32_spill] sm:$0xff] %v15923_v48  ;;  %13329 = vpow2.f32 %v11221_v47  ;;  %v15928_v6 = vpop.f32.mrb[137].mxu0  ;;  %v15950_v19 = vrot.slane %v15926_v44, %v16852_v63  ;;  %v15954_v61 = vrot.slane %v15926_v44, %v16858_v26  ;;  %v12784_v26 = vld [vmem:[%s13815_s7 + $0x588] sm:$0xff]  }
0x1946   : > { %v13308_v31 = vpop.eup %13307  ;;  %16878 = vst [vmem:[#allocation19_spill] sm:$0xff] %v15928_v6  ;;  %v15930_v42 = vpop.f32.mrb[137].mxu1  ;;  %13331 = vpow2.f32 %v11234_v24  ;;  %9268 = vmatprep.mubr.bf16.mxu0 %v8433_v51  ;;  %9317 = vmatprep.mubr.bf16.mxu1 %v8435_v59  ;;  %v15971_v51 = vadd.f32 %v15828_v29, %v15800_v50 }
0x1947   : > { %v13310_v52 = vpop.eup %13309  ;;  %16879 = vst [vmem:[#allocation20_spill] sm:$0xff] %v15930_v42  ;;  %v15934_v23 = vpop.f32.mrb[138].mxu0  ;;  %13333 = vpow2.f32 %v11236_v10  ;;  %9269 = vmatmul.mubr.bf16.vlgmr.msra.gmra.mrb[148].mxu0 %v8432_v38  ;;  %9318 = vmatmul.mubr.bf16.vlgmr.msra.gmra.mrb[148].mxu1 %v8434_v32  ;;  %v15967_v38 = vmul.f32 %v13308_v31, %v15786_v56  ;;  %v15977_v56 = vadd.f32 %v15836_v36, %v15804_v30  ;;  %v12787_v30 = vld [vmem:[%s13815_s7 + $0x510] sm:$0xff]  }
0x1948   : > { %v13312_v4 = vpop.eup %13311  ;;  %v7969_v35 = vadd.f32 1.0, %v13310_v52  ;;  %v15936_v49 = vpop.f32.mrb[138].mxu1  ;;  %12075 = vmatpush3.bf16.msra.mxu0 %v12779_v12  ;;  %12103 = vmatpush3.bf16.msra.mxu1 %v12780_v21  ;;  %v15981_v31 = vrot.slane %v15926_v44, %v16855_v25  ;;  %v12788_v36 = vld [vmem:[%s13815_s7 + $0x590] sm:$0xff]  }
0x1949   : > { %v13314_v47 = vpop.eup %13313  ;;  %v7968_v48 = vadd.f32 1.0, %v13312_v4  ;;  %v15940_v9 = vpop.f32.mrb[139].mxu0  ;;  %v15958_v4 = vadd.f32 %v15820_v20, %v15808_v16  ;;  %12076 = vmatprep.subr.bf16.mxu0 %v12781_v11  ;;  %12104 = vmatprep.subr.bf16.mxu1 %v12782_v2  ;;  %v12785_v20 = vld [vmem:[%s13815_s7 + $0x550] sm:$0xff]   ;;  %v15989_v11 = vmul.f32 %v15903_v34, %v15773_v27 }
0x194a   : > { %v15942_v6 = vpop.f32.mrb[139].mxu1  ;;  %v13316_v42 = vpop.eup %13315  ;;  %13335 = vrcp.f32 %v7969_v35  ;;  %v7970_v24 = vadd.f32 1.0, %v13314_v47  ;;  %v15993_v47 = vadd.f32 %v15838_v33, %v15808_v16 }
0x194b   : > { %v13318_v53 = vpop.eup %13317  ;;  %13337 = vrcp.f32 %v7968_v48  ;;  %v7923_v10 = vadd.f32 1.0, %v13316_v42  ;;  %v15962_v48 = vadd.f32 %v15826_v62, %v15815_v60  ;;  %v12783_v42 = vld [vmem:[%s13815_s7 + $0x508] sm:$0xff]   ;;  %v12786_v62 = vld [vmem:[%s13815_s7 + $0x5d0] sm:$0xff]   ;;  %v15983_v50 = vpop.f32.mrb[140].mxu0  ;;  %v11235_v27 = vmul.f32 -1.442695, %v15958_v4 }
0x194c   : > { %v13320_v52 = vpop.eup %13319  ;;  %13339 = vrcp.f32 %v7970_v24  ;;  %v7925_v45 = vadd.f32 1.0, %v13318_v53  ;;  %v15985_v29 = vpop.f32.mrb[140].mxu1  ;;  %v12789_v24 = vld [vmem:[%s13815_s7 + $0x558] sm:$0xff]   ;;  %12077 = vmatpush3.bf16.msra.mxu0 %v12783_v42  ;;  %12105 = vmatpush3.bf16.msra.mxu1 %v12784_v26  ;;  %v11252_v26 = vmul.f32 -1.442695, %v15977_v56 }
0x194d   : > { %v13322_v35 = vpop.eup %13321  ;;  %13341 = vrcp.f32 %v7923_v10  ;;  %v7924_v32 = vadd.f32 1.0, %v13320_v52  ;;  %v15998_v53 = vpop.f32.mrb[141].mxu0  ;;  %v11237_v34 = vmul.f32 -1.442695, %v15962_v48  ;;  %12078 = vmatprep.subr.bf16.mxu0 %v12785_v20  ;;  %12106 = vmatprep.subr.bf16.mxu1 %v12786_v62 }
0x194e   : > { %v13324_v59 = vpop.eup %13323  ;;  %13343 = vrcp.f32 %v7925_v45  ;;  %v7926_v12 = vadd.f32 1.0, %v13322_v35  ;;  %v16000_v10 = vpop.f32.mrb[141].mxu1 }
0x194f   : > { %v13326_v2 = vpop.eup %13325  ;;  %13345 = vrcp.f32 %v7924_v32  ;;  %v7939_v21 = vadd.f32 1.0, %v13324_v59  ;;  %v16004_v35 = vpop.f32.mrb[142].mxu0  ;;  %v11250_v32 = vmul.f32 -1.442695, %v15971_v51  ;;  %v11251_v59 = vmul.f32 -1.442695, %v15993_v47 }
0x1950   : > { %v13328_v52 = vpop.eup %13327  ;;  %13347 = vrcp.f32 %v7926_v12  ;;  %v7941_v45 = vadd.f32 1.0, %v13326_v2  ;;  %v12790_v12 = vld [vmem:[%s13815_s7 + $0x5d8] sm:$0xff]   ;;  %v16010_v2 = vpop.f32.mrb[142].mxu1  ;;  %12079 = vmatpush3.bf16.msra.mxu0 %v12787_v30  ;;  %12107 = vmatpush3.bf16.msra.mxu1 %v12788_v36  ;;  %v8144_v30 = vmul.f32 %v15911_v28, %v15779_v41 }
0x1951   : > { %v13330_v16 = vpop.eup %13329  ;;  %13349 = vrcp.f32 %v7939_v21  ;;  %v7940_v33 = vadd.f32 1.0, %v13328_v52  ;;  %16880 = vst [vmem:[#allocation12_spill] sm:$0xff] %v16010_v2  ;;  %v16012_v25 = vpop.f32.mrb[143].mxu0  ;;  %v16017_v21 = vadd.f32 %v15844_v43, %v15815_v60  ;;  %v16028_v60 = vadd.f32 %v15867_v3, %v15950_v19  ;;  %12080 = vmatprep.subr.bf16.mxu0 %v12789_v24  ;;  %12108 = vmatprep.subr.bf16.mxu1 %v12790_v12  ;;  %v12793_v3 = vld [vmem:[%s13815_s7 + $0x560] sm:$0xff]  }
0x1952   : > { %16881 = vst [vmem:[#allocation8_spill] sm:$0xff] %v16012_v25  ;;  %v13332_v63 = vpop.eup %13331  ;;  %13351 = vrcp.f32 %v7941_v45  ;;  %v7942_v42 = vadd.f32 1.0, %v13330_v16  ;;  %v16019_v20 = vpop.f32.mrb[143].mxu1  ;;  %v16024_v25 = vadd.f32 %v15865_v54, %v15946_v7  ;;  %v16032_v43 = vadd.f32 %v15876_v15, %v15954_v61  ;;  %v12794_v15 = vld [vmem:[%s13815_s7 + $0x5e0] sm:$0xff]  }
0x1953   : > { %16882 = vst [vmem:[#allocation11_spill] sm:$0xff] %v16019_v20  ;;  %v13334_v62 = vpop.eup %13333  ;;  %13353 = vrcp.f32 %v7940_v33  ;;  %v7955_v52 = vadd.f32 1.0, %v13332_v63  ;;  %v12791_v63 = vld [vmem:[%s13815_s7 + $0x518] sm:$0xff]   ;;  %v8145_v54 = vmul.f32 %v15908_v5, %v15776_v39  ;;  %v16050_v5 = vadd.f32 %v15889_v46, %v15946_v7  ;;  %v16052_v39 = vpop.f32.mrb[144].mxu0 }
0x1954   : > { %v13336_v45 = vpop.eup %13335  ;;  %13355 = vrcp.f32 %v7942_v42  ;;  %v7957_v16 = vadd.f32 1.0, %v13334_v62  ;;  %v12792_v33 = vld [vmem:[%s13815_s7 + $0x598] sm:$0xff]   ;;  %v16041_v62 = vadd.f32 %v15878_v18, %v15981_v31  ;;  %v8146_v24 = vmul.f32 %v15916_v0, %v15782_v55  ;;  %v16059_v28 = vpop.f32.mrb[145].mxu0  ;;  %12081 = vmatpush3.bf16.msra.mxu0 %v12791_v63  ;;  %v12795_v0 = vld [vmem:[%s13815_s7 + $0x520] sm:$0xff]   ;;  %v12797_v63 = vld [vmem:[%s13815_s7 + $0x568] sm:$0xff]  }
0x1955   : > { %v13338_v20 = vpop.eup %13337  ;;  %v8161_v42 = vmul.f32 %v13336_v45, %v15796_v17  ;;  %13357 = vrcp.f32 %v7955_v52  ;;  %v16054_v17 = vpop.f32.mrb[144].mxu1  ;;  %v11253_v46 = vmul.f32 -1.442695, %v16017_v21  ;;  %v16066_v52 = vadd.f32 %v15891_v37, %v15950_v19  ;;  %12109 = vmatpush3.bf16.msra.mxu1 %v12792_v33  ;;  %12082 = vmatprep.subr.bf16.mxu0 %v12793_v3  ;;  %v12796_v37 = vld [vmem:[%s13815_s7 + $0x5a0] sm:$0xff]  }
0x1956   : > { %v13340_v2 = vpop.eup %13339  ;;  %v8160_v36 = vmul.f32 %v13338_v20, %v15811_v22  ;;  %13359 = vrcp.f32 %v7957_v16  ;;  %v16061_v22 = vpop.f32.mrb[145].mxu1  ;;  %12110 = vmatprep.subr.bf16.mxu1 %v12794_v15  ;;  %v11209_v3 = vmul.f32 -1.442695, %v16041_v62  ;;  %v11222_v15 = vmul.f32 -1.442695, %v16050_v5 }
0x1957   : > { %v13342_v18 = vpop.eup %13341  ;;  %v8162_v12 = vmul.f32 %v13340_v2, %v15818_v13  ;;  %13361 = vpow2.f32 %v11235_v27  ;;  %v8450_v41 = vpack.c.bf16 %v8161_v42, %v8145_v54  ;;  %v16069_v55 = vpop.f32.mrb[146].mxu0  ;;  %v16076_v2 = vadd.f32 %v15899_v14, %v15954_v61 }
0x1958   : > { %v13344_v20 = vpop.eup %13343  ;;  %13363 = vpow2.f32 %v11237_v34  ;;  %v8449_v45 = vpack.c.bf16 %v8160_v36, %v8144_v30  ;;  %v16071_v13 = vpop.f32.mrb[146].mxu1  ;;  %v11206_v34 = vmul.f32 -1.442695, %v16024_v25  ;;  %v11208_v30 = vmul.f32 -1.442695, %v16028_v60  ;;  %12083 = vmatpush3.bf16.msra.mxu0 %v12795_v0 }
0x1959   : > { %v13346_v27 = vpop.eup %13345  ;;  %13365 = vpow2.f32 %v11250_v32  ;;  %v8451_v16 = vpack.c.bf16 %v8162_v12, %v8146_v24  ;;  %v16080_v33 = vpop.f32.mrb[147].mxu0  ;;  %v12798_v32 = vld [vmem:[%s13815_s7 + $0x5e8] sm:$0xff]   ;;  %v11207_v14 = vmul.f32 -1.442695, %v16032_v43  ;;  %v16884_v24 = vpack.c.bf16 %v15967_v38, %v15989_v11  ;;  %12111 = vmatpush3.bf16.msra.mxu1 %v12796_v37  ;;  %12084 = vmatprep.subr.bf16.mxu0 %v12797_v63 }
0x195a   : > { %v16082_v54 = vpop.f32.mrb[147].mxu1  ;;  %v13348_v42 = vpop.eup %13347  ;;  %13367 = vpow2.f32 %v11252_v26  ;;  %9276 = vmatprep.mubr.bf16.mxu0 %v8449_v45  ;;  %v16093_v12 = vmul.f32 %v13342_v18, %v15824_v40  ;;  %v16101_v38 = vmul.f32 %v13344_v20, %v15831_v1  ;;  %v11223_v40 = vmul.f32 -1.442695, %v16076_v2  ;;  %v12801_v18 = vld [vmem:[%s13815_s7 + $0x570] sm:$0xff]   ;;  %12112 = vmatprep.subr.bf16.mxu1 %v12798_v32 }
0x195b   : > { %16883 = vst [vmem:[#allocation33_spill] sm:$0xff] %v16082_v54  ;;  %v13350_v36 = vpop.eup %13349  ;;  %13369 = vpow2.f32 %v11251_v59  ;;  %9325 = vmatprep.mubr.bf16.mxu1 %v8451_v16  ;;  %9277 = vmatmul.mubr.bf16.gmra.mrb[152].mxu0 %v16884_v24  ;;  %v11224_v59 = vmul.f32 -1.442695, %v16066_v52  ;;  %v12799_v54 = vld [vmem:[%s13815_s7 + $0x528] sm:$0xff]   ;;  %v16887_v24 = vld [vmem:[#allocation22_spill] sm:$0xff] }
0x195c   : > { %v13352_v26 = vpop.eup %13351  ;;  %v16096_v45 = vmul.f32 %v13350_v36, %v15848_v58  ;;  %13371 = vpow2.f32 %v11253_v46  ;;  %9326 = vmatmul.mubr.bf16.gmra.mrb[152].mxu1 %v8450_v41  ;;  %v12800_v58 = vld [vmem:[%s13815_s7 + $0x5a8] sm:$0xff]   ;;  %v8116_v41 = vmul.f32 %v13346_v27, %v15834_v57  ;;  %12085 = vmatpush3.bf16.msra.mxu0 %v12799_v54 }
0x195d   : > { %v13354_v16 = vpop.eup %13353  ;;  %v16104_v11 = vmul.f32 %v13352_v26, %v15855_v8  ;;  %13373 = vpow2.f32 %v11206_v34  ;;  %v16885_v36 = vld [vmem:[#allocation28_spill] sm:$0xff]  ;;  %v12802_v8 = vld [vmem:[%s13815_s7 + $0x5f0] sm:$0xff]   ;;  %v16886_v34 = vld [vmem:[#allocation27_spill] sm:$0xff]  ;;  %12113 = vmatpush3.bf16.msra.mxu1 %v12800_v58  ;;  %12086 = vmatprep.subr.bf16.mxu0 %v12801_v18 }
0x195e   : > { %v13356_v46 = vpop.eup %13355  ;;  %v8132_v1 = vmul.f32 %v13354_v16, %v16885_v36  ;;  %13375 = vpow2.f32 %v11208_v30  ;;  %v8118_v37 = vmul.f32 %v13348_v42, %v16886_v34  ;;  %v12803_v30 = vld [vmem:[%s13815_s7 + $0x530] sm:$0xff]   ;;  %v12805_v42 = vld [vmem:[%s13815_s7 + $0x578] sm:$0xff]   ;;  %12114 = vmatprep.subr.bf16.mxu1 %v12802_v8 }
0x195f   : > { %v16114_v20 = vpop.eup %13357  ;;  %v8134_v26 = vmul.f32 %v13356_v46, %v16887_v24  ;;  %13377 = vpow2.f32 %v11207_v14  ;;  %v12804_v36 = vld [vmem:[%s13815_s7 + $0x5b0] sm:$0xff]   ;;  %v12806_v14 = vld [vmem:[%s13815_s7 + $0x5f8] sm:$0xff]  }
0x1960   : > { %v16120_v57 = vpop.eup %13359  ;;  %13379 = vpow2.f32 %v11209_v3  ;;  %v8437_v27 = vpack.c.bf16 %v8132_v1, %v8116_v41  ;;  %12087 = vmatpush3.bf16.msra.mxu0 %v12803_v30  ;;  %v12807_v58 = vld [vmem:[%s13815_s7 + $0x538] sm:$0xff]   ;;  %v12809_v1 = vld [vmem:[%s13815_s7 + $0x640] sm:$0xff]  }
0x1961   : > { %v13362_v32 = vpop.eup %13361  ;;  %13381 = vpow2.f32 %v11222_v15  ;;  %v8439_v16 = vpack.c.bf16 %v8134_v26, %v8118_v37  ;;  %12115 = vmatpush3.bf16.msra.mxu1 %v12804_v36  ;;  %12088 = vmatprep.subr.bf16.mxu0 %v12805_v42  ;;  %v16889_v30 = vld [vmem:[#allocation16_spill] sm:$0xff]  ;;  %v16890_v42 = vld [vmem:[#allocation17_spill] sm:$0xff] }
0x1962   : > { %v13364_v34 = vpop.eup %13363  ;;  %v7956_v63 = vadd.f32 1.0, %v13362_v32  ;;  %13383 = vpow2.f32 %v11224_v59  ;;  %9366 = vmatprep.mubr.bf16.mxu0 %v8437_v27  ;;  %v12808_v59 = vld [vmem:[%s13815_s7 + $0x5b8] sm:$0xff]   ;;  %12116 = vmatprep.subr.bf16.mxu1 %v12806_v14  ;;  %v16136_v32 = vrot.slane %v15926_v44, %v16889_v30  ;;  %v12813_v30 = vld [vmem:[%s13815_s7 + $0x648] sm:$0xff]  }
0x1963   : > { %v13366_v3 = vpop.eup %13365  ;;  %v7958_v46 = vadd.f32 1.0, %v13364_v34  ;;  %13385 = vpow2.f32 %v11223_v40  ;;  %9415 = vmatprep.mubr.bf16.mxu1 %v8439_v16  ;;  %v12810_v40 = vld [vmem:[%s13815_s7 + $0x6c0] sm:$0xff]   ;;  %v16140_v34 = vrot.slane %v15926_v44, %v16890_v42  ;;  %v16891_v14 = vld [vmem:[#allocation18_spill] sm:$0xff] }
0x1964   : > { %v13368_v54 = vpop.eup %13367  ;;  %13387 = vrcp.f32 %v7956_v63  ;;  %v7971_v15 = vadd.f32 1.0, %v13366_v3  ;;  %v16888_v63 = vld [vmem:[#allocation15_spill] sm:$0xff]  ;;  %v16144_v3 = vrot.slane %v15926_v44, %v16891_v14  ;;  %12089 = vmatpush3.bf16.msra.mxu0 %v12807_v58  ;;  %v16894_v42 = vld [vmem:[#allocation32_spill] sm:$0xff] }
0x1965   : > { %v13370_v18 = vpop.eup %13369  ;;  %13389 = vrcp.f32 %v7958_v46  ;;  %v7973_v41 = vadd.f32 1.0, %v13368_v54  ;;  %v16132_v27 = vrot.slane %v15926_v44, %v16888_v63  ;;  %v12811_v46 = vld [vmem:[%s13815_s7 + $0x600] sm:$0xff]   ;;  %12117 = vmatpush3.bf16.msra.mxu1 %v12808_v59  ;;  %12130 = vmatprep.subr.bf16.mxu0 %v12809_v1  ;;  %v16159_v14 = vadd.f32 %v16894_v42, %v15950_v19  ;;  %v12821_v63 = vld [vmem:[%s13815_s7 + $0x658] sm:$0xff]  }
0x1966   : > { %v13372_v8 = vpop.eup %13371  ;;  %13391 = vrcp.f32 %v7971_v15  ;;  %v7972_v37 = vadd.f32 1.0, %v13370_v18  ;;  %v16892_v18 = vld [vmem:[#allocation30_spill] sm:$0xff]  ;;  %12158 = vmatprep.subr.bf16.mxu1 %v12810_v40  ;;  %v16896_v1 = vld [vmem:[#allocation20_spill] sm:$0xff] }
0x1967   : > { %v13374_v24 = vpop.eup %13373  ;;  %13393 = vrcp.f32 %v7973_v41  ;;  %v7974_v26 = vadd.f32 1.0, %v13372_v8  ;;  %v16149_v41 = vadd.f32 %v16892_v18, %v15981_v31  ;;  %v16893_v8 = vld [vmem:[#allocation31_spill] sm:$0xff]  ;;  %v12814_v18 = vld [vmem:[%s13815_s7 + $0x6c8] sm:$0xff]   ;;  %v16168_v0 = vadd.f32 %v16896_v1, %v15981_v31 }
0x1968   : > { %v13376_v16 = vpop.eup %13375  ;;  %13395 = vrcp.f32 %v7972_v37  ;;  %v7927_v36 = vadd.f32 1.0, %v13374_v24  ;;  %v16153_v37 = vadd.f32 %v16893_v8, %v15946_v7  ;;  %v12812_v24 = vld [vmem:[%s13815_s7 + $0x680] sm:$0xff]  }
0x1969   : > { %v13378_v54 = vpop.eup %13377  ;;  %13397 = vrcp.f32 %v7974_v26  ;;  %v7929_v15 = vadd.f32 1.0, %v13376_v16  ;;  %v16895_v26 = vld [vmem:[#allocation19_spill] sm:$0xff]  ;;  %16897 = vst [vmem:[#allocation28_spill] sm:$0xff] %v16168_v0 }
0x196a   : > { %v13380_v44 = vpop.eup %13379  ;;  %13399 = vrcp.f32 %v7927_v36  ;;  %v7928_v58 = vadd.f32 1.0, %v13378_v54  ;;  %v16163_v16 = vadd.f32 %v16895_v26, %v15954_v61  ;;  %v16172_v36 = vadd.f32 %v15934_v23, %v15946_v7  ;;  %v12815_v7 = vld [vmem:[%s13815_s7 + $0x608] sm:$0xff]  }
0x196b   : > { %v13382_v8 = vpop.eup %13381  ;;  %13401 = vrcp.f32 %v7929_v15  ;;  %v7930_v59 = vadd.f32 1.0, %v13380_v44  ;;  %v16898_v54 = vpack.c.bf16 %v16096_v45, %v16093_v12  ;;  %v16179_v15 = vadd.f32 %v15936_v49, %v15950_v19  ;;  %v12816_v12 = vld [vmem:[%s13815_s7 + $0x688] sm:$0xff]   ;;  %v12817_v19 = vld [vmem:[%s13815_s7 + $0x650] sm:$0xff]  }
0x196c   : > { %v13384_v42 = vpop.eup %13383  ;;  %13403 = vrcp.f32 %v7928_v58  ;;  %v7943_v40 = vadd.f32 1.0, %v13382_v8  ;;  %v16183_v44 = vadd.f32 %v15940_v9, %v15954_v61  ;;  %v16900_v23 = vpack.c.bf16 %v16104_v11, %v16101_v38 }
0x196d   : > { %9367 = vmatmul.mubr.bf16.vlgmr.msra.gmra.mrb[156].mxu0 %v16898_v54  ;;  %v13386_v45 = vpop.eup %13385  ;;  %13405 = vrcp.f32 %v7930_v59  ;;  %v7945_v58 = vadd.f32 1.0, %v13384_v42  ;;  %v11225_v26 = vmul.f32 -1.442695, %v16149_v41  ;;  %v11238_v49 = vmul.f32 -1.442695, %v16153_v37 }
0x196e   : > { %16899 = vst [vmem:[#allocation27_spill] sm:$0xff] %v16183_v44  ;;  %9416 = vmatmul.mubr.bf16.vlgmr.msra.gmra.mrb[156].mxu1 %v16900_v23  ;;  %12131 = vmatpush3.bf16.msra.mxu0 %v12811_v46  ;;  %v13388_v9 = vpop.eup %13387  ;;  %13407 = vrcp.f32 %v7943_v40  ;;  %v7944_v61 = vadd.f32 1.0, %v13386_v45  ;;  %v11240_v38 = vmul.f32 -1.442695, %v16159_v14  ;;  %v11239_v11 = vmul.f32 -1.442695, %v16163_v16 }
0x196f   : > { %12159 = vmatpush3.bf16.msra.mxu1 %v12812_v24  ;;  %12132 = vmatprep.subr.bf16.mxu0 %v12813_v30  ;;  %v12818_v46 = vld [vmem:[%s13815_s7 + $0x6d0] sm:$0xff]   ;;  %v13390_v8 = vpop.eup %13389  ;;  %13409 = vrcp.f32 %v7945_v58  ;;  %v11241_v59 = vmul.f32 -1.442695, %v16168_v0  ;;  %v11254_v1 = vmul.f32 -1.442695, %v16172_v36  ;;  %v16200_v24 = vadd.f32 %v15942_v6, %v15981_v31  ;;  %v16901_v45 = vld [vmem:[#allocation23_spill] sm:$0xff] }
0x1970   : > { %12160 = vmatprep.subr.bf16.mxu1 %v12814_v18  ;;  %v13392_v30 = vpop.eup %13391  ;;  %13411 = vrcp.f32 %v7944_v61  ;;  %v11256_v54 = vmul.f32 -1.442695, %v16179_v15  ;;  %v11255_v42 = vmul.f32 -1.442695, %v16183_v44  ;;  %v16206_v18 = vadd.f32 %v15983_v50, %v16132_v27  ;;  %v12819_v40 = vld [vmem:[%s13815_s7 + $0x610] sm:$0xff]  }
0x1971   : > { %v13394_v23 = vpop.eup %13393  ;;  %v8147_v58 = vmul.f32 %v16114_v20, %v16901_v45  ;;  %v8163_v6 = vmul.f32 %v13392_v30, %v15971_v51  ;;  %13413 = vpow2.f32 %v11225_v26  ;;  %v16214_v31 = vadd.f32 %v15985_v29, %v16136_v32  ;;  %v12820_v61 = vld [vmem:[%s13815_s7 + $0x690] sm:$0xff]   ;;  %v12822_v51 = vld [vmem:[%s13815_s7 + $0x6d8] sm:$0xff]  }
0x1972   : > { %12133 = vmatpush3.bf16.msra.mxu0 %v12815_v7  ;;  %v13396_v50 = vpop.eup %13395  ;;  %v16902_v0 = vld [vmem:[#allocation29_spill] sm:$0xff]  ;;  %v8165_v44 = vmul.f32 %v13394_v23, %v15977_v56  ;;  %13415 = vpow2.f32 %v11238_v49  ;;  %v16223_v20 = vadd.f32 %v15998_v53, %v16140_v34  ;;  %v8148_v29 = vmul.f32 %v13388_v9, %v15958_v4 }
0x1973   : > { %12161 = vmatpush3.bf16.msra.mxu1 %v12816_v12  ;;  %12134 = vmatprep.subr.bf16.mxu0 %v12817_v19  ;;  %v8149_v7 = vmul.f32 %v16120_v57, %v16902_v0  ;;  %v13398_v26 = vpop.eup %13397  ;;  %v8164_v12 = vmul.f32 %v13396_v50, %v15993_v47  ;;  %13417 = vpow2.f32 %v11240_v38  ;;  %v8452_v19 = vpack.c.bf16 %v8163_v6, %v8147_v58  ;;  %v12824_v38 = vld [vmem:[%s13815_s7 + $0x698] sm:$0xff]  }
0x1974   : > { %12162 = vmatprep.subr.bf16.mxu1 %v12818_v46  ;;  %v13400_v30 = vpop.eup %13399  ;;  %v8150_v0 = vmul.f32 %v13390_v8, %v15962_v48  ;;  %v8166_v56 = vmul.f32 %v13398_v26, %v16017_v21  ;;  %13419 = vpow2.f32 %v11239_v11  ;;  %v11257_v49 = vmul.f32 -1.442695, %v16200_v24  ;;  %v12823_v48 = vld [vmem:[%s13815_s7 + $0x618] sm:$0xff]   ;;  %v12825_v11 = vld [vmem:[%s13815_s7 + $0x660] sm:$0xff]  }
0x1975   : > { %v8454_v57 = vpack.c.bf16 %v8165_v44, %v8149_v7  ;;  %v13402_v53 = vpop.eup %13401  ;;  %13421 = vpow2.f32 %v11241_v59  ;;  %v16233_v4 = vadd.f32 %v16000_v10, %v16144_v3  ;;  %v8453_v47 = vpack.c.bf16 %v8164_v12, %v8148_v29  ;;  %v12826_v8 = vld [vmem:[%s13815_s7 + $0x6e0] sm:$0xff]  }
0x1976   : > { %12135 = vmatpush3.bf16.msra.mxu0 %v12819_v40  ;;  %v13404_v9 = vpop.eup %13403  ;;  %13423 = vpow2.f32 %v11254_v1  ;;  %v11210_v21 = vmul.f32 -1.442695, %v16206_v18  ;;  %v8455_v44 = vpack.c.bf16 %v8166_v56, %v8150_v0  ;;  %v11212_v10 = vmul.f32 -1.442695, %v16214_v31  ;;  %v12832_v56 = vld [vmem:[%s13815_s7 + $0x6a8] sm:$0xff]  }
0x1977   : > { %12163 = vmatpush3.bf16.msra.mxu1 %v12820_v61  ;;  %12136 = vmatprep.subr.bf16.mxu0 %v12821_v63  ;;  %v16239_v46 = vpop.eup %13405  ;;  %13425 = vpow2.f32 %v11256_v54  ;;  %v11211_v63 = vmul.f32 -1.442695, %v16223_v20  ;;  %v16245_v40 = vmul.f32 %v13400_v30, %v16024_v25  ;;  %v11213_v54 = vmul.f32 -1.442695, %v16233_v4  ;;  %v12828_v25 = vld [vmem:[%s13815_s7 + $0x6a0] sm:$0xff]   ;;  %v12831_v30 = vld [vmem:[%s13815_s7 + $0x628] sm:$0xff]  }
0x1978   : > { %12164 = vmatprep.subr.bf16.mxu1 %v12822_v51  ;;  %9374 = vmatprep.mubr.bf16.mxu0 %v8453_v47  ;;  %v13408_v59 = vpop.eup %13407  ;;  %13427 = vpow2.f32 %v11255_v42  ;;  %v12827_v42 = vld [vmem:[%s13815_s7 + $0x620] sm:$0xff]   ;;  %v16253_v58 = vmul.f32 %v13402_v53, %v16028_v60  ;;  %v8120_v50 = vmul.f32 %v13404_v9, %v16032_v43  ;;  %v12830_v60 = vld [vmem:[%s13815_s7 + $0x6e8] sm:$0xff]   ;;  %v12834_v47 = vld [vmem:[%s13815_s7 + $0x6f0] sm:$0xff]  }
0x1979   : > { %9423 = vmatprep.mubr.bf16.mxu1 %v8455_v44  ;;  %9375 = vmatmul.mubr.bf16.gmra.mrb[160].mxu0 %v8452_v19  ;;  %v13410_v1 = vpop.eup %13409  ;;  %v16248_v23 = vmul.f32 %v13408_v59, %v16050_v5  ;;  %13429 = vpow2.f32 %v11257_v49  ;;  %v12829_v5 = vld [vmem:[%s13815_s7 + $0x668] sm:$0xff]   ;;  %v12836_v59 = vld [vmem:[%s13815_s7 + $0x6b0] sm:$0xff]  }
0x197a   : > { %9424 = vmatmul.mubr.bf16.gmra.mrb[160].mxu1 %v8454_v57  ;;  %12137 = vmatpush3.bf16.msra.mxu0 %v12823_v48  ;;  %v13412_v45 = vpop.eup %13411  ;;  %v16256_v6 = vmul.f32 %v13410_v1, %v16066_v52  ;;  %13431 = vpow2.f32 %v11210_v21  ;;  %v12833_v57 = vld [vmem:[%s13815_s7 + $0x670] sm:$0xff]  }
0x197b   : > { %12165 = vmatpush3.bf16.msra.mxu1 %v12824_v38  ;;  %12138 = vmatprep.subr.bf16.mxu0 %v12825_v11  ;;  %v13414_v61 = vpop.eup %13413  ;;  %v8440_v7 = vpack.c.bf16 %v16248_v23, %v16245_v40  ;;  %v8136_v51 = vmul.f32 %v13412_v45, %v16076_v2  ;;  %13433 = vpow2.f32 %v11212_v10  ;;  %v12835_v38 = vld [vmem:[%s13815_s7 + $0x630] sm:$0xff]  }
0x197c   : > { %12166 = vmatprep.subr.bf16.mxu1 %v12826_v8  ;;  %v13416_v52 = vpop.eup %13415  ;;  %v8442_v26 = vpack.c.bf16 %v16256_v6, %v16253_v58  ;;  %v7946_v29 = vadd.f32 1.0, %v13414_v61  ;;  %13435 = vpow2.f32 %v11211_v63  ;;  %v16274_v8 = vadd.f32 %v16004_v35, %v16132_v27  ;;  %v12837_v63 = vld [vmem:[%s13815_s7 + $0x678] sm:$0xff]  }
0x197d   : > { %v13418_v12 = vpop.eup %13417  ;;  %v7959_v19 = vadd.f32 1.0, %v13416_v52  ;;  %13437 = vpow2.f32 %v11213_v54  ;;  %v8441_v43 = vpack.c.bf16 %v8136_v51, %v8120_v50  ;;  %v12838_v61 = vld [vmem:[%s13815_s7 + $0x6f8] sm:$0xff]  }
0x197e   : > { %12139 = vmatpush3.bf16.msra.mxu0 %v12827_v42  ;;  %v13420_v0 = vpop.eup %13419  ;;  %13439 = vrcp.f32 %v7946_v29  ;;  %v7961_v2 = vadd.f32 1.0, %v13418_v12  ;;  %v16903_v42 = vld [vmem:[#allocation12_spill] sm:$0xff]  ;;  %v12839_v52 = vld [vmem:[%s13815_s7 + $0x638] sm:$0xff]  }
0x197f   : > { %12167 = vmatpush3.bf16.msra.mxu1 %v12828_v25  ;;  %12140 = vmatprep.subr.bf16.mxu0 %v12829_v5  ;;  %v13422_v53 = vpop.eup %13421  ;;  %13441 = vrcp.f32 %v7959_v19  ;;  %v7960_v49 = vadd.f32 1.0, %v13420_v0  ;;  %v16280_v45 = vadd.f32 %v16903_v42, %v16136_v32  ;;  %v16904_v25 = vld [vmem:[#allocation8_spill] sm:$0xff]  ;;  %v11226_v19 = vmul.f32 -1.442695, %v16274_v8  ;;  %v12840_v0 = vld [vmem:[%s13815_s7 + $0x6b8] sm:$0xff]  }
0x1980   : > { %9464 = vmatprep.mubr.bf16.mxu0 %v8441_v43  ;;  %12168 = vmatprep.subr.bf16.mxu1 %v12830_v60  ;;  %v13424_v48 = vpop.eup %13423  ;;  %13443 = vrcp.f32 %v7961_v2  ;;  %v7962_v9 = vadd.f32 1.0, %v13422_v53  ;;  %v16284_v5 = vadd.f32 %v16904_v25, %v16140_v34  ;;  %v16905_v43 = vld [vmem:[#allocation11_spill] sm:$0xff]  ;;  %v12846_v42 = vld [vmem:[%s13815_s7 + $0x7c8] sm:$0xff]  }
0x1981   : > { %v13426_v21 = vpop.eup %13425  ;;  %13445 = vrcp.f32 %v7960_v49  ;;  %v7975_v44 = vadd.f32 1.0, %v13424_v48  ;;  %v12841_v2 = vld [vmem:[%s13815_s7 + $0x740] sm:$0xff]   ;;  %v11228_v53 = vmul.f32 -1.442695, %v16280_v45 }
0x1982   : > { %12141 = vmatpush3.bf16.msra.mxu0 %v12831_v30  ;;  %v13428_v11 = vpop.eup %13427  ;;  %13447 = vrcp.f32 %v7962_v9  ;;  %v7977_v10 = vadd.f32 1.0, %v13426_v21  ;;  %v16291_v30 = vadd.f32 %v16905_v43, %v16144_v3  ;;  %v11227_v49 = vmul.f32 -1.442695, %v16284_v5  ;;  %v12842_v48 = vld [vmem:[%s13815_s7 + $0x7c0] sm:$0xff]  }
0x1983   : > { %12169 = vmatpush3.bf16.msra.mxu1 %v12832_v56  ;;  %12142 = vmatprep.subr.bf16.mxu0 %v12833_v57  ;;  %v13430_v1 = vpop.eup %13429  ;;  %13449 = vrcp.f32 %v7975_v44  ;;  %v7976_v54 = vadd.f32 1.0, %v13428_v11  ;;  %v16306_v21 = vadd.f32 %v16054_v17, %v16136_v32  ;;  %v16310_v44 = vadd.f32 %v16059_v28, %v16140_v34  ;;  %v16907_v43 = vld [vmem:[#allocation27_spill] sm:$0xff] }
0x1984   : > { %12170 = vmatprep.subr.bf16.mxu1 %v12834_v47  ;;  %v13432_v35 = vpop.eup %13431  ;;  %13451 = vrcp.f32 %v7977_v10  ;;  %v7978_v50 = vadd.f32 1.0, %v13430_v1  ;;  %v16301_v47 = vadd.f32 %v16052_v39, %v16132_v27  ;;  %v8122_v39 = vmul.f32 %v16239_v46, %v16041_v62  ;;  %v12845_v62 = vld [vmem:[%s13815_s7 + $0x748] sm:$0xff]   ;;  %v12844_v1 = vld [vmem:[%s13815_s7 + $0x780] sm:$0xff]  }
0x1985   : > { %v13434_v51 = vpop.eup %13433  ;;  %13453 = vrcp.f32 %v7976_v54  ;;  %v7931_v60 = vadd.f32 1.0, %v13432_v35  ;;  %v16321_v17 = vadd.f32 %v16069_v55, %v16132_v27  ;;  %v16333_v27 = vadd.f32 %v16080_v33, %v16140_v34 }
0x1986   : > { %12143 = vmatpush3.bf16.msra.mxu0 %v12835_v38  ;;  %v13436_v29 = vpop.eup %13435  ;;  %13455 = vrcp.f32 %v7978_v50  ;;  %v7933_v12 = vadd.f32 1.0, %v13434_v51  ;;  %v16314_v38 = vadd.f32 %v16061_v22, %v16144_v3  ;;  %v16327_v22 = vadd.f32 %v16071_v13, %v16136_v32  ;;  %v12847_v50 = vld [vmem:[%s13815_s7 + $0x708] sm:$0xff]  }
0x1987   : > { %12171 = vmatpush3.bf16.msra.mxu1 %v12836_v59  ;;  %12144 = vmatprep.subr.bf16.mxu0 %v12837_v63  ;;  %v16295_v56 = vpop.eup %13437  ;;  %v7932_v57 = vadd.f32 1.0, %v13436_v29  ;;  %13457 = vrcp.f32 %v7931_v60  ;;  %v12843_v59 = vld [vmem:[%s13815_s7 + $0x700] sm:$0xff]   ;;  %v11229_v63 = vmul.f32 -1.442695, %v16291_v30  ;;  %v11242_v55 = vmul.f32 -1.442695, %v16301_v47 }
0x1988   : > { %12172 = vmatprep.subr.bf16.mxu1 %v12838_v61  ;;  %v13440_v9 = vpop.eup %13439  ;;  %13459 = vrcp.f32 %v7933_v12  ;;  %v11244_v13 = vmul.f32 -1.442695, %v16306_v21  ;;  %v11243_v32 = vmul.f32 -1.442695, %v16310_v44  ;;  %v11245_v33 = vmul.f32 -1.442695, %v16314_v38 }
0x1989   : > { %v13442_v11 = vpop.eup %13441  ;;  %v8138_v10 = vmul.f32 %v13440_v9, %v16149_v41  ;;  %13461 = vrcp.f32 %v7932_v57  ;;  %v11258_v34 = vmul.f32 -1.442695, %v16321_v17  ;;  %v16906_v61 = vld [vmem:[#allocation33_spill] sm:$0xff]  ;;  %v7934_v9 = vadd.f32 1.0, %v16295_v56 }
0x198a   : > { %12145 = vmatpush3.bf16.msra.mxu0 %v12839_v52  ;;  %v13444_v28 = vpop.eup %13443  ;;  %13463 = vpow2.f32 %v11226_v19  ;;  %v16346_v35 = vadd.f32 %v16906_v61, %v16144_v3  ;;  %v8151_v40 = vmul.f32 %v13442_v11, %v16153_v37  ;;  %v12849_v3 = vld [vmem:[%s13815_s7 + $0x750] sm:$0xff]   ;;  %v11259_v37 = vmul.f32 -1.442695, %v16333_v27  ;;  %v12859_v61 = vld [vmem:[%s13815_s7 + $0x720] sm:$0xff]  }
0x198b   : > { %12173 = vmatpush3.bf16.msra.mxu1 %v12840_v0  ;;  %12186 = vmatprep.subr.bf16.mxu0 %v12841_v2  ;;  %v13446_v41 = vpop.eup %13445  ;;  %v8443_v46 = vpack.c.bf16 %v8138_v10, %v8122_v39  ;;  %13465 = vpow2.f32 %v11228_v53  ;;  %v8153_v52 = vmul.f32 %v13444_v28, %v16159_v14  ;;  %v16908_v0 = vld [vmem:[#allocation28_spill] sm:$0xff]  ;;  %v12853_v39 = vld [vmem:[%s13815_s7 + $0x758] sm:$0xff]  }
0x198c   : > { %12214 = vmatprep.subr.bf16.mxu1 %v12842_v48  ;;  %v13448_v54 = vpop.eup %13447  ;;  %13467 = vpow2.f32 %v11227_v49  ;;  %v8152_v19 = vmul.f32 %v13446_v41, %v16163_v16  ;;  %v11261_v16 = vmul.f32 -1.442695, %v16346_v35  ;;  %v12851_v49 = vld [vmem:[%s13815_s7 + $0x710] sm:$0xff]  }
0x198d   : > { %9465 = vmatmul.mubr.bf16.vlgmr.msra.gmra.mrb[164].mxu0 %v8440_v7  ;;  %v13450_v25 = vpop.eup %13449  ;;  %9513 = vmatprep.mubr.bf16.mxu1 %v8443_v46  ;;  %13469 = vpow2.f32 %v11229_v63  ;;  %v11260_v7 = vmul.f32 -1.442695, %v16327_v22  ;;  %v8154_v2 = vmul.f32 %v13448_v54, %v16908_v0  ;;  %v12856_v46 = vld [vmem:[%s13815_s7 + $0x798] sm:$0xff]  }
0x198e   : > { %12187 = vmatpush3.bf16.msra.mxu0 %v12843_v59  ;;  %v13452_v51 = vpop.eup %13451  ;;  %v8167_v23 = vmul.f32 %v13450_v25, %v16172_v36  ;;  %9514 = vmatmul.mubr.bf16.vlgmr.msra.gmra.mrb[164].mxu1 %v8442_v26  ;;  %13471 = vpow2.f32 %v11242_v55  ;;  %v12848_v36 = vld [vmem:[%s13815_s7 + $0x788] sm:$0xff]   ;;  %v12850_v26 = vld [vmem:[%s13815_s7 + $0x7d0] sm:$0xff]   ;;  %v12854_v59 = vld [vmem:[%s13815_s7 + $0x7d8] sm:$0xff]  }
0x198f   : > { %12188 = vmatprep.subr.bf16.mxu0 %v12845_v62  ;;  %v13454_v60 = vpop.eup %13453  ;;  %v8169_v29 = vmul.f32 %v13452_v51, %v16179_v15  ;;  %12215 = vmatpush3.bf16.msra.mxu1 %v12844_v1  ;;  %13473 = vpow2.f32 %v11244_v13  ;;  %v12855_v62 = vld [vmem:[%s13815_s7 + $0x718] sm:$0xff]   ;;  %v12857_v1 = vld [vmem:[%s13815_s7 + $0x760] sm:$0xff]  }
0x1990   : > { %v13456_v12 = vpop.eup %13455  ;;  %v8168_v58 = vmul.f32 %v13454_v60, %v16907_v43  ;;  %12216 = vmatprep.subr.bf16.mxu1 %v12846_v42  ;;  %v8456_v6 = vpack.c.bf16 %v8167_v23, %v8151_v40  ;;  %13475 = vpow2.f32 %v11243_v32  ;;  %v12858_v32 = vld [vmem:[%s13815_s7 + $0x7e0] sm:$0xff]   ;;  %v12861_v23 = vld [vmem:[%s13815_s7 + $0x768] sm:$0xff]  }
0x1991   : > { %v8170_v14 = vmul.f32 %v13456_v12, %v16200_v24  ;;  %v8458_v15 = vpack.c.bf16 %v8169_v29, %v8153_v52  ;;  %v16365_v57 = vpop.eup %13457  ;;  %13477 = vpow2.f32 %v11245_v33  ;;  %v12852_v24 = vld [vmem:[%s13815_s7 + $0x790] sm:$0xff]   ;;  %v12860_v40 = vld [vmem:[%s13815_s7 + $0x7a0] sm:$0xff]   ;;  %v12862_v60 = vld [vmem:[%s13815_s7 + $0x7e8] sm:$0xff]  }
0x1992   : > { %12189 = vmatpush3.bf16.msra.mxu0 %v12847_v50  ;;  %v8457_v53 = vpack.c.bf16 %v8168_v58, %v8152_v19  ;;  %v16369_v48 = vpop.eup %13459  ;;  %13479 = vpow2.f32 %v11258_v34  ;;  %v12863_v12 = vld [vmem:[%s13815_s7 + $0x728] sm:$0xff]  }
0x1993   : > { %12190 = vmatprep.subr.bf16.mxu0 %v12849_v3  ;;  %v8459_v11 = vpack.c.bf16 %v8170_v14, %v8154_v2  ;;  %12217 = vmatpush3.bf16.msra.mxu1 %v12848_v36  ;;  %v16374_v10 = vpop.eup %13461  ;;  %13481 = vpow2.f32 %v11260_v7  ;;  %v12864_v58 = vld [vmem:[%s13815_s7 + $0x7a8] sm:$0xff]   ;;  %v12866_v2 = vld [vmem:[%s13815_s7 + $0x7f0] sm:$0xff]  }
0x1994   : > { %9472 = vmatprep.mubr.bf16.mxu0 %v8457_v53  ;;  %12218 = vmatprep.subr.bf16.mxu1 %v12850_v26  ;;  %v13464_v28 = vpop.eup %13463  ;;  %13483 = vpow2.f32 %v11259_v37  ;;  %v12867_v53 = vld [vmem:[%s13815_s7 + $0x730] sm:$0xff]  }
0x1995   : > { %9521 = vmatprep.mubr.bf16.mxu1 %v8459_v11  ;;  %9473 = vmatmul.mubr.bf16.gmra.mrb[168].mxu0 %v8456_v6  ;;  %v13466_v63 = vpop.eup %13465  ;;  %v7947_v56 = vadd.f32 1.0, %v13464_v28  ;;  %13485 = vpow2.f32 %v11261_v16  ;;  %v12865_v6 = vld [vmem:[%s13815_s7 + $0x770] sm:$0xff]   ;;  %v8125_v28 = vmul.f32 %v16369_v48, %v16214_v31  ;;  %v12871_v31 = vld [vmem:[%s13815_s7 + $0x738] sm:$0xff]  }
0x1996   : > { %9522 = vmatmul.mubr.bf16.gmra.mrb[168].mxu1 %v8458_v15  ;;  %12191 = vmatpush3.bf16.msra.mxu0 %v12851_v49  ;;  %v13468_v41 = vpop.eup %13467  ;;  %13487 = vrcp.f32 %v7934_v9  ;;  %v7949_v55 = vadd.f32 1.0, %v13466_v63  ;;  %v8123_v9 = vmul.f32 %v16365_v57, %v16206_v18  ;;  %v8124_v18 = vmul.f32 %v16374_v10, %v16223_v20 }
0x1997   : > { %12219 = vmatpush3.bf16.msra.mxu1 %v12852_v24  ;;  %12192 = vmatprep.subr.bf16.mxu0 %v12853_v39  ;;  %v13470_v54 = vpop.eup %13469  ;;  %13489 = vrcp.f32 %v7947_v56  ;;  %v7948_v13 = vadd.f32 1.0, %v13468_v41  ;;  %v12868_v24 = vld [vmem:[%s13815_s7 + $0x7b0] sm:$0xff]   ;;  %v12869_v39 = vld [vmem:[%s13815_s7 + $0x778] sm:$0xff]  }
0x1998   : > { %12220 = vmatprep.subr.bf16.mxu1 %v12854_v59  ;;  %v13472_v42 = vpop.eup %13471  ;;  %13491 = vrcp.f32 %v7949_v55  ;;  %v7950_v25 = vadd.f32 1.0, %v13470_v54  ;;  %v12870_v56 = vld [vmem:[%s13815_s7 + $0x7f8] sm:$0xff]  }
0x1999   : > { %v13474_v33 = vpop.eup %13473  ;;  %13493 = vrcp.f32 %v7948_v13  ;;  %v7963_v34 = vadd.f32 1.0, %v13472_v42  ;;  %v12872_v54 = vld [vmem:[%s13815_s7 + $0x7b8] sm:$0xff]  }
0x199a   : > { %12193 = vmatpush3.bf16.msra.mxu0 %v12855_v62  ;;  %v13476_v50 = vpop.eup %13475  ;;  %13495 = vrcp.f32 %v7950_v25  ;;  %v7965_v51 = vadd.f32 1.0, %v13474_v33 }
0x199b   : > { %12221 = vmatpush3.bf16.msra.mxu1 %v12856_v46  ;;  %12194 = vmatprep.subr.bf16.mxu0 %v12857_v1  ;;  %v13478_v7 = vpop.eup %13477  ;;  %13497 = vrcp.f32 %v7963_v34  ;;  %v7964_v3 = vadd.f32 1.0, %v13476_v50 }
0x199c   : > { %12222 = vmatprep.subr.bf16.mxu1 %v12858_v32  ;;  %v13480_v52 = vpop.eup %13479  ;;  %13499 = vrcp.f32 %v7965_v51  ;;  %v7966_v29 = vadd.f32 1.0, %v13478_v7 }
0x199d   : > { %v13482_v37 = vpop.eup %13481  ;;  %13501 = vrcp.f32 %v7964_v3  ;;  %v7979_v36 = vadd.f32 1.0, %v13480_v52  ;;  %v16909_v3 = vld [vmem:[#allocation13_spill] sm:$0xff] }
0x199e   : > { %12195 = vmatpush3.bf16.msra.mxu0 %v12859_v61  ;;  %v13484_v19 = vpop.eup %13483  ;;  %13503 = vrcp.f32 %v7966_v29  ;;  %v7981_v43 = vadd.f32 1.0, %v13482_v37 }
0x199f   : > { %12223 = vmatpush3.bf16.msra.mxu1 %v12860_v40  ;;  %12196 = vmatprep.subr.bf16.mxu0 %v12861_v23  ;;  %v13486_v26 = vpop.eup %13485  ;;  %13505 = vrcp.f32 %v7979_v36  ;;  %v7980_v0 = vadd.f32 1.0, %v13484_v19 }
0x19a0   : > { %12224 = vmatprep.subr.bf16.mxu1 %v12862_v60  ;;  %v13488_v14 = vpop.eup %13487  ;;  %13507 = vrcp.f32 %v7981_v43  ;;  %v7982_v15 = vadd.f32 1.0, %v13486_v26 }
0x19a1   : > { %v13490_v16 = vpop.eup %13489  ;;  %13509 = vrcp.f32 %v7980_v0  ;;  %v8126_v55 = vmul.f32 %v13488_v14, %v16233_v4 }
0x19a2   : > { %12197 = vmatpush3.bf16.msra.mxu0 %v12863_v12  ;;  %v13492_v49 = vpop.eup %13491  ;;  %v8139_v11 = vmul.f32 %v13490_v16, %v16274_v8  ;;  %13511 = vrcp.f32 %v7982_v15 }
0x19a3   : > { %12225 = vmatpush3.bf16.msra.mxu1 %v12864_v58  ;;  %12198 = vmatprep.subr.bf16.mxu0 %v12865_v6  ;;  %v13494_v59 = vpop.eup %13493  ;;  %v8141_v63 = vmul.f32 %v13492_v49, %v16280_v45 }
0x19a4   : > { %12226 = vmatprep.subr.bf16.mxu1 %v12866_v2  ;;  %v13496_v62 = vpop.eup %13495  ;;  %v8444_v8 = vpack.c.bf16 %v8139_v11, %v8123_v9  ;;  %v8140_v57 = vmul.f32 %v13494_v59, %v16284_v5 }
0x19a5   : > { %v13498_v41 = vpop.eup %13497  ;;  %v8446_v46 = vpack.c.bf16 %v8141_v63, %v8125_v28  ;;  %v8142_v1 = vmul.f32 %v13496_v62, %v16291_v30 }
0x19a6   : > { %12199 = vmatpush3.bf16.msra.mxu0 %v12867_v53  ;;  %v13500_v48 = vpop.eup %13499  ;;  %v8445_v45 = vpack.c.bf16 %v8140_v57, %v8124_v18  ;;  %v8155_v4 = vmul.f32 %v13498_v41, %v16301_v47 }
0x19a7   : > { %12227 = vmatpush3.bf16.msra.mxu1 %v12868_v24  ;;  %12200 = vmatprep.subr.bf16.mxu0 %v12869_v39  ;;  %v13502_v13 = vpop.eup %13501  ;;  %v8447_v32 = vpack.c.bf16 %v8142_v1, %v8126_v55  ;;  %v8157_v25 = vmul.f32 %v13500_v48, %v16306_v21 }
0x19a8   : > { %12228 = vmatprep.subr.bf16.mxu1 %v12870_v56  ;;  %v13504_v20 = vpop.eup %13503  ;;  %9562 = vmatprep.mubr.bf16.mxu0 %v8445_v45  ;;  %v8156_v61 = vmul.f32 %v13502_v13, %v16310_v44  ;;  %v16415_v44 = vld [vmem:[%s13799_s3 + $0x10] sm:$0x1f]  ;;  %s16916_s3 = sld [smem:[#allocation44_spill]] (!%p11646_p5) }
0x19a9   : > { %v13506_v10 = vpop.eup %13505  ;;  %9611 = vmatprep.mubr.bf16.mxu1 %v8447_v32  ;;  %v8158_v40 = vmul.f32 %v13504_v20, %v16314_v38 }
0x19aa   : > { %12201 = vmatpush3.bf16.msra.mxu0 %v12871_v31  ;;  %v13508_v5 = vpop.eup %13507  ;;  %v8171_v30 = vmul.f32 %v13506_v10, %v16321_v17 }
0x19ab   : > { %12229 = vmatpush3.bf16.msra.mxu1 %v12872_v54  ;;  %v13510_v42 = vpop.eup %13509  ;;  %v8173_v33 = vmul.f32 %v13508_v5, %v16327_v22 }
0x19ac   : > { %v13512_v34 = vpop.eup %13511  ;;  %v8172_v50 = vmul.f32 %v13510_v42, %v16333_v27  ;;  %v8460_v51 = vpack.c.bf16 %v8171_v30, %v8155_v4  ;;  %v8467_v27 = vrot.slane %v16415_v44, %v16909_v3 }
0x19ad   : > { %9563 = vmatmul.mubr.bf16.vlgmr.msra.gmra.mrb[172].mxu0 %v8444_v8  ;;  %v8174_v47 = vmul.f32 %v13512_v34, %v16346_v35  ;;  %v8462_v17 = vpack.c.bf16 %v8173_v33, %v8157_v25 }
0x19ae   : > { %9612 = vmatmul.mubr.bf16.vlgmr.msra.gmra.mrb[172].mxu1 %v8446_v46  ;;  %v8461_v23 = vpack.c.bf16 %v8172_v50, %v8156_v61 }
0x19af   : > { %v8463_v7 = vpack.c.bf16 %v8174_v47, %v8158_v40 }
0x19b0   : > { %9570 = vmatprep.mubr.bf16.mxu0 %v8461_v23 }
0x19b1   : > { %9619 = vmatprep.mubr.bf16.mxu1 %v8463_v7 }
0x19b5   : > { %9571 = vmatmul.mubr.bf16.gmra.mrb[176].mxu0 %v8460_v51 }
0x19b6   : > { %9620 = vmatmul.mubr.bf16.gmra.mrb[176].mxu1 %v8462_v17 }
0x1a1a   : > { %v12034_v21 = vpop.f32.mrb[148].mxu0  ;;  %v12062_v22 = vpop.f32.mrb[148].mxu1 }
0x1a1b   : > { %v12035_v60 = vpop.f32.mrb[149].mxu0  ;;  %v12063_v52 = vpop.f32.mrb[149].mxu1 }
0x1a1c   : > { %v12036_v38 = vadd.f32 %v12035_v60, %v12034_v21  ;;  %v12064_v29 = vadd.f32 %v12063_v52, %v12062_v22  ;;  %v12037_v35 = vpop.f32.mrb[150].mxu0  ;;  %v12065_v37 = vpop.f32.mrb[150].mxu1 }
0x1a1d   : > { %v12038_v36 = vpop.f32.mrb[151].mxu0  ;;  %v12066_v12 = vpop.f32.mrb[151].mxu1 }
0x1a1e   : > { %v9271_v19 = vadd.f32 %v12036_v38, %v8467_v27  ;;  %v12039_v43 = vadd.f32 %v12038_v36, %v12037_v35  ;;  %v12067_v58 = vadd.f32 %v12066_v12, %v12065_v37 }
0x1a20   : > { %v9320_v6 = vadd.f32 %v12064_v29, %v9271_v19  ;;  %v9274_v26 = vadd.f32 %v12039_v43, %v8467_v27 }
0x1a22   : > { %v9323_v0 = vadd.f32 %v12067_v58, %v9274_v26 }
0x1a2e   : > { %v12040_v2 = vpop.f32.mrb[152].mxu0 }
0x1a2f   : > { %v12068_v14 = vpop.f32.mrb[152].mxu1  ;;  %v12041_v15 = vpop.f32.mrb[153].mxu0 }
0x1a30   : > { %v12042_v16 = vadd.f32 %v12041_v15, %v12040_v2  ;;  %v12069_v53 = vpop.f32.mrb[153].mxu1  ;;  %v12043_v49 = vpop.f32.mrb[154].mxu0 }
0x1a31   : > { %v12070_v9 = vadd.f32 %v12069_v53, %v12068_v14  ;;  %v12071_v11 = vpop.f32.mrb[154].mxu1  ;;  %v12044_v24 = vpop.f32.mrb[155].mxu0 }
0x1a32   : > { %v9279_v39 = vadd.f32 %v12042_v16, %v8467_v27  ;;  %v12045_v59 = vadd.f32 %v12044_v24, %v12043_v49  ;;  %v12072_v28 = vpop.f32.mrb[155].mxu1 }
0x1a33   : > { %v12073_v63 = vadd.f32 %v12072_v28, %v12071_v11 }
0x1a34   : > { %v9328_v56 = vadd.f32 %v12070_v9, %v9279_v39  ;;  %v9282_v62 = vadd.f32 %v12045_v59, %v8467_v27 }
0x1a36   : > { %v9331_v18 = vadd.f32 %v12073_v63, %v9282_v62 }
0x1a40   : > { %v12090_v8 = vpop.f32.mrb[156].mxu0 }
0x1a41   : > { %v12118_v57 = vpop.f32.mrb[156].mxu1  ;;  %v12091_v41 = vpop.f32.mrb[157].mxu0 }
0x1a42   : > { %v12092_v55 = vadd.f32 %v12091_v41, %v12090_v8  ;;  %v12119_v46 = vpop.f32.mrb[157].mxu1  ;;  %v12093_v1 = vpop.f32.mrb[158].mxu0 }
0x1a43   : > { %v12120_v31 = vadd.f32 %v12119_v46, %v12118_v57  ;;  %v12121_v48 = vpop.f32.mrb[158].mxu1  ;;  %v12094_v45 = vpop.f32.mrb[159].mxu0 }
0x1a44   : > { %v9369_v54 = vadd.f32 %v12092_v55, %v9320_v6  ;;  %v12095_v13 = vadd.f32 %v12094_v45, %v12093_v1  ;;  %v12122_v32 = vpop.f32.mrb[159].mxu1 }
0x1a45   : > { %v12123_v20 = vadd.f32 %v12122_v32, %v12121_v48 }
0x1a46   : > { %v9418_v10 = vadd.f32 %v12120_v31, %v9369_v54  ;;  %v9372_v5 = vadd.f32 %v12095_v13, %v9323_v0 }
0x1a48   : > { %v9421_v4 = vadd.f32 %v12123_v20, %v9372_v5 }
0x1a4c   : > { %v12096_v30 = vpop.f32.mrb[160].mxu0 }
0x1a4d   : > { %v12124_v42 = vpop.f32.mrb[160].mxu1  ;;  %v12097_v25 = vpop.f32.mrb[161].mxu0 }
0x1a4e   : > { %v12098_v33 = vadd.f32 %v12097_v25, %v12096_v30  ;;  %v12125_v34 = vpop.f32.mrb[161].mxu1  ;;  %v12099_v61 = vpop.f32.mrb[162].mxu0 }
0x1a4f   : > { %v12126_v50 = vadd.f32 %v12125_v34, %v12124_v42  ;;  %v12127_v51 = vpop.f32.mrb[162].mxu1  ;;  %v12100_v40 = vpop.f32.mrb[163].mxu0 }
0x1a50   : > { %v9377_v47 = vadd.f32 %v12098_v33, %v9328_v56  ;;  %v12101_v17 = vadd.f32 %v12100_v40, %v12099_v61  ;;  %v12128_v23 = vpop.f32.mrb[163].mxu1 }
0x1a51   : > { %v12129_v7 = vadd.f32 %v12128_v23, %v12127_v51 }
0x1a52   : > { %v9426_v21 = vadd.f32 %v12126_v50, %v9377_v47  ;;  %v9380_v22 = vadd.f32 %v12101_v17, %v9331_v18  ;;  %v16910_v47 = vld [vmem:[#allocation21_spill] sm:$0xff] }
0x1a54   : > { %v9429_v3 = vadd.f32 %v12129_v7, %v9380_v22 }
0x1a60   : > { %v12146_v27 = vpop.f32.mrb[164].mxu0 }
0x1a61   : > { %v12147_v60 = vpop.f32.mrb[165].mxu0  ;;  %v12174_v52 = vpop.f32.mrb[164].mxu1 }
0x1a62   : > { %v12148_v38 = vadd.f32 %v12147_v60, %v12146_v27  ;;  %v12149_v29 = vpop.f32.mrb[166].mxu0  ;;  %v12175_v35 = vpop.f32.mrb[165].mxu1 }
0x1a63   : > { %v12150_v37 = vpop.f32.mrb[167].mxu0  ;;  %v12176_v12 = vadd.f32 %v12175_v35, %v12174_v52  ;;  %v12177_v19 = vpop.f32.mrb[166].mxu1  ;;  %v16911_v52 = vld [vmem:[#allocation25_spill] sm:$0xff] }
0x1a64   : > { %v9467_v36 = vadd.f32 %v12148_v38, %v9418_v10  ;;  %v12151_v43 = vadd.f32 %v12150_v37, %v12149_v29  ;;  %v12178_v58 = vpop.f32.mrb[167].mxu1 }
0x1a65   : > { %v12179_v0 = vadd.f32 %v12178_v58, %v12177_v19  ;;  %v16912_v58 = vld [vmem:[#allocation24_spill] sm:$0xff] }
0x1a66   : > { %v9516_v6 = vadd.f32 %v12176_v12, %v9467_v36  ;;  %v9470_v26 = vadd.f32 %v12151_v43, %v9421_v4 }
0x1a68   : > { %v9519_v2 = vadd.f32 %v12179_v0, %v9470_v26  ;;  %v12152_v14 = vpop.f32.mrb[168].mxu0  ;;  %v16913_v0 = vld [vmem:[#allocation26_spill] sm:$0xff] }
0x1a69   : > { %v12180_v15 = vpop.f32.mrb[168].mxu1  ;;  %v12153_v16 = vpop.f32.mrb[169].mxu0 }
0x1a6a   : > { %v12154_v53 = vadd.f32 %v12153_v16, %v12152_v14  ;;  %v12181_v49 = vpop.f32.mrb[169].mxu1  ;;  %v12155_v9 = vpop.f32.mrb[170].mxu0 }
0x1a6b   : > { %v12182_v11 = vadd.f32 %v12181_v49, %v12180_v15  ;;  %v12183_v24 = vpop.f32.mrb[170].mxu1  ;;  %v12156_v39 = vpop.f32.mrb[171].mxu0 }
0x1a6c   : > { %v9475_v59 = vadd.f32 %v12154_v53, %v9426_v21  ;;  %v12157_v28 = vadd.f32 %v12156_v39, %v12155_v9  ;;  %v12184_v63 = vpop.f32.mrb[171].mxu1 }
0x1a6d   : > { %v12185_v56 = vadd.f32 %v12184_v63, %v12183_v24 }
0x1a6e   : > { %v9524_v62 = vadd.f32 %v12182_v11, %v9475_v59  ;;  %v9478_v18 = vadd.f32 %v12157_v28, %v9429_v3 }
0x1a70   : > { %v9527_v8 = vadd.f32 %v12185_v56, %v9478_v18 }
0x1a80   : > { %v12202_v57 = vpop.f32.mrb[172].mxu0 }
0x1a81   : > { %v12230_v41 = vpop.f32.mrb[172].mxu1  ;;  %v12203_v55 = vpop.f32.mrb[173].mxu0 }
0x1a82   : > { %v12204_v46 = vadd.f32 %v12203_v55, %v12202_v57  ;;  %v12231_v1 = vpop.f32.mrb[173].mxu1  ;;  %v12205_v31 = vpop.f32.mrb[174].mxu0 }
0x1a83   : > { %v12232_v48 = vadd.f32 %v12231_v1, %v12230_v41  ;;  %v12233_v45 = vpop.f32.mrb[174].mxu1  ;;  %v12206_v54 = vpop.f32.mrb[175].mxu0 }
0x1a84   : > { %v9565_v13 = vadd.f32 %v12204_v46, %v9516_v6  ;;  %v12207_v32 = vadd.f32 %v12206_v54, %v12205_v31  ;;  %v12234_v20 = vpop.f32.mrb[175].mxu1 }
0x1a85   : > { %v12235_v10 = vadd.f32 %v12234_v20, %v12233_v45 }
0x1a86   : > { %v9614_v5 = vadd.f32 %v12232_v48, %v9565_v13  ;;  %v9568_v4 = vadd.f32 %v12207_v32, %v9519_v2 }
0x1a88   : > { %v9628_v30 = vmul.f32 0.5, %v9614_v5  ;;  %v9617_v42 = vadd.f32 %v12235_v10, %v9568_v4  ;;  %v12208_v25 = vpop.f32.mrb[176].mxu0 }
0x1a89   : > { %v12236_v33 = vpop.f32.mrb[176].mxu1  ;;  %v12209_v34 = vpop.f32.mrb[177].mxu0 }
0x1a8a   : > { %v9629_v61 = vmul.f32 0.5, %v9617_v42  ;;  %v12210_v50 = vadd.f32 %v12209_v34, %v12208_v25  ;;  %v12237_v51 = vpop.f32.mrb[177].mxu1  ;;  %v12211_v40 = vpop.f32.mrb[178].mxu0  ;;  %v9632_v17 = vadd.f32 %v9628_v30, %v16910_v47  ;;  %v16914_v25 = vld [vmem:[#allocation14_spill] sm:$0xff] }
0x1a8b   : > { %v12238_v23 = vadd.f32 %v12237_v51, %v12236_v33  ;;  %v12239_v7 = vpop.f32.mrb[178].mxu1  ;;  %v12212_v21 = vpop.f32.mrb[179].mxu0  ;;  %v9691_v33 = vrot.slane %v16415_v44, %v16914_v25 }
0x1a8c   : > { %v9573_v22 = vadd.f32 %v12210_v50, %v9524_v62  ;;  %v12213_v3 = vadd.f32 %v12212_v21, %v12211_v40  ;;  %v12240_v27 = vpop.f32.mrb[179].mxu1  ;;  %v9636_v60 = vsel %vm1553_vm7, %v9632_v17, 0.0  ;;  %v9633_v38 = vadd.f32 %v9629_v61, %v16911_v52  ;;  %v16915_v61 = vld [vmem:[#allocation15_spill] sm:$0xff] }
0x1a8d   : > { %v12241_v29 = vadd.f32 %v12240_v27, %v12239_v7  ;;  %9637 = vadd.xlane.f32.xlu0 %v9636_v60  ;;  %v9699_v50 = vrot.slane %v16415_v44, %v16915_v61 }
0x1a8e   : > { %v9622_v35 = vadd.f32 %v12238_v23, %v9573_v22  ;;  %v9576_v37 = vadd.f32 %v12213_v3, %v9527_v8  ;;  %v9639_v36 = vsel %vm1553_vm7, %v9633_v38, 0.0 }
0x1a8f   : > { %9640 = vadd.xlane.f32.xlu1 %v9639_v36 }
0x1a90   : > { %v9630_v12 = vmul.f32 0.5, %v9622_v35  ;;  %v9625_v19 = vadd.f32 %v12241_v29, %v9576_v37 }
0x1a92   : > { %v9631_v43 = vmul.f32 0.5, %v9625_v19  ;;  %v9634_v6 = vadd.f32 %v9630_v12, %v16912_v58 }
0x1a94   : > { %v9642_v26 = vsel %vm1553_vm7, %v9634_v6, 0.0  ;;  %v9635_v2 = vadd.f32 %v9631_v43, %v16913_v0 }
0x1a95   : > { %9643 = vadd.xlane.f32.xlu0 %v9642_v26 }
0x1a96   : > { %v9645_v14 = vsel %vm1553_vm7, %v9635_v2, 0.0 }
0x1a97   : > { %9646 = vadd.xlane.f32.xlu1 %v9645_v14 }
0x1b1a   : > { %v9638_v15 = vpop.xlane.xlu0 %9637 }
0x1b1b   : > { %v9648_v16 = vmul.f32 0.015625, %v9638_v15 }
0x1b1c   : > { %v9641_v53 = vpop.xlane.xlu1 %9640 }
0x1b1d   : > { %v9652_v49 = vsub.f32 %v9632_v17, %v9648_v16  ;;  %v9649_v9 = vmul.f32 0.015625, %v9641_v53 }
0x1b1f   : > { %v9653_v11 = vsub.f32 %v9633_v38, %v9649_v9  ;;  %v9656_v24 = vmul.f32 %v9652_v49, %v9652_v49 }
0x1b21   : > { %v9660_v39 = vsel %vm1553_vm7, %v9656_v24, 0.0  ;;  %v9657_v59 = vmul.f32 %v9653_v11, %v9653_v11 }
0x1b22   : > { %9661 = vadd.xlane.f32.xlu0 %v9660_v39  ;;  %v9644_v28 = vpop.xlane.xlu0 %9643 }
0x1b23   : > { %v9650_v63 = vmul.f32 0.015625, %v9644_v28  ;;  %v9663_v56 = vsel %vm1553_vm7, %v9657_v59, 0.0 }
0x1b24   : > { %9664 = vadd.xlane.f32.xlu1 %v9663_v56  ;;  %v9647_v62 = vpop.xlane.xlu1 %9646 }
0x1b25   : > { %v9654_v18 = vsub.f32 %v9634_v6, %v9650_v63  ;;  %v9651_v8 = vmul.f32 0.015625, %v9647_v62  ;;  %v13528_v62 = vld [vmem:[%s16916_s3] sm:$0xff] (!%p11646_p5)  }
0x1b27   : > { %v9655_v57 = vsub.f32 %v9635_v2, %v9651_v8  ;;  %v9658_v41 = vmul.f32 %v9654_v18, %v9654_v18  ;;  %v13529_v8 = vld [vmem:[%s16916_s3 + $0x8] sm:$0xff] (!%p11646_p5)  }
0x1b29   : > { %v9666_v55 = vsel %vm1553_vm7, %v9658_v41, 0.0  ;;  %v9659_v46 = vmul.f32 %v9655_v57, %v9655_v57  ;;  %v13531_v41 = vld [vmem:[%s16916_s3 + $0x18] sm:$0xff] (!%p11646_p5)  }
0x1b2a   : > { %9667 = vadd.xlane.f32.xlu0 %v9666_v55  ;;  %v13532_v55 = vld [vmem:[%s16916_s3 + $0x20] sm:$0xff] (!%p11646_p5)  }
0x1b2b   : > { %v9669_v1 = vsel %vm1553_vm7, %v9659_v46, 0.0  ;;  %v13533_v46 = vld [vmem:[%s16916_s3 + $0x28] sm:$0xff] (!%p11646_p5)  }
0x1b2c   : > { %9670 = vadd.xlane.f32.xlu1 %v9669_v1  ;;  %v13534_v1 = vld [vmem:[%s16916_s3 + $0x30] sm:$0xff] (!%p11646_p5)  }
0x1baf   : > { %v9662_v31 = vpop.xlane.xlu0 %9661 }
0x1bb0   : > { %v9672_v48 = vmul.f32 0.015625, %v9662_v31  ;;  %v13535_v31 = vld [vmem:[%s16916_s3 + $0x38] sm:$0xff] (!%p11646_p5)  }
0x1bb1   : > { %v9665_v45 = vpop.xlane.xlu1 %9664 }
0x1bb2   : > { %v9676_v54 = vadd.f32 1e-05, %v9672_v48  ;;  %v9673_v13 = vmul.f32 0.015625, %v9665_v45  ;;  %v13536_v48 = vld [vmem:[%s16916_s3 + $0x40] sm:$0xff] (!%p11646_p5)   ;;  %v13537_v45 = vld [vmem:[%s16916_s3 + $0x48] sm:$0xff] (!%p11646_p5)  }
0x1bb4   : > { %13513 = vrsqrt.f32 %v9676_v54  ;;  %v9677_v32 = vadd.f32 1e-05, %v9673_v13  ;;  %v13538_v54 = vld [vmem:[%s16916_s3 + $0x50] sm:$0xff] (!%p11646_p5)  }
0x1bb6   : > { %13515 = vrsqrt.f32 %v9677_v32 }
0x1bb7   : > { %v9668_v20 = vpop.xlane.xlu0 %9667 }
0x1bb8   : > { %v9674_v10 = vmul.f32 0.015625, %v9668_v20 }
0x1bb9   : > { %v9671_v5 = vpop.xlane.xlu1 %9670 }
0x1bba   : > { %v9678_v4 = vadd.f32 1e-05, %v9674_v10  ;;  %v9675_v30 = vmul.f32 0.015625, %v9671_v5 }
0x1bbc   : > { %13517 = vrsqrt.f32 %v9678_v4  ;;  %v9679_v42 = vadd.f32 1e-05, %v9675_v30 }
0x1bbe   : > { %v13514_v34 = vpop.eup %13513  ;;  %13519 = vrsqrt.f32 %v9679_v42 }
0x1bbf   : > { %v9684_v51 = vmul.f32 %v13514_v34, %v9652_v49 }
0x1bc0   : > { %v13516_v40 = vpop.eup %13515 }
0x1bc1   : > { %v9692_v47 = vmul.f32 %v9691_v33, %v9684_v51  ;;  %v9685_v17 = vmul.f32 %v13516_v40, %v9653_v11  ;;  %v11647_v51 = vld [vmem:[%s16917_s5] ss:$0 sm:$0xff] (!%p11646_p5) }
0x1bc3   : > { %v9700_v23 = vadd.f32 %v9699_v50, %v9692_v47  ;;  %v9693_v7 = vmul.f32 %v9691_v33, %v9685_v17  ;;  %v11648_v47 = vld [vmem:[%s16917_s5 + $0x1] ss:$0 sm:$0xff] (!%p11646_p5) }
0x1bc5   : > { %9704 = vst.msk [vmem:[#allocation2] sm:$0xff] %vm1553_vm7, %v9700_v23  ;;  %v9701_v21 = vadd.f32 %v9699_v50, %v9693_v7  ;;  %v9714_v36 = vsel (!%p11646_p5), %vm1553_vm7, %v9700_v23, 0.0 }
0x1bc6   : > { %v13518_v22 = vpop.eup %13517 }
0x1bc7   : > { %9705 = vst.msk [vmem:[#allocation2 + $0x8] sm:$0xff] %vm1553_vm7, %v9701_v21  ;;  %v9686_v3 = vmul.f32 %v13518_v22, %v9654_v18  ;;  %v9717_v35 = vsel (!%p11646_p5), %vm1553_vm7, %v9701_v21, 0.0  ;;  %v13644_v18 = vmov (!%p11646_p5), 0  }
0x1bc8   : > { %v13520_v27 = vpop.eup %13519  ;;  %9718 = vadd.xlane.f32.xlu0 (!%p11646_p5), %v9717_v35  ;;  %9977 = vmatprep.subr.bf16.mxu0 (!%p11646_p5), %v13644_v18 }
0x1bc9   : > { %v9694_v60 = vmul.f32 %v9691_v33, %v9686_v3  ;;  %v9687_v52 = vmul.f32 %v13520_v27, %v9655_v57  ;;  %9711 = sbr.rel (%p11646_p5) target bundleno = 8486 (0x2126), region = 120  ;;  %9978 = vmatpush1.bf16.msra.mxu0 (!%p11646_p5), %v13528_v62  ;;  %v13530_v57 = vld [vmem:[%s16916_s3 + $0x10] sm:$0xff] (!%p11646_p5)  }
0x1bca   : > { %9979 = vmatprep.subr.bf16.mxu0 (!%p11646_p5), %v13644_v18 }
0x1bcb   : > { %v9702_v38 = vadd.f32 %v9699_v50, %v9694_v60  ;;  %v9695_v29 = vmul.f32 %v9691_v33, %v9687_v52  ;;  %v16918_v60 = vld [vmem:[#allocation9_spill] sm:$0xff] (!%p11646_p5) }
0x1bcc   : > { %9715 = vadd.xlane.f32.xlu0 (!%p11646_p5), %v9714_v36 }
0x1bcd   : > { %9706 = vst.msk [vmem:[#allocation2 + $0x10] sm:$0xff] %vm1553_vm7, %v9702_v38  ;;  %v9703_v44 = vadd.f32 %v9699_v50, %v9695_v29  ;;  %v9720_v12 = vsel (!%p11646_p5), %vm1553_vm7, %v9702_v38, 0.0  ;;  %9980 = vmatpush1.bf16.msra.mxu0 (!%p11646_p5), %v13529_v8 }
0x1bce   : > { %9981 = vmatprep.subr.bf16.mxu0 (!%p11646_p5), %v13644_v18 }
0x1bcf   : > { %9707 = vst.msk [vmem:[#allocation2 + $0x18] sm:$0xff] %vm1553_vm7, %v9703_v44  ;;  %v9723_v37 = vsel (!%p11646_p5), %vm1553_vm7, %v9703_v44, 0.0 }
0x1bd0   : > { %9724 = vadd.xlane.f32.xlu1 %v9723_v37 }
0x1bd1   : > { %9982 = vmatpush1.bf16.msra.mxu0 %v13530_v57 }
0x1bd2   : > { %9983 = vmatprep.subr.bf16.mxu0 %v13644_v18 }
0x1bd4   : > { %9721 = vadd.xlane.f32.xlu1 %v9720_v12 }
0x1bd5   : > { %9984 = vmatpush1.bf16.msra.mxu0 %v13531_v41 }
0x1bd6   : > { %9985 = vmatprep.subr.bf16.mxu0 %v13644_v18 }
0x1bd9   : > { %9986 = vmatpush1.bf16.msra.mxu0 %v13532_v55 }
0x1bda   : > { %9987 = vmatprep.subr.bf16.mxu0 %v13644_v18 }
0x1bdd   : > { %9988 = vmatpush1.bf16.msra.mxu0 %v13533_v46 }
0x1bde   : > { %9989 = vmatprep.subr.bf16.mxu0 %v13644_v18 }
0x1be1   : > { %9990 = vmatpush1.bf16.msra.mxu0 %v13534_v1 }
0x1be2   : > { %9991 = vmatprep.subr.bf16.mxu0 %v13644_v18 }
0x1be5   : > { %9992 = vmatpush1.bf16.msra.mxu0 %v13535_v31 }
0x1be6   : > { %9993 = vmatprep.subr.bf16.mxu0 %v13644_v18 }
0x1be9   : > { %9994 = vmatpush1.bf16.msra.mxu0 %v13536_v48 }
0x1bea   : > { %9995 = vmatprep.subr.bf16.mxu0 %v13644_v18 }
0x1bed   : > { %9996 = vmatpush1.bf16.msra.mxu0 %v13537_v45 }
0x1bee   : > { %9997 = vmatprep.subr.bf16.mxu0 %v13644_v18 }
0x1bf1   : > { %9998 = vmatpush1.bf16.msra.mxu0 %v13538_v54 }
0x1bf2   : > { %9999 = vmatprep.subr.bf16.mxu0 %v13644_v18 }
0x1c55   : > { %v9719_v19 = vpop.xlane.xlu0 %9718 }
0x1c56   : > { %v9727_v58 = vmul.f32 0.015625, %v9719_v19 }
0x1c58   : > { %v16444_v26 = vsub.f32 %v9701_v21, %v9727_v58  ;;  %v16919_v58 = vld [vmem:[#allocation10_spill] sm:$0xff] }
0x1c59   : > { %v9716_v2 = vpop.xlane.xlu0 %9715 }
0x1c5a   : > { %v9726_v15 = vmul.f32 0.015625, %v9716_v2  ;;  %v9735_v53 = vmul.f32 %v16444_v26, %v16444_v26  ;;  %v13539_v2 = vld [vmem:[%s16916_s3 + $0x58] sm:$0xff]  }
0x1c5b   : > { %10000 = vmatpush1.bf16.msra.mxu0 %v13539_v2 }
0x1c5c   : > { %v16452_v9 = vsub.f32 %v9700_v23, %v9726_v15  ;;  %v9741_v24 = vsel %vm1553_vm7, %v9735_v53, 0.0 }
0x1c5d   : > { %v9725_v43 = vpop.xlane.xlu1 %9724  ;;  %9742 = vadd.xlane.f32.xlu0 %v9741_v24 }
0x1c5e   : > { %v9729_v6 = vmul.f32 0.015625, %v9725_v43  ;;  %v9734_v59 = vmul.f32 %v16452_v9, %v16452_v9 }
0x1c60   : > { %v16446_v0 = vsub.f32 %v9703_v44, %v9729_v6  ;;  %v9738_v63 = vsel %vm1553_vm7, %v9734_v59, 0.0 }
0x1c61   : > { %v9722_v14 = vpop.xlane.xlu1 %9721  ;;  %9739 = vadd.xlane.f32.xlu1 %v9738_v63 }
0x1c62   : > { %v9728_v16 = vmul.f32 0.015625, %v9722_v14  ;;  %v9737_v49 = vmul.f32 %v16446_v0, %v16446_v0 }
0x1c64   : > { %v16454_v11 = vsub.f32 %v9702_v38, %v9728_v16  ;;  %v9747_v39 = vsel %vm1553_vm7, %v9737_v49, 0.0 }
0x1c65   : > { %9748 = vadd.xlane.f32.xlu0 %v9747_v39 }
0x1c66   : > { %v9736_v28 = vmul.f32 %v16454_v11, %v16454_v11 }
0x1c68   : > { %v9744_v56 = vsel %vm1553_vm7, %v9736_v28, 0.0 }
0x1c69   : > { %9745 = vadd.xlane.f32.xlu1 %v9744_v56 }
0x1cea   : > { %v9743_v13 = vpop.xlane.xlu0 %9742 }
0x1ceb   : > { %v9751_v32 = vmul.f32 0.015625, %v9743_v13 }
0x1ced   : > { %v9755_v20 = vadd.f32 1e-05, %v9751_v32 }
0x1cee   : > { %v9740_v10 = vpop.xlane.xlu1 %9739 }
0x1cef   : > { %13556 = vrsqrt.f32 %v9755_v20  ;;  %v9750_v4 = vmul.f32 0.015625, %v9740_v10 }
0x1cf1   : > { %v9754_v42 = vadd.f32 1e-05, %v9750_v4 }
0x1cf2   : > { %v9749_v5 = vpop.xlane.xlu0 %9748 }
0x1cf3   : > { %v9753_v30 = vmul.f32 0.015625, %v9749_v5  ;;  %13558 = vrsqrt.f32 %v9754_v42 }
0x1cf5   : > { %v9757_v25 = vadd.f32 1e-05, %v9753_v30 }
0x1cf6   : > { %v9746_v33 = vpop.xlane.xlu1 %9745 }
0x1cf7   : > { %v9752_v34 = vmul.f32 0.015625, %v9746_v33  ;;  %13560 = vrsqrt.f32 %v9757_v25 }
0x1cf9   : > { %v9756_v61 = vadd.f32 1e-05, %v9752_v34  ;;  %v13557_v50 = vpop.eup %13556 }
0x1cfa   : > { %v9763_v40 = vmul.f32 %v13557_v50, %v16444_v26 }
0x1cfb   : > { %13562 = vrsqrt.f32 %v9756_v61 }
0x1cfc   : > { %v9771_v17 = vmul.f32 %v11647_v51, %v9763_v40 }
0x1cfd   : > { %v13559_v23 = vpop.eup %13558 }
0x1cfe   : > { %v16504_v21 = vadd.f32 %v11648_v47, %v9771_v17  ;;  %v9762_v22 = vmul.f32 %v13559_v23, %v16452_v9 }
0x1d00   : > { %v9770_v27 = vmul.f32 %v11647_v51, %v9762_v22  ;;  %v9783_v52 = vmul.f32 %v16918_v60, %v16504_v21 }
0x1d01   : > { %v13561_v7 = vpop.eup %13560 }
0x1d02   : > { %v9765_v3 = vmul.f32 %v13561_v7, %v16446_v0  ;;  %v16510_v44 = vadd.f32 %v11648_v47, %v9770_v27  ;;  %v9787_v19 = vsel %vm1553_vm7, %v9783_v52, 0.0 }
0x1d04   : > { %v9773_v29 = vmul.f32 %v11647_v51, %v9765_v3  ;;  %v9786_v12 = vsel %vm1553_vm7, %v16510_v44, 0.0 }
0x1d05   : > { %v13563_v38 = vpop.eup %13562  ;;  %v9788_v43 = vadd.f32 %v9787_v19, %v9786_v12 }
0x1d06   : > { %v9764_v35 = vmul.f32 %v13563_v38, %v16454_v11  ;;  %v16513_v37 = vadd.f32 %v11648_v47, %v9773_v29 }
0x1d07   : > { %v9789_v0 = vrot.slane %v9788_v43, 4 }
0x1d08   : > { %v9772_v36 = vmul.f32 %v11647_v51, %v9764_v35  ;;  %v9785_v6 = vmul.f32 %v16919_v58, %v16513_v37 }
0x1d09   : > { %v9790_v16 = vadd.f32 %v9789_v0, %v9788_v43 }
0x1d0a   : > { %v16520_v26 = vadd.f32 %v11648_v47, %v9772_v36  ;;  %v9796_v15 = vsel %vm1553_vm7, %v9785_v6, 0.0 }
0x1d0b   : > { %v9791_v49 = vrot.slane %v9790_v16, 2 }
0x1d0c   : > { %v9795_v14 = vsel %vm1553_vm7, %v16520_v26, 0.0 }
0x1d0d   : > { %v9797_v53 = vadd.f32 %v9796_v15, %v9795_v14  ;;  %v9792_v11 = vadd.f32 %v9791_v49, %v9790_v16 }
0x1d0f   : > { %v9798_v9 = vrot.slane %v9797_v53, 4  ;;  %v9793_v39 = vrot.slane %v9792_v11, 1 }
0x1d11   : > { %v9799_v24 = vadd.f32 %v9798_v9, %v9797_v53  ;;  %v9794_v28 = vadd.f32 %v9793_v39, %v9792_v11 }
0x1d13   : > { %v9800_v59 = vrot.slane %v9799_v24, 2  ;;  %v9804_v56 = vmul.f32 0.06666667, %v9794_v28  ;;  %v13540_v28 = vld [vmem:[%s16920_s18] sm:$0xff]  }
0x1d14   : > { %12429 = vmatprep.subr.bf16.mxu1 %v13540_v28 }
0x1d15   : > { %v9801_v63 = vadd.f32 %v9800_v59, %v9799_v24  ;;  %9856 = vrot.lane.b32.xlu0 %v9804_v56, %s13645_s2  ;;  %v9806_v18 = vsub.f32 %v16510_v44, %v9804_v56  ;;  %v9807_v8 = vsub.f32 %v16504_v21, %v9804_v56  ;;  %12430 = vmatpush3.bf16.msra.mxu1 %v13540_v28  ;;  %v13542_v56 = vld [vmem:[%s16920_s18 + $0x10] sm:$0xff]  }
0x1d16   : > { %v13550_v28 = vld [vmem:[%s16922_s1 + $0x10] sm:$0xff]  }
0x1d17   : > { %v9802_v62 = vrot.slane %v9801_v63, 1  ;;  %v9810_v41 = vmul.f32 %v9806_v18, %v9806_v18  ;;  %v9811_v55 = vmul.f32 %v9807_v8, %v9807_v8  ;;  %v13544_v18 = vld [vmem:[%s16920_s18 + $0x20] sm:$0xff]   ;;  %v13545_v8 = vld [vmem:[%s16920_s18 + $0x28] sm:$0xff]  }
0x1d19   : > { %v9803_v57 = vadd.f32 %v9802_v62, %v9801_v63  ;;  %v9815_v1 = vmul.f32 %v16918_v60, %v9811_v55  ;;  %v9818_v31 = vsel %vm1553_vm7, %v9810_v41, 0.0  ;;  %v13541_v63 = vld [vmem:[%s16920_s18 + $0x8] sm:$0xff]   ;;  %v13543_v62 = vld [vmem:[%s16920_s18 + $0x18] sm:$0xff]   ;;  %v11649_v55 = vld [vmem:[%s16921_s21] ss:$0 sm:$0xff] }
0x1d1a   : > { %12431 = vmatprep.subr.bf16.mxu1 %v13541_v63  ;;  %v13547_v41 = vld [vmem:[%s16920_s18 + $0x38] sm:$0xff]  }
0x1d1b   : > { %v9805_v46 = vmul.f32 0.06666667, %v9803_v57  ;;  %v9819_v48 = vsel %vm1553_vm7, %v9815_v1, 0.0  ;;  %12432 = vmatpush3.bf16.msra.mxu1 %v13541_v63  ;;  %v13546_v57 = vld [vmem:[%s16920_s18 + $0x30] sm:$0xff]  }
0x1d1c   : > { %v9820_v45 = vadd.f32 %v9819_v48, %v9818_v31  ;;  %12433 = vmatprep.subr.bf16.mxu1 %v13542_v56  ;;  %v11664_v48 = vld [vmem:[%s16921_s21 + $0x1] ss:$0 sm:$0xff] }
0x1d1d   : > { %9858 = vrot.lane.b32.xlu1 %v9805_v46, %s13645_s2  ;;  %v9809_v51 = vsub.f32 %v16513_v37, %v9805_v46  ;;  %v9808_v47 = vsub.f32 %v16520_v26, %v9805_v46 }
0x1d1e   : > { %v9821_v54 = vrot.slane %v9820_v45, 4 }
0x1d1f   : > { %v9813_v40 = vmul.f32 %v9809_v51, %v9809_v51  ;;  %v9812_v23 = vmul.f32 %v9808_v47, %v9808_v47  ;;  %12434 = vmatpush3.bf16.msra.mxu1 %v13542_v56 }
0x1d20   : > { %v9822_v13 = vadd.f32 %v9821_v54, %v9820_v45  ;;  %12435 = vmatprep.subr.bf16.mxu1 %v13543_v62 }
0x1d21   : > { %v9817_v17 = vmul.f32 %v16919_v58, %v9813_v40  ;;  %v9827_v22 = vsel %vm1553_vm7, %v9812_v23, 0.0 }
0x1d22   : > { %v9823_v32 = vrot.slane %v9822_v13, 2 }
0x1d23   : > { %v9828_v7 = vsel %vm1553_vm7, %v9817_v17, 0.0  ;;  %12436 = vmatpush3.bf16.msra.mxu1 %v13543_v62 }
0x1d24   : > { %v9824_v20 = vadd.f32 %v9823_v32, %v9822_v13  ;;  %v9829_v3 = vadd.f32 %v9828_v7, %v9827_v22  ;;  %12437 = vmatprep.subr.bf16.mxu1 %v13544_v18 }
0x1d26   : > { %v9825_v10 = vrot.slane %v9824_v20, 1  ;;  %v9830_v27 = vrot.slane %v9829_v3, 4 }
0x1d27   : > { %12438 = vmatpush3.bf16.msra.mxu1 %v13544_v18 }
0x1d28   : > { %v9826_v5 = vadd.f32 %v9825_v10, %v9824_v20  ;;  %v9831_v52 = vadd.f32 %v9830_v27, %v9829_v3  ;;  %12439 = vmatprep.subr.bf16.mxu1 %v13545_v8  ;;  %v11665_v20 = vld [vmem:[%s16921_s21 + $0x2] ss:$0 sm:$0xff] }
0x1d2a   : > { %v9836_v4 = vmul.f32 0.06666667, %v9826_v5  ;;  %v9832_v38 = vrot.slane %v9831_v52, 2 }
0x1d2b   : > { %12440 = vmatpush3.bf16.msra.mxu1 %v13545_v8 }
0x1d2c   : > { %v9838_v30 = vmax.f32 %v9836_v4, 1e-12  ;;  %v9833_v29 = vadd.f32 %v9832_v38, %v9831_v52  ;;  %12441 = vmatprep.subr.bf16.mxu1 %v13546_v57 }
0x1d2e   : > { %13564 = vrsqrt.f32 %v9838_v30  ;;  %vm9842_vm12 = vcmp.eq.f32.partialorder %v9838_v30, inf  ;;  %v9845_v33 = vand.u32 2147483648, %v9838_v30  ;;  %vm9844_vm13 = vcmp.eq.f32.partialorder %v9838_v30, 0.0 }
0x1d2f   : > { %v9834_v35 = vrot.slane %v9833_v29, 1  ;;  %12442 = vmatpush3.bf16.msra.mxu1 %v13546_v57 }
0x1d30   : > { %12443 = vmatprep.subr.bf16.mxu1 %v13547_v41 }
0x1d31   : > { %v9835_v36 = vadd.f32 %v9834_v35, %v9833_v29 }
0x1d33   : > { %v9837_v12 = vmul.f32 0.06666667, %v9835_v36  ;;  %12444 = vmatpush3.bf16.msra.mxu1 %v13547_v41  ;;  %v10175_v36 = vsub.f32 1.0, %v16919_v58 }
0x1d35   : > { %v9839_v19 = vmax.f32 %v9837_v12, 1e-12  ;;  %v10173_v12 = vsub.f32 1.0, %v16918_v60 }
0x1d37   : > { %13566 = vrsqrt.f32 %v9839_v19  ;;  %vm9849_vm14 = vcmp.eq.f32.partialorder %v9839_v19, inf  ;;  %v9852_v2 = vand.u32 2147483648, %v9839_v19  ;;  %vm9851_vm15 = vcmp.eq.f32.partialorder %v9839_v19, 0.0 }
0x1d38   : > { %v13565_v42 = vpop.eup %13564 }
0x1d39   : > { %v9841_v25 = vmul.f32 %v13565_v42, %v9838_v30 }
0x1d3b   : > { %v9843_v34 = vsel %vm9842_vm12, %v9838_v30, %v9841_v25 }
0x1d3c   : > { %v9846_v61 = vsel %vm9844_vm13, %v9845_v33, %v9843_v34 }
0x1d3d   : > { %v9891_v50 = vpack.c.bf16 %v9846_v61, %v9846_v61 }
0x1d3f   : > { %11662 = vmatprep.mubr.msk.bf16.mxu0 %vm1553_vm7, %v9891_v50 }
0x1d41   : > { %v13567_v43 = vpop.eup %13566 }
0x1d42   : > { %v9848_v6 = vmul.f32 %v13567_v43, %v9839_v19 }
0x1d44   : > { %v9850_v0 = vsel %vm9849_vm14, %v9839_v19, %v9848_v6  ;;  %v13548_v19 = vld [vmem:[%s16922_s1] sm:$0xff]  }
0x1d45   : > { %v9853_v15 = vsel %vm9851_vm15, %v9852_v2, %v9850_v0  ;;  %v11666_v6 = vld [vmem:[%s16917_s5 + $0x2] ss:$0 sm:$0xff]  ;;  %v13646_v0 = vmov 0.0  }
0x1d46   : > { %v9893_v9 = vpack.c.bf16 %v9853_v15, %v9853_v15  ;;  %12449 = vmatprep.subr.bf16.mxu1 %v13646_v0  ;;  %v13549_v15 = vld [vmem:[%s16922_s1 + $0x8] sm:$0xff]  }
0x1d87   : > { %v9857_v14 = vpop.permute.xlu0 %9856 }
0x1d88   : > { %v9862_v16 = vsel %vm1553_vm7, %v16510_v44, %v9857_v14  ;;  %v9863_v53 = vsel %vm1553_vm7, %v16504_v21, %v9857_v14  ;;  %v10179_v14 = vmul.f32 -1e+30, %v10175_v36 }
0x1d89   : > { %v9890_v49 = vpack.c.bf16 %v9863_v53, %v9862_v16  ;;  %v10177_v53 = vmul.f32 -1e+30, %v10173_v12 }
0x1d8b   : > { %10010 = vmatmul.mubr.bf16.vlgmr.msra.gmra.mrb[0].mxu0 %v9890_v49 }
0x1d8c   : > { %11663 = vmatprep.mubr.msk.bf16.mxu0 %vm1553_vm7, %v9893_v9 }
0x1d8f   : > { %v9859_v11 = vpop.permute.xlu1 %9858 }
0x1d90   : > { %v9864_v24 = vsel %vm1553_vm7, %v16520_v26, %v9859_v11  ;;  %v9865_v39 = vsel %vm1553_vm7, %v16513_v37, %v9859_v11 }
0x1d91   : > { %v9892_v59 = vpack.c.bf16 %v9865_v39, %v9864_v24 }
0x1d93   : > { %10018 = vmatmul.mubr.bf16.gmra.mrb[4].mxu0 %v9892_v59 }
0x1e5e   : > { %v10011_v46 = vpop.f32.mrb[0].mxu0 }
0x1e5f   : > { %v10012_v1 = vadd.f32 %v11649_v55, %v10011_v46  ;;  %v10013_v31 = vpop.f32.mrb[1].mxu0 }
0x1e60   : > { %v10014_v45 = vpop.f32.mrb[2].mxu0 }
0x1e61   : > { %v10026_v54 = vmax.f32 %v10012_v1, 0.0  ;;  %v10015_v13 = vadd.f32 %v11649_v55, %v10014_v45  ;;  %v10016_v32 = vpop.f32.mrb[3].mxu0 }
0x1e63   : > { %v10035_v10 = vmul.f32 %v11664_v48, %v10026_v54  ;;  %v10027_v5 = vmax.f32 %v10015_v13, 0.0 }
0x1e65   : > { %v10044_v4 = vadd.f32 %v11665_v20, %v10035_v10  ;;  %v10036_v30 = vmul.f32 %v11664_v48, %v10027_v5 }
0x1e66   : > { %v10019_v42 = vpop.f32.mrb[4].mxu0 }
0x1e67   : > { %v10045_v25 = vadd.f32 %v11665_v20, %v10036_v30  ;;  %v10020_v33 = vadd.f32 %v11649_v55, %v10019_v42  ;;  %v10021_v34 = vpop.f32.mrb[5].mxu0  ;;  %13568 = vtanh.f32 %v10044_v4 }
0x1e68   : > { %v10022_v61 = vpop.f32.mrb[6].mxu0 }
0x1e69   : > { %13570 = vtanh.f32 %v10045_v25  ;;  %v10028_v50 = vmax.f32 %v10020_v33, 0.0  ;;  %v10023_v51 = vadd.f32 %v11649_v55, %v10022_v61  ;;  %v10024_v40 = vpop.f32.mrb[7].mxu0  ;;  %v13551_v55 = vld [vmem:[%s16922_s1 + $0x18] sm:$0xff]  }
0x1e6b   : > { %v10037_v47 = vmul.f32 %v11664_v48, %v10028_v50  ;;  %v10029_v17 = vmax.f32 %v10023_v51, 0.0 }
0x1e6d   : > { %v10046_v23 = vadd.f32 %v11665_v20, %v10037_v47  ;;  %v10038_v7 = vmul.f32 %v11664_v48, %v10029_v17 }
0x1e6f   : > { %v10047_v22 = vadd.f32 %v11665_v20, %v10038_v7  ;;  %13572 = vtanh.f32 %v10046_v23 }
0x1e71   : > { %13574 = vtanh.f32 %v10047_v22  ;;  %v13569_v3 = vpop.eup %13568 }
0x1e73   : > { %v13571_v27 = vpop.eup %13570 }
0x1e74   : > { %v10068_v52 = vpack.c.bf16 %v13571_v27, %v13569_v3 }
0x1e76   : > { %12445 = vmatprep.mubr.bf16.mxu1 %v10068_v52 }
0x1e79   : > { %v13573_v38 = vpop.eup %13572 }
0x1e7b   : > { %v13575_v29 = vpop.eup %13574 }
0x1e7c   : > { %v10069_v35 = vpack.c.bf16 %v13575_v29, %v13573_v38 }
0x1e7e   : > { %12446 = vmatmul.mubr.bf16.vlgmr.msra.gmra.mrb[0].mxu1 %v10069_v35 }
0x1e7f   : > { %12450 = vmatpush3.bf16.msra.mxu1 %v13548_v19  ;;  %12465 = vmatprep.mubr.msk.bf16.mxu1 %vm13647_vm3, %v13646_v0 }
0x1e80   : > { %12451 = vmatprep.subr.bf16.mxu1 %v13646_v0 }
0x1e83   : > { %12452 = vmatpush3.bf16.msra.mxu1 %v13549_v15 }
0x1e84   : > { %12453 = vmatprep.subr.bf16.mxu1 %v13646_v0 }
0x1e87   : > { %12454 = vmatpush3.bf16.msra.mxu1 %v13550_v28 }
0x1e88   : > { %12455 = vmatprep.subr.bf16.mxu1 %v13646_v0 }
0x1e8b   : > { %12456 = vmatpush3.bf16.msra.mxu1 %v13551_v55 }
0x1e8c   : > { %12457 = vmatprep.subr.bf16.mxu1 %v13646_v0 }
0x1f51   : > { %v12447_v43 = vpop.f32.mrb[0].mxu1 }
0x1f52   : > { %v10157_v2 = vpop.f32.mrb[1].mxu1  ;;  %v10166_v49 = vadd.f32 %v12447_v43, %v11666_v6 }
0x1f53   : > { %v12448_v16 = vpop.f32.mrb[2].mxu1  ;;  %v10158_v24 = vadd.f32 %v11666_v6, %v10157_v2 }
0x1f54   : > { %v10169_v9 = vadd.f32 %v12448_v16, %v11666_v6  ;;  %v10160_v11 = vpop.f32.mrb[3].mxu1  ;;  %v10193_v56 = vsel %vm1553_vm7, %v10166_v49, -inf }
0x1f55   : > { %v10161_v39 = vadd.f32 %v11666_v6, %v10160_v11  ;;  %v10184_v18 = vsel %vm1553_vm7, %v10158_v24, -inf }
0x1f56   : > { %v10183_v59 = vadd.f32 %v10179_v14, %v10169_v9 }
0x1f57   : > { %v10181_v63 = vadd.f32 %v10177_v53, %v10161_v39 }
0x1f58   : > { %v10194_v62 = vsel %vm1553_vm7, %v10183_v59, -inf }
0x1f59   : > { %v10195_v8 = vmax.f32 %v10193_v56, %v10194_v62  ;;  %v10185_v57 = vsel %vm1553_vm7, %v10181_v63, -inf }
0x1f5a   : > { %v10186_v41 = vmax.f32 %v10184_v18, %v10185_v57 }
0x1f5b   : > { %v10196_v46 = vrot.slane %v10195_v8, 4 }
0x1f5c   : > { %v10187_v1 = vrot.slane %v10186_v41, 4 }
0x1f5d   : > { %v10197_v31 = vmax.f32 %v10195_v8, %v10196_v46 }
0x1f5e   : > { %v10188_v48 = vmax.f32 %v10186_v41, %v10187_v1 }
0x1f5f   : > { %v10198_v45 = vrot.slane %v10197_v31, 2 }
0x1f60   : > { %v10189_v54 = vrot.slane %v10188_v48, 2 }
0x1f61   : > { %v10199_v13 = vmax.f32 %v10197_v31, %v10198_v45 }
0x1f62   : > { %v10190_v32 = vmax.f32 %v10188_v48, %v10189_v54 }
0x1f63   : > { %v10200_v20 = vrot.slane %v10199_v13, 1 }
0x1f64   : > { %v10191_v10 = vrot.slane %v10190_v32, 1 }
0x1f65   : > { %v10201_v5 = vmax.f32 %v10199_v13, %v10200_v20 }
0x1f66   : > { %v10192_v4 = vmax.f32 %v10190_v32, %v10191_v10 }
0x1f67   : > { %v10204_v30 = vsub.f32 %v10166_v49, %v10201_v5  ;;  %v10205_v42 = vsub.f32 %v10183_v59, %v10201_v5 }
0x1f68   : > { %v10202_v25 = vsub.f32 %v10158_v24, %v10192_v4  ;;  %v10203_v33 = vsub.f32 %v10181_v63, %v10192_v4 }
0x1f69   : > { %v10210_v34 = vmul.f32 1.442695, %v10204_v30  ;;  %v10212_v61 = vmul.f32 1.442695, %v10205_v42 }
0x1f6a   : > { %v10206_v50 = vmul.f32 1.442695, %v10202_v25  ;;  %v10208_v51 = vmul.f32 1.442695, %v10203_v33 }
0x1f6b   : > { %13576 = vpow2.f32 %v10210_v34 }
0x1f6c   : > { %13578 = vpow2.f32 %v10212_v61 }
0x1f6d   : > { %13580 = vpow2.f32 %v10206_v50 }
0x1f6e   : > { %13582 = vpow2.f32 %v10208_v51 }
0x1f75   : > { %v13577_v40 = vpop.eup %13576 }
0x1f76   : > { %v13579_v47 = vpop.eup %13578  ;;  %v10227_v22 = vsel %vm1553_vm7, %v13577_v40, 0.0 }
0x1f77   : > { %v13581_v17 = vpop.eup %13580  ;;  %v10217_v23 = vmul.f32 %v13579_v47, %v16919_v58 }
0x1f78   : > { %v13583_v7 = vpop.eup %13582  ;;  %v10218_v38 = vsel %vm1553_vm7, %v13581_v17, 0.0 }
0x1f79   : > { %v10228_v3 = vsel %vm1553_vm7, %v10217_v23, 0.0  ;;  %v10215_v27 = vmul.f32 %v13583_v7, %v16918_v60 }
0x1f7a   : > { %v10229_v52 = vadd.f32 %v10228_v3, %v10227_v22 }
0x1f7b   : > { %v10219_v29 = vsel %vm1553_vm7, %v10215_v27, 0.0 }
0x1f7c   : > { %v10230_v35 = vrot.slane %v10229_v52, 4  ;;  %v10220_v36 = vadd.f32 %v10219_v29, %v10218_v38 }
0x1f7e   : > { %v10231_v12 = vadd.f32 %v10230_v35, %v10229_v52  ;;  %v10221_v19 = vrot.slane %v10220_v36, 4 }
0x1f80   : > { %v10232_v43 = vrot.slane %v10231_v12, 2  ;;  %v10222_v6 = vadd.f32 %v10221_v19, %v10220_v36 }
0x1f82   : > { %v10233_v2 = vadd.f32 %v10232_v43, %v10231_v12  ;;  %v10223_v58 = vrot.slane %v10222_v6, 2 }
0x1f84   : > { %v10234_v14 = vrot.slane %v10233_v2, 1  ;;  %v10224_v15 = vadd.f32 %v10223_v58, %v10222_v6 }
0x1f86   : > { %v10235_v16 = vadd.f32 %v10234_v14, %v10233_v2  ;;  %v10225_v53 = vrot.slane %v10224_v15, 1 }
0x1f88   : > { %13584 = vrcp.f32 %v10235_v16  ;;  %v10226_v49 = vadd.f32 %v10225_v53, %v10224_v15  ;;  %v13552_v16 = vld [vmem:[%s16922_s1 + $0x20] sm:$0xff]   ;;  %v13553_v53 = vld [vmem:[%s16922_s1 + $0x28] sm:$0xff]  }
0x1f89   : > { %12458 = vmatpush3.bf16.msra.mxu1 %v13552_v16 }
0x1f8a   : > { %13586 = vrcp.f32 %v10226_v49  ;;  %12459 = vmatprep.subr.bf16.mxu1 %v13646_v0 }
0x1f8d   : > { %12460 = vmatpush3.bf16.msra.mxu1 %v13553_v53 }
0x1f8e   : > { %12461 = vmatprep.subr.bf16.mxu1 %v13646_v0 }
0x1f92   : > { %v13585_v60 = vpop.eup %13584 }
0x1f93   : > { %v10240_v9 = vmul.f32 %v13585_v60, %v13577_v40  ;;  %v10241_v11 = vmul.f32 %v13585_v60, %v10217_v23  ;;  %v13554_v60 = vld [vmem:[%s16922_s1 + $0x30] sm:$0xff]  }
0x1f94   : > { %v13587_v24 = vpop.eup %13586  ;;  %12462 = vmatpush3.bf16.msra.mxu1 %v13554_v60 }
0x1f95   : > { %v10244_v39 = vmul.f32 %v10240_v9, %v16520_v26  ;;  %v10245_v59 = vmul.f32 %v10241_v11, %v16513_v37  ;;  %v10238_v28 = vmul.f32 %v13587_v24, %v13581_v17  ;;  %v10239_v63 = vmul.f32 %v13587_v24, %v10215_v27  ;;  %12463 = vmatprep.subr.bf16.mxu1 %v13646_v0 }
0x1f97   : > { %v10255_v56 = vsel %vm1553_vm7, %v10244_v39, 0.0  ;;  %v10256_v62 = vsel %vm1553_vm7, %v10245_v59, 0.0  ;;  %v10242_v18 = vmul.f32 %v10238_v28, %v16510_v44  ;;  %v10243_v8 = vmul.f32 %v10239_v63, %v16504_v21 }
0x1f98   : > { %v10257_v57 = vadd.f32 %v10256_v62, %v10255_v56 }
0x1f99   : > { %v10246_v41 = vsel %vm1553_vm7, %v10242_v18, 0.0  ;;  %v10247_v55 = vsel %vm1553_vm7, %v10243_v8, 0.0  ;;  %v11675_v8 = vld [vmem:[%s16921_s21 + $0x3] ss:$0 sm:$0xff] }
0x1f9a   : > { %v10258_v46 = vrot.slane %v10257_v57, 4  ;;  %v10248_v1 = vadd.f32 %v10247_v55, %v10246_v41  ;;  %v11676_v41 = vld [vmem:[%s16921_s21 + $0x4] ss:$0 sm:$0xff] }
0x1f9c   : > { %v10259_v31 = vadd.f32 %v10258_v46, %v10257_v57  ;;  %v10249_v48 = vrot.slane %v10248_v1, 4 }
0x1f9e   : > { %v10260_v45 = vrot.slane %v10259_v31, 2  ;;  %v10250_v54 = vadd.f32 %v10249_v48, %v10248_v1 }
0x1fa0   : > { %v10261_v13 = vadd.f32 %v10260_v45, %v10259_v31  ;;  %v10251_v32 = vrot.slane %v10250_v54, 2 }
0x1fa2   : > { %v10262_v20 = vrot.slane %v10261_v13, 1  ;;  %v10252_v10 = vadd.f32 %v10251_v32, %v10250_v54 }
0x1fa4   : > { %v16623_v5 = vadd.f32 %v10262_v20, %v10261_v13  ;;  %v10253_v4 = vrot.slane %v10252_v10, 1 }
0x1fa6   : > { %v10266_v30 = vsub.f32 %v16520_v26, %v16623_v5  ;;  %v10267_v42 = vsub.f32 %v16513_v37, %v16623_v5  ;;  %v16629_v25 = vadd.f32 %v10253_v4, %v10252_v10 }
0x1fa8   : > { %v10270_v33 = vmul.f32 %v10266_v30, %v10266_v30  ;;  %v10271_v34 = vmul.f32 %v10267_v42, %v10267_v42  ;;  %v10264_v61 = vsub.f32 %v16510_v44, %v16629_v25  ;;  %v10265_v50 = vsub.f32 %v16504_v21, %v16629_v25 }
0x1faa   : > { %v10274_v51 = vmul.f32 %v10270_v33, %v10240_v9  ;;  %v10275_v40 = vmul.f32 %v10271_v34, %v10241_v11  ;;  %v10268_v47 = vmul.f32 %v10264_v61, %v10264_v61  ;;  %v10269_v17 = vmul.f32 %v10265_v50, %v10265_v50 }
0x1fac   : > { %v10285_v23 = vsel %vm1553_vm7, %v10274_v51, 0.0  ;;  %v10286_v26 = vsel %vm1553_vm7, %v10275_v40, 0.0  ;;  %v10272_v7 = vmul.f32 %v10268_v47, %v10238_v28  ;;  %v10273_v37 = vmul.f32 %v10269_v17, %v10239_v63  ;;  %v13555_v28 = vld [vmem:[%s16922_s1 + $0x38] sm:$0xff]  }
0x1fad   : > { %v10287_v22 = vadd.f32 %v10286_v26, %v10285_v23  ;;  %12464 = vmatpush3.bf16.msra.mxu1 %v13555_v28 }
0x1fae   : > { %v10276_v3 = vsel %vm1553_vm7, %v10272_v7, 0.0  ;;  %v10277_v27 = vsel %vm1553_vm7, %v10273_v37, 0.0 }
0x1faf   : > { %v10288_v52 = vrot.slane %v10287_v22, 4  ;;  %v10278_v44 = vadd.f32 %v10277_v27, %v10276_v3 }
0x1fb1   : > { %v10289_v38 = vadd.f32 %v10288_v52, %v10287_v22  ;;  %v10279_v29 = vrot.slane %v10278_v44, 4 }
0x1fb3   : > { %v10290_v21 = vrot.slane %v10289_v38, 2  ;;  %v10280_v35 = vadd.f32 %v10279_v29, %v10278_v44 }
0x1fb5   : > { %v10291_v36 = vadd.f32 %v10290_v21, %v10289_v38  ;;  %v10281_v12 = vrot.slane %v10280_v35, 2 }
0x1fb7   : > { %v10292_v19 = vrot.slane %v10291_v36, 1  ;;  %v10282_v43 = vadd.f32 %v10281_v12, %v10280_v35 }
0x1fb9   : > { %v10293_v6 = vadd.f32 %v10292_v19, %v10291_v36  ;;  %v10283_v2 = vrot.slane %v10282_v43, 1 }
0x1fbb   : > { %v10295_v58 = vmax.f32 %v10293_v6, 1e-12  ;;  %v10284_v14 = vadd.f32 %v10283_v2, %v10282_v43 }
0x1fbd   : > { %v10294_v15 = vmax.f32 %v10284_v14, 1e-12  ;;  %13588 = vrsqrt.f32 %v10295_v58  ;;  %vm10305_vm0 = vcmp.eq.f32.partialorder %v10295_v58, inf  ;;  %v10308_v24 = vand.u32 2147483648, %v10295_v58 }
0x1fbe   : > { %vm10307_vm1 = vcmp.eq.f32.partialorder %v10295_v58, 0.0 }
0x1fbf   : > { %13590 = vrsqrt.f32 %v10294_v15  ;;  %vm10298_vm2 = vcmp.eq.f32.partialorder %v10294_v15, inf  ;;  %v10301_v62 = vand.u32 2147483648, %v10294_v15  ;;  %vm10300_vm4 = vcmp.eq.f32.partialorder %v10294_v15, 0.0 }
0x1fc7   : > { %v13589_v49 = vpop.eup %13588 }
0x1fc8   : > { %v10304_v9 = vmul.f32 %v13589_v49, %v10295_v58 }
0x1fc9   : > { %v13591_v11 = vpop.eup %13590 }
0x1fca   : > { %v10306_v39 = vsel %vm10305_vm0, %v10295_v58, %v10304_v9  ;;  %v10297_v59 = vmul.f32 %v13591_v11, %v10294_v15 }
0x1fcb   : > { %v10309_v63 = vsel %vm10307_vm1, %v10308_v24, %v10306_v39 }
0x1fcc   : > { %10314 = vrot.lane.b32.xlu1 %v10309_v63, %s13645_s2  ;;  %v10299_v56 = vsel %vm10298_vm2, %v10294_v15, %v10297_v59 }
0x1fcd   : > { %v10302_v18 = vsel %vm10300_vm4, %v10301_v62, %v10299_v56 }
0x1fd0   : > { %10312 = vrot.lane.b32.xlu1 %v10302_v18, %s13645_s2 }
0x203e   : > { %v10315_v57 = vpop.permute.xlu1 %10314 }
0x203f   : > { %v10319_v0 = vsel %vm1553_vm7, %v16623_v5, %v10315_v57  ;;  %v11677_v5 = vld [vmem:[%s16923_s17] ss:$0 sm:$0xff] }
0x2040   : > { %v10326_v55 = vmul.f32 %v11675_v8, %v10319_v0 }
0x2042   : > { %v10333_v46 = vadd.f32 %v11676_v41, %v10326_v55  ;;  %v10313_v1 = vpop.permute.xlu1 %10312 }
0x2043   : > { %v10318_v31 = vsel %vm1553_vm7, %v16629_v25, %v10313_v1 }
0x2044   : > { %v10351_v48 = vpack.c.bf16 %v10333_v46, %v10333_v46  ;;  %v10325_v45 = vmul.f32 %v11675_v8, %v10318_v31 }
0x2046   : > { %v10362_v54 = vunpack.c.l.b16 %v10351_v48  ;;  %v10332_v13 = vadd.f32 %v11676_v41, %v10325_v45 }
0x2048   : > { %v10350_v32 = vpack.c.bf16 %v10332_v13, %v10332_v13  ;;  %v10363_v20 = vrot.slane %v10362_v54, 7 }
0x204a   : > { %v10361_v10 = vunpack.c.l.b16 %v10350_v32 }
0x204c   : > { %v10365_v4 = vsel %vm10364_vm5, %v10363_v20, %v10361_v10 }
0x204d   : > { %v10366_v30 = vpack.c.b16 %v10365_v4, %v10365_v4 }
0x204f   : > { %12466 = vmatmul.mubr.bf16.vlgmr.msra.gmra.mrb[4].mxu1 %v10366_v30 }
0x2122   : > { %v10450_v42 = vpop.f32.mrb[4].mxu1 }
0x2123   : > { %v10451_v33 = vadd.f32 %v11677_v5, %v10450_v42  ;;  %v12467_v34 = vpop.f32.mrb[5].mxu1 }
0x2124   : > { %v10453_v25 = vpop.f32.mrb[6].mxu1 }
0x2125   : > { %10457 = vst.msk [vmem:[#allocation4] sm:$0x3] %vm10456_vm6, %v10451_v33  ;;  %v12468_v61 = vpop.f32.mrb[7].mxu1 }
0x2126 PF: > { %p12478_p6 = scmp.eq.s32.totalorder %s13775_s30, 1  ;;  %s13648_s20 = smov [#allocation4]  }
0x2127   : > { %s10465_s27 = sshll.u32 %s13648_s20, 4  ;;  %s10466_s27 = int_to_ptr.vmem [resolvable:$true] %s10465_s27 }
0x2128   : > { %s13592_s23 = scalar_lea.vmem %s10466_s27, 32  ;;  %p13599_p10 = scmp.lt.s32.totalorder %s10466_s27, %s10466_s27 }
0x2129   : > { %p13593_p7 = scmp.ne.s32.totalorder %s10466_s27, %s13592_s23  ;;  %p13600_p11 = scmp.lt.s32.totalorder %s13592_s23, %s13592_s23 }
0x212b   : > { %p13594_p8 = pnand %p13593_p7, %p12478_p6  ;;  %p13601_p12 = por %p13600_p11, %p13599_p10 }
0x212d   : > { %p13595_p9 = pneg %p13594_p8 }
0x212f   : > { %p13602_p13 = pnand %p13601_p12, %p13595_p9 }
0x2131   : > { %13605 = shalt.err (!%p13602_p13)
}
0x2132   : > { %s16924_s24 = sld [smem:[#allocation48_spill]] }
0x2138   : > { %s13606_s7 = scalar_lea.hbm %s16924_s24, 32 }
0x2139   : > { %p13607_p0 = scmp.ne.s32.totalorder %s16924_s24, %s13606_s7  ;;  %p13612_p3 = scmp.lt.u32.totalorder %s13606_s7, %s16924_s24 }
0x213b   : > { %p13608_p1 = pnand %p13607_p0, %p12478_p6 }
0x213d   : > { %p13609_p2 = pneg %p13608_p1 }
0x213f   : > { %p13614_p4 = pnand %p13612_p3, %p13609_p2 }
0x2141   : > { %13617 = shalt.err (!%p13614_p4)
}
0x2142   : > { %12475 = dma.vmem_to_hbm [thread:$0]  (%p12478_p6), %s10466_s27, 32, %s16924_s24, [#allocation5]  }
0x2143   : > { %13623 = dma.done.wait (%p12478_p6), [#allocation5], 32  }
0x2144   : > { %13625 = vsyncadd (%p12478_p6), [#allocation5], 4294967264 }
0x2145 PF: > { %s16925_s6 = sld [smem:[#allocation7_spill]] }
0x214b   : > { %s34_s4 = sadd.s32 1, %s16925_s6  }
0x214c   : > { %p31_p5 = scmp.ge.s32.totalorder %s34_s4, 4  }
0x214e   :  { %33 = sbr.rel (!%p31_p5) target bundleno = 17 (0x11), region = 182 }
0x2155   :  { %10478 = vsyncpa [#allocation5], 1 }
0x2156   :  { %10480 = vsyncpa [#allocation5 + $0x1], 1 }

</bundles_post_ra>
